<compile_context>
chip_gen: v7x
topology: tpu7x:2x2x1
jax: 0.10.0
libtpu: 0.0.40
codegen_flags: <defaults>
</compile_context>

<pallas_src>
import functools

import jax
import jax.numpy as jnp
from jax import lax
from jax.experimental import pallas as pl
from jax.experimental.pallas import tpu as pltpu


def _gelu_exact(x):
    """Exact (erf-based) GELU matching PyTorch nn.GELU() default.

    erf via Abramowitz & Stegun 7.1.26 (|error| < 1.5e-7); the 1/(1+c|z|) term
    uses the EUP approximate reciprocal (its own VLIW slot, ~free).
    """
    z = x * 0.7071067811865476
    az = jnp.abs(z)
    t = pl.reciprocal(1.0 + 0.3275911 * az, approx=True)
    poly = t * (0.254829592 + t * (-0.284496736 + t * (1.421413741
               + t * (-1.453152027 + t * 1.061405429))))
    erf_abs = 1.0 - poly * jnp.exp(-az * az)
    erf = jnp.where(z >= 0.0, erf_abs, -erf_abs)
    return 0.5 * x * (1.0 + erf)


def _layernorm_cm(z, gamma, beta, eps):
    """LayerNorm over the channel (sublane) axis of a channels-major (C, S) tile.

    gamma / beta are (C, 1) column vectors; one-pass (E[x], E[x^2]) stats.
    """
    mean = jnp.mean(z, axis=0, keepdims=True)             # (1, S)
    mean_sq = jnp.mean(z * z, axis=0, keepdims=True)
    var = mean_sq - mean * mean
    inv = lax.rsqrt(var + eps)
    return (z - mean) * inv * gamma + beta


def _selfattn_kernel(x_ref, ln1_g_ref, ln1_b_ref, wqkv_ref,
                     wproj_ref, bproj_ref, ln2_g_ref, ln2_b_ref,
                     w1_ref, b1_ref, w2_ref, b2_ref, out_ref,
                     *, num_heads, scale, eps):
    """One batch element per grid step; channels-major (features, S) throughout.

    x_ref     : (1, C, S)   channels-major slab (S = H*W on the lane axis)
    w*_ref    : Linear weights in PyTorch (out, in) layout, bf16
    b* / ln*  : (dim, 1) f32 column vectors
    out_ref   : (1, C, S)
    """
    _, C, S = x_ref.shape
    hd = C // num_heads
    bf16 = jnp.bfloat16

    # Lane-dense load; no transpose.
    x = x_ref[0].astype(jnp.float32)                                   # (C, S)

    # ---- attention branch: LN1 -> fused QKV -> batched per-head softmax -> proj ----
    h1 = _layernorm_cm(x, ln1_g_ref[...], ln1_b_ref[...], eps)         # (C, S)
    qkv = lax.dot_general(wqkv_ref[...], h1.astype(bf16),              # (3C, S)
                          (((1,), (0,)), ((), ())),
                          preferred_element_type=jnp.float32)

    # Head split along the sublane axis: hd-row (8-row) slices are sublane-aligned.
    q = qkv[0 * C:1 * C].reshape(num_heads, hd, S).astype(bf16)        # (nh, hd, S)
    k = qkv[1 * C:2 * C].reshape(num_heads, hd, S).astype(bf16)
    v = qkv[2 * C:3 * C].reshape(num_heads, hd, S).astype(bf16)

    # Batched scores: s[h, i, j] = sum_d q[h, d, i] * k[h, d, j]       -> (nh, S, S)
    s = lax.dot_general(q, k, (((1,), (1,)), ((0,), (0,))),
                        preferred_element_type=jnp.float32) * scale
    s = s - jnp.max(s, axis=-1, keepdims=True)
    p = jnp.exp(s)
    p = p * pl.reciprocal(jnp.sum(p, axis=-1, keepdims=True), approx=True)

    # Batched PV: o[h, d, i] = sum_j v[h, d, j] * p[h, i, j]           -> (nh, hd, S)
    o = lax.dot_general(v, p.astype(bf16), (((2,), (2,)), ((0,), (0,))),
                        preferred_element_type=jnp.float32)
    o = o.reshape(C, S).astype(bf16)                                   # merge heads

    # Single fused output projection: (C, C) @ (C, S) + bias.
    proj = lax.dot_general(wproj_ref[...], o, (((1,), (0,)), ((), ())),
                           preferred_element_type=jnp.float32) + bproj_ref[...]
    x = x + proj                                                       # residual 1

    # ---- MLP branch: LN2 -> fc1 -> GELU(exact) -> fc2 ----
    h2 = _layernorm_cm(x, ln2_g_ref[...], ln2_b_ref[...], eps)
    f = lax.dot_general(w1_ref[...], h2.astype(bf16), (((1,), (0,)), ((), ())),
                        preferred_element_type=jnp.float32) + b1_ref[...]
    f = _gelu_exact(f)
    f = lax.dot_general(w2_ref[...], f.astype(bf16), (((1,), (0,)), ((), ())),
                        preferred_element_type=jnp.float32) + b2_ref[...]
    x = x + f                                                          # residual 2

    # Lane-dense store (S multiple of 128); no transpose.
    out_ref[0] = x.astype(out_ref.dtype)


def selfattn_forward(x_nchw, params, num_heads, eps=1e-5):
    """Forward pass equivalent to SelfAttn.forward (sr_ratio=1, all drops = 0).

    x_nchw : (B, C, H, W) float32
    params : dict of PyTorch-layout parameters (Linear weights are (out, in)).
    returns: (B, C, H, W) float32
    """
    B, C, H, W = x_nchw.shape
    S = H * W
    hd = C // num_heads
    hidden = params["w1"].shape[0]

    # Free reshape: NCHW -> (B, C, S); S = H*W is the lane dimension in the kernel.
    x_cs = x_nchw.reshape(B, C, S).astype(jnp.float32)

    col = lambda v: jnp.asarray(v, jnp.float32).reshape(-1, 1)   # (dim, 1) columns
    w16 = lambda a: jnp.asarray(a, jnp.bfloat16)                 # (out, in), untransposed

    kernel = functools.partial(_selfattn_kernel, num_heads=num_heads,
                               scale=float(hd) ** -0.5, eps=eps)

    def whole(shape):
        # Constant operand resident for every grid step (index_map never changes,
        # so the pipeline does not re-DMA it across steps).
        return pl.BlockSpec(shape, lambda b: (0,) * len(shape))

    out_cs = pl.pallas_call(
        kernel,
        out_shape=jax.ShapeDtypeStruct((B, C, S), jnp.float32),
        grid_spec=pltpu.PrefetchScalarGridSpec(
            num_scalar_prefetch=0,
            grid=(B,),
            in_specs=[
                pl.BlockSpec((1, C, S), lambda b: (b, 0, 0)),   # x, per-batch slab
                whole((C, 1)), whole((C, 1)),                   # LN1 gamma / beta
                whole((3 * C, C)),                              # fused QKV weight
                whole((C, C)), whole((C, 1)),                   # proj weight / bias
                whole((C, 1)), whole((C, 1)),                   # LN2 gamma / beta
                whole((hidden, C)), whole((hidden, 1)),         # fc1 weight / bias
                whole((C, hidden)), whole((C, 1)),              # fc2 weight / bias
            ],
            out_specs=pl.BlockSpec((1, C, S), lambda b: (b, 0, 0)),
        ),
        compiler_params=pltpu.CompilerParams(
            dimension_semantics=("parallel",),     # batch steps are independent
            vmem_limit_bytes=32 * 1024 * 1024,     # tiny working set; safe on v5e/v6e/v7x
        ),
    )(x_cs, col(params["ln1_g"]), col(params["ln1_b"]), w16(params["wqkv"]),
      w16(params["wproj"]), col(params["bproj"]), col(params["ln2_g"]),
      col(params["ln2_b"]), w16(params["w1"]), col(params["b1"]),
      w16(params["w2"]), col(params["b2"]))

    return out_cs.reshape(B, C, H, W)


def _reference(x_nchw, params, num_heads, eps=1e-5):
    """Pure-JAX f32 reference implementing the PyTorch module (correctness check)."""
    B, C, H, W = x_nchw.shape
    S = H * W
    hd = C // num_heads
    scale = float(hd) ** -0.5

    def ln(z, g, b):
        m = jnp.mean(z, axis=-1, keepdims=True)
        v = jnp.mean(jnp.square(z - m), axis=-1, keepdims=True)
        return (z - m) * lax.rsqrt(v + eps) * g + b

    x = jnp.transpose(x_nchw.reshape(B, C, S), (0, 2, 1))            # (B, S, C)

    h = ln(x, params["ln1_g"], params["ln1_b"])
    qkv = h @ params["wqkv"].T                                       # (B, S, 3C)
    qkv = jnp.transpose(qkv.reshape(B, S, 3, num_heads, hd), (2, 0, 3, 1, 4))
    q, k, v = qkv[0], qkv[1], qkv[2]                                 # (B, nh, S, hd)
    attn = jax.nn.softmax((q @ jnp.swapaxes(k, -1, -2)) * scale, axis=-1)
    o = jnp.transpose(attn @ v, (0, 2, 1, 3)).reshape(B, S, C)
    o = o @ params["wproj"].T + params["bproj"]
    x = x + o

    h = ln(x, params["ln2_g"], params["ln2_b"])
    f = h @ params["w1"].T + params["b1"]
    f = jax.nn.gelu(f, approximate=False)                            # exact-erf GELU
    f = f @ params["w2"].T + params["b2"]
    x = x + f

    return jnp.transpose(x, (0, 2, 1)).reshape(B, C, H, W)


if __name__ == "__main__":
    # Small shapes consistent with SelfAttn.forward: NCHW input, dim divisible by heads.
    # B=4 so a v7x chip (2 TensorCores) gets >=2 parallel grid steps per core.
    B, C, H, W = 4, 32, 16, 16          # seq length S = H*W = 256 (lane-dense)
    num_heads = 4
    mlp_hidden = int(C * 4.0)           # mlp_ratio = 4.0 -> 128

    key = jax.random.PRNGKey(0)
    (k_x, k_wqkv, k_wp, k_bp, k_w1, k_b1, k_w2, k_b2) = jax.random.split(key, 8)

    x = jax.random.normal(k_x, (B, C, H, W), dtype=jnp.float32)

    def uniform(k, shape, fan_in):
        bound = 1.0 / (fan_in ** 0.5)
        return jax.random.uniform(k, shape, minval=-bound, maxval=bound,
                                  dtype=jnp.float32)

    params = {
        # GlobalSparseAttn (sr_ratio=1): fused qkv (qkv_bias=False), output proj (bias)
        "wqkv": uniform(k_wqkv, (3 * C, C), C),
        "wproj": uniform(k_wp, (C, C), C),
        "bproj": uniform(k_bp, (C,), C),
        # Mlp: fc1 / fc2 (Linear default init)
        "w1": uniform(k_w1, (mlp_hidden, C), C),
        "b1": uniform(k_b1, (mlp_hidden,), C),
        "w2": uniform(k_w2, (C, mlp_hidden), mlp_hidden),
        "b2": uniform(k_b2, (C,), mlp_hidden),
        # LayerNorms (PyTorch default init)
        "ln1_g": jnp.ones((C,), jnp.float32), "ln1_b": jnp.zeros((C,), jnp.float32),
        "ln2_g": jnp.ones((C,), jnp.float32), "ln2_b": jnp.zeros((C,), jnp.float32),
    }

    out = selfattn_forward(x, params, num_heads)
    out = jax.block_until_ready(out)

    with jax.default_matmul_precision("highest"):
        ref = _reference(x, params, num_heads)
    ref = jax.block_until_ready(ref)

    assert out.shape == (B, C, H, W)
    # Tolerance loosened vs the f32 reference because matmul operands are bf16
    # (f32 accumulation); observed errors are well inside this bound.
    max_err = float(jnp.max(jnp.abs(out - ref)))
    assert jnp.allclose(out, ref, atol=5e-2, rtol=5e-2), \
        f"mismatch vs reference (max abs err {max_err})"

    # TODO(synk): self.pos_embed (depthwise Conv2d) is constructed by SelfAttn but never
    # called in the given forward(), so it is intentionally not implemented here.
    print("KERNEL_OK")
</pallas_src>

<mosaic_0001>
module attributes {stable_mosaic.version = 11 : i64} {
  func.func @_selfattn_kernel(%arg0: i32, %arg1: memref<1x32x256xf32, #tpu.memory_space<vmem>>, %arg2: memref<32x1xf32, #tpu.memory_space<vmem>>, %arg3: memref<32x1xf32, #tpu.memory_space<vmem>>, %arg4: memref<96x32xbf16, #tpu.memory_space<vmem>>, %arg5: memref<32x32xbf16, #tpu.memory_space<vmem>>, %arg6: memref<32x1xf32, #tpu.memory_space<vmem>>, %arg7: memref<32x1xf32, #tpu.memory_space<vmem>>, %arg8: memref<32x1xf32, #tpu.memory_space<vmem>>, %arg9: memref<128x32xbf16, #tpu.memory_space<vmem>>, %arg10: memref<128x1xf32, #tpu.memory_space<vmem>>, %arg11: memref<32x128xbf16, #tpu.memory_space<vmem>>, %arg12: memref<32x1xf32, #tpu.memory_space<vmem>>, %arg13: memref<1x32x256xf32, #tpu.memory_space<vmem>>) attributes {dimension_semantics = [#tpu.dimension_semantics<parallel>], iteration_bounds = array<i64: 4>, scalar_prefetch = 0 : i64, scratch_operands = 0 : i64, tpu.core_type = #tpu.core_type<tc>, window_params = [{transform_indices = @transform_0, window_bounds = array<i64: 1, 32, 256>}, {pipeline_mode = #tpu.pipeline_mode<synchronous>, transform_indices = @transform_1, window_bounds = array<i64: 32, 1>}, {pipeline_mode = #tpu.pipeline_mode<synchronous>, transform_indices = @transform_2, window_bounds = array<i64: 32, 1>}, {pipeline_mode = #tpu.pipeline_mode<synchronous>, transform_indices = @transform_3, window_bounds = array<i64: 96, 32>}, {pipeline_mode = #tpu.pipeline_mode<synchronous>, transform_indices = @transform_4, window_bounds = array<i64: 32, 32>}, {pipeline_mode = #tpu.pipeline_mode<synchronous>, transform_indices = @transform_5, window_bounds = array<i64: 32, 1>}, {pipeline_mode = #tpu.pipeline_mode<synchronous>, transform_indices = @transform_6, window_bounds = array<i64: 32, 1>}, {pipeline_mode = #tpu.pipeline_mode<synchronous>, transform_indices = @transform_7, window_bounds = array<i64: 32, 1>}, {pipeline_mode = #tpu.pipeline_mode<synchronous>, transform_indices = @transform_8, window_bounds = array<i64: 128, 32>}, {pipeline_mode = #tpu.pipeline_mode<synchronous>, transform_indices = @transform_9, window_bounds = array<i64: 128, 1>}, {pipeline_mode = #tpu.pipeline_mode<synchronous>, transform_indices = @transform_10, window_bounds = array<i64: 32, 128>}, {pipeline_mode = #tpu.pipeline_mode<synchronous>, transform_indices = @transform_11, window_bounds = array<i64: 32, 1>}, {transform_indices = @transform_12, window_bounds = array<i64: 1, 32, 256>}]} {
    %c0 = arith.constant 0 : index
    %c0_0 = arith.constant 0 : index
    %c0_1 = arith.constant 0 : index
    %0 = vector.load %arg1[%c0, %c0_0, %c0_1] : memref<1x32x256xf32, #tpu.memory_space<vmem>>, vector<1x32x256xf32>
    %1 = vector.shape_cast %0 : vector<1x32x256xf32> to vector<32x256xf32>
    %c0_2 = arith.constant 0 : index
    %c0_3 = arith.constant 0 : index
    %2 = vector.load %arg2[%c0_2, %c0_3] : memref<32x1xf32, #tpu.memory_space<vmem>>, vector<32x1xf32>
    %c0_4 = arith.constant 0 : index
    %c0_5 = arith.constant 0 : index
    %3 = vector.load %arg3[%c0_4, %c0_5] : memref<32x1xf32, #tpu.memory_space<vmem>>, vector<32x1xf32>
    %cst = arith.constant dense<0.000000e+00> : vector<256xf32>
    %4 = vector.multi_reduction <add>, %1, %cst [0] : vector<32x256xf32> to vector<256xf32>
    %5 = vector.shape_cast %4 : vector<256xf32> to vector<1x256xf32>
    %cst_6 = arith.constant 3.200000e+01 : f32
    %6 = vector.broadcast %cst_6 : f32 to vector<1x256xf32>
    %7 = arith.divf %5, %6 : vector<1x256xf32>
    %8 = arith.mulf %1, %1 : vector<32x256xf32>
    %cst_7 = arith.constant dense<0.000000e+00> : vector<256xf32>
    %9 = vector.multi_reduction <add>, %8, %cst_7 [0] : vector<32x256xf32> to vector<256xf32>
    %10 = vector.shape_cast %9 : vector<256xf32> to vector<1x256xf32>
    %cst_8 = arith.constant 3.200000e+01 : f32
    %11 = vector.broadcast %cst_8 : f32 to vector<1x256xf32>
    %12 = arith.divf %10, %11 : vector<1x256xf32>
    %13 = arith.mulf %7, %7 : vector<1x256xf32>
    %14 = arith.subf %12, %13 : vector<1x256xf32>
    %cst_9 = arith.constant 9.99999974E-6 : f32
    %15 = vector.broadcast %cst_9 : f32 to vector<1x256xf32>
    %16 = arith.addf %14, %15 : vector<1x256xf32>
    %17 = math.rsqrt %16 : vector<1x256xf32>
    %18 = vector.broadcast %7 : vector<1x256xf32> to vector<32x256xf32>
    %19 = arith.subf %1, %18 : vector<32x256xf32>
    %20 = vector.broadcast %17 : vector<1x256xf32> to vector<32x256xf32>
    %21 = arith.mulf %19, %20 : vector<32x256xf32>
    %22 = vector.broadcast %2 : vector<32x1xf32> to vector<32x256xf32>
    %23 = arith.mulf %21, %22 : vector<32x256xf32>
    %24 = vector.broadcast %3 : vector<32x1xf32> to vector<32x256xf32>
    %25 = arith.addf %23, %24 : vector<32x256xf32>
    %c0_10 = arith.constant 0 : index
    %c0_11 = arith.constant 0 : index
    %26 = vector.load %arg4[%c0_10, %c0_11] : memref<96x32xbf16, #tpu.memory_space<vmem>>, vector<96x32xbf16>
    %27 = arith.truncf %25 : vector<32x256xf32> to vector<32x256xbf16>
    %cst_12 = arith.constant dense<0.000000e+00> : vector<96x256xf32>
    %28 = tpu.matmul %26, %27, %cst_12 {dimension_numbers = #tpu.dot_dimension_numbers<[1], [0], [0], [1], [0, 0, 1, 1], [], []>} : vector<96x32xbf16>, vector<32x256xbf16>, vector<96x256xf32> -> vector<96x256xf32>
    %29 = vector.extract_strided_slice %28 {offsets = [0, 0], sizes = [32, 256], strides = [1, 1]} : vector<96x256xf32> to vector<32x256xf32>
    %30 = vector.shape_cast %29 : vector<32x256xf32> to vector<4x8x256xf32>
    %31 = arith.truncf %30 : vector<4x8x256xf32> to vector<4x8x256xbf16>
    %32 = vector.extract_strided_slice %28 {offsets = [32, 0], sizes = [32, 256], strides = [1, 1]} : vector<96x256xf32> to vector<32x256xf32>
    %33 = vector.shape_cast %32 : vector<32x256xf32> to vector<4x8x256xf32>
    %34 = arith.truncf %33 : vector<4x8x256xf32> to vector<4x8x256xbf16>
    %35 = vector.extract_strided_slice %28 {offsets = [64, 0], sizes = [32, 256], strides = [1, 1]} : vector<96x256xf32> to vector<32x256xf32>
    %36 = vector.shape_cast %35 : vector<32x256xf32> to vector<4x8x256xf32>
    %37 = arith.truncf %36 : vector<4x8x256xf32> to vector<4x8x256xbf16>
    %cst_13 = arith.constant dense<0.000000e+00> : vector<4x256x256xf32>
    %38 = tpu.matmul %31, %34, %cst_13 {dimension_numbers = #tpu.dot_dimension_numbers<[1], [1], [2], [2], [0, 0, 0, 2, 1, 2], [0], [0]>} : vector<4x8x256xbf16>, vector<4x8x256xbf16>, vector<4x256x256xf32> -> vector<4x256x256xf32>
    %cst_14 = arith.constant 0.353553385 : f32
    %39 = vector.broadcast %cst_14 : f32 to vector<4x256x256xf32>
    %40 = arith.mulf %38, %39 : vector<4x256x256xf32>
    %cst_15 = arith.constant dense<0xFF800000> : vector<4x256xf32>
    %41 = vector.multi_reduction <maximumf>, %40, %cst_15 [2] : vector<4x256x256xf32> to vector<4x256xf32>
    %42 = vector.shape_cast %41 : vector<4x256xf32> to vector<4x256x1xf32>
    %43 = vector.broadcast %42 : vector<4x256x1xf32> to vector<4x256x256xf32>
    %44 = arith.subf %40, %43 : vector<4x256x256xf32>
    %45 = math.exp %44 : vector<4x256x256xf32>
    %cst_16 = arith.constant dense<0.000000e+00> : vector<4x256xf32>
    %46 = vector.multi_reduction <add>, %45, %cst_16 [2] : vector<4x256x256xf32> to vector<4x256xf32>
    %47 = vector.shape_cast %46 : vector<4x256xf32> to vector<4x256x1xf32>
    %48 = tpu.reciprocal %47 {approx = true} : vector<4x256x1xf32> -> vector<4x256x1xf32>
    %49 = vector.broadcast %48 : vector<4x256x1xf32> to vector<4x256x256xf32>
    %50 = arith.mulf %45, %49 : vector<4x256x256xf32>
    %51 = arith.truncf %50 : vector<4x256x256xf32> to vector<4x256x256xbf16>
    %cst_17 = arith.constant dense<0.000000e+00> : vector<4x8x256xf32>
    %52 = tpu.matmul %37, %51, %cst_17 {dimension_numbers = #tpu.dot_dimension_numbers<[2], [2], [1], [1], [0, 0, 0, 1, 1, 1], [0], [0]>} : vector<4x8x256xbf16>, vector<4x256x256xbf16>, vector<4x8x256xf32> -> vector<4x8x256xf32>
    %53 = vector.shape_cast %52 : vector<4x8x256xf32> to vector<32x256xf32>
    %54 = arith.truncf %53 : vector<32x256xf32> to vector<32x256xbf16>
    %c0_18 = arith.constant 0 : index
    %c0_19 = arith.constant 0 : index
    %55 = vector.load %arg5[%c0_18, %c0_19] : memref<32x32xbf16, #tpu.memory_space<vmem>>, vector<32x32xbf16>
    %cst_20 = arith.constant dense<0.000000e+00> : vector<32x256xf32>
    %56 = tpu.matmul %55, %54, %cst_20 {dimension_numbers = #tpu.dot_dimension_numbers<[1], [0], [0], [1], [0, 0, 1, 1], [], []>} : vector<32x32xbf16>, vector<32x256xbf16>, vector<32x256xf32> -> vector<32x256xf32>
    %c0_21 = arith.constant 0 : index
    %c0_22 = arith.constant 0 : index
    %57 = vector.load %arg6[%c0_21, %c0_22] : memref<32x1xf32, #tpu.memory_space<vmem>>, vector<32x1xf32>
    %58 = vector.broadcast %57 : vector<32x1xf32> to vector<32x256xf32>
    %59 = arith.addf %56, %58 : vector<32x256xf32>
    %60 = arith.addf %1, %59 : vector<32x256xf32>
    %c0_23 = arith.constant 0 : index
    %c0_24 = arith.constant 0 : index
    %61 = vector.load %arg7[%c0_23, %c0_24] : memref<32x1xf32, #tpu.memory_space<vmem>>, vector<32x1xf32>
    %c0_25 = arith.constant 0 : index
    %c0_26 = arith.constant 0 : index
    %62 = vector.load %arg8[%c0_25, %c0_26] : memref<32x1xf32, #tpu.memory_space<vmem>>, vector<32x1xf32>
    %cst_27 = arith.constant dense<0.000000e+00> : vector<256xf32>
    %63 = vector.multi_reduction <add>, %60, %cst_27 [0] : vector<32x256xf32> to vector<256xf32>
    %64 = vector.shape_cast %63 : vector<256xf32> to vector<1x256xf32>
    %cst_28 = arith.constant 3.200000e+01 : f32
    %65 = vector.broadcast %cst_28 : f32 to vector<1x256xf32>
    %66 = arith.divf %64, %65 : vector<1x256xf32>
    %67 = arith.mulf %60, %60 : vector<32x256xf32>
    %cst_29 = arith.constant dense<0.000000e+00> : vector<256xf32>
    %68 = vector.multi_reduction <add>, %67, %cst_29 [0] : vector<32x256xf32> to vector<256xf32>
    %69 = vector.shape_cast %68 : vector<256xf32> to vector<1x256xf32>
    %cst_30 = arith.constant 3.200000e+01 : f32
    %70 = vector.broadcast %cst_30 : f32 to vector<1x256xf32>
    %71 = arith.divf %69, %70 : vector<1x256xf32>
    %72 = arith.mulf %66, %66 : vector<1x256xf32>
    %73 = arith.subf %71, %72 : vector<1x256xf32>
    %cst_31 = arith.constant 9.99999974E-6 : f32
    %74 = vector.broadcast %cst_31 : f32 to vector<1x256xf32>
    %75 = arith.addf %73, %74 : vector<1x256xf32>
    %76 = math.rsqrt %75 : vector<1x256xf32>
    %77 = vector.broadcast %66 : vector<1x256xf32> to vector<32x256xf32>
    %78 = arith.subf %60, %77 : vector<32x256xf32>
    %79 = vector.broadcast %76 : vector<1x256xf32> to vector<32x256xf32>
    %80 = arith.mulf %78, %79 : vector<32x256xf32>
    %81 = vector.broadcast %61 : vector<32x1xf32> to vector<32x256xf32>
    %82 = arith.mulf %80, %81 : vector<32x256xf32>
    %83 = vector.broadcast %62 : vector<32x1xf32> to vector<32x256xf32>
    %84 = arith.addf %82, %83 : vector<32x256xf32>
    %c0_32 = arith.constant 0 : index
    %c0_33 = arith.constant 0 : index
    %85 = vector.load %arg9[%c0_32, %c0_33] : memref<128x32xbf16, #tpu.memory_space<vmem>>, vector<128x32xbf16>
    %86 = arith.truncf %84 : vector<32x256xf32> to vector<32x256xbf16>
    %cst_34 = arith.constant dense<0.000000e+00> : vector<128x256xf32>
    %87 = tpu.matmul %85, %86, %cst_34 {dimension_numbers = #tpu.dot_dimension_numbers<[1], [0], [0], [1], [0, 0, 1, 1], [], []>} : vector<128x32xbf16>, vector<32x256xbf16>, vector<128x256xf32> -> vector<128x256xf32>
    %c0_35 = arith.constant 0 : index
    %c0_36 = arith.constant 0 : index
    %88 = vector.load %arg10[%c0_35, %c0_36] : memref<128x1xf32, #tpu.memory_space<vmem>>, vector<128x1xf32>
    %89 = vector.broadcast %88 : vector<128x1xf32> to vector<128x256xf32>
    %90 = arith.addf %87, %89 : vector<128x256xf32>
    %cst_37 = arith.constant 0.707106769 : f32
    %91 = vector.broadcast %cst_37 : f32 to vector<128x256xf32>
    %92 = arith.mulf %90, %91 : vector<128x256xf32>
    %93 = math.absf %92 : vector<128x256xf32>
    %cst_38 = arith.constant 0.327591091 : f32
    %94 = vector.broadcast %cst_38 : f32 to vector<128x256xf32>
    %95 = arith.mulf %94, %93 : vector<128x256xf32>
    %cst_39 = arith.constant 1.000000e+00 : f32
    %96 = vector.broadcast %cst_39 : f32 to vector<128x256xf32>
    %97 = arith.addf %96, %95 : vector<128x256xf32>
    %98 = tpu.reciprocal %97 {approx = true} : vector<128x256xf32> -> vector<128x256xf32>
    %cst_40 = arith.constant 1.06140542 : f32
    %99 = vector.broadcast %cst_40 : f32 to vector<128x256xf32>
    %100 = arith.mulf %98, %99 : vector<128x256xf32>
    %cst_41 = arith.constant -1.45315206 : f32
    %101 = vector.broadcast %cst_41 : f32 to vector<128x256xf32>
    %102 = arith.addf %101, %100 : vector<128x256xf32>
    %103 = arith.mulf %98, %102 : vector<128x256xf32>
    %cst_42 = arith.constant 1.42141378 : f32
    %104 = vector.broadcast %cst_42 : f32 to vector<128x256xf32>
    %105 = arith.addf %104, %103 : vector<128x256xf32>
    %106 = arith.mulf %98, %105 : vector<128x256xf32>
    %cst_43 = arith.constant -0.284496725 : f32
    %107 = vector.broadcast %cst_43 : f32 to vector<128x256xf32>
    %108 = arith.addf %107, %106 : vector<128x256xf32>
    %109 = arith.mulf %98, %108 : vector<128x256xf32>
    %cst_44 = arith.constant 0.254829586 : f32
    %110 = vector.broadcast %cst_44 : f32 to vector<128x256xf32>
    %111 = arith.addf %110, %109 : vector<128x256xf32>
    %112 = arith.mulf %98, %111 : vector<128x256xf32>
    %cst_45 = arith.constant 0.000000e+00 : f32
    %113 = vector.broadcast %cst_45 : f32 to vector<128x256xf32>
    %114 = arith.subf %113, %93 : vector<128x256xf32>
    %115 = arith.mulf %114, %93 : vector<128x256xf32>
    %116 = math.exp %115 : vector<128x256xf32>
    %117 = arith.mulf %112, %116 : vector<128x256xf32>
    %cst_46 = arith.constant 1.000000e+00 : f32
    %118 = vector.broadcast %cst_46 : f32 to vector<128x256xf32>
    %119 = arith.subf %118, %117 : vector<128x256xf32>
    %cst_47 = arith.constant 0.000000e+00 : f32
    %120 = vector.broadcast %cst_47 : f32 to vector<128x256xf32>
    %121 = arith.cmpf oge, %92, %120 : vector<128x256xf32>
    %cst_48 = arith.constant 0.000000e+00 : f32
    %122 = vector.broadcast %cst_48 : f32 to vector<128x256xf32>
    %123 = arith.subf %122, %119 : vector<128x256xf32>
    %124 = arith.select %121, %119, %123 : vector<128x256xi1>, vector<128x256xf32>
    %cst_49 = arith.constant 5.000000e-01 : f32
    %125 = vector.broadcast %cst_49 : f32 to vector<128x256xf32>
    %126 = arith.mulf %125, %90 : vector<128x256xf32>
    %cst_50 = arith.constant 1.000000e+00 : f32
    %127 = vector.broadcast %cst_50 : f32 to vector<128x256xf32>
    %128 = arith.addf %127, %124 : vector<128x256xf32>
    %129 = arith.mulf %126, %128 : vector<128x256xf32>
    %c0_51 = arith.constant 0 : index
    %c0_52 = arith.constant 0 : index
    %130 = vector.load %arg11[%c0_51, %c0_52] : memref<32x128xbf16, #tpu.memory_space<vmem>>, vector<32x128xbf16>
    %131 = arith.truncf %129 : vector<128x256xf32> to vector<128x256xbf16>
    %cst_53 = arith.constant dense<0.000000e+00> : vector<32x256xf32>
    %132 = tpu.matmul %130, %131, %cst_53 {dimension_numbers = #tpu.dot_dimension_numbers<[1], [0], [0], [1], [0, 0, 1, 1], [], []>} : vector<32x128xbf16>, vector<128x256xbf16>, vector<32x256xf32> -> vector<32x256xf32>
    %c0_54 = arith.constant 0 : index
    %c0_55 = arith.constant 0 : index
    %133 = vector.load %arg12[%c0_54, %c0_55] : memref<32x1xf32, #tpu.memory_space<vmem>>, vector<32x1xf32>
    %134 = vector.broadcast %133 : vector<32x1xf32> to vector<32x256xf32>
    %135 = arith.addf %132, %134 : vector<32x256xf32>
    %136 = arith.addf %60, %135 : vector<32x256xf32>
    %c0_56 = arith.constant 0 : index
    %c0_57 = arith.constant 0 : index
    %c0_58 = arith.constant 0 : index
    %137 = vector.load %arg13[%c0_56, %c0_57, %c0_58] : memref<1x32x256xf32, #tpu.memory_space<vmem>>, vector<1x32x256xf32>
    %138 = vector.shape_cast %137 : vector<1x32x256xf32> to vector<32x256xf32>
    %139 = vector.shape_cast %136 : vector<32x256xf32> to vector<1x32x256xf32>
    tpu.vector_store %arg13[%c0_56, %c0_57, %c0_58], %139 {strides = array<i32>} : memref<1x32x256xf32, #tpu.memory_space<vmem>>, vector<1x32x256xf32>,
    return
  }
  func.func @transform_0(%arg0: i32) -> (i32, i32, i32) {
    %c0_i32 = arith.constant 0 : i32
    %c0_i32_0 = arith.constant 0 : i32
    %c0_i32_1 = arith.constant 0 : i32
    return %arg0, %c0_i32, %c0_i32_0 : i32, i32, i32
  }
  func.func @transform_1(%arg0: i32) -> (i32, i32) {
    %c0_i32 = arith.constant 0 : i32
    %c0_i32_0 = arith.constant 0 : i32
    %c0_i32_1 = arith.constant 0 : i32
    return %c0_i32, %c0_i32_0 : i32, i32
  }
  func.func @transform_2(%arg0: i32) -> (i32, i32) {
    %c0_i32 = arith.constant 0 : i32
    %c0_i32_0 = arith.constant 0 : i32
    %c0_i32_1 = arith.constant 0 : i32
    return %c0_i32, %c0_i32_0 : i32, i32
  }
  func.func @transform_3(%arg0: i32) -> (i32, i32) {
    %c0_i32 = arith.constant 0 : i32
    %c0_i32_0 = arith.constant 0 : i32
    %c0_i32_1 = arith.constant 0 : i32
    return %c0_i32, %c0_i32_0 : i32, i32
  }
  func.func @transform_4(%arg0: i32) -> (i32, i32) {
    %c0_i32 = arith.constant 0 : i32
    %c0_i32_0 = arith.constant 0 : i32
    %c0_i32_1 = arith.constant 0 : i32
    return %c0_i32, %c0_i32_0 : i32, i32
  }
  func.func @transform_5(%arg0: i32) -> (i32, i32) {
    %c0_i32 = arith.constant 0 : i32
    %c0_i32_0 = arith.constant 0 : i32
    %c0_i32_1 = arith.constant 0 : i32
    return %c0_i32, %c0_i32_0 : i32, i32
  }
  func.func @transform_6(%arg0: i32) -> (i32, i32) {
    %c0_i32 = arith.constant 0 : i32
    %c0_i32_0 = arith.constant 0 : i32
    %c0_i32_1 = arith.constant 0 : i32
    return %c0_i32, %c0_i32_0 : i32, i32
  }
  func.func @transform_7(%arg0: i32) -> (i32, i32) {
    %c0_i32 = arith.constant 0 : i32
    %c0_i32_0 = arith.constant 0 : i32
    %c0_i32_1 = arith.constant 0 : i32
    return %c0_i32, %c0_i32_0 : i32, i32
  }
  func.func @transform_8(%arg0: i32) -> (i32, i32) {
    %c0_i32 = arith.constant 0 : i32
    %c0_i32_0 = arith.constant 0 : i32
    %c0_i32_1 = arith.constant 0 : i32
    return %c0_i32, %c0_i32_0 : i32, i32
  }
  func.func @transform_9(%arg0: i32) -> (i32, i32) {
    %c0_i32 = arith.constant 0 : i32
    %c0_i32_0 = arith.constant 0 : i32
    %c0_i32_1 = arith.constant 0 : i32
    return %c0_i32, %c0_i32_0 : i32, i32
  }
  func.func @transform_10(%arg0: i32) -> (i32, i32) {
    %c0_i32 = arith.constant 0 : i32
    %c0_i32_0 = arith.constant 0 : i32
    %c0_i32_1 = arith.constant 0 : i32
    return %c0_i32, %c0_i32_0 : i32, i32
  }
  func.func @transform_11(%arg0: i32) -> (i32, i32) {
    %c0_i32 = arith.constant 0 : i32
    %c0_i32_0 = arith.constant 0 : i32
    %c0_i32_1 = arith.constant 0 : i32
    return %c0_i32, %c0_i32_0 : i32, i32
  }
  func.func @transform_12(%arg0: i32) -> (i32, i32, i32) {
    %c0_i32 = arith.constant 0 : i32
    %c0_i32_0 = arith.constant 0 : i32
    %c0_i32_1 = arith.constant 0 : i32
    return %arg0, %c0_i32, %c0_i32_0 : i32, i32, i32
  }
}

</mosaic_0001>

<bundles_post_ra>
// kernel: tpu_custom_call.1
= control target key start
LH: loop header
LB: loop body
LE: loop exit
PB: predicated region body
PF: predicated region fallthrough
CT: control target
= control target key end

     0   :  { %17 = vsyncpa [#allocation3], 0  ;;  %s11352_s0 = inlined_call_operand.vmem [shape: f32[4,32,256], index: 0, kind: input, shape index: {}]   ;;  %s11353_s1 = inlined_call_operand.vmem [shape: f32[32,1], index: 1, kind: input, shape index: {}]   ;;  %s11354_s2 = inlined_call_operand.vmem [shape: f32[32,1], index: 2, kind: input, shape index: {}]   ;;  %s11355_s3 = inlined_call_operand.vmem [shape: bf16[96,32], index: 3, kind: input, shape index: {}]   ;;  %s11356_s4 = inlined_call_operand.vmem [shape: bf16[32,32], index: 4, kind: input, shape index: {}]   ;;  %s11357_s5 = inlined_call_operand.vmem [shape: f32[32,1], index: 5, kind: input, shape index: {}]   ;;  %s11358_s6 = inlined_call_operand.vmem [shape: f32[32,1], index: 6, kind: input, shape index: {}]   ;;  %s11359_s7 = inlined_call_operand.vmem [shape: f32[32,1], index: 7, kind: input, shape index: {}]   ;;  %s11360_s8 = inlined_call_operand.vmem [shape: bf16[128,32], index: 8, kind: input, shape index: {}]   ;;  %s11361_s9 = inlined_call_operand.vmem [shape: f32[128,1], index: 9, kind: input, shape index: {}]   ;;  %s11362_s10 = inlined_call_operand.vmem [shape: bf16[32,128], index: 10, kind: input, shape index: {}]   ;;  %s11363_s11 = inlined_call_operand.vmem [shape: f32[32,1], index: 11, kind: input, shape index: {}]   ;;  %s11364_s12 = inlined_call_operand.hbm [shape: f32[4,32,256], index: 12, kind: output, shape index: {}]  }
   0x1   :  { %19 = vsyncpa [#allocation3 + $0x1], 0  ;;  %s7136_s21 = smov 0   ;;  %s7138_s22 = smov 0  }
   0x2   :  { %s7140_s23 = smov 0   ;;  %s7142_s24 = smov 0  }
   0x3 LB: > { %s7157_s25 = sadd.s32 4294967295, %s7065_s24   ;;  %s5897_s26 = sadd.s32 4294967294, %s7065_s24   ;;  %s7065_s24 = sphi %s7142_s24, %s12863_s24   ;;  %s7061_s23 = sphi %s7140_s23, %s12862_s23   ;;  %s7057_s22 = sphi %s7138_s22, %s12861_s22   ;;  %s7053_s21 = sphi %s7136_s21, %s12860_s21  }
   0x4   : > { %s7161_s27 = sadd.s32 1, %s7065_s24   ;;  %s289_s28 = sadd.s32 1, %s7061_s23 }
   0x5   : > { %s286_s29 = ssub.s32 %s7065_s24, %s7161_s27  ;;  %p299_p0 = scmp.ne.s32.totalorder %s7061_s23, %s7057_s22 }
   0x6   : > { %p287_p1 = scmp.eq.s32.totalorder %s286_s29, 0  ;;  %p300_p2 = scmp.eq.s32.totalorder %s7157_s25, 3 }
   0x7   : > { %p305_p3 = scmp.ne.s32.totalorder %s7057_s22, %s7053_s21  ;;  %p306_p4 = scmp.eq.s32.totalorder %s5897_s26, 3 }
   0x8   : > { %s7172_s30 = scalar_select %p287_p1, %s7061_s23, %s289_s28  }
   0x9   : > { %p7174_p5 = por %p300_p2, %p299_p0  ;;  %p7178_p6 = por %p306_p4, %p305_p3 }
   0xa   : > { %11807 = sst [smem:[#allocation5_spill]] %s7172_s30  ;;  %p5900_p7 = scmp.ge.s32.totalorder %s7065_s24, 1 }
   0xb   : > { %p365_p8 = scmp.lt.s32.totalorder %s7065_s24, 5 }
   0xd   : > { %p366_p9 = pnand %p5900_p7, %p365_p8 }
   0xf   : > { %369 = sbr.rel (%p366_p9) target bundleno = 2591 (0xa1f), region = 68 }
  0x16   : > { %v425_v0 = vld [vmem:[%s11354_s2] sm:$0xff]  ;;  %v11365_v2 = vmov 0   ;;  %v426_v3 = vld [vmem:[%s11354_s2 + $0x8] sm:$0xff]  ;;  %v424_v5 = vld [vmem:[%s11353_s1 + $0x18] sm:$0xff]  ;;  %p407_p10 = scmp.lt.s32.totalorder %s7157_s25, 3  ;;  %vm604_vm0 = vcmask 261120  }
  0x17   : > { %v421_v1 = vld [vmem:[%s11353_s1] sm:$0xff]  ;;  %6072 = vset.pattern.permute.xlu1 %v11365_v2  ;;  %6071 = vset.pattern.permute.xlu0 %v11365_v2  ;;  %v422_v4 = vld [vmem:[%s11353_s1 + $0x8] sm:$0xff]  ;;  %v423_v6 = vld [vmem:[%s11353_s1 + $0x10] sm:$0xff]  ;;  %vm821_vm1 = vcmask 1043456   ;;  %vm772_vm2 = vcmask 64512   ;;  %s6012_s30 = sshll.u32 %s7157_s25, 10 }
  0x18   : > { %532 = vperm.xlu1 %6072, %v425_v0   ;;  %504 = vperm.xlu0 %6071, %v421_v1   ;;  %v428_v7 = vld [vmem:[%s11354_s2 + $0x18] sm:$0xff]  ;;  %v427_v8 = vld [vmem:[%s11354_s2 + $0x10] sm:$0xff]  ;;  %s408_s28 = scalar_select %p407_p10, %s7157_s25, 3 }
  0x19   : > { %655 = vmatprep.mubr.bf16.mxu0 %v11365_v2  ;;  %860 = vmatprep.mubr.bf16.mxu1 %v11365_v2  ;;  %s11303_s20 = scalar_lea.hbm %s11364_s12, %s6012_s30 }
  0x1a   : > { %s6011_s29 = sshll.u32 %s408_s28, 6 }
  0x1b   : > { %s7217_s16 = scalar_lea.vmem %s11352_s0, %s6011_s29  ;;  %s7068_s29 = smov [#allocation2]  }
  0x1c   : > { %537 = vperm.xlu1 %6072, %v426_v3   ;;  %509 = vperm.xlu0 %6071, %v422_v4   ;;  %v7220_v9 = vld [vmem:[%s7217_s16] sm:$0xff]  ;;  %v7223_v10 = vld [vmem:[%s7217_s16 + $0x10] sm:$0xff]  ;;  %v7226_v11 = vld [vmem:[%s7217_s16 + $0x8] sm:$0xff] }
  0x1d   : > { %v7229_v12 = vld [vmem:[%s7217_s16 + $0x18] sm:$0xff]  ;;  %v429_v13 = vadd.f32 %v7223_v10, %v7220_v9  ;;  %v450_v14 = vmul.f32 %v7220_v9, %v7220_v9  ;;  %v452_v15 = vmul.f32 %v7223_v10, %v7223_v10  ;;  %v7238_v16 = vld [vmem:[%s7217_s16 + $0x20] sm:$0xff]  ;;  %v451_v18 = vmul.f32 %v7226_v11, %v7226_v11  ;;  %v7247_v20 = vld [vmem:[%s7217_s16 + $0x28] sm:$0xff] }
  0x1e   : > { %v438_v17 = vadd.f32 %v7229_v12, %v7226_v11  ;;  %v453_v19 = vmul.f32 %v7229_v12, %v7229_v12  ;;  %v454_v22 = vmul.f32 %v7238_v16, %v7238_v16  ;;  %v7253_v24 = vld [vmem:[%s7217_s16 + $0x30] sm:$0xff]  ;;  %v455_v26 = vmul.f32 %v7247_v20, %v7247_v20  ;;  %v7259_v28 = vld [vmem:[%s7217_s16 + $0x38] sm:$0xff] }
  0x1f   : > { %v430_v21 = vadd.f32 %v429_v13, %v7238_v16  ;;  %v458_v23 = vadd.f32 %v452_v15, %v450_v14  ;;  %v456_v30 = vmul.f32 %v7253_v24, %v7253_v24  ;;  %v457_v33 = vmul.f32 %v7259_v28, %v7259_v28 }
  0x20   : > { %519 = vperm.xlu1 %6072, %v424_v5   ;;  %514 = vperm.xlu0 %6071, %v423_v6   ;;  %v439_v25 = vadd.f32 %v438_v17, %v7247_v20  ;;  %v467_v27 = vadd.f32 %v453_v19, %v451_v18 }
  0x21   : > { %v431_v29 = vadd.f32 %v430_v21, %v7253_v24  ;;  %v459_v31 = vadd.f32 %v458_v23, %v454_v22 }
  0x22   : > { %v440_v32 = vadd.f32 %v439_v25, %v7259_v28  ;;  %v468_v34 = vadd.f32 %v467_v27, %v455_v26 }
  0x23   : > { %v432_v35 = vrot.slane %v431_v29, 4  ;;  %v460_v36 = vadd.f32 %v459_v31, %v456_v30 }
  0x24   : > { %547 = vperm.xlu1 %6072, %v428_v7   ;;  %542 = vperm.xlu0 %6071, %v427_v8   ;;  %v441_v37 = vrot.slane %v440_v32, 4  ;;  %v469_v38 = vadd.f32 %v468_v34, %v457_v33 }
  0x25   : > { %v433_v39 = vadd.f32 %v432_v35, %v431_v29  ;;  %v461_v40 = vrot.slane %v460_v36, 4 }
  0x26   : > { %v442_v41 = vadd.f32 %v441_v37, %v440_v32  ;;  %v470_v42 = vrot.slane %v469_v38, 4 }
  0x27   : > { %v434_v43 = vrot.slane %v433_v39, 2  ;;  %v462_v44 = vadd.f32 %v461_v40, %v460_v36 }
  0x28   : > { %v443_v45 = vrot.slane %v442_v41, 2  ;;  %v471_v46 = vadd.f32 %v470_v42, %v469_v38 }
  0x29   : > { %v435_v47 = vadd.f32 %v434_v43, %v433_v39  ;;  %v463_v48 = vrot.slane %v462_v44, 2 }
  0x2a   : > { %v444_v49 = vadd.f32 %v443_v45, %v442_v41  ;;  %v472_v50 = vrot.slane %v471_v46, 2 }
  0x2b   : > { %v436_v51 = vrot.slane %v435_v47, 1  ;;  %v464_v52 = vadd.f32 %v463_v48, %v462_v44 }
  0x2c   : > { %v445_v53 = vrot.slane %v444_v49, 1  ;;  %v473_v54 = vadd.f32 %v472_v50, %v471_v46 }
  0x2d   : > { %v437_v55 = vadd.f32 %v436_v51, %v435_v47  ;;  %v465_v56 = vrot.slane %v464_v52, 1 }
  0x2e   : > { %v446_v57 = vadd.f32 %v445_v53, %v444_v49  ;;  %v474_v58 = vrot.slane %v473_v54, 1 }
  0x2f   : > { %v448_v59 = vmul.f32 0.03125, %v437_v55  ;;  %v466_v60 = vadd.f32 %v465_v56, %v464_v52  ;;  %v6074_v55 = vld [vmem:[%s11355_s3 + $0x8] sm:$0xff]   ;;  %v6075_v56 = vld [vmem:[%s11355_s3 + $0x10] sm:$0xff]  }
  0x30   : > { %v449_v61 = vmul.f32 0.03125, %v446_v57  ;;  %v475_v62 = vadd.f32 %v474_v58, %v473_v54  ;;  %v6073_v54 = vld [vmem:[%s11355_s3] sm:$0xff]   ;;  %v6076_v57 = vld [vmem:[%s11355_s3 + $0x18] sm:$0xff]  }
  0x31   : > { %v476_v63 = vmul.f32 0.03125, %v466_v60  ;;  %v478_v0 = vmul.f32 %v448_v59, %v448_v59  ;;  %v486_v13 = vsub.f32 %v7220_v9, %v448_v59  ;;  %v488_v17 = vsub.f32 %v7223_v10, %v448_v59  ;;  %v6077_v58 = vld [vmem:[%s11355_s3 + $0x20] sm:$0xff]  }
  0x32   : > { %v477_v1 = vmul.f32 0.03125, %v475_v62  ;;  %v479_v3 = vmul.f32 %v449_v61, %v449_v61  ;;  %v487_v14 = vsub.f32 %v7226_v11, %v449_v61  ;;  %v489_v18 = vsub.f32 %v7229_v12, %v449_v61 }
  0x33   : > { %v480_v4 = vsub.f32 %v476_v63, %v478_v0  ;;  %v492_v27 = vsub.f32 %v7253_v24, %v448_v59  ;;  %v490_v29 = vsub.f32 %v7238_v16, %v448_v59  ;;  %v493_v30 = vsub.f32 %v7259_v28, %v449_v61  ;;  %v6078_v59 = vld [vmem:[%s11355_s3 + $0x28] sm:$0xff]  }
  0x34   : > { %v481_v5 = vsub.f32 %v477_v1, %v479_v3  ;;  %v491_v9 = vsub.f32 %v7247_v20, %v449_v61 }
  0x35   : > { %v482_v6 = vadd.f32 1e-05, %v480_v4 }
  0x36   : > { %v483_v7 = vadd.f32 1e-05, %v481_v5 }
  0x37   : > { %6091 = vrsqrt.f32 %v482_v6 }
  0x38   : > { %6093 = vrsqrt.f32 %v483_v7 }
  0x41   : > { %v6092_v8 = vpop.eup %6091 }
  0x42   : > { %v6094_v15 = vpop.eup %6093  ;;  %v494_v22 = vmul.f32 %v6092_v8, %v486_v13  ;;  %v496_v25 = vmul.f32 %v6092_v8, %v488_v17  ;;  %v500_v34 = vmul.f32 %v6092_v8, %v492_v27  ;;  %v498_v35 = vmul.f32 %v6092_v8, %v490_v29 }
  0x43   : > { %v495_v23 = vmul.f32 %v6094_v15, %v487_v14  ;;  %v497_v26 = vmul.f32 %v6094_v15, %v489_v18  ;;  %v501_v36 = vmul.f32 %v6094_v15, %v493_v30  ;;  %v499_v37 = vmul.f32 %v6094_v15, %v491_v9 }
  0x97   : > { %v533_v19 = vpop.permute.xlu1 %532  ;;  %v505_v21 = vpop.permute.xlu0 %504 }
  0x98   : > { %v522_v11 = vmul.f32 %v505_v21, %v494_v22  ;;  %v523_v31 = vmul.f32 %v505_v21, %v495_v23 }
  0x9a   : > { %v551_v41 = vadd.f32 %v533_v19, %v523_v31  ;;  %v550_v16 = vadd.f32 %v533_v19, %v522_v11 }
  0x9b   : > { %v538_v32 = vpop.permute.xlu1 %537  ;;  %v510_v10 = vpop.permute.xlu0 %509 }
  0x9c   : > { %v524_v33 = vmul.f32 %v510_v10, %v496_v25  ;;  %v525_v12 = vmul.f32 %v510_v10, %v497_v26 }
  0x9e   : > { %v553_v38 = vadd.f32 %v538_v32, %v525_v12  ;;  %v552_v39 = vadd.f32 %v538_v32, %v524_v33 }
  0x9f   : > { %v520_v40 = vpop.permute.xlu1 %519  ;;  %v515_v24 = vpop.permute.xlu0 %514 }
  0xa0   : > { %v571_v42 = vpack.c.bf16 %v553_v38, %v551_v41  ;;  %v570_v28 = vpack.c.bf16 %v552_v39, %v550_v16  ;;  %v528_v43 = vmul.f32 %v520_v40, %v500_v34  ;;  %v529_v20 = vmul.f32 %v520_v40, %v501_v36 }
  0xa1   : > { %v526_v44 = vmul.f32 %v515_v24, %v498_v35  ;;  %v527_v45 = vmul.f32 %v515_v24, %v499_v37 }
  0xa2   : > { %623 = vmatprep.subr.bf16.mxu0 %v571_v42 }
  0xa3   : > { %v548_v46 = vpop.permute.xlu1 %547  ;;  %v543_v47 = vpop.permute.xlu0 %542  ;;  %624 = vmatpush1.bf16.msra.mxu0 %v570_v28 }
  0xa4   : > { %v556_v48 = vadd.f32 %v548_v46, %v528_v43  ;;  %v557_v49 = vadd.f32 %v548_v46, %v529_v20  ;;  %v554_v50 = vadd.f32 %v543_v47, %v526_v44  ;;  %v555_v51 = vadd.f32 %v543_v47, %v527_v45 }
  0xa6   : > { %v573_v52 = vpack.c.bf16 %v557_v49, %v555_v51  ;;  %v572_v53 = vpack.c.bf16 %v556_v48, %v554_v50 }
  0xa8   : > { %625 = vmatprep.subr.bf16.mxu0 %v573_v52 }
  0xa9   : > { %626 = vmatpush1.bf16.msra.mxu0 %v572_v53 }
  0xac   : > { %5910 = vmatmul.mubr.msk.bf16.vlgmr.msra.gmra.mrb[0].mxu0 %vm604_vm0, %v6073_v54 }
  0xad   : > { %665 = vmatprep.mubr.bf16.mxu0 %v11365_v2 }
  0xb4   : > { %5911 = vmatmul.mubr.msk.bf16.gmra.mrb[4].mxu0 %vm604_vm0, %v6074_v55 }
  0xb5   : > { %675 = vmatprep.mubr.bf16.mxu0 %v11365_v2 }
  0xbc   : > { %5912 = vmatmul.mubr.msk.bf16.gmra.mrb[8].mxu0 %vm604_vm0, %v6075_v56 }
  0xbd   : > { %685 = vmatprep.mubr.bf16.mxu0 %v11365_v2 }
  0xc4   : > { %5913 = vmatmul.mubr.msk.bf16.gmra.mrb[12].mxu0 %vm604_vm0, %v6076_v57 }
  0xc5   : > { %695 = vmatprep.mubr.bf16.mxu0 %v11365_v2 }
  0xcc   : > { %5914 = vmatmul.mubr.msk.bf16.gmra.mrb[16].mxu0 %vm604_vm0, %v6077_v58 }
  0xcd   : > { %705 = vmatprep.mubr.bf16.mxu0 %v11365_v2 }
  0xd4   : > { %5915 = vmatmul.mubr.msk.bf16.gmra.mrb[20].mxu0 %vm604_vm0, %v6078_v59 }
  0xd5   : > { %1139 = vmatprep.mubr.bf16.mxu0 %v11365_v2 }
 0x17f   : > { %v657_v60 = vpop.f32.mrb[0].mxu0 }
 0x180   : > { %v716_v61 = vpack.c.bf16 %v657_v60, %v657_v60  ;;  %v659_v62 = vpop.f32.mrb[1].mxu0 }
 0x181   : > { %v661_v63 = vpop.f32.mrb[2].mxu0  ;;  %v717_v10 = vpack.c.bf16 %v659_v62, %v659_v62 }
 0x182   : > { %v718_v0 = vpack.c.bf16 %v661_v63, %v661_v63  ;;  %740 = vxpose.xlu0.c.b16.start.end [1/1] (short) %v716_v61, 128  ;;  %v663_v1 = vpop.f32.mrb[3].mxu0 }
 0x183   : > { %v719_v33 = vpack.c.bf16 %v663_v1, %v663_v1 }
 0x184   : > { %1021 = vxpose.xlu1.c.b16.start.end [1/1] (short) %v718_v0, 128 }
 0x187   : > { %v667_v3 = vpop.f32.mrb[4].mxu0 }
 0x188   : > { %v669_v4 = vpop.f32.mrb[5].mxu0  ;;  %v720_v12 = vpack.c.bf16 %v667_v3, %v667_v3 }
 0x189   : > { %v671_v5 = vpop.f32.mrb[6].mxu0  ;;  %v721_v35 = vpack.c.bf16 %v669_v4, %v669_v4 }
 0x18a   : > { %v673_v6 = vpop.f32.mrb[7].mxu0  ;;  %v722_v34 = vpack.c.bf16 %v671_v5, %v671_v5 }
 0x18b   : > { %v723_v36 = vpack.c.bf16 %v673_v6, %v673_v6 }
 0x18f   : > { %v677_v7 = vpop.f32.mrb[8].mxu0 }
 0x190   : > { %v724_v8 = vpack.c.bf16 %v677_v7, %v677_v7  ;;  %v679_v13 = vpop.f32.mrb[9].mxu0 }
 0x191   : > { %v725_v14 = vpack.c.bf16 %v679_v13, %v679_v13  ;;  %v681_v15 = vpop.f32.mrb[10].mxu0 }
 0x192   : > { %v726_v17 = vpack.c.bf16 %v681_v15, %v681_v15  ;;  %v683_v18 = vpop.f32.mrb[11].mxu0  ;;  %v823_v19 = vsel %vm821_vm1, %v724_v8, 0 }
 0x193   : > { %v727_v21 = vpack.c.bf16 %v683_v18, %v683_v18  ;;  %5916 = vmatprep.subr.msk.bf16.mxu1 %vm821_vm1, %v725_v14 }
 0x194   : > { %v1102_v22 = vsel %vm821_vm1, %v726_v17, 0  ;;  %829 = vmatpush1.bf16.msra.mxu1 %v823_v19 }
 0x195   : > { %5933 = vmatprep.subr.msk.bf16.mxu0 %vm821_vm1, %v727_v21 }
 0x196   : > { %1108 = vmatpush1.bf16.msra.mxu0 %v1102_v22 }
 0x197   : > { %v687_v23 = vpop.f32.mrb[12].mxu0 }
 0x198   : > { %v728_v25 = vpack.c.bf16 %v687_v23, %v687_v23  ;;  %v689_v26 = vpop.f32.mrb[13].mxu0 }
 0x199   : > { %v729_v27 = vpack.c.bf16 %v689_v26, %v689_v26  ;;  %v691_v29 = vpop.f32.mrb[14].mxu0 }
 0x19a   : > { %v1381_v30 = vsel %vm821_vm1, %v728_v25, 0  ;;  %v730_v9 = vpack.c.bf16 %v691_v29, %v691_v29  ;;  %v693_v11 = vpop.f32.mrb[15].mxu0 }
 0x19b   : > { %v731_v31 = vpack.c.bf16 %v693_v11, %v693_v11  ;;  %5950 = vmatprep.subr.msk.bf16.mxu1 %vm821_vm1, %v729_v27 }
 0x19c   : > { %v1660_v32 = vsel %vm821_vm1, %v730_v9, 0 }
 0x19d   : > { %5967 = vmatprep.subr.msk.bf16.mxu0 %vm821_vm1, %v731_v31 }
 0x19f   : > { %756 = vxpose.xlu0.c.b16.start.end [1/1] (short) %v717_v10, 128  ;;  %v7349_v52 = vpop.f32.mrb[16].mxu0 }
 0x1a0   : > { %11810 = vst [vmem:[#allocation6_spill] sm:$0xff] %v7349_v52  ;;  %v7351_v53 = vpop.f32.mrb[17].mxu0 }
 0x1a1   : > { %1037 = vxpose.xlu1.c.b16.start.end [1/1] (short) %v719_v33, 128  ;;  %v7353_v55 = vpop.f32.mrb[18].mxu0 }
 0x1a2   : > { %11811 = vst [vmem:[#allocation7_spill] sm:$0xff] %v7353_v55  ;;  %v7356_v56 = vpop.f32.mrb[19].mxu0 }
 0x1a7   : > { %v7361_v58 = vpop.f32.mrb[20].mxu0 }
 0x1a8   : > { %11812 = vst [vmem:[#allocation8_spill] sm:$0xff] %v7361_v58  ;;  %v7363_v59 = vpop.f32.mrb[21].mxu0 }
 0x1a9   : > { %11813 = vst [vmem:[#allocation9_spill] sm:$0xff] %v7363_v59  ;;  %v7365_v61 = vpop.f32.mrb[22].mxu0 }
 0x1aa   : > { %11814 = vst [vmem:[#allocation10_spill] sm:$0xff] %v7365_v61  ;;  %v7368_v62 = vpop.f32.mrb[23].mxu0 }
 0x1ab   : > { %11815 = vst [vmem:[#allocation11_spill] sm:$0xff] %v7368_v62 }
 0x1bc   : > { %1300 = vxpose.xlu0.c.b16.start.end [1/1] (short) %v720_v12, 128 }
 0x1be   : > { %1579 = vxpose.xlu1.c.b16.start.end [1/1] (short) %v722_v34, 128 }
 0x1d9   : > { %1316 = vxpose.xlu0.c.b16.start.end [1/1] (short) %v721_v35, 128 }
 0x1db   : > { %1595 = vxpose.xlu1.c.b16.start.end [1/1] (short) %v723_v36, 128 }
 0x1e8   : > { %v748_v37 = vpop.trf.xlu0 }
 0x1e9   : > { %5917 = vmatmul.mubr.msk.bf16.vlgmr.msra.gmra.mrb[0].mxu1 %vm772_vm2, %v748_v37 }
 0x1ea   : > { %v1029_v38 = vpop.trf.xlu1  ;;  %870 = vmatprep.mubr.bf16.mxu1 %v11365_v2  ;;  %1387 = vmatpush1.bf16.msra.mxu1 %v1381_v30 }
 0x1eb   : > { %5934 = vmatmul.mubr.msk.bf16.vlgmr.msra.gmra.mrb[24].mxu0 %vm772_vm2, %v1029_v38 }
 0x1ec   : > { %1149 = vmatprep.mubr.bf16.mxu0 %v11365_v2  ;;  %1666 = vmatpush1.bf16.msra.mxu0 %v1660_v32  ;;  %v749_v39 = vpop.trf.xlu0 }
 0x1ee   : > { %v1030_v40 = vpop.trf.xlu1 }
 0x1f0   : > { %v750_v24 = vpop.trf.xlu0 }
 0x1f1   : > { %5918 = vmatmul.mubr.msk.bf16.gmra.mrb[4].mxu1 %vm772_vm2, %v749_v39 }
 0x1f2   : > { %880 = vmatprep.mubr.bf16.mxu1 %v11365_v2  ;;  %v1031_v41 = vpop.trf.xlu1 }
 0x1f3   : > { %5935 = vmatmul.mubr.msk.bf16.gmra.mrb[28].mxu0 %vm772_vm2, %v1030_v40 }
 0x1f4   : > { %1159 = vmatprep.mubr.bf16.mxu0 %v11365_v2  ;;  %v751_v16 = vpop.trf.xlu0 }
 0x1f6   : > { %v1032_v42 = vpop.trf.xlu1 }
 0x1f8   : > { %v752_v28 = vpop.trf.xlu0 }
 0x1f9   : > { %5919 = vmatmul.mubr.msk.bf16.gmra.mrb[8].mxu1 %vm772_vm2, %v750_v24 }
 0x1fa   : > { %890 = vmatprep.mubr.bf16.mxu1 %v11365_v2  ;;  %v1033_v43 = vpop.trf.xlu1 }
 0x1fb   : > { %5936 = vmatmul.mubr.msk.bf16.gmra.mrb[32].mxu0 %vm772_vm2, %v1031_v41 }
 0x1fc   : > { %1169 = vmatprep.mubr.bf16.mxu0 %v11365_v2  ;;  %v753_v20 = vpop.trf.xlu0 }
 0x1fe   : > { %v1034_v44 = vpop.trf.xlu1 }
 0x200   : > { %v754_v45 = vpop.trf.xlu0 }
 0x201   : > { %5920 = vmatmul.mubr.msk.bf16.gmra.mrb[12].mxu1 %vm772_vm2, %v751_v16 }
 0x202   : > { %900 = vmatprep.mubr.bf16.mxu1 %v11365_v2  ;;  %v1035_v46 = vpop.trf.xlu1 }
 0x203   : > { %5937 = vmatmul.mubr.msk.bf16.gmra.mrb[36].mxu0 %vm772_vm2, %v1032_v42 }
 0x204   : > { %1179 = vmatprep.mubr.bf16.mxu0 %v11365_v2  ;;  %v755_v47 = vpop.trf.xlu0 }
 0x206   : > { %v1036_v48 = vpop.trf.xlu1 }
 0x208   : > { %v764_v49 = vpop.trf.xlu0 }
 0x209   : > { %5921 = vmatmul.mubr.msk.bf16.gmra.mrb[16].mxu1 %vm772_vm2, %v752_v28 }
 0x20a   : > { %910 = vmatprep.mubr.bf16.mxu1 %v11365_v2  ;;  %v1045_v50 = vpop.trf.xlu1 }
 0x20b   : > { %5938 = vmatmul.mubr.msk.bf16.gmra.mrb[40].mxu0 %vm772_vm2, %v1033_v43 }
 0x20c   : > { %1189 = vmatprep.mubr.bf16.mxu0 %v11365_v2  ;;  %v765_v51 = vpop.trf.xlu0 }
 0x20e   : > { %v1046_v54 = vpop.trf.xlu1 }
 0x210   : > { %v766_v57 = vpop.trf.xlu0 }
 0x211   : > { %5922 = vmatmul.mubr.msk.bf16.gmra.mrb[20].mxu1 %vm772_vm2, %v753_v20 }
 0x212   : > { %920 = vmatprep.mubr.bf16.mxu1 %v11365_v2  ;;  %v1047_v60 = vpop.trf.xlu1 }
 0x213   : > { %5939 = vmatmul.mubr.msk.bf16.gmra.mrb[44].mxu0 %vm772_vm2, %v1034_v44 }
 0x214   : > { %1199 = vmatprep.mubr.bf16.mxu0 %v11365_v2  ;;  %v767_v63 = vpop.trf.xlu0 }
 0x216   : > { %v1048_v0 = vpop.trf.xlu1 }
 0x218   : > { %v768_v1 = vpop.trf.xlu0 }
 0x219   : > { %5923 = vmatmul.mubr.msk.bf16.gmra.mrb[24].mxu1 %vm772_vm2, %v754_v45 }
 0x21a   : > { %930 = vmatprep.mubr.bf16.mxu1 %v11365_v2  ;;  %v1049_v3 = vpop.trf.xlu1 }
 0x21b   : > { %5940 = vmatmul.mubr.msk.bf16.gmra.mrb[48].mxu0 %vm772_vm2, %v1035_v46 }
 0x21c   : > { %1209 = vmatprep.mubr.bf16.mxu0 %v11365_v2  ;;  %v769_v4 = vpop.trf.xlu0 }
 0x21e   : > { %v1050_v5 = vpop.trf.xlu1 }
 0x220   : > { %v770_v6 = vpop.trf.xlu0 }
 0x221   : > { %5924 = vmatmul.mubr.msk.bf16.gmra.mrb[28].mxu1 %vm772_vm2, %v755_v47 }
 0x222   : > { %940 = vmatprep.mubr.bf16.mxu1 %v11365_v2  ;;  %v1051_v7 = vpop.trf.xlu1 }
 0x223   : > { %5941 = vmatmul.mubr.msk.bf16.gmra.mrb[52].mxu0 %vm772_vm2, %v1036_v48 }
 0x224   : > { %1219 = vmatprep.mubr.bf16.mxu0 %v11365_v2  ;;  %v771_v8 = vpop.trf.xlu0 }
 0x226   : > { %v1052_v13 = vpop.trf.xlu1 }
 0x228   : > { %v1308_v14 = vpop.trf.xlu0 }
 0x229   : > { %5925 = vmatmul.mubr.msk.bf16.gmra.mrb[32].mxu1 %vm772_vm2, %v764_v49 }
 0x22a   : > { %950 = vmatprep.mubr.bf16.mxu1 %v11365_v2  ;;  %v1587_v15 = vpop.trf.xlu1 }
 0x22b   : > { %5942 = vmatmul.mubr.msk.bf16.gmra.mrb[56].mxu0 %vm772_vm2, %v1045_v50 }
 0x22c   : > { %1229 = vmatprep.mubr.bf16.mxu0 %v11365_v2  ;;  %v1309_v17 = vpop.trf.xlu0 }
 0x22e   : > { %v1588_v18 = vpop.trf.xlu1 }
 0x230   : > { %v1310_v19 = vpop.trf.xlu0 }
 0x231   : > { %5926 = vmatmul.mubr.msk.bf16.gmra.mrb[36].mxu1 %vm772_vm2, %v765_v51 }
 0x232   : > { %960 = vmatprep.mubr.bf16.mxu1 %v11365_v2  ;;  %v1589_v21 = vpop.trf.xlu1 }
 0x233   : > { %5943 = vmatmul.mubr.msk.bf16.gmra.mrb[60].mxu0 %vm772_vm2, %v1046_v54 }
 0x234   : > { %1239 = vmatprep.mubr.bf16.mxu0 %v11365_v2  ;;  %v1311_v22 = vpop.trf.xlu0 }
 0x236   : > { %v1590_v23 = vpop.trf.xlu1 }
 0x238   : > { %v1312_v25 = vpop.trf.xlu0 }
 0x239   : > { %5927 = vmatmul.mubr.msk.bf16.gmra.mrb[40].mxu1 %vm772_vm2, %v766_v57 }
 0x23a   : > { %970 = vmatprep.mubr.bf16.mxu1 %v11365_v2  ;;  %v1591_v26 = vpop.trf.xlu1 }
 0x23b   : > { %5944 = vmatmul.mubr.msk.bf16.gmra.mrb[64].mxu0 %vm772_vm2, %v1047_v60 }
 0x23c   : > { %1249 = vmatprep.mubr.bf16.mxu0 %v11365_v2  ;;  %v1313_v27 = vpop.trf.xlu0 }
 0x23e   : > { %v1592_v29 = vpop.trf.xlu1 }
 0x240   : > { %v1314_v30 = vpop.trf.xlu0 }
 0x241   : > { %5928 = vmatmul.mubr.msk.bf16.gmra.mrb[44].mxu1 %vm772_vm2, %v767_v63 }
 0x242   : > { %980 = vmatprep.mubr.bf16.mxu1 %v11365_v2  ;;  %v1593_v9 = vpop.trf.xlu1 }
 0x243   : > { %5945 = vmatmul.mubr.msk.bf16.gmra.mrb[68].mxu0 %vm772_vm2, %v1048_v0 }
 0x244   : > { %1259 = vmatprep.mubr.bf16.mxu0 %v11365_v2  ;;  %v1315_v11 = vpop.trf.xlu0 }
 0x246   : > { %v1594_v31 = vpop.trf.xlu1 }
 0x248   : > { %v1324_v32 = vpop.trf.xlu0 }
 0x249   : > { %5929 = vmatmul.mubr.msk.bf16.gmra.mrb[48].mxu1 %vm772_vm2, %v768_v1 }
 0x24a   : > { %990 = vmatprep.mubr.bf16.mxu1 %v11365_v2  ;;  %v1603_v10 = vpop.trf.xlu1 }
 0x24b   : > { %5946 = vmatmul.mubr.msk.bf16.gmra.mrb[72].mxu0 %vm772_vm2, %v1049_v3 }
 0x24c   : > { %1269 = vmatprep.mubr.bf16.mxu0 %v11365_v2  ;;  %v1325_v33 = vpop.trf.xlu0 }
 0x24e   : > { %v1604_v12 = vpop.trf.xlu1 }
 0x250   : > { %v1326_v34 = vpop.trf.xlu0 }
 0x251   : > { %5930 = vmatmul.mubr.msk.bf16.gmra.mrb[52].mxu1 %vm772_vm2, %v769_v4 }
 0x252   : > { %1000 = vmatprep.mubr.bf16.mxu1 %v11365_v2  ;;  %v1605_v35 = vpop.trf.xlu1 }
 0x253   : > { %5947 = vmatmul.mubr.msk.bf16.gmra.mrb[76].mxu0 %vm772_vm2, %v1050_v5 }
 0x254   : > { %1279 = vmatprep.mubr.bf16.mxu0 %v11365_v2  ;;  %v1327_v39 = vpop.trf.xlu0 }
 0x256   : > { %v1606_v46 = vpop.trf.xlu1 }
 0x258   : > { %v1328_v0 = vpop.trf.xlu0 }
 0x259   : > { %5931 = vmatmul.mubr.msk.bf16.gmra.mrb[56].mxu1 %vm772_vm2, %v770_v6 }
 0x25a   : > { %1010 = vmatprep.mubr.bf16.mxu1 %v11365_v2 }
 0x25b   : > { %5948 = vmatmul.mubr.msk.bf16.gmra.mrb[80].mxu0 %vm772_vm2, %v1051_v7 }
 0x25c   : > { %1289 = vmatprep.mubr.bf16.mxu0 %v11365_v2 }
 0x261   : > { %5932 = vmatmul.mubr.msk.bf16.gmra.mrb[60].mxu1 %vm772_vm2, %v771_v8 }
 0x262   : > { %1418 = vmatprep.mubr.bf16.mxu1 %v11365_v2 }
 0x263   : > { %5949 = vmatmul.mubr.msk.bf16.gmra.mrb[84].mxu0 %vm772_vm2, %v1052_v13 }
 0x264   : > { %1697 = vmatprep.mubr.bf16.mxu0 %v11365_v2 }
 0x269   : > { %5951 = vmatmul.mubr.msk.bf16.vlgmr.msra.gmra.mrb[64].mxu1 %vm772_vm2, %v1308_v14 }
 0x26a   : > { %1428 = vmatprep.mubr.bf16.mxu1 %v11365_v2 }
 0x26b   : > { %5968 = vmatmul.mubr.msk.bf16.vlgmr.msra.gmra.mrb[88].mxu0 %vm772_vm2, %v1587_v15 }
 0x26c   : > { %1707 = vmatprep.mubr.bf16.mxu0 %v11365_v2 }
 0x271   : > { %5952 = vmatmul.mubr.msk.bf16.gmra.mrb[68].mxu1 %vm772_vm2, %v1309_v17  ;;  %v1607_v17 = vpop.trf.xlu1 }
 0x272   : > { %1438 = vmatprep.mubr.bf16.mxu1 %v11365_v2 }
 0x273   : > { %5969 = vmatmul.mubr.msk.bf16.gmra.mrb[92].mxu0 %vm772_vm2, %v1588_v18 }
 0x274   : > { %1717 = vmatprep.mubr.bf16.mxu0 %v11365_v2 }
 0x279   : > { %5953 = vmatmul.mubr.msk.bf16.gmra.mrb[72].mxu1 %vm772_vm2, %v1310_v19 }
 0x27a   : > { %1448 = vmatprep.mubr.bf16.mxu1 %v11365_v2 }
 0x27b   : > { %5970 = vmatmul.mubr.msk.bf16.gmra.mrb[96].mxu0 %vm772_vm2, %v1589_v21 }
 0x27c   : > { %1727 = vmatprep.mubr.bf16.mxu0 %v11365_v2 }
 0x281   : > { %5954 = vmatmul.mubr.msk.bf16.gmra.mrb[76].mxu1 %vm772_vm2, %v1311_v22 }
 0x282   : > { %1458 = vmatprep.mubr.bf16.mxu1 %v11365_v2 }
 0x283   : > { %5971 = vmatmul.mubr.msk.bf16.gmra.mrb[100].mxu0 %vm772_vm2, %v1590_v23 }
 0x284   : > { %1737 = vmatprep.mubr.bf16.mxu0 %v11365_v2 }
 0x289   : > { %5955 = vmatmul.mubr.msk.bf16.gmra.mrb[80].mxu1 %vm772_vm2, %v1312_v25 }
 0x28a   : > { %1468 = vmatprep.mubr.bf16.mxu1 %v11365_v2 }
 0x28b   : > { %5972 = vmatmul.mubr.msk.bf16.gmra.mrb[104].mxu0 %vm772_vm2, %v1591_v26 }
 0x28c   : > { %1747 = vmatprep.mubr.bf16.mxu0 %v11365_v2 }
 0x291   : > { %5956 = vmatmul.mubr.msk.bf16.gmra.mrb[84].mxu1 %vm772_vm2, %v1313_v27 }
 0x292   : > { %1478 = vmatprep.mubr.bf16.mxu1 %v11365_v2 }
 0x293   : > { %5973 = vmatmul.mubr.msk.bf16.gmra.mrb[108].mxu0 %vm772_vm2, %v1592_v29 }
 0x294   : > { %1757 = vmatprep.mubr.bf16.mxu0 %v11365_v2 }
 0x299   : > { %5957 = vmatmul.mubr.msk.bf16.gmra.mrb[88].mxu1 %vm772_vm2, %v1314_v30 }
 0x29a   : > { %1488 = vmatprep.mubr.bf16.mxu1 %v11365_v2 }
 0x29b   : > { %5974 = vmatmul.mubr.msk.bf16.gmra.mrb[112].mxu0 %vm772_vm2, %v1593_v9  ;;  %v1329_v9 = vpop.trf.xlu0 }
 0x29c   : > { %1767 = vmatprep.mubr.bf16.mxu0 %v11365_v2 }
 0x2a1   : > { %5958 = vmatmul.mubr.msk.bf16.gmra.mrb[92].mxu1 %vm772_vm2, %v1315_v11 }
 0x2a2   : > { %1498 = vmatprep.mubr.bf16.mxu1 %v11365_v2 }
 0x2a3   : > { %5975 = vmatmul.mubr.msk.bf16.gmra.mrb[116].mxu0 %vm772_vm2, %v1594_v31 }
 0x2a4   : > { %1777 = vmatprep.mubr.bf16.mxu0 %v11365_v2 }
 0x2a9   : > { %5959 = vmatmul.mubr.msk.bf16.gmra.mrb[96].mxu1 %vm772_vm2, %v1324_v32 }
 0x2aa   : > { %1508 = vmatprep.mubr.bf16.mxu1 %v11365_v2 }
 0x2ab   : > { %5976 = vmatmul.mubr.msk.bf16.gmra.mrb[120].mxu0 %vm772_vm2, %v1603_v10 }
 0x2ac   : > { %1787 = vmatprep.mubr.bf16.mxu0 %v11365_v2 }
 0x2b1   : > { %5960 = vmatmul.mubr.msk.bf16.gmra.mrb[100].mxu1 %vm772_vm2, %v1325_v33 }
 0x2b2   : > { %1518 = vmatprep.mubr.bf16.mxu1 %v11365_v2 }
 0x2b3   : > { %5977 = vmatmul.mubr.msk.bf16.gmra.mrb[124].mxu0 %vm772_vm2, %v1604_v12 }
 0x2b4   : > { %1797 = vmatprep.mubr.bf16.mxu0 %v11365_v2 }
 0x2b9   : > { %5961 = vmatmul.mubr.msk.bf16.gmra.mrb[104].mxu1 %vm772_vm2, %v1326_v34 }
 0x2ba   : > { %1528 = vmatprep.mubr.bf16.mxu1 %v11365_v2 }
 0x2bb   : > { %5978 = vmatmul.mubr.msk.bf16.gmra.mrb[128].mxu0 %vm772_vm2, %v1605_v35 }
 0x2bc   : > { %v862_v36 = vpop.f32.mrb[0].mxu1  ;;  %1807 = vmatprep.mubr.bf16.mxu0 %v11365_v2 }
 0x2bd   : > { %v7437_v37 = vmul.f32 0.35355338, %v862_v36  ;;  %v864_v38 = vpop.f32.mrb[1].mxu1 }
 0x2be   : > { %v7439_v40 = vmul.f32 0.35355338, %v864_v38  ;;  %v866_v24 = vpop.f32.mrb[2].mxu1  ;;  %v1141_v41 = vpop.f32.mrb[24].mxu0 }
 0x2bf   : > { %v7441_v16 = vmul.f32 0.35355338, %v866_v24  ;;  %v7443_v42 = vmul.f32 0.35355338, %v1141_v41  ;;  %v868_v28 = vpop.f32.mrb[3].mxu1  ;;  %v1143_v43 = vpop.f32.mrb[25].mxu0 }
 0x2c0   : > { %v7445_v20 = vmul.f32 0.35355338, %v868_v28  ;;  %v7447_v44 = vmul.f32 0.35355338, %v1143_v43  ;;  %v1145_v45 = vpop.f32.mrb[26].mxu0  ;;  %v2114_v47 = vmax.f32 %v7437_v37, %v7439_v40 }
 0x2c1   : > { %v1147_v48 = vpop.f32.mrb[27].mxu0  ;;  %5962 = vmatmul.mubr.msk.bf16.gmra.mrb[108].mxu1 %vm772_vm2, %v1327_v39  ;;  %v7458_v51 = vmul.f32 0.35355338, %v1145_v45  ;;  %v1608_v39 = vpop.trf.xlu1 }
 0x2c2   : > { %2115 = vmax.xlane.f32.xlu0 %v2114_v47  ;;  %v2117_v49 = vmax.f32 %v7441_v16, %v7445_v20  ;;  %v2210_v50 = vmax.f32 %v7443_v42, %v7447_v44  ;;  %1538 = vmatprep.mubr.bf16.mxu1 %v11365_v2  ;;  %v7460_v54 = vmul.f32 0.35355338, %v1147_v48 }
 0x2c3   : > { %5979 = vmatmul.mubr.msk.bf16.gmra.mrb[132].mxu0 %vm772_vm2, %v1606_v46 }
 0x2c4   : > { %2118 = vmax.xlane.f32.xlu1 %v2117_v49  ;;  %v872_v57 = vpop.f32.mrb[4].mxu1  ;;  %1817 = vmatprep.mubr.bf16.mxu0 %v11365_v2  ;;  %v2213_v19 = vmax.f32 %v7458_v51, %v7460_v54 }
 0x2c5   : > { %v7463_v60 = vmul.f32 0.35355338, %v872_v57  ;;  %v874_v63 = vpop.f32.mrb[5].mxu1  ;;  %v1330_v57 = vpop.trf.xlu0 }
 0x2c6   : > { %v7465_v1 = vmul.f32 0.35355338, %v874_v63  ;;  %v876_v3 = vpop.f32.mrb[6].mxu1  ;;  %2211 = vmax.xlane.f32.xlu0 %v2210_v50  ;;  %v1151_v4 = vpop.f32.mrb[28].mxu0 }
 0x2c7   : > { %v7467_v5 = vmul.f32 0.35355338, %v876_v3  ;;  %v878_v6 = vpop.f32.mrb[7].mxu1  ;;  %v7469_v7 = vmul.f32 0.35355338, %v1151_v4  ;;  %v1153_v8 = vpop.f32.mrb[29].mxu0 }
 0x2c8   : > { %v7471_v13 = vmul.f32 0.35355338, %v878_v6  ;;  %v7473_v14 = vmul.f32 0.35355338, %v1153_v8  ;;  %v1155_v15 = vpop.f32.mrb[30].mxu0  ;;  %v2120_v18 = vmax.f32 %v7463_v60, %v7465_v1 }
 0x2c9   : > { %5963 = vmatmul.mubr.msk.bf16.gmra.mrb[112].mxu1 %vm772_vm2, %v1328_v0  ;;  %v1157_v21 = vpop.f32.mrb[31].mxu0  ;;  %v7484_v23 = vmul.f32 0.35355338, %v1155_v15 }
 0x2ca   : > { %2121 = vmax.xlane.f32.xlu1 %v2120_v18  ;;  %2214 = vmax.xlane.f32.xlu0 %v2213_v19  ;;  %v2216_v22 = vmax.f32 %v7469_v7, %v7473_v14  ;;  %v7486_v25 = vmul.f32 0.35355338, %v1157_v21  ;;  %v2123_v27 = vmax.f32 %v7467_v5, %v7471_v13  ;;  %v1609_v21 = vpop.trf.xlu1 }
 0x2cb   : > { %5980 = vmatmul.mubr.msk.bf16.gmra.mrb[136].mxu0 %vm772_vm2, %v1607_v17  ;;  %1548 = vmatprep.mubr.bf16.mxu1 %v11365_v2 }
 0x2cc   : > { %v882_v26 = vpop.f32.mrb[8].mxu1  ;;  %1827 = vmatprep.mubr.bf16.mxu0 %v11365_v2  ;;  %v2219_v41 = vmax.f32 %v7484_v23, %v7486_v25 }
 0x2cd   : > { %v7491_v29 = vmul.f32 0.35355338, %v882_v26  ;;  %v884_v30 = vpop.f32.mrb[9].mxu1 }
 0x2ce   : > { %v7493_v11 = vmul.f32 0.35355338, %v884_v30  ;;  %v886_v31 = vpop.f32.mrb[10].mxu1  ;;  %2124 = vmax.xlane.f32.xlu0 %v2123_v27  ;;  %2217 = vmax.xlane.f32.xlu1 %v2216_v22  ;;  %v1161_v32 = vpop.f32.mrb[32].mxu0 }
 0x2cf   : > { %v7495_v10 = vmul.f32 0.35355338, %v886_v31  ;;  %v888_v33 = vpop.f32.mrb[11].mxu1  ;;  %v7497_v12 = vmul.f32 0.35355338, %v1161_v32  ;;  %v1163_v34 = vpop.f32.mrb[33].mxu0 }
 0x2d0   : > { %v7499_v35 = vmul.f32 0.35355338, %v888_v33  ;;  %v7501_v36 = vmul.f32 0.35355338, %v1163_v34  ;;  %v1165_v38 = vpop.f32.mrb[34].mxu0  ;;  %v2126_v24 = vmax.f32 %v7491_v29, %v7493_v11 }
 0x2d1   : > { %5964 = vmatmul.mubr.msk.bf16.gmra.mrb[116].mxu1 %vm772_vm2, %v1329_v9  ;;  %v1167_v28 = vpop.f32.mrb[35].mxu0  ;;  %v7512_v45 = vmul.f32 0.35355338, %v1165_v38 }
 0x2d2   : > { %2127 = vmax.xlane.f32.xlu1 %v2126_v24  ;;  %2220 = vmax.xlane.f32.xlu0 %v2219_v41  ;;  %v2222_v43 = vmax.f32 %v7497_v12, %v7501_v36  ;;  %v7514_v46 = vmul.f32 0.35355338, %v1167_v28  ;;  %v2129_v48 = vmax.f32 %v7495_v10, %v7499_v35 }
 0x2d3   : > { %5981 = vmatmul.mubr.msk.bf16.gmra.mrb[140].mxu0 %vm772_vm2, %v1608_v39  ;;  %1558 = vmatprep.mubr.bf16.mxu1 %v11365_v2  ;;  %v1331_v39 = vpop.trf.xlu0 }
 0x2d4   : > { %v892_v47 = vpop.f32.mrb[12].mxu1  ;;  %1837 = vmatprep.mubr.bf16.mxu0 %v11365_v2  ;;  %v2225_v26 = vmax.f32 %v7512_v45, %v7514_v46 }
 0x2d5   : > { %v7519_v49 = vmul.f32 0.35355338, %v892_v47  ;;  %v894_v50 = vpop.f32.mrb[13].mxu1 }
 0x2d6   : > { %v7521_v63 = vmul.f32 0.35355338, %v894_v50  ;;  %v896_v0 = vpop.f32.mrb[14].mxu1  ;;  %2130 = vmax.xlane.f32.xlu0 %v2129_v48  ;;  %2223 = vmax.xlane.f32.xlu1 %v2222_v43  ;;  %v1171_v3 = vpop.f32.mrb[36].mxu0  ;;  %v733_v50 = vpack.c.bf16 %v7351_v53, %v7351_v53  ;;  %v735_v53 = vpack.c.bf16 %v7356_v56, %v7356_v56 }
 0x2d7   : > { %v7523_v4 = vmul.f32 0.35355338, %v896_v0  ;;  %v898_v6 = vpop.f32.mrb[15].mxu1  ;;  %v7525_v8 = vmul.f32 0.35355338, %v1171_v3  ;;  %v1173_v15 = vpop.f32.mrb[37].mxu0 }
 0x2d8   : > { %v7527_v17 = vmul.f32 0.35355338, %v898_v6  ;;  %v7529_v18 = vmul.f32 0.35355338, %v1173_v15  ;;  %v1175_v19 = vpop.f32.mrb[38].mxu0  ;;  %v2132_v22 = vmax.f32 %v7519_v49, %v7521_v63  ;;  %v1610_v3 = vpop.trf.xlu1 }
 0x2d9   : > { %5965 = vmatmul.mubr.msk.bf16.gmra.mrb[120].mxu1 %vm772_vm2, %v1330_v57  ;;  %v1177_v27 = vpop.f32.mrb[39].mxu0  ;;  %v7540_v9 = vmul.f32 0.35355338, %v1175_v19 }
 0x2da   : > { %2133 = vmax.xlane.f32.xlu1 %v2132_v22  ;;  %2226 = vmax.xlane.f32.xlu0 %v2225_v26  ;;  %v2228_v30 = vmax.f32 %v7525_v8, %v7529_v18  ;;  %v2135_v32 = vmax.f32 %v7523_v4, %v7527_v17  ;;  %v7545_v33 = vmul.f32 0.35355338, %v1177_v27 }
 0x2db   : > { %5982 = vmatmul.mubr.msk.bf16.gmra.mrb[144].mxu0 %vm772_vm2, %v1609_v21  ;;  %1568 = vmatprep.mubr.bf16.mxu1 %v11365_v2 }
 0x2dc   : > { %v902_v31 = vpop.f32.mrb[16].mxu1  ;;  %1847 = vmatprep.mubr.bf16.mxu0 %v11365_v2  ;;  %v2231_v21 = vmax.f32 %v7540_v9, %v7545_v33 }
 0x2dd   : > { %v7547_v34 = vmul.f32 0.35355338, %v902_v31  ;;  %v904_v38 = vpop.f32.mrb[17].mxu1 }
 0x2de   : > { %v7549_v24 = vmul.f32 0.35355338, %v904_v38  ;;  %v906_v41 = vpop.f32.mrb[18].mxu1  ;;  %2136 = vmax.xlane.f32.xlu0 %v2135_v32  ;;  %2229 = vmax.xlane.f32.xlu1 %v2228_v30  ;;  %v1181_v28 = vpop.f32.mrb[40].mxu0 }
 0x2df   : > { %v908_v43 = vpop.f32.mrb[19].mxu1  ;;  %v7551_v47 = vmul.f32 0.35355338, %v1181_v28  ;;  %v1183_v48 = vpop.f32.mrb[41].mxu0  ;;  %v7559_v15 = vmul.f32 0.35355338, %v906_v41 }
 0x2e0   : > { %v7555_v57 = vmul.f32 0.35355338, %v1183_v48  ;;  %v1185_v0 = vpop.f32.mrb[42].mxu0  ;;  %v2138_v6 = vmax.f32 %v7547_v34, %v7549_v24  ;;  %v7561_v19 = vmul.f32 0.35355338, %v908_v43 }
 0x2e1   : > { %5966 = vmatmul.mubr.msk.bf16.gmra.mrb[124].mxu1 %vm772_vm2, %v1331_v39  ;;  %v1187_v22 = vpop.f32.mrb[43].mxu0  ;;  %v7571_v27 = vmul.f32 0.35355338, %v1185_v0 }
 0x2e2   : > { %4194 = vmatprep.mubr.bf16.mxu1 %v733_v50  ;;  %2139 = vmax.xlane.f32.xlu1 %v2138_v6  ;;  %v2234_v26 = vmax.f32 %v7551_v47, %v7555_v57  ;;  %v7573_v31 = vmul.f32 0.35355338, %v1187_v22  ;;  %v2141_v56 = vmax.f32 %v7559_v15, %v7561_v19 }
 0x2e3   : > { %2232 = vmax.xlane.f32.xlu0 %v2231_v21  ;;  %5983 = vmatmul.mubr.msk.bf16.gmra.mrb[148].mxu0 %vm772_vm2, %v1610_v3 }
 0x2e4   : > { %v912_v30 = vpop.f32.mrb[20].mxu1  ;;  %4235 = vmatprep.mubr.bf16.mxu0 %v735_v53  ;;  %v2237_v53 = vmax.f32 %v7571_v27, %v7573_v31 }
 0x2e5   : > { %v7575_v32 = vmul.f32 0.35355338, %v912_v30  ;;  %v914_v38 = vpop.f32.mrb[21].mxu1 }
 0x2e6   : > { %v7579_v39 = vmul.f32 0.35355338, %v914_v38  ;;  %v916_v41 = vpop.f32.mrb[22].mxu1  ;;  %2235 = vmax.xlane.f32.xlu1 %v2234_v26  ;;  %v1191_v28 = vpop.f32.mrb[44].mxu0 }
 0x2e7   : > { %2142 = vmax.xlane.f32.xlu0 %v2141_v56  ;;  %v918_v43 = vpop.f32.mrb[23].mxu1  ;;  %v7581_v48 = vmul.f32 0.35355338, %v1191_v28  ;;  %v1193_v50 = vpop.f32.mrb[45].mxu0  ;;  %v7587_v21 = vmul.f32 0.35355338, %v916_v41 }
 0x2e8   : > { %v7583_v0 = vmul.f32 0.35355338, %v1193_v50  ;;  %v1195_v3 = vpop.f32.mrb[46].mxu0  ;;  %v2144_v6 = vmax.f32 %v7575_v32, %v7579_v39  ;;  %v7589_v22 = vmul.f32 0.35355338, %v918_v43 }
 0x2e9   : > { %11816 = vst [vmem:[#allocation12_spill] sm:$0xff] %v7581_v48  ;;  %v1197_v26 = vpop.f32.mrb[47].mxu0  ;;  %v7595_v38 = vmul.f32 0.35355338, %v1195_v3 }
 0x2ea   : > { %11817 = vst [vmem:[#allocation13_spill] sm:$0xff] %v7583_v0  ;;  %2145 = vmax.xlane.f32.xlu1 %v2144_v6  ;;  %v2240_v30 = vmax.f32 %v7581_v48, %v7583_v0  ;;  %v7597_v28 = vmul.f32 0.35355338, %v1197_v26  ;;  %v2147_v43 = vmax.f32 %v7587_v21, %v7589_v22 }
 0x2eb   : > { %2238 = vmax.xlane.f32.xlu0 %v2237_v53  ;;  %11818 = vst [vmem:[#allocation14_spill] sm:$0xff] %v7595_v38 }
 0x2ec   : > { %v922_v56 = vpop.f32.mrb[24].mxu1  ;;  %11819 = vst [vmem:[#allocation15_spill] sm:$0xff] %v7597_v28 }
 0x2ed   : > { %v7599_v50 = vmul.f32 0.35355338, %v922_v56  ;;  %v924_v41 = vpop.f32.mrb[25].mxu1 }
 0x2ee   : > { %v7603_v2 = vmul.f32 0.35355338, %v924_v41  ;;  %v926_v61 = vpop.f32.mrb[26].mxu1  ;;  %2241 = vmax.xlane.f32.xlu1 %v2240_v30  ;;  %v1201_v6 = vpop.f32.mrb[48].mxu0  ;;  %v2243_v41 = vmax.f32 %v7595_v38, %v7597_v28 }
 0x2ef   : > { %11820 = vst [vmem:[#allocation16_spill] sm:$0xff] %v7599_v50  ;;  %2148 = vmax.xlane.f32.xlu0 %v2147_v43  ;;  %v928_v58 = vpop.f32.mrb[27].mxu1  ;;  %v7605_v62 = vmul.f32 0.35355338, %v1201_v6  ;;  %v1203_v3 = vpop.f32.mrb[49].mxu0 }
 0x2f0   : > { %11821 = vst [vmem:[#allocation17_spill] sm:$0xff] %v7603_v2  ;;  %v7607_v53 = vmul.f32 0.35355338, %v1203_v3  ;;  %v1205_v26 = vpop.f32.mrb[50].mxu0  ;;  %v2150_v56 = vmax.f32 %v7599_v50, %v7603_v2  ;;  %v7611_v55 = vmul.f32 0.35355338, %v926_v61 }
 0x2f1   : > { %11822 = vst [vmem:[#allocation18_spill] sm:$0xff] %v7605_v62  ;;  %v7613_v59 = vmul.f32 0.35355338, %v928_v58  ;;  %v1207_v30 = vpop.f32.mrb[51].mxu0  ;;  %v7619_v6 = vmul.f32 0.35355338, %v1205_v26 }
 0x2f2   : > { %11823 = vst [vmem:[#allocation19_spill] sm:$0xff] %v7607_v53  ;;  %11824 = vst [vmem:[#allocation20_spill] sm:$0xff] %v7611_v55  ;;  %2151 = vmax.xlane.f32.xlu1 %v2150_v56  ;;  %v2246_v43 = vmax.f32 %v7605_v62, %v7607_v53  ;;  %v7623_v2 = vmul.f32 0.35355338, %v1207_v30 }
 0x2f3   : > { %11825 = vst [vmem:[#allocation21_spill] sm:$0xff] %v7613_v59  ;;  %2244 = vmax.xlane.f32.xlu0 %v2243_v41  ;;  %11826 = vst [vmem:[#allocation22_spill] sm:$0xff] %v7619_v6  ;;  %v2153_v52 = vmax.f32 %v7611_v55, %v7613_v59 }
 0x2f4   : > { %v932_v3 = vpop.f32.mrb[28].mxu1  ;;  %11827 = vst [vmem:[#allocation23_spill] sm:$0xff] %v7623_v2 }
 0x2f5   : > { %v7625_v61 = vmul.f32 0.35355338, %v932_v3  ;;  %v934_v58 = vpop.f32.mrb[29].mxu1  ;;  %v2249_v3 = vmax.f32 %v7619_v6, %v7623_v2 }
 0x2f6   : > { %v7627_v50 = vmul.f32 0.35355338, %v934_v58  ;;  %v936_v28 = vpop.f32.mrb[30].mxu1  ;;  %2247 = vmax.xlane.f32.xlu1 %v2246_v43  ;;  %v1211_v56 = vpop.f32.mrb[52].mxu0 }
 0x2f7   : > { %11828 = vst [vmem:[#allocation24_spill] sm:$0xff] %v7625_v61  ;;  %2154 = vmax.xlane.f32.xlu0 %v2153_v52  ;;  %v938_v38 = vpop.f32.mrb[31].mxu1  ;;  %v7629_v53 = vmul.f32 0.35355338, %v1211_v56  ;;  %v1213_v26 = vpop.f32.mrb[53].mxu0 }
 0x2f8   : > { %11829 = vst [vmem:[#allocation25_spill] sm:$0xff] %v7627_v50  ;;  %v2156_v41 = vmax.f32 %v7625_v61, %v7627_v50  ;;  %v7633_v62 = vmul.f32 0.35355338, %v1213_v26  ;;  %v1215_v30 = vpop.f32.mrb[54].mxu0  ;;  %v7637_v59 = vmul.f32 0.35355338, %v936_v28 }
 0x2f9   : > { %11830 = vst [vmem:[#allocation26_spill] sm:$0xff] %v7629_v53  ;;  %v7639_v58 = vmul.f32 0.35355338, %v938_v38  ;;  %v1217_v43 = vpop.f32.mrb[55].mxu0  ;;  %v7643_v56 = vmul.f32 0.35355338, %v1215_v30 }
 0x2fa   : > { %11831 = vst [vmem:[#allocation27_spill] sm:$0xff] %v7633_v62  ;;  %11832 = vst [vmem:[#allocation28_spill] sm:$0xff] %v7637_v59  ;;  %v2252_v52 = vmax.f32 %v7629_v53, %v7633_v62  ;;  %2157 = vmax.xlane.f32.xlu1 %v2156_v41  ;;  %v7647_v50 = vmul.f32 0.35355338, %v1217_v43 }
 0x2fb   : > { %11833 = vst [vmem:[#allocation29_spill] sm:$0xff] %v7639_v58  ;;  %2250 = vmax.xlane.f32.xlu0 %v2249_v3  ;;  %11834 = vst [vmem:[#allocation30_spill] sm:$0xff] %v7643_v56  ;;  %v2159_v26 = vmax.f32 %v7637_v59, %v7639_v58 }
 0x2fc   : > { %v942_v55 = vpop.f32.mrb[32].mxu1  ;;  %11835 = vst [vmem:[#allocation31_spill] sm:$0xff] %v7647_v50 }
 0x2fd   : > { %v7649_v61 = vmul.f32 0.35355338, %v942_v55  ;;  %v944_v28 = vpop.f32.mrb[33].mxu1  ;;  %v2255_v55 = vmax.f32 %v7643_v56, %v7647_v50 }
 0x2fe   : > { %v7651_v2 = vmul.f32 0.35355338, %v944_v28  ;;  %v946_v38 = vpop.f32.mrb[34].mxu1  ;;  %2253 = vmax.xlane.f32.xlu1 %v2252_v52  ;;  %v1221_v6 = vpop.f32.mrb[56].mxu0 }
 0x2ff   : > { %11836 = vst [vmem:[#allocation32_spill] sm:$0xff] %v7649_v61  ;;  %2160 = vmax.xlane.f32.xlu0 %v2159_v26  ;;  %v948_v62 = vpop.f32.mrb[35].mxu1  ;;  %v7653_v41 = vmul.f32 0.35355338, %v1221_v6  ;;  %v1223_v30 = vpop.f32.mrb[57].mxu0 }
 0x300   : > { %11837 = vst [vmem:[#allocation33_spill] sm:$0xff] %v7651_v2  ;;  %v2162_v3 = vmax.f32 %v7649_v61, %v7651_v2  ;;  %v7657_v53 = vmul.f32 0.35355338, %v1223_v30  ;;  %v1225_v43 = vpop.f32.mrb[58].mxu0  ;;  %v7661_v58 = vmul.f32 0.35355338, %v946_v38 }
 0x301   : > { %11838 = vst [vmem:[#allocation34_spill] sm:$0xff] %v7653_v41  ;;  %v7663_v28 = vmul.f32 0.35355338, %v948_v62  ;;  %v1227_v52 = vpop.f32.mrb[59].mxu0  ;;  %v7667_v6 = vmul.f32 0.35355338, %v1225_v43 }
 0x302   : > { %11839 = vst [vmem:[#allocation35_spill] sm:$0xff] %v7657_v53  ;;  %11840 = vst [vmem:[#allocation36_spill] sm:$0xff] %v7661_v58  ;;  %v2258_v26 = vmax.f32 %v7653_v41, %v7657_v53  ;;  %2163 = vmax.xlane.f32.xlu1 %v2162_v3  ;;  %v7671_v2 = vmul.f32 0.35355338, %v1227_v52 }
 0x303   : > { %11841 = vst [vmem:[#allocation37_spill] sm:$0xff] %v7663_v28  ;;  %2256 = vmax.xlane.f32.xlu0 %v2255_v55  ;;  %11842 = vst [vmem:[#allocation38_spill] sm:$0xff] %v7667_v6  ;;  %v2165_v30 = vmax.f32 %v7661_v58, %v7663_v28 }
 0x304   : > { %v952_v59 = vpop.f32.mrb[36].mxu1  ;;  %11843 = vst [vmem:[#allocation39_spill] sm:$0xff] %v7671_v2 }
 0x305   : > { %v7673_v61 = vmul.f32 0.35355338, %v952_v59  ;;  %v954_v38 = vpop.f32.mrb[37].mxu1  ;;  %v2261_v59 = vmax.f32 %v7667_v6, %v7671_v2 }
 0x306   : > { %v7675_v50 = vmul.f32 0.35355338, %v954_v38  ;;  %v956_v62 = vpop.f32.mrb[38].mxu1  ;;  %2259 = vmax.xlane.f32.xlu1 %v2258_v26  ;;  %v1231_v56 = vpop.f32.mrb[60].mxu0 }
 0x307   : > { %11844 = vst [vmem:[#allocation40_spill] sm:$0xff] %v7673_v61  ;;  %2166 = vmax.xlane.f32.xlu0 %v2165_v30  ;;  %v958_v53 = vpop.f32.mrb[39].mxu1  ;;  %v7677_v3 = vmul.f32 0.35355338, %v1231_v56  ;;  %v1233_v43 = vpop.f32.mrb[61].mxu0 }
 0x308   : > { %11845 = vst [vmem:[#allocation41_spill] sm:$0xff] %v7675_v50  ;;  %v2168_v55 = vmax.f32 %v7673_v61, %v7675_v50  ;;  %v7681_v41 = vmul.f32 0.35355338, %v1233_v43  ;;  %v1235_v52 = vpop.f32.mrb[62].mxu0  ;;  %v7685_v28 = vmul.f32 0.35355338, %v956_v62 }
 0x309   : > { %11846 = vst [vmem:[#allocation42_spill] sm:$0xff] %v7677_v3  ;;  %v7687_v38 = vmul.f32 0.35355338, %v958_v53  ;;  %v1237_v26 = vpop.f32.mrb[63].mxu0  ;;  %v7691_v56 = vmul.f32 0.35355338, %v1235_v52 }
 0x30a   : > { %11847 = vst [vmem:[#allocation43_spill] sm:$0xff] %v7681_v41  ;;  %11848 = vst [vmem:[#allocation44_spill] sm:$0xff] %v7685_v28  ;;  %v2264_v30 = vmax.f32 %v7677_v3, %v7681_v41  ;;  %2169 = vmax.xlane.f32.xlu1 %v2168_v55  ;;  %v7695_v50 = vmul.f32 0.35355338, %v1237_v26 }
 0x30b   : > { %11849 = vst [vmem:[#allocation45_spill] sm:$0xff] %v7687_v38  ;;  %2262 = vmax.xlane.f32.xlu0 %v2261_v59  ;;  %11850 = vst [vmem:[#allocation46_spill] sm:$0xff] %v7691_v56  ;;  %v2171_v43 = vmax.f32 %v7685_v28, %v7687_v38 }
 0x30c   : > { %v962_v58 = vpop.f32.mrb[40].mxu1  ;;  %11851 = vst [vmem:[#allocation47_spill] sm:$0xff] %v7695_v50 }
 0x30d   : > { %v7697_v61 = vmul.f32 0.35355338, %v962_v58  ;;  %v964_v62 = vpop.f32.mrb[41].mxu1  ;;  %v2267_v58 = vmax.f32 %v7691_v56, %v7695_v50 }
 0x30e   : > { %v7699_v2 = vmul.f32 0.35355338, %v964_v62  ;;  %v966_v53 = vpop.f32.mrb[42].mxu1  ;;  %2265 = vmax.xlane.f32.xlu1 %v2264_v30  ;;  %v1241_v6 = vpop.f32.mrb[64].mxu0 }
 0x30f   : > { %11852 = vst [vmem:[#allocation48_spill] sm:$0xff] %v7697_v61  ;;  %2172 = vmax.xlane.f32.xlu0 %v2171_v43  ;;  %v968_v41 = vpop.f32.mrb[43].mxu1  ;;  %v7701_v55 = vmul.f32 0.35355338, %v1241_v6  ;;  %v1243_v52 = vpop.f32.mrb[65].mxu0 }
 0x310   : > { %11853 = vst [vmem:[#allocation49_spill] sm:$0xff] %v7699_v2  ;;  %v2174_v59 = vmax.f32 %v7697_v61, %v7699_v2  ;;  %v7705_v3 = vmul.f32 0.35355338, %v1243_v52  ;;  %v1245_v26 = vpop.f32.mrb[66].mxu0  ;;  %v7709_v38 = vmul.f32 0.35355338, %v966_v53 }
 0x311   : > { %11854 = vst [vmem:[#allocation50_spill] sm:$0xff] %v7701_v55  ;;  %v7711_v62 = vmul.f32 0.35355338, %v968_v41  ;;  %v1247_v30 = vpop.f32.mrb[67].mxu0  ;;  %v7715_v6 = vmul.f32 0.35355338, %v1245_v26 }
 0x312   : > { %11855 = vst [vmem:[#allocation51_spill] sm:$0xff] %v7705_v3  ;;  %11856 = vst [vmem:[#allocation52_spill] sm:$0xff] %v7709_v38  ;;  %v2270_v43 = vmax.f32 %v7701_v55, %v7705_v3  ;;  %2175 = vmax.xlane.f32.xlu1 %v2174_v59  ;;  %v7719_v2 = vmul.f32 0.35355338, %v1247_v30 }
 0x313   : > { %11857 = vst [vmem:[#allocation53_spill] sm:$0xff] %v7711_v62  ;;  %2268 = vmax.xlane.f32.xlu0 %v2267_v58  ;;  %11858 = vst [vmem:[#allocation54_spill] sm:$0xff] %v7715_v6  ;;  %v2177_v52 = vmax.f32 %v7709_v38, %v7711_v62 }
 0x314   : > { %v972_v28 = vpop.f32.mrb[44].mxu1  ;;  %11859 = vst [vmem:[#allocation55_spill] sm:$0xff] %v7719_v2 }
 0x315   : > { %v7721_v61 = vmul.f32 0.35355338, %v972_v28  ;;  %v974_v53 = vpop.f32.mrb[45].mxu1  ;;  %v2273_v28 = vmax.f32 %v7715_v6, %v7719_v2 }
 0x316   : > { %v7723_v50 = vmul.f32 0.35355338, %v974_v53  ;;  %v976_v41 = vpop.f32.mrb[46].mxu1  ;;  %2271 = vmax.xlane.f32.xlu1 %v2270_v43  ;;  %v1251_v56 = vpop.f32.mrb[68].mxu0 }
 0x317   : > { %11860 = vst [vmem:[#allocation56_spill] sm:$0xff] %v7721_v61  ;;  %2178 = vmax.xlane.f32.xlu0 %v2177_v52  ;;  %v978_v3 = vpop.f32.mrb[47].mxu1  ;;  %v7725_v59 = vmul.f32 0.35355338, %v1251_v56  ;;  %v1253_v26 = vpop.f32.mrb[69].mxu0 }
 0x318   : > { %11861 = vst [vmem:[#allocation57_spill] sm:$0xff] %v7723_v50  ;;  %v2180_v58 = vmax.f32 %v7721_v61, %v7723_v50  ;;  %v7729_v55 = vmul.f32 0.35355338, %v1253_v26  ;;  %v1255_v30 = vpop.f32.mrb[70].mxu0  ;;  %v7733_v62 = vmul.f32 0.35355338, %v976_v41 }
 0x319   : > { %11862 = vst [vmem:[#allocation58_spill] sm:$0xff] %v7725_v59  ;;  %v7735_v53 = vmul.f32 0.35355338, %v978_v3  ;;  %v1257_v43 = vpop.f32.mrb[71].mxu0  ;;  %v7739_v56 = vmul.f32 0.35355338, %v1255_v30 }
 0x31a   : > { %11863 = vst [vmem:[#allocation59_spill] sm:$0xff] %v7729_v55  ;;  %11864 = vst [vmem:[#allocation60_spill] sm:$0xff] %v7733_v62  ;;  %v2276_v52 = vmax.f32 %v7725_v59, %v7729_v55  ;;  %2181 = vmax.xlane.f32.xlu1 %v2180_v58  ;;  %v7743_v50 = vmul.f32 0.35355338, %v1257_v43 }
 0x31b   : > { %11865 = vst [vmem:[#allocation61_spill] sm:$0xff] %v7735_v53  ;;  %2274 = vmax.xlane.f32.xlu0 %v2273_v28  ;;  %11866 = vst [vmem:[#allocation62_spill] sm:$0xff] %v7739_v56  ;;  %v2183_v26 = vmax.f32 %v7733_v62, %v7735_v53 }
 0x31c   : > { %v982_v38 = vpop.f32.mrb[48].mxu1  ;;  %11867 = vst [vmem:[#allocation63_spill] sm:$0xff] %v7743_v50 }
 0x31d   : > { %v7745_v61 = vmul.f32 0.35355338, %v982_v38  ;;  %v984_v41 = vpop.f32.mrb[49].mxu1  ;;  %v2279_v38 = vmax.f32 %v7739_v56, %v7743_v50 }
 0x31e   : > { %v7747_v2 = vmul.f32 0.35355338, %v984_v41  ;;  %v986_v3 = vpop.f32.mrb[50].mxu1  ;;  %2277 = vmax.xlane.f32.xlu1 %v2276_v52  ;;  %v1261_v6 = vpop.f32.mrb[72].mxu0 }
 0x31f   : > { %11868 = vst [vmem:[#allocation64_spill] sm:$0xff] %v7745_v61  ;;  %2184 = vmax.xlane.f32.xlu0 %v2183_v26  ;;  %v988_v55 = vpop.f32.mrb[51].mxu1  ;;  %v7749_v58 = vmul.f32 0.35355338, %v1261_v6  ;;  %v1263_v30 = vpop.f32.mrb[73].mxu0 }
 0x320   : > { %11869 = vst [vmem:[#allocation65_spill] sm:$0xff] %v7747_v2  ;;  %v2186_v28 = vmax.f32 %v7745_v61, %v7747_v2  ;;  %v7753_v59 = vmul.f32 0.35355338, %v1263_v30  ;;  %v1265_v43 = vpop.f32.mrb[74].mxu0  ;;  %v7757_v53 = vmul.f32 0.35355338, %v986_v3 }
 0x321   : > { %11870 = vst [vmem:[#allocation66_spill] sm:$0xff] %v7749_v58  ;;  %v7759_v41 = vmul.f32 0.35355338, %v988_v55  ;;  %v1267_v52 = vpop.f32.mrb[75].mxu0  ;;  %v7763_v6 = vmul.f32 0.35355338, %v1265_v43 }
 0x322   : > { %11871 = vst [vmem:[#allocation67_spill] sm:$0xff] %v7753_v59  ;;  %11872 = vst [vmem:[#allocation68_spill] sm:$0xff] %v7757_v53  ;;  %v2282_v26 = vmax.f32 %v7749_v58, %v7753_v59  ;;  %2187 = vmax.xlane.f32.xlu1 %v2186_v28  ;;  %v7767_v2 = vmul.f32 0.35355338, %v1267_v52 }
 0x323   : > { %11873 = vst [vmem:[#allocation69_spill] sm:$0xff] %v7759_v41  ;;  %2280 = vmax.xlane.f32.xlu0 %v2279_v38  ;;  %11874 = vst [vmem:[#allocation70_spill] sm:$0xff] %v7763_v6  ;;  %v2189_v30 = vmax.f32 %v7757_v53, %v7759_v41 }
 0x324   : > { %v992_v62 = vpop.f32.mrb[52].mxu1  ;;  %11875 = vst [vmem:[#allocation71_spill] sm:$0xff] %v7767_v2 }
 0x325   : > { %v7769_v61 = vmul.f32 0.35355338, %v992_v62  ;;  %v994_v3 = vpop.f32.mrb[53].mxu1  ;;  %v2285_v62 = vmax.f32 %v7763_v6, %v7767_v2 }
 0x326   : > { %v7771_v50 = vmul.f32 0.35355338, %v994_v3  ;;  %v996_v55 = vpop.f32.mrb[54].mxu1  ;;  %2283 = vmax.xlane.f32.xlu1 %v2282_v26  ;;  %v1271_v56 = vpop.f32.mrb[76].mxu0 }
 0x327   : > { %11876 = vst [vmem:[#allocation72_spill] sm:$0xff] %v7769_v61  ;;  %2190 = vmax.xlane.f32.xlu0 %v2189_v30  ;;  %v998_v59 = vpop.f32.mrb[55].mxu1  ;;  %v7773_v28 = vmul.f32 0.35355338, %v1271_v56  ;;  %v1273_v43 = vpop.f32.mrb[77].mxu0 }
 0x328   : > { %11877 = vst [vmem:[#allocation73_spill] sm:$0xff] %v7771_v50  ;;  %v2192_v38 = vmax.f32 %v7769_v61, %v7771_v50  ;;  %v7777_v58 = vmul.f32 0.35355338, %v1273_v43  ;;  %v1275_v52 = vpop.f32.mrb[78].mxu0  ;;  %v7781_v41 = vmul.f32 0.35355338, %v996_v55 }
 0x329   : > { %11878 = vst [vmem:[#allocation74_spill] sm:$0xff] %v7773_v28  ;;  %v7783_v3 = vmul.f32 0.35355338, %v998_v59  ;;  %v1277_v26 = vpop.f32.mrb[79].mxu0  ;;  %v7787_v56 = vmul.f32 0.35355338, %v1275_v52 }
 0x32a   : > { %11879 = vst [vmem:[#allocation75_spill] sm:$0xff] %v7777_v58  ;;  %11880 = vst [vmem:[#allocation76_spill] sm:$0xff] %v7781_v41  ;;  %v2288_v30 = vmax.f32 %v7773_v28, %v7777_v58  ;;  %2193 = vmax.xlane.f32.xlu1 %v2192_v38  ;;  %v7791_v50 = vmul.f32 0.35355338, %v1277_v26 }
 0x32b   : > { %11881 = vst [vmem:[#allocation77_spill] sm:$0xff] %v7783_v3  ;;  %2286 = vmax.xlane.f32.xlu0 %v2285_v62  ;;  %11882 = vst [vmem:[#allocation78_spill] sm:$0xff] %v7787_v56  ;;  %v2195_v43 = vmax.f32 %v7781_v41, %v7783_v3 }
 0x32c   : > { %v1002_v53 = vpop.f32.mrb[56].mxu1  ;;  %11883 = vst [vmem:[#allocation79_spill] sm:$0xff] %v7791_v50 }
 0x32d   : > { %v7793_v61 = vmul.f32 0.35355338, %v1002_v53  ;;  %v1004_v55 = vpop.f32.mrb[57].mxu1  ;;  %v2291_v53 = vmax.f32 %v7787_v56, %v7791_v50 }
 0x32e   : > { %v7795_v2 = vmul.f32 0.35355338, %v1004_v55  ;;  %v1006_v59 = vpop.f32.mrb[58].mxu1  ;;  %2289 = vmax.xlane.f32.xlu1 %v2288_v30  ;;  %v1281_v6 = vpop.f32.mrb[80].mxu0 }
 0x32f   : > { %11884 = vst [vmem:[#allocation80_spill] sm:$0xff] %v7793_v61  ;;  %2196 = vmax.xlane.f32.xlu0 %v2195_v43  ;;  %v1008_v58 = vpop.f32.mrb[59].mxu1  ;;  %v7797_v38 = vmul.f32 0.35355338, %v1281_v6  ;;  %v1283_v52 = vpop.f32.mrb[81].mxu0 }
 0x330   : > { %11885 = vst [vmem:[#allocation81_spill] sm:$0xff] %v7795_v2  ;;  %v2198_v62 = vmax.f32 %v7793_v61, %v7795_v2  ;;  %v7801_v28 = vmul.f32 0.35355338, %v1283_v52  ;;  %v1285_v26 = vpop.f32.mrb[82].mxu0  ;;  %v7805_v3 = vmul.f32 0.35355338, %v1006_v59 }
 0x331   : > { %11886 = vst [vmem:[#allocation82_spill] sm:$0xff] %v7797_v38  ;;  %v7807_v55 = vmul.f32 0.35355338, %v1008_v58  ;;  %v1287_v30 = vpop.f32.mrb[83].mxu0  ;;  %v7811_v6 = vmul.f32 0.35355338, %v1285_v26 }
 0x332   : > { %11887 = vst [vmem:[#allocation83_spill] sm:$0xff] %v7801_v28  ;;  %11888 = vst [vmem:[#allocation84_spill] sm:$0xff] %v7805_v3  ;;  %v2294_v43 = vmax.f32 %v7797_v38, %v7801_v28  ;;  %2199 = vmax.xlane.f32.xlu1 %v2198_v62  ;;  %v7815_v2 = vmul.f32 0.35355338, %v1287_v30 }
 0x333   : > { %11889 = vst [vmem:[#allocation85_spill] sm:$0xff] %v7807_v55  ;;  %2292 = vmax.xlane.f32.xlu0 %v2291_v53  ;;  %11890 = vst [vmem:[#allocation86_spill] sm:$0xff] %v7811_v6  ;;  %v2201_v52 = vmax.f32 %v7805_v3, %v7807_v55 }
 0x334   : > { %v1012_v41 = vpop.f32.mrb[60].mxu1  ;;  %11891 = vst [vmem:[#allocation87_spill] sm:$0xff] %v7815_v2 }
 0x335   : > { %v7817_v61 = vmul.f32 0.35355338, %v1012_v41  ;;  %v1014_v59 = vpop.f32.mrb[61].mxu1  ;;  %v2297_v41 = vmax.f32 %v7811_v6, %v7815_v2 }
 0x336   : > { %v7819_v50 = vmul.f32 0.35355338, %v1014_v59  ;;  %v1016_v58 = vpop.f32.mrb[62].mxu1  ;;  %2295 = vmax.xlane.f32.xlu1 %v2294_v43  ;;  %v1291_v56 = vpop.f32.mrb[84].mxu0 }
 0x337   : > { %11892 = vst [vmem:[#allocation88_spill] sm:$0xff] %v7817_v61  ;;  %2202 = vmax.xlane.f32.xlu0 %v2201_v52  ;;  %v1018_v28 = vpop.f32.mrb[63].mxu1  ;;  %v7821_v62 = vmul.f32 0.35355338, %v1291_v56  ;;  %v1293_v26 = vpop.f32.mrb[85].mxu0 }
 0x338   : > { %11893 = vst [vmem:[#allocation89_spill] sm:$0xff] %v7819_v50  ;;  %v2204_v53 = vmax.f32 %v7817_v61, %v7819_v50  ;;  %v7825_v38 = vmul.f32 0.35355338, %v1293_v26  ;;  %v1295_v30 = vpop.f32.mrb[86].mxu0  ;;  %v7829_v55 = vmul.f32 0.35355338, %v1016_v58 }
 0x339   : > { %11894 = vst [vmem:[#allocation90_spill] sm:$0xff] %v7821_v62  ;;  %v7831_v59 = vmul.f32 0.35355338, %v1018_v28  ;;  %v1297_v43 = vpop.f32.mrb[87].mxu0  ;;  %v7835_v56 = vmul.f32 0.35355338, %v1295_v30 }
 0x33a   : > { %11895 = vst [vmem:[#allocation91_spill] sm:$0xff] %v7825_v38  ;;  %11896 = vst [vmem:[#allocation92_spill] sm:$0xff] %v7829_v55  ;;  %v2300_v52 = vmax.f32 %v7821_v62, %v7825_v38  ;;  %2205 = vmax.xlane.f32.xlu1 %v2204_v53  ;;  %v7839_v50 = vmul.f32 0.35355338, %v1297_v43 }
 0x33b   : > { %11897 = vst [vmem:[#allocation93_spill] sm:$0xff] %v7831_v59  ;;  %2298 = vmax.xlane.f32.xlu0 %v2297_v41  ;;  %11898 = vst [vmem:[#allocation94_spill] sm:$0xff] %v7835_v56  ;;  %v2207_v26 = vmax.f32 %v7829_v55, %v7831_v59 }
 0x33c   : > { %v1420_v3 = vpop.f32.mrb[64].mxu1  ;;  %11899 = vst [vmem:[#allocation95_spill] sm:$0xff] %v7839_v50 }
 0x33d   : > { %v7841_v61 = vmul.f32 0.35355338, %v1420_v3  ;;  %v1422_v58 = vpop.f32.mrb[65].mxu1  ;;  %v2303_v3 = vmax.f32 %v7835_v56, %v7839_v50 }
 0x33e   : > { %v7843_v2 = vmul.f32 0.35355338, %v1422_v58  ;;  %v1424_v28 = vpop.f32.mrb[66].mxu1  ;;  %2301 = vmax.xlane.f32.xlu1 %v2300_v52  ;;  %v1699_v6 = vpop.f32.mrb[88].mxu0 }
 0x33f   : > { %11900 = vst [vmem:[#allocation96_spill] sm:$0xff] %v7841_v61  ;;  %2208 = vmax.xlane.f32.xlu0 %v2207_v26  ;;  %v1426_v38 = vpop.f32.mrb[67].mxu1  ;;  %v7845_v53 = vmul.f32 0.35355338, %v1699_v6  ;;  %v1701_v30 = vpop.f32.mrb[89].mxu0 }
 0x340   : > { %11901 = vst [vmem:[#allocation97_spill] sm:$0xff] %v7843_v2  ;;  %v2306_v41 = vmax.f32 %v7841_v61, %v7843_v2  ;;  %v7849_v62 = vmul.f32 0.35355338, %v1701_v30  ;;  %v1703_v43 = vpop.f32.mrb[90].mxu0  ;;  %v7853_v59 = vmul.f32 0.35355338, %v1424_v28 }
 0x341   : > { %11902 = vst [vmem:[#allocation98_spill] sm:$0xff] %v7845_v53  ;;  %v7855_v58 = vmul.f32 0.35355338, %v1426_v38  ;;  %v1705_v52 = vpop.f32.mrb[91].mxu0  ;;  %v7859_v6 = vmul.f32 0.35355338, %v1703_v43 }
 0x342   : > { %11903 = vst [vmem:[#allocation99_spill] sm:$0xff] %v7849_v62  ;;  %11904 = vst [vmem:[#allocation100_spill] sm:$0xff] %v7853_v59  ;;  %v2402_v26 = vmax.f32 %v7845_v53, %v7849_v62  ;;  %2307 = vmax.xlane.f32.xlu1 %v2306_v41  ;;  %v7863_v2 = vmul.f32 0.35355338, %v1705_v52 }
 0x343   : > { %11905 = vst [vmem:[#allocation101_spill] sm:$0xff] %v7855_v58  ;;  %2304 = vmax.xlane.f32.xlu0 %v2303_v3  ;;  %11906 = vst [vmem:[#allocation102_spill] sm:$0xff] %v7859_v6  ;;  %v2309_v30 = vmax.f32 %v7853_v59, %v7855_v58 }
 0x344   : > { %v1430_v55 = vpop.f32.mrb[68].mxu1  ;;  %11907 = vst [vmem:[#allocation103_spill] sm:$0xff] %v7863_v2 }
 0x345   : > { %v7865_v61 = vmul.f32 0.35355338, %v1430_v55  ;;  %v1432_v28 = vpop.f32.mrb[69].mxu1  ;;  %v2405_v55 = vmax.f32 %v7859_v6, %v7863_v2 }
 0x346   : > { %v7867_v50 = vmul.f32 0.35355338, %v1432_v28  ;;  %v1434_v38 = vpop.f32.mrb[70].mxu1  ;;  %2403 = vmax.xlane.f32.xlu1 %v2402_v26  ;;  %v1709_v56 = vpop.f32.mrb[92].mxu0 }
 0x347   : > { %11908 = vst [vmem:[#allocation104_spill] sm:$0xff] %v7865_v61  ;;  %2310 = vmax.xlane.f32.xlu0 %v2309_v30  ;;  %v1436_v62 = vpop.f32.mrb[71].mxu1  ;;  %v7869_v41 = vmul.f32 0.35355338, %v1709_v56  ;;  %v1711_v43 = vpop.f32.mrb[93].mxu0 }
 0x348   : > { %11909 = vst [vmem:[#allocation105_spill] sm:$0xff] %v7867_v50  ;;  %v2312_v3 = vmax.f32 %v7865_v61, %v7867_v50  ;;  %v7873_v53 = vmul.f32 0.35355338, %v1711_v43  ;;  %v1713_v52 = vpop.f32.mrb[94].mxu0  ;;  %v7877_v58 = vmul.f32 0.35355338, %v1434_v38 }
 0x349   : > { %11910 = vst [vmem:[#allocation106_spill] sm:$0xff] %v7869_v41  ;;  %v7879_v28 = vmul.f32 0.35355338, %v1436_v62  ;;  %v1715_v26 = vpop.f32.mrb[95].mxu0  ;;  %v7883_v56 = vmul.f32 0.35355338, %v1713_v52 }
 0x34a   : > { %11911 = vst [vmem:[#allocation107_spill] sm:$0xff] %v7873_v53  ;;  %11912 = vst [vmem:[#allocation108_spill] sm:$0xff] %v7877_v58  ;;  %v2408_v30 = vmax.f32 %v7869_v41, %v7873_v53  ;;  %2313 = vmax.xlane.f32.xlu1 %v2312_v3  ;;  %v7887_v50 = vmul.f32 0.35355338, %v1715_v26 }
 0x34b   : > { %11913 = vst [vmem:[#allocation109_spill] sm:$0xff] %v7879_v28  ;;  %2406 = vmax.xlane.f32.xlu0 %v2405_v55  ;;  %11914 = vst [vmem:[#allocation110_spill] sm:$0xff] %v7883_v56  ;;  %v2315_v43 = vmax.f32 %v7877_v58, %v7879_v28 }
 0x34c   : > { %v1440_v59 = vpop.f32.mrb[72].mxu1  ;;  %11915 = vst [vmem:[#allocation111_spill] sm:$0xff] %v7887_v50 }
 0x34d   : > { %v7889_v61 = vmul.f32 0.35355338, %v1440_v59  ;;  %v1442_v38 = vpop.f32.mrb[73].mxu1 }
 0x34e   : > { %v7891_v2 = vmul.f32 0.35355338, %v1442_v38  ;;  %v1444_v62 = vpop.f32.mrb[74].mxu1  ;;  %2409 = vmax.xlane.f32.xlu1 %v2408_v30  ;;  %v1719_v6 = vpop.f32.mrb[96].mxu0  ;;  %v2411_v38 = vmax.f32 %v7883_v56, %v7887_v50 }
 0x34f   : > { %11916 = vst [vmem:[#allocation112_spill] sm:$0xff] %v7889_v61  ;;  %2316 = vmax.xlane.f32.xlu0 %v2315_v43  ;;  %v2116_v53 = vpop.xlane.xlu0 %2115  ;;  %v1446_v3 = vpop.f32.mrb[75].mxu1  ;;  %v7893_v55 = vmul.f32 0.35355338, %v1719_v6  ;;  %v7897_v41 = vmul.f32 0.35355338, %v1444_v62 }
 0x350   : > { %11917 = vst [vmem:[#allocation113_spill] sm:$0xff] %v7891_v2  ;;  %v2318_v52 = vmax.f32 %v7889_v61, %v7891_v2  ;;  %v2498_v26 = vsub.f32 %v7437_v37, %v2116_v53  ;;  %v2499_v59 = vsub.f32 %v7439_v40, %v2116_v53  ;;  %v1721_v28 = vpop.f32.mrb[97].mxu0  ;;  %v7903_v30 = vmul.f32 0.35355338, %v1446_v3 }
 0x351   : > { %11918 = vst [vmem:[#allocation114_spill] sm:$0xff] %v7893_v55  ;;  %11919 = vst [vmem:[#allocation115_spill] sm:$0xff] %v7897_v41  ;;  %v7905_v43 = vmul.f32 0.35355338, %v1721_v28  ;;  %v2119_v58 = vpop.xlane.xlu1 %2118  ;;  %v1723_v6 = vpop.f32.mrb[98].mxu0 }
 0x352   : > { %11920 = vst [vmem:[#allocation116_spill] sm:$0xff] %v7903_v30  ;;  %v2754_v0 = vmul.f32 1.442695, %v2498_v26  ;;  %v2500_v48 = vsub.f32 %v7441_v16, %v2119_v58  ;;  %2319 = vmax.xlane.f32.xlu1 %v2318_v52  ;;  %v1725_v62 = vpop.f32.mrb[99].mxu0  ;;  %v2756_v2 = vmul.f32 1.442695, %v2499_v59  ;;  %v2501_v40 = vsub.f32 %v7445_v20, %v2119_v58 }
 0x353   : > { %11921 = vst [vmem:[#allocation117_spill] sm:$0xff] %v7905_v43  ;;  %v2414_v37 = vmax.f32 %v7893_v55, %v7905_v43  ;;  %v7911_v53 = vmul.f32 0.35355338, %v1723_v6  ;;  %2412 = vmax.xlane.f32.xlu0 %v2411_v38  ;;  %v2212_v3 = vpop.xlane.xlu0 %2211  ;;  %v7913_v28 = vmul.f32 0.35355338, %v1725_v62  ;;  %v2321_v26 = vmax.f32 %v7897_v41, %v7903_v30 }
 0x354   : > { %v2758_v50 = vmul.f32 1.442695, %v2500_v48  ;;  %v1450_v56 = vpop.f32.mrb[76].mxu1  ;;  %v2760_v16 = vmul.f32 1.442695, %v2501_v40  ;;  %6095 = vpow2.f32 %v2754_v0  ;;  %v2562_v43 = vsub.f32 %v7443_v42, %v2212_v3 }
 0x355   : > { %11922 = vst [vmem:[#allocation118_spill] sm:$0xff] %v7911_v53  ;;  %11923 = vst [vmem:[#allocation119_spill] sm:$0xff] %v7913_v28  ;;  %v7917_v52 = vmul.f32 0.35355338, %v1450_v56  ;;  %v1452_v59 = vpop.f32.mrb[77].mxu1  ;;  %6097 = vpow2.f32 %v2756_v2  ;;  %v2563_v20 = vsub.f32 %v7447_v44, %v2212_v3  ;;  %v2417_v38 = vmax.f32 %v7911_v53, %v7913_v28 }
 0x356   : > { %v7920_v55 = vmul.f32 0.35355338, %v1452_v59  ;;  %2415 = vmax.xlane.f32.xlu1 %v2414_v37  ;;  %v1454_v48 = vpop.f32.mrb[78].mxu1  ;;  %6099 = vpow2.f32 %v2758_v50  ;;  %v1729_v44 = vpop.f32.mrb[100].mxu0  ;;  %v2882_v37 = vmul.f32 1.442695, %v2562_v43 }
 0x357   : > { %11924 = vst [vmem:[#allocation120_spill] sm:$0xff] %v7917_v52  ;;  %2322 = vmax.xlane.f32.xlu0 %v2321_v26  ;;  %v2122_v58 = vpop.xlane.xlu1 %2121  ;;  %v1456_v6 = vpop.f32.mrb[79].mxu1  ;;  %6101 = vpow2.f32 %v2760_v16  ;;  %v7927_v42 = vmul.f32 0.35355338, %v1454_v48  ;;  %v7933_v50 = vmul.f32 0.35355338, %v1729_v44 }
 0x358   : > { %11925 = vst [vmem:[#allocation121_spill] sm:$0xff] %v7920_v55  ;;  %v2324_v56 = vmax.f32 %v7917_v52, %v7920_v55  ;;  %v2215_v0 = vpop.xlane.xlu0 %2214  ;;  %v7929_v62 = vmul.f32 0.35355338, %v1456_v6  ;;  %v1731_v3 = vpop.f32.mrb[101].mxu0  ;;  %v2884_v26 = vmul.f32 1.442695, %v2563_v20  ;;  %v2502_v16 = vsub.f32 %v7463_v60, %v2122_v58 }
 0x359   : > { %11926 = vst [vmem:[#allocation122_spill] sm:$0xff] %v7927_v42  ;;  %v2564_v2 = vsub.f32 %v7458_v51, %v2215_v0  ;;  %v2565_v40 = vsub.f32 %v7460_v54, %v2215_v0  ;;  %11928 = vst [vmem:[#allocation124_spill] sm:$0xff] %v7933_v50  ;;  %v7935_v59 = vmul.f32 0.35355338, %v1731_v3  ;;  %v1733_v6 = vpop.f32.mrb[102].mxu0  ;;  %6103 = vpow2.f32 %v2882_v37 }
 0x35a   : > { %11927 = vst [vmem:[#allocation123_spill] sm:$0xff] %v7929_v62  ;;  %2325 = vmax.xlane.f32.xlu1 %v2324_v56  ;;  %v2327_v51 = vmax.f32 %v7927_v42, %v7929_v62  ;;  %v7942_v0 = vmul.f32 0.35355338, %v1733_v6  ;;  %v1735_v56 = vpop.f32.mrb[103].mxu0  ;;  %6105 = vpow2.f32 %v2884_v26  ;;  %v2503_v60 = vsub.f32 %v7465_v1, %v2122_v58 }
 0x35b   : > { %11929 = vst [vmem:[#allocation125_spill] sm:$0xff] %v7935_v59  ;;  %2418 = vmax.xlane.f32.xlu0 %v2417_v38  ;;  %v2218_v28 = vpop.xlane.xlu1 %2217  ;;  %v2886_v48 = vmul.f32 1.442695, %v2564_v2  ;;  %v2888_v43 = vmul.f32 1.442695, %v2565_v40  ;;  %v2420_v54 = vmax.f32 %v7933_v50, %v7935_v59 }
 0x35c   : > { %v2125_v53 = vpop.xlane.xlu0 %2124  ;;  %11930 = vst [vmem:[#allocation126_spill] sm:$0xff] %v7942_v0  ;;  %v1460_v20 = vpop.f32.mrb[80].mxu1  ;;  %v7944_v44 = vmul.f32 0.35355338, %v1735_v56  ;;  %v2762_v62 = vmul.f32 1.442695, %v2502_v16  ;;  %v2566_v58 = vsub.f32 %v7469_v7, %v2218_v28 }
 0x35d   : > { %v1462_v38 = vpop.f32.mrb[81].mxu1  ;;  %6107 = vpow2.f32 %v2886_v48  ;;  %v2504_v6 = vsub.f32 %v7467_v5, %v2125_v53  ;;  %v2505_v1 = vsub.f32 %v7471_v13, %v2125_v53  ;;  %v7962_v16 = vmul.f32 0.35355338, %v1460_v20 }
 0x35e   : > { %11931 = vst [vmem:[#allocation127_spill] sm:$0xff] %v7944_v44  ;;  %v7946_v3 = vpop.f32.mrb[104].mxu0  ;;  %2421 = vmax.xlane.f32.xlu1 %v2420_v54  ;;  %v7949_v40 = vpop.eup %6095  ;;  %6109 = vpow2.f32 %v2888_v43  ;;  %v2423_v26 = vmax.f32 %v7942_v0, %v7944_v44  ;;  %v7964_v5 = vmul.f32 0.35355338, %v1462_v38  ;;  %v2764_v42 = vmul.f32 1.442695, %v2503_v60 }
 0x35f   : > { %2328 = vmax.xlane.f32.xlu0 %v2327_v51  ;;  %v2128_v2 = vpop.xlane.xlu1 %2127  ;;  %11932 = vst [vmem:[#allocation128_spill] sm:$0xff] %v7949_v40  ;;  %v1464_v37 = vpop.f32.mrb[82].mxu1  ;;  %11935 = vst [vmem:[#allocation131_spill] sm:$0xff] %v7962_v16  ;;  %v2567_v43 = vsub.f32 %v7473_v14, %v2218_v28  ;;  %v2766_v44 = vmul.f32 1.442695, %v2504_v6  ;;  %6111 = vpow2.f32 %v2762_v62 }
 0x360   : > { %v7952_v59 = vpop.xlane.xlu0 %2220  ;;  %v7954_v56 = vpop.eup %6097  ;;  %11936 = vst [vmem:[#allocation132_spill] sm:$0xff] %v7964_v5  ;;  %v2506_v13 = vsub.f32 %v7491_v29, %v2128_v2  ;;  %v2768_v20 = vmul.f32 1.442695, %v2505_v1  ;;  %v2890_v38 = vmul.f32 1.442695, %v2566_v58  ;;  %v2507_v52 = vsub.f32 %v7493_v11, %v2128_v2 }
 0x361   : > { %11933 = vst [vmem:[#allocation129_spill] sm:$0xff] %v7954_v56  ;;  %v1466_v51 = vpop.f32.mrb[83].mxu1  ;;  %v1741_v54 = vpop.f32.mrb[105].mxu0  ;;  %v3266_v7 = vadd.f32 %v7954_v56, %v7949_v40  ;;  %v2330_v14 = vmax.f32 %v7962_v16, %v7964_v5  ;;  %v7979_v28 = vmul.f32 0.35355338, %v1464_v37  ;;  %6113 = vpow2.f32 %v2764_v42 }
 0x362   : > { %v7960_v50 = vpop.eup %6099  ;;  %v1743_v0 = vpop.f32.mrb[106].mxu0  ;;  %v7981_v6 = vmul.f32 0.35355338, %v1466_v51  ;;  %v2892_v11 = vmul.f32 1.442695, %v2567_v43  ;;  %v2568_v2 = vsub.f32 %v7484_v23, %v7952_v59  ;;  %6115 = vpow2.f32 %v2766_v44 }
 0x363   : > { %11934 = vst [vmem:[#allocation130_spill] sm:$0xff] %v7960_v50  ;;  %v7966_v48 = vpop.eup %6101  ;;  %2424 = vmax.xlane.f32.xlu0 %v2423_v26  ;;  %v7969_v55 = vpop.xlane.xlu1 %2223  ;;  %11938 = vst [vmem:[#allocation134_spill] sm:$0xff] %v7979_v28  ;;  %3267 = vadd.xlane.f32.xlu1 %v3266_v7  ;;  %v2770_v37 = vmul.f32 1.442695, %v2506_v13  ;;  %v2569_v51 = vsub.f32 %v7486_v25, %v7952_v59  ;;  %6117 = vpow2.f32 %v2768_v20  ;;  %v2772_v42 = vmul.f32 1.442695, %v2507_v52 }
 0x364   : > { %11937 = vst [vmem:[#allocation133_spill] sm:$0xff] %v7966_v48  ;;  %v2131_v53 = vpop.xlane.xlu0 %2130  ;;  %v1745_v30 = vpop.f32.mrb[107].mxu0  ;;  %11939 = vst [vmem:[#allocation135_spill] sm:$0xff] %v7981_v6  ;;  %v3269_v29 = vadd.f32 %v7966_v48, %v7960_v50  ;;  %6119 = vpow2.f32 %v2890_v38  ;;  %v2333_v25 = vmax.f32 %v7979_v28, %v7981_v6  ;;  %v8014_v59 = vmul.f32 0.35355338, %v7946_v3 }
 0x365   : > { %v7975_v60 = vpop.f32.mrb[84].mxu1  ;;  %v7993_v58 = vpop.eup %6103  ;;  %v2508_v23 = vsub.f32 %v7495_v10, %v2131_v53  ;;  %v2509_v43 = vsub.f32 %v7499_v35, %v2131_v53  ;;  %v8016_v20 = vmul.f32 0.35355338, %v1741_v54  ;;  %6121 = vpow2.f32 %v2892_v11 }
 0x366   : > { %v7985_v26 = vpop.f32.mrb[85].mxu1  ;;  %v7987_v62 = vpop.f32.mrb[108].mxu0  ;;  %11940 = vst [vmem:[#allocation136_spill] sm:$0xff] %v7993_v58  ;;  %11943 = vst [vmem:[#allocation139_spill] sm:$0xff] %v8014_v59  ;;  %v2894_v10 = vmul.f32 1.442695, %v2568_v2  ;;  %v2570_v35 = vsub.f32 %v7497_v12, %v7969_v55  ;;  %6123 = vpow2.f32 %v2770_v37 }
 0x367   : > { %v7991_v1 = vpop.xlane.xlu1 %2133  ;;  %3270 = vadd.xlane.f32.xlu0 %v3269_v29  ;;  %v7999_v5 = vpop.f32.mrb[86].mxu1  ;;  %2331 = vmax.xlane.f32.xlu1 %v2330_v14  ;;  %11944 = vst [vmem:[#allocation140_spill] sm:$0xff] %v8016_v20  ;;  %v2896_v38 = vmul.f32 1.442695, %v2569_v51  ;;  %v2571_v14 = vsub.f32 %v7501_v36, %v7969_v55  ;;  %6125 = vpow2.f32 %v2772_v42  ;;  %v2774_v2 = vmul.f32 1.442695, %v2508_v23 }
 0x368   : > { %v7997_v7 = vpop.xlane.xlu0 %2226  ;;  %v8001_v16 = vpop.eup %6105  ;;  %v2776_v12 = vmul.f32 1.442695, %v2509_v43  ;;  %v2510_v6 = vsub.f32 %v7519_v49, %v7991_v1  ;;  %v2426_v37 = vmax.f32 %v8014_v59, %v8016_v20  ;;  %v8040_v36 = vmul.f32 0.35355338, %v1743_v0 }
 0x369   : > { %11941 = vst [vmem:[#allocation137_spill] sm:$0xff] %v8001_v16  ;;  %v8005_v50 = vpop.f32.mrb[87].mxu1  ;;  %v8007_v44 = vpop.f32.mrb[109].mxu0  ;;  %v3362_v3 = vadd.f32 %v8001_v16, %v7993_v58  ;;  %v8042_v55 = vmul.f32 0.35355338, %v1745_v30  ;;  %6127 = vpow2.f32 %v2894_v10  ;;  %v2511_v43 = vsub.f32 %v7521_v63, %v7991_v1 }
 0x36a   : > { %v8009_v13 = vpop.eup %6107  ;;  %v8024_v29 = vpop.f32.mrb[110].mxu0  ;;  %11946 = vst [vmem:[#allocation142_spill] sm:$0xff] %v8040_v36  ;;  %v2898_v49 = vmul.f32 1.442695, %v2570_v35  ;;  %6129 = vpow2.f32 %v2896_v38  ;;  %v2900_v0 = vmul.f32 1.442695, %v2571_v14  ;;  %v2572_v30 = vsub.f32 %v7512_v45, %v7997_v7 }
 0x36b   : > { %11942 = vst [vmem:[#allocation138_spill] sm:$0xff] %v8009_v13  ;;  %v8018_v52 = vpop.eup %6109  ;;  %v8022_v53 = vpop.xlane.xlu1 %2229  ;;  %2334 = vmax.xlane.f32.xlu0 %v2333_v25  ;;  %3363 = vadd.xlane.f32.xlu1 %v3362_v3  ;;  %11947 = vst [vmem:[#allocation143_spill] sm:$0xff] %v8042_v55  ;;  %6131 = vpow2.f32 %v2774_v2  ;;  %v2778_v10 = vmul.f32 1.442695, %v2510_v6  ;;  %v2573_v35 = vsub.f32 %v7514_v46, %v7997_v7  ;;  %v8077_v2 = vmul.f32 0.35355338, %v7975_v60 }
 0x36c   : > { %11945 = vst [vmem:[#allocation141_spill] sm:$0xff] %v8018_v52  ;;  %v8030_v54 = vpop.xlane.xlu0 %2136  ;;  %v8032_v11 = vpop.f32.mrb[111].mxu0  ;;  %v3365_v51 = vadd.f32 %v8018_v52, %v8009_v13  ;;  %6133 = vpow2.f32 %v2776_v12  ;;  %v2429_v14 = vmax.f32 %v8040_v36, %v8042_v55  ;;  %v8080_v6 = vmul.f32 0.35355338, %v7985_v26 }
 0x36d   : > { %v8036_v28 = vpop.f32.mrb[88].mxu1  ;;  %v8050_v23 = vpop.eup %6111  ;;  %v2512_v63 = vsub.f32 %v7523_v4, %v8030_v54  ;;  %11951 = vst [vmem:[#allocation147_spill] sm:$0xff] %v8077_v2  ;;  %6135 = vpow2.f32 %v2898_v49  ;;  %v2780_v4 = vmul.f32 1.442695, %v2511_v43  ;;  %v2513_v7 = vsub.f32 %v7527_v17, %v8030_v54 }
 0x36e   : > { %v8046_v25 = vpop.f32.mrb[89].mxu1  ;;  %v8048_v42 = vpop.f32.mrb[112].mxu0  ;;  %11948 = vst [vmem:[#allocation144_spill] sm:$0xff] %v8050_v23  ;;  %11952 = vst [vmem:[#allocation148_spill] sm:$0xff] %v8080_v6  ;;  %6137 = vpow2.f32 %v2900_v0  ;;  %v2574_v60 = vsub.f32 %v7525_v8, %v8022_v53  ;;  %v2904_v54 = vmul.f32 1.442695, %v2573_v35  ;;  %v2575_v0 = vsub.f32 %v7529_v18, %v8022_v53 }
 0x36f   : > { %v8054_v20 = vpop.xlane.xlu1 %2139  ;;  %3366 = vadd.xlane.f32.xlu0 %v3365_v51  ;;  %v8060_v59 = vpop.f32.mrb[90].mxu1  ;;  %2427 = vmax.xlane.f32.xlu1 %v2426_v37  ;;  %v2902_v37 = vmul.f32 1.442695, %v2572_v30  ;;  %6139 = vpow2.f32 %v2778_v10  ;;  %v2782_v55 = vmul.f32 1.442695, %v2512_v63  ;;  %v2336_v8 = vmax.f32 %v8077_v2, %v8080_v6 }
 0x370   : > { %v8058_v3 = vpop.xlane.xlu0 %2232  ;;  %v8062_v13 = vpop.eup %6113  ;;  %6141 = vpow2.f32 %v2780_v4  ;;  %v2784_v63 = vmul.f32 1.442695, %v2513_v7  ;;  %v2514_v6 = vsub.f32 %v7547_v34, %v8054_v20  ;;  %v2908_v4 = vmul.f32 1.442695, %v2575_v0 }
 0x371   : > { %11949 = vst [vmem:[#allocation145_spill] sm:$0xff] %v8062_v13  ;;  %v8068_v1 = vpop.f32.mrb[91].mxu1  ;;  %v8070_v38 = vpop.f32.mrb[113].mxu0  ;;  %v3272_v26 = vadd.f32 %v8062_v13, %v8050_v23  ;;  %v8114_v23 = vmul.f32 0.35355338, %v8005_v50  ;;  %6143 = vpow2.f32 %v2902_v37  ;;  %v2576_v7 = vsub.f32 %v7540_v9, %v8058_v3 }
 0x372   : > { %v8072_v45 = vpop.eup %6115  ;;  %v8088_v12 = vpop.f32.mrb[114].mxu0  ;;  %v2906_v50 = vmul.f32 1.442695, %v2574_v60  ;;  %6145 = vpow2.f32 %v2904_v54  ;;  %v2577_v34 = vsub.f32 %v7545_v33, %v8058_v3  ;;  %v8149_v54 = vmul.f32 0.35355338, %v7987_v62 }
 0x373   : > { %11950 = vst [vmem:[#allocation146_spill] sm:$0xff] %v8072_v45  ;;  %v8082_v46 = vpop.eup %6117  ;;  %v8086_v51 = vpop.xlane.xlu1 %2235  ;;  %2430 = vmax.xlane.f32.xlu0 %v2429_v14  ;;  %v8111_v14 = vmul.f32 0.35355338, %v7999_v5  ;;  %11958 = vst [vmem:[#allocation154_spill] sm:$0xff] %v8114_v23  ;;  %3273 = vadd.xlane.f32.xlu1 %v3272_v26  ;;  %v2515_v26 = vsub.f32 %v7549_v24, %v8054_v20  ;;  %6147 = vpow2.f32 %v2782_v55  ;;  %v8152_v0 = vmul.f32 0.35355338, %v8007_v44 }
 0x374   : > { %11953 = vst [vmem:[#allocation149_spill] sm:$0xff] %v8082_v46  ;;  %v8090_v58 = vpop.eup %6119  ;;  %v8096_v49 = vpop.xlane.xlu0 %2142  ;;  %v3275_v10 = vadd.f32 %v8082_v46, %v8072_v45  ;;  %11962 = vst [vmem:[#allocation158_spill] sm:$0xff] %v8149_v54  ;;  %6149 = vpow2.f32 %v2784_v63  ;;  %v2786_v33 = vmul.f32 1.442695, %v2514_v6 }
 0x375   : > { %11954 = vst [vmem:[#allocation150_spill] sm:$0xff] %v8090_v58  ;;  %v8098_v43 = vpop.f32.mrb[115].mxu0  ;;  %v8100_v17 = vpop.eup %6121  ;;  %11957 = vst [vmem:[#allocation153_spill] sm:$0xff] %v8111_v14  ;;  %v2339_v20 = vmax.f32 %v8111_v14, %v8114_v23  ;;  %v2516_v3 = vsub.f32 %v7559_v15, %v8096_v49  ;;  %6151 = vpow2.f32 %v2906_v50  ;;  %v2517_v62 = vsub.f32 %v7561_v19, %v8096_v49 }
 0x376   : > { %11955 = vst [vmem:[#allocation151_spill] sm:$0xff] %v8100_v17  ;;  %v8104_v30 = vpop.f32.mrb[92].mxu1  ;;  %v8106_v36 = vpop.eup %6123  ;;  %11963 = vst [vmem:[#allocation159_spill] sm:$0xff] %v8152_v0  ;;  %v3368_v44 = vadd.f32 %v8100_v17, %v8090_v58  ;;  %6153 = vpow2.f32 %v2908_v4  ;;  %v2910_v23 = vmul.f32 1.442695, %v2576_v7  ;;  %v2578_v50 = vsub.f32 %v7551_v47, %v8086_v51 }
 0x377   : > { %11956 = vst [vmem:[#allocation152_spill] sm:$0xff] %v8106_v36  ;;  %v8118_v35 = vpop.f32.mrb[93].mxu1  ;;  %v8120_v18 = vpop.f32.mrb[116].mxu0  ;;  %3276 = vadd.xlane.f32.xlu0 %v3275_v10  ;;  %2337 = vmax.xlane.f32.xlu1 %v2336_v8  ;;  %v2788_v8 = vmul.f32 1.442695, %v2515_v26  ;;  %v2432_v19 = vmax.f32 %v8149_v54, %v8152_v0  ;;  %6155 = vpow2.f32 %v2786_v33  ;;  %v2579_v0 = vsub.f32 %v7555_v57, %v8086_v51 }
 0x378   : > { %v8122_v53 = vpop.eup %6125  ;;  %v8126_v5 = vpop.xlane.xlu1 %2145  ;;  %v2912_v14 = vmul.f32 1.442695, %v2577_v34  ;;  %v8183_v49 = vmul.f32 0.35355338, %v8024_v29  ;;  %v2790_v58 = vmul.f32 1.442695, %v2516_v3 }
 0x379   : > { %11959 = vst [vmem:[#allocation155_spill] sm:$0xff] %v8122_v53  ;;  %v8130_v2 = vpop.xlane.xlu0 %2238  ;;  %v8132_v45 = vpop.f32.mrb[94].mxu1  ;;  %6157 = vpow2.f32 %v2788_v8  ;;  %v2914_v33 = vmul.f32 1.442695, %v2578_v50  ;;  %v2519_v3 = vsub.f32 %v7579_v39, %v8126_v5  ;;  %v8224_v50 = vmul.f32 0.35355338, %v8046_v25 }
 0x37a   : > { %v8134_v46 = vpop.eup %6127  ;;  %v8140_v37 = vpop.f32.mrb[95].mxu1  ;;  %11968 = vst [vmem:[#allocation164_spill] sm:$0xff] %v8183_v49  ;;  %6159 = vpow2.f32 %v2910_v23  ;;  %v2580_v57 = vsub.f32 %v7571_v27, %v8130_v2  ;;  %v8221_v23 = vmul.f32 0.35355338, %v8036_v28  ;;  %v2916_v27 = vmul.f32 1.442695, %v2579_v0 }
 0x37b   : > { %11960 = vst [vmem:[#allocation156_spill] sm:$0xff] %v8134_v46  ;;  %v8142_v60 = vpop.f32.mrb[117].mxu0  ;;  %v8144_v24 = vpop.eup %6129  ;;  %2340 = vmax.xlane.f32.xlu0 %v2339_v20  ;;  %3369 = vadd.xlane.f32.xlu1 %v3368_v44  ;;  %v8186_v20 = vmul.f32 0.35355338, %v8032_v11  ;;  %v2792_v44 = vmul.f32 1.442695, %v2517_v62  ;;  %v2518_v11 = vsub.f32 %v7575_v32, %v8126_v5  ;;  %6161 = vpow2.f32 %v2912_v14 }
 0x37c   : > { %11961 = vst [vmem:[#allocation157_spill] sm:$0xff] %v8144_v24  ;;  %v8154_v9 = vpop.eup %6131  ;;  %v8158_v10 = vpop.xlane.xlu1 %2241  ;;  %v3371_v4 = vadd.f32 %v8144_v24, %v8134_v46  ;;  %11973 = vst [vmem:[#allocation169_spill] sm:$0xff] %v8221_v23  ;;  %6163 = vpow2.f32 %v2790_v58  ;;  %v2581_v5 = vsub.f32 %v7573_v31, %v8130_v2  ;;  %v3278_v25 = vadd.f32 %v8122_v53, %v8106_v36 }
 0x37d   : > { %11964 = vst [vmem:[#allocation160_spill] sm:$0xff] %v8154_v9  ;;  %v8160_v55 = vpop.f32.mrb[118].mxu0  ;;  %v8162_v13 = vpop.eup %6133  ;;  %11969 = vst [vmem:[#allocation165_spill] sm:$0xff] %v8186_v20  ;;  %v2435_v62 = vmax.f32 %v8183_v49, %v8186_v20  ;;  %6165 = vpow2.f32 %v2792_v44  ;;  %v2796_v2 = vmul.f32 1.442695, %v2519_v3 }
 0x37e   : > { %11965 = vst [vmem:[#allocation161_spill] sm:$0xff] %v8162_v13  ;;  %v8168_v63 = vpop.xlane.xlu0 %2148  ;;  %v8170_v6 = vpop.f32.mrb[119].mxu0  ;;  %11974 = vst [vmem:[#allocation170_spill] sm:$0xff] %v8224_v50  ;;  %v2918_v20 = vmul.f32 1.442695, %v2580_v57 }
 0x37f   : > { %v8172_v15 = vpop.eup %6135  ;;  %v8176_v26 = vpop.f32.mrb[96].mxu1  ;;  %3372 = vadd.xlane.f32.xlu0 %v3371_v4  ;;  %2433 = vmax.xlane.f32.xlu1 %v2432_v19  ;;  %v2794_v19 = vmul.f32 1.442695, %v2518_v11  ;;  %v2520_v28 = vsub.f32 %v7587_v21, %v8168_v63  ;;  %6167 = vpow2.f32 %v2914_v33  ;;  %v2521_v44 = vsub.f32 %v7589_v22, %v8168_v63 }
 0x380   : > { %11966 = vst [vmem:[#allocation162_spill] sm:$0xff] %v8172_v15  ;;  %v8178_v52 = vpop.eup %6137  ;;  %v8190_v7 = vpop.f32.mrb[97].mxu1  ;;  %v2342_v21 = vmax.f32 %v8221_v23, %v8224_v50  ;;  %v8258_v36 = vmul.f32 0.35355338, %v8068_v1  ;;  %v3281_v33 = vadd.f32 %v8162_v13, %v8154_v9  ;;  %6169 = vpow2.f32 %v2916_v27  ;;  %v11982_v50 = vld [vmem:[#allocation12_spill] sm:$0xff] }
 0x381   : > { %11967 = vst [vmem:[#allocation163_spill] sm:$0xff] %v8178_v52  ;;  %v8192_v47 = vpop.f32.mrb[120].mxu0  ;;  %v8194_v34 = vpop.eup %6139  ;;  %v2920_v57 = vmul.f32 1.442695, %v2581_v5  ;;  %v2582_v23 = vsub.f32 %v11982_v50, %v8158_v10  ;;  %6171 = vpow2.f32 %v2794_v19  ;;  %v2798_v1 = vmul.f32 1.442695, %v2520_v28 }
 0x382   : > { %11970 = vst [vmem:[#allocation166_spill] sm:$0xff] %v8194_v34  ;;  %v8198_v29 = vpop.xlane.xlu1 %2151  ;;  %v8202_v54 = vpop.xlane.xlu0 %2244  ;;  %11980 = vst [vmem:[#allocation176_spill] sm:$0xff] %v8258_v36  ;;  %v2800_v27 = vmul.f32 1.442695, %v2521_v44  ;;  %v11985_v5 = vld [vmem:[#allocation16_spill] sm:$0xff]  ;;  %v11986_v50 = vld [vmem:[#allocation17_spill] sm:$0xff] }
 0x383   : > { %v8204_v46 = vpop.f32.mrb[98].mxu1  ;;  %v8206_v24 = vpop.eup %6141  ;;  %2436 = vmax.xlane.f32.xlu0 %v2435_v62  ;;  %v8255_v62 = vmul.f32 0.35355338, %v8060_v59  ;;  %3279 = vadd.xlane.f32.xlu1 %v3278_v25  ;;  %v11983_v25 = vld [vmem:[#allocation13_spill] sm:$0xff]  ;;  %6173 = vpow2.f32 %v2796_v2  ;;  %v2522_v40 = vsub.f32 %v11985_v5, %v8198_v29  ;;  %v2523_v48 = vsub.f32 %v11986_v50, %v8198_v29  ;;  %v11992_v5 = vld [vmem:[#allocation14_spill] sm:$0xff] }
 0x384   : > { %11971 = vst [vmem:[#allocation167_spill] sm:$0xff] %v8206_v24  ;;  %v8212_v51 = vpop.f32.mrb[99].mxu1  ;;  %v8214_v8 = vpop.f32.mrb[121].mxu0  ;;  %v2583_v53 = vsub.f32 %v11983_v25, %v8158_v10  ;;  %v8293_v2 = vmul.f32 0.35355338, %v8048_v42  ;;  %v2584_v50 = vsub.f32 %v11992_v5, %v8202_v54  ;;  %v11995_v42 = vld [vmem:[#allocation15_spill] sm:$0xff] }
 0x385   : > { %v8216_v32 = vpop.eup %6143  ;;  %v8232_v14 = vpop.f32.mrb[122].mxu0  ;;  %11979 = vst [vmem:[#allocation175_spill] sm:$0xff] %v8255_v62  ;;  %6175 = vpow2.f32 %v2918_v20  ;;  %v8296_v44 = vmul.f32 0.35355338, %v8070_v38  ;;  %v2922_v29 = vmul.f32 1.442695, %v2582_v23  ;;  %v3374_v38 = vadd.f32 %v8178_v52, %v8172_v15 }
 0x386   : > { %11972 = vst [vmem:[#allocation168_spill] sm:$0xff] %v8216_v32  ;;  %v8226_v39 = vpop.eup %6145  ;;  %v8230_v4 = vpop.xlane.xlu1 %2247  ;;  %11989 = vst [vmem:[#allocation17_spill] sm:$0xff] %v8293_v2  ;;  %6177 = vpow2.f32 %v2920_v57  ;;  %v2804_v61 = vmul.f32 1.442695, %v2523_v48  ;;  %v2926_v15 = vmul.f32 1.442695, %v2584_v50 }
 0x387   : > { %11975 = vst [vmem:[#allocation171_spill] sm:$0xff] %v8226_v39  ;;  %v8234_v17 = vpop.eup %6147  ;;  %v8240_v58 = vpop.xlane.xlu0 %2154  ;;  %3282 = vadd.xlane.f32.xlu0 %v3281_v33  ;;  %v2345_v33 = vmax.f32 %v8255_v62, %v8258_v36  ;;  %2343 = vmax.xlane.f32.xlu1 %v2342_v21  ;;  %11990 = vst [vmem:[#allocation178_spill] sm:$0xff] %v8296_v44  ;;  %6179 = vpow2.f32 %v2798_v1  ;;  %v2924_v21 = vmul.f32 1.442695, %v2583_v53  ;;  %v2802_v62 = vmul.f32 1.442695, %v2522_v40 }
 0x388   : > { %11976 = vst [vmem:[#allocation172_spill] sm:$0xff] %v8234_v17  ;;  %v8242_v0 = vpop.f32.mrb[123].mxu0  ;;  %v8244_v31 = vpop.eup %6149  ;;  %v2585_v36 = vsub.f32 %v11995_v42, %v8202_v54  ;;  %6181 = vpow2.f32 %v2800_v27  ;;  %v2438_v54 = vmax.f32 %v8293_v2, %v8296_v44  ;;  %v8330_v42 = vmul.f32 0.35355338, %v8098_v43  ;;  %v12005_v44 = vld [vmem:[#allocation21_spill] sm:$0xff]  ;;  %v12006_v43 = vld [vmem:[#allocation18_spill] sm:$0xff] }
 0x389   : > { %11977 = vst [vmem:[#allocation173_spill] sm:$0xff] %v8244_v31  ;;  %v8248_v11 = vpop.f32.mrb[100].mxu1  ;;  %v8250_v49 = vpop.eup %6151  ;;  %v3377_v40 = vadd.f32 %v8226_v39, %v8216_v32  ;;  %6183 = vpow2.f32 %v2922_v29  ;;  %v2525_v2 = vsub.f32 %v12005_v44, %v8240_v58  ;;  %v2586_v52 = vsub.f32 %v12006_v43, %v8230_v4  ;;  %v12009_v50 = vld [vmem:[#allocation19_spill] sm:$0xff] }
 0x38a   : > { %11978 = vst [vmem:[#allocation174_spill] sm:$0xff] %v8250_v49  ;;  %v8262_v3 = vpop.f32.mrb[101].mxu1  ;;  %v8264_v22 = vpop.f32.mrb[124].mxu0  ;;  %12001 = vst [vmem:[#allocation183_spill] sm:$0xff] %v8330_v42 }
 0x38b   : > { %v8266_v63 = vpop.eup %6153  ;;  %v8270_v59 = vpop.xlane.xlu1 %2157  ;;  %2346 = vmax.xlane.f32.xlu0 %v2345_v33  ;;  %v8327_v33 = vmul.f32 0.35355338, %v8088_v12  ;;  %3375 = vadd.xlane.f32.xlu1 %v3374_v38  ;;  %6185 = vpow2.f32 %v2924_v21  ;;  %v2928_v38 = vmul.f32 1.442695, %v2585_v36 }
 0x38c   : > { %11981 = vst [vmem:[#allocation177_spill] sm:$0xff] %v8266_v63  ;;  %v8274_v9 = vpop.xlane.xlu0 %2250  ;;  %v8276_v13 = vpop.f32.mrb[102].mxu1 }
 0x38d   : > { %v8278_v16 = vpop.eup %6155  ;;  %v8284_v19 = vpop.f32.mrb[103].mxu1  ;;  %12000 = vst [vmem:[#allocation182_spill] sm:$0xff] %v8327_v33  ;;  %6187 = vpow2.f32 %v2802_v62  ;;  %v8365_v62 = vmul.f32 0.35355338, %v8104_v30  ;;  %v12020_v30 = vld [vmem:[#allocation22_spill] sm:$0xff] }
 0x38e   : > { %11984 = vst [vmem:[#allocation12_spill] sm:$0xff] %v8278_v16  ;;  %v8286_v28 = vpop.f32.mrb[125].mxu0  ;;  %v8288_v10 = vpop.eup %6157  ;;  %6189 = vpow2.f32 %v2804_v61 }
 0x38f   : > { %11987 = vst [vmem:[#allocation13_spill] sm:$0xff] %v8286_v28  ;;  %11988 = vst [vmem:[#allocation16_spill] sm:$0xff] %v8288_v10  ;;  %v8298_v25 = vpop.eup %6159  ;;  %v8302_v56 = vpop.xlane.xlu1 %2253  ;;  %3378 = vadd.xlane.f32.xlu0 %v3377_v40  ;;  %v2441_v40 = vmax.f32 %v8327_v33, %v8330_v42  ;;  %2439 = vmax.xlane.f32.xlu1 %v2438_v54  ;;  %6191 = vpow2.f32 %v2926_v15  ;;  %v2930_v54 = vmul.f32 1.442695, %v2586_v52 }
 0x390   : > { %11991 = vst [vmem:[#allocation179_spill] sm:$0xff] %v8298_v25  ;;  %v8304_v20 = vpop.f32.mrb[126].mxu0  ;;  %v8306_v41 = vpop.eup %6161  ;;  %12014 = vst [vmem:[#allocation188_spill] sm:$0xff] %v8365_v62  ;;  %6193 = vpow2.f32 %v2928_v38  ;;  %v2588_v42 = vsub.f32 %v12020_v30, %v8274_v9 }
 0x391   : > { %11993 = vst [vmem:[#allocation14_spill] sm:$0xff] %v8304_v20  ;;  %11994 = vst [vmem:[#allocation180_spill] sm:$0xff] %v8306_v41  ;;  %v8312_v57 = vpop.xlane.xlu0 %2160  ;;  %v8314_v23 = vpop.f32.mrb[127].mxu0  ;;  %v11997_v20 = vld [vmem:[#allocation20_spill] sm:$0xff] }
 0x392   : > { %v8316_v5 = vpop.eup %6163  ;;  %v2524_v1 = vsub.f32 %v11997_v20, %v8240_v58  ;;  %v8320_v53 = vpop.f32.mrb[104].mxu1  ;;  %v12010_v58 = vld [vmem:[#allocation24_spill] sm:$0xff] }
 0x393   : > { %11996 = vst [vmem:[#allocation15_spill] sm:$0xff] %v8316_v5  ;;  %11998 = vst [vmem:[#allocation20_spill] sm:$0xff] %v8320_v53  ;;  %v8322_v28 = vpop.eup %6165  ;;  %v8334_v48 = vpop.f32.mrb[105].mxu1  ;;  %v2526_v44 = vsub.f32 %v12010_v58, %v8270_v59  ;;  %v12017_v58 = vld [vmem:[#allocation25_spill] sm:$0xff]  ;;  %2442 = vmax.xlane.f32.xlu0 %v2441_v40  ;;  %v8399_v40 = vmul.f32 0.35355338, %v8132_v45 }
 0x394   : > { %11999 = vst [vmem:[#allocation181_spill] sm:$0xff] %v8322_v28  ;;  %12002 = vst [vmem:[#allocation184_spill] sm:$0xff] %v8334_v48  ;;  %v8336_v27 = vpop.f32.mrb[128].mxu0  ;;  %v8338_v20 = vpop.eup %6167  ;;  %v2806_v29 = vmul.f32 1.442695, %v2524_v1  ;;  %v2587_v48 = vsub.f32 %v12009_v50, %v8230_v4 }
 0x395   : > { %12003 = vst [vmem:[#allocation185_spill] sm:$0xff] %v8336_v27  ;;  %12004 = vst [vmem:[#allocation186_spill] sm:$0xff] %v8338_v20  ;;  %v8342_v12 = vpop.xlane.xlu1 %2163  ;;  %v8346_v32 = vpop.xlane.xlu0 %2256  ;;  %v8368_v1 = vmul.f32 0.35355338, %v8118_v35  ;;  %v2808_v50 = vmul.f32 1.442695, %v2525_v2  ;;  %v3284_v35 = vadd.f32 %v8206_v24, %v8194_v34 }
 0x396   : > { %v8348_v39 = vpop.f32.mrb[106].mxu1  ;;  %v8350_v27 = vpop.eup %6169  ;;  %6195 = vpow2.f32 %v2806_v29  ;;  %v2810_v33 = vmul.f32 1.442695, %v2526_v44  ;;  %12026 = vst [vmem:[#allocation194_spill] sm:$0xff] %v8399_v40  ;;  %v8402_v34 = vmul.f32 0.35355338, %v8140_v37 }
 0x397   : > { %12007 = vst [vmem:[#allocation21_spill] sm:$0xff] %v8348_v39  ;;  %12008 = vst [vmem:[#allocation18_spill] sm:$0xff] %v8350_v27  ;;  %v8356_v21 = vpop.f32.mrb[107].mxu1  ;;  %v8358_v36 = vpop.f32.mrb[129].mxu0  ;;  %v2348_v30 = vmax.f32 %v8365_v62, %v8368_v1  ;;  %3285 = vadd.xlane.f32.xlu1 %v3284_v35  ;;  %6197 = vpow2.f32 %v2808_v50  ;;  %v2934_v37 = vmul.f32 1.442695, %v2588_v42 }
 0x398   : > { %12011 = vst [vmem:[#allocation19_spill] sm:$0xff] %v8356_v21  ;;  %12012 = vst [vmem:[#allocation24_spill] sm:$0xff] %v8358_v36  ;;  %v8360_v43 = vpop.eup %6171  ;;  %v2527_v36 = vsub.f32 %v12017_v58, %v8270_v59  ;;  %v8376_v61 = vpop.f32.mrb[130].mxu0  ;;  %v2932_v58 = vmul.f32 1.442695, %v2587_v48  ;;  %v3287_v48 = vadd.f32 %v8244_v31, %v8234_v17  ;;  %6199 = vpow2.f32 %v2930_v54  ;;  %v12032_v35 = vld [vmem:[#allocation29_spill] sm:$0xff] }
 0x399   : > { %12013 = vst [vmem:[#allocation187_spill] sm:$0xff] %v8360_v43  ;;  %12015 = vst [vmem:[#allocation189_spill] sm:$0xff] %v8368_v1  ;;  %v8370_v4 = vpop.eup %6173  ;;  %v8374_v21 = vpop.xlane.xlu1 %2259  ;;  %v12031_v1 = vld [vmem:[#allocation28_spill] sm:$0xff]  ;;  %v2529_v24 = vsub.f32 %v12032_v35, %v8312_v57 }
 0x39a   : > { %12016 = vst [vmem:[#allocation190_spill] sm:$0xff] %v8370_v4  ;;  %12018 = vst [vmem:[#allocation25_spill] sm:$0xff] %v8376_v61  ;;  %v8378_v39 = vpop.eup %6175  ;;  %v8384_v15 = vpop.xlane.xlu0 %2166  ;;  %v12023_v61 = vld [vmem:[#allocation23_spill] sm:$0xff]  ;;  %v2528_v62 = vsub.f32 %v12031_v1, %v8312_v57  ;;  %3288 = vadd.xlane.f32.xlu0 %v3287_v48  ;;  %6201 = vpow2.f32 %v2932_v58  ;;  %v2351_v48 = vmax.f32 %v8399_v40, %v8402_v34  ;;  %v8437_v58 = vmul.f32 0.35355338, %v8120_v18  ;;  %v12046_v18 = vld [vmem:[#allocation33_spill] sm:$0xff] }
 0x39b   : > { %12019 = vst [vmem:[#allocation191_spill] sm:$0xff] %v8378_v39  ;;  %v8386_v2 = vpop.f32.mrb[131].mxu0  ;;  %v8388_v59 = vpop.eup %6177  ;;  %v2589_v38 = vsub.f32 %v12023_v61, %v8274_v9  ;;  %12027 = vst [vmem:[#allocation195_spill] sm:$0xff] %v8402_v34  ;;  %v2812_v61 = vmul.f32 1.442695, %v2527_v36  ;;  %v12035_v36 = vld [vmem:[#allocation26_spill] sm:$0xff]  ;;  %6203 = vpow2.f32 %v2810_v33  ;;  %2349 = vmax.xlane.f32.xlu1 %v2348_v30  ;;  %v2531_v34 = vsub.f32 %v12046_v18, %v8342_v12 }
 0x39c   : > { %12021 = vst [vmem:[#allocation22_spill] sm:$0xff] %v8386_v2  ;;  %12022 = vst [vmem:[#allocation192_spill] sm:$0xff] %v8388_v59  ;;  %v8392_v52 = vpop.f32.mrb[108].mxu1  ;;  %v8394_v53 = vpop.eup %6179  ;;  %v12036_v1 = vld [vmem:[#allocation27_spill] sm:$0xff]  ;;  %v2816_v30 = vmul.f32 1.442695, %v2529_v24 }
 0x39d   : > { %12024 = vst [vmem:[#allocation23_spill] sm:$0xff] %v8392_v52  ;;  %12025 = vst [vmem:[#allocation193_spill] sm:$0xff] %v8394_v53  ;;  %v8406_v29 = vpop.f32.mrb[109].mxu1  ;;  %v8408_v9 = vpop.f32.mrb[132].mxu0  ;;  %v2936_v50 = vmul.f32 1.442695, %v2589_v38  ;;  %v2591_v52 = vsub.f32 %v12036_v1, %v8302_v56  ;;  %6205 = vpow2.f32 %v2812_v61 }
 0x39e   : > { %12028 = vst [vmem:[#allocation196_spill] sm:$0xff] %v8406_v29  ;;  %12029 = vst [vmem:[#allocation197_spill] sm:$0xff] %v8408_v9  ;;  %v8410_v44 = vpop.eup %6181  ;;  %v8414_v45 = vpop.xlane.xlu1 %2169  ;;  %v2590_v29 = vsub.f32 %v12035_v36, %v8302_v56  ;;  %v8440_v38 = vmul.f32 0.35355338, %v8142_v60  ;;  %v2814_v56 = vmul.f32 1.442695, %v2528_v62  ;;  %6207 = vpow2.f32 %v2934_v37  ;;  %2352 = vmax.xlane.f32.xlu0 %v2351_v48 }
 0x39f   : > { %12030 = vst [vmem:[#allocation198_spill] sm:$0xff] %v8410_v44  ;;  %v8418_v17 = vpop.xlane.xlu0 %2262  ;;  %v8420_v31 = vpop.f32.mrb[110].mxu1  ;;  %12040 = vst [vmem:[#allocation200_spill] sm:$0xff] %v8437_v58  ;;  %v12043_v36 = vld [vmem:[#allocation32_spill] sm:$0xff]  ;;  %v3380_v60 = vadd.f32 %v8266_v63, %v8250_v49  ;;  %6209 = vpow2.f32 %v2936_v50  ;;  %v8471_v48 = vmul.f32 0.35355338, %v8160_v55 }
 0x3a0   : > { %12033 = vst [vmem:[#allocation28_spill] sm:$0xff] %v8420_v31  ;;  %v8422_v9 = vpop.eup %6183  ;;  %v8428_v54 = vpop.f32.mrb[111].mxu1  ;;  %12041 = vst [vmem:[#allocation201_spill] sm:$0xff] %v8440_v38  ;;  %v2530_v1 = vsub.f32 %v12043_v36, %v8342_v12  ;;  %v2938_v40 = vmul.f32 1.442695, %v2590_v29  ;;  %v12048_v31 = vld [vmem:[#allocation30_spill] sm:$0xff]  ;;  %v2444_v12 = vmax.f32 %v8437_v58, %v8440_v38  ;;  %6211 = vpow2.f32 %v2814_v56 }
 0x3a1   : > { %12034 = vst [vmem:[#allocation29_spill] sm:$0xff] %v8422_v9  ;;  %12037 = vst [vmem:[#allocation26_spill] sm:$0xff] %v8428_v54  ;;  %v8430_v42 = vpop.f32.mrb[133].mxu0  ;;  %v8432_v57 = vpop.eup %6185  ;;  %v2592_v37 = vsub.f32 %v12048_v31, %v8346_v32  ;;  %3381 = vadd.xlane.f32.xlu1 %v3380_v60  ;;  %v8474_v18 = vmul.f32 0.35355338, %v8170_v6  ;;  %v12056_v38 = vld [vmem:[#allocation31_spill] sm:$0xff]  ;;  %6213 = vpow2.f32 %v2816_v30 }
 0x3a2   : > { %12038 = vst [vmem:[#allocation27_spill] sm:$0xff] %v8430_v42  ;;  %12039 = vst [vmem:[#allocation199_spill] sm:$0xff] %v8432_v57  ;;  %v8442_v35 = vpop.eup %6187  ;;  %v8446_v42 = vpop.xlane.xlu1 %2265  ;;  %v2818_v49 = vmul.f32 1.442695, %v2530_v1  ;;  %v2593_v58 = vsub.f32 %v12056_v38, %v8346_v32  ;;  %v2820_v60 = vmul.f32 1.442695, %v2531_v34  ;;  %6215 = vpow2.f32 %v2938_v40 }
 0x3a3   : > { %12042 = vst [vmem:[#allocation202_spill] sm:$0xff] %v8442_v35  ;;  %v8448_v33 = vpop.f32.mrb[134].mxu0  ;;  %v8450_v54 = vpop.eup %6189  ;;  %12051 = vst [vmem:[#allocation205_spill] sm:$0xff] %v8471_v48  ;;  %v12057_v6 = vld [vmem:[#allocation36_spill] sm:$0xff]  ;;  %v2942_v56 = vmul.f32 1.442695, %v2592_v37 }
 0x3a4   : > { %12044 = vst [vmem:[#allocation32_spill] sm:$0xff] %v8448_v33  ;;  %12045 = vst [vmem:[#allocation203_spill] sm:$0xff] %v8450_v54  ;;  %v8456_v61 = vpop.xlane.xlu0 %2172  ;;  %v8458_v62 = vpop.f32.mrb[135].mxu0  ;;  %v2940_v33 = vmul.f32 1.442695, %v2591_v52  ;;  %v3383_v52 = vadd.f32 %v8306_v41, %v8298_v25  ;;  %v2532_v63 = vsub.f32 %v12057_v6, %v8384_v15  ;;  %v12060_v1 = vld [vmem:[#allocation37_spill] sm:$0xff] }
 0x3a5   : > { %v8460_v36 = vpop.eup %6191  ;;  %v8464_v24 = vpop.f32.mrb[112].mxu1  ;;  %12052 = vst [vmem:[#allocation206_spill] sm:$0xff] %v8474_v18  ;;  %v12061_v32 = vld [vmem:[#allocation34_spill] sm:$0xff]  ;;  %2445 = vmax.xlane.f32.xlu1 %v2444_v12  ;;  %v8509_v40 = vmul.f32 0.35355338, %v8176_v26  ;;  %v12071_v26 = vld [vmem:[#allocation40_spill] sm:$0xff] }
 0x3a6   : > { %12047 = vst [vmem:[#allocation33_spill] sm:$0xff] %v8460_v36  ;;  %12049 = vst [vmem:[#allocation30_spill] sm:$0xff] %v8464_v24  ;;  %v8466_v2 = vpop.eup %6193  ;;  %v8478_v29 = vpop.f32.mrb[113].mxu1  ;;  %3384 = vadd.xlane.f32.xlu0 %v3383_v52  ;;  %v2594_v38 = vsub.f32 %v12061_v32, %v8374_v21  ;;  %6217 = vpow2.f32 %v2940_v33  ;;  %v2447_v52 = vmax.f32 %v8471_v48, %v8474_v18  ;;  %v8512_v37 = vmul.f32 0.35355338, %v8190_v7  ;;  %v12068_v32 = vld [vmem:[#allocation35_spill] sm:$0xff] }
 0x3a7   : > { %12050 = vst [vmem:[#allocation204_spill] sm:$0xff] %v8466_v2  ;;  %12053 = vst [vmem:[#allocation207_spill] sm:$0xff] %v8478_v29  ;;  %v8480_v31 = vpop.f32.mrb[136].mxu0  ;;  %v8482_v50 = vpop.eup %6195  ;;  %v2533_v29 = vsub.f32 %v12060_v1, %v8384_v15  ;;  %6219 = vpow2.f32 %v2818_v49  ;;  %v2944_v1 = vmul.f32 1.442695, %v2593_v58  ;;  %v2534_v18 = vsub.f32 %v12071_v26, %v8414_v45 }
 0x3a8   : > { %12054 = vst [vmem:[#allocation208_spill] sm:$0xff] %v8480_v31  ;;  %12055 = vst [vmem:[#allocation209_spill] sm:$0xff] %v8482_v50  ;;  %v8486_v55 = vpop.xlane.xlu1 %2175  ;;  %v8490_v25 = vpop.xlane.xlu0 %2268  ;;  %6221 = vpow2.f32 %v2820_v60  ;;  %v2822_v12 = vmul.f32 1.442695, %v2532_v63  ;;  %v3290_v7 = vadd.f32 %v8288_v10, %v8278_v16  ;;  %v2946_v48 = vmul.f32 1.442695, %v2594_v38 }
 0x3a9   : > { %v8492_v41 = vpop.f32.mrb[114].mxu1  ;;  %v8494_v31 = vpop.eup %6197  ;;  %12065 = vst [vmem:[#allocation211_spill] sm:$0xff] %v8509_v40  ;;  %12066 = vst [vmem:[#allocation212_spill] sm:$0xff] %v8512_v37  ;;  %6223 = vpow2.f32 %v2942_v56  ;;  %v2354_v26 = vmax.f32 %v8509_v40, %v8512_v37  ;;  %v8546_v16 = vmul.f32 0.35355338, %v8212_v51  ;;  %v12082_v37 = vld [vmem:[#allocation38_spill] sm:$0xff] }
 0x3aa   : > { %12058 = vst [vmem:[#allocation31_spill] sm:$0xff] %v8492_v41  ;;  %12059 = vst [vmem:[#allocation36_spill] sm:$0xff] %v8494_v31  ;;  %v8500_v30 = vpop.f32.mrb[115].mxu1  ;;  %v8502_v34 = vpop.f32.mrb[137].mxu0  ;;  %2448 = vmax.xlane.f32.xlu0 %v2447_v52  ;;  %v8543_v52 = vmul.f32 0.35355338, %v8204_v46  ;;  %3291 = vadd.xlane.f32.xlu1 %v3290_v7  ;;  %6225 = vpow2.f32 %v2944_v1  ;;  %v2596_v40 = vsub.f32 %v12082_v37, %v8418_v17 }
 0x3ab   : > { %12062 = vst [vmem:[#allocation37_spill] sm:$0xff] %v8500_v30  ;;  %12063 = vst [vmem:[#allocation34_spill] sm:$0xff] %v8502_v34  ;;  %v8504_v6 = vpop.eup %6199  ;;  %v2595_v34 = vsub.f32 %v12068_v32, %v8374_v21  ;;  %v8520_v33 = vpop.f32.mrb[138].mxu0  ;;  %v2824_v32 = vmul.f32 1.442695, %v2533_v29  ;;  %v3293_v29 = vadd.f32 %v8322_v28, %v8316_v5  ;;  %6227 = vpow2.f32 %v2822_v12  ;;  %v12083_v7 = vld [vmem:[#allocation39_spill] sm:$0xff] }
 0x3ac   : > { %12064 = vst [vmem:[#allocation210_spill] sm:$0xff] %v8504_v6  ;;  %v8514_v15 = vpop.eup %6201  ;;  %v8518_v30 = vpop.xlane.xlu1 %2271  ;;  %12069 = vst [vmem:[#allocation35_spill] sm:$0xff] %v8520_v33  ;;  %v12074_v33 = vld [vmem:[#allocation41_spill] sm:$0xff]  ;;  %v2826_v51 = vmul.f32 1.442695, %v2534_v18  ;;  %v2597_v10 = vsub.f32 %v12083_v7, %v8418_v17 }
 0x3ad   : > { %12067 = vst [vmem:[#allocation213_spill] sm:$0xff] %v8514_v15  ;;  %v8522_v41 = vpop.eup %6203  ;;  %v8528_v49 = vpop.xlane.xlu0 %2178  ;;  %v2535_v60 = vsub.f32 %v12074_v33, %v8414_v45  ;;  %12077 = vst [vmem:[#allocation217_spill] sm:$0xff] %v8543_v52  ;;  %v2948_v33 = vmul.f32 1.442695, %v2595_v34  ;;  %6229 = vpow2.f32 %v2824_v32  ;;  %v12086_v34 = vld [vmem:[#allocation44_spill] sm:$0xff]  ;;  %v12087_v37 = vld [vmem:[#allocation45_spill] sm:$0xff] }
 0x3ae   : > { %12070 = vst [vmem:[#allocation214_spill] sm:$0xff] %v8522_v41  ;;  %v8530_v58 = vpop.f32.mrb[139].mxu0  ;;  %v8532_v21 = vpop.eup %6205  ;;  %12078 = vst [vmem:[#allocation218_spill] sm:$0xff] %v8546_v16  ;;  %3294 = vadd.xlane.f32.xlu0 %v3293_v29  ;;  %6231 = vpow2.f32 %v2946_v48  ;;  %v2357_v29 = vmax.f32 %v8543_v52, %v8546_v16  ;;  %2355 = vmax.xlane.f32.xlu1 %v2354_v26  ;;  %v8581_v32 = vmul.f32 0.35355338, %v8192_v47  ;;  %v12097_v47 = vld [vmem:[#allocation43_spill] sm:$0xff] }
 0x3af   : > { %12072 = vst [vmem:[#allocation40_spill] sm:$0xff] %v8530_v58  ;;  %12073 = vst [vmem:[#allocation215_spill] sm:$0xff] %v8532_v21  ;;  %v8536_v63 = vpop.f32.mrb[116].mxu1  ;;  %v8538_v24 = vpop.eup %6207  ;;  %v2828_v1 = vmul.f32 1.442695, %v2535_v60  ;;  %6233 = vpow2.f32 %v2948_v33  ;;  %v2599_v16 = vsub.f32 %v12097_v47, %v8446_v42 }
 0x3b0   : > { %12075 = vst [vmem:[#allocation41_spill] sm:$0xff] %v8536_v63  ;;  %12076 = vst [vmem:[#allocation216_spill] sm:$0xff] %v8538_v24  ;;  %v8550_v56 = vpop.f32.mrb[117].mxu1  ;;  %v8552_v45 = vpop.f32.mrb[140].mxu0  ;;  %v2537_v63 = vsub.f32 %v12087_v37, %v8456_v61  ;;  %v8584_v60 = vmul.f32 0.35355338, %v8214_v8  ;;  %6235 = vpow2.f32 %v2826_v51  ;;  %v3386_v8 = vadd.f32 %v8350_v27, %v8338_v20 }
 0x3b1   : > { %12079 = vst [vmem:[#allocation219_spill] sm:$0xff] %v8550_v56  ;;  %12080 = vst [vmem:[#allocation220_spill] sm:$0xff] %v8552_v45  ;;  %v8554_v38 = vpop.eup %6209  ;;  %v8558_v46 = vpop.xlane.xlu1 %2181  ;;  %v2536_v56 = vsub.f32 %v12086_v34, %v8456_v61  ;;  %v2950_v61 = vmul.f32 1.442695, %v2596_v40  ;;  %v12094_v34 = vld [vmem:[#allocation42_spill] sm:$0xff]  ;;  %6237 = vpow2.f32 %v2828_v1 }
 0x3b2   : > { %12081 = vst [vmem:[#allocation221_spill] sm:$0xff] %v8554_v38  ;;  %v8562_v5 = vpop.xlane.xlu0 %2274  ;;  %v8564_v28 = vpop.f32.mrb[118].mxu1  ;;  %12091 = vst [vmem:[#allocation223_spill] sm:$0xff] %v8581_v32  ;;  %v2598_v37 = vsub.f32 %v12094_v34, %v8446_v42  ;;  %v2952_v26 = vmul.f32 1.442695, %v2597_v10  ;;  %2358 = vmax.xlane.f32.xlu0 %v2357_v29  ;;  %v2450_v42 = vmax.f32 %v8581_v32, %v8584_v60  ;;  %3387 = vadd.xlane.f32.xlu1 %v3386_v8 }
 0x3b3   : > { %12084 = vst [vmem:[#allocation38_spill] sm:$0xff] %v8564_v28  ;;  %v8566_v45 = vpop.eup %6211  ;;  %v8572_v12 = vpop.f32.mrb[119].mxu1  ;;  %12092 = vst [vmem:[#allocation224_spill] sm:$0xff] %v8584_v60  ;;  %v2830_v52 = vmul.f32 1.442695, %v2536_v56  ;;  %v12099_v28 = vld [vmem:[#allocation48_spill] sm:$0xff]  ;;  %6239 = vpow2.f32 %v2950_v61 }
 0x3b4   : > { %12085 = vst [vmem:[#allocation39_spill] sm:$0xff] %v8566_v45  ;;  %12088 = vst [vmem:[#allocation44_spill] sm:$0xff] %v8572_v12  ;;  %v8574_v18 = vpop.f32.mrb[141].mxu0  ;;  %v8576_v17 = vpop.eup %6213  ;;  %v2538_v51 = vsub.f32 %v12099_v28, %v8486_v55  ;;  %v8615_v29 = vmul.f32 0.35355338, %v8232_v14  ;;  %v12107_v60 = vld [vmem:[#allocation49_spill] sm:$0xff]  ;;  %6241 = vpow2.f32 %v2952_v26 }
 0x3b5   : > { %12089 = vst [vmem:[#allocation45_spill] sm:$0xff] %v8574_v18  ;;  %12090 = vst [vmem:[#allocation222_spill] sm:$0xff] %v8576_v17  ;;  %v8586_v7 = vpop.eup %6215  ;;  %v8590_v18 = vpop.xlane.xlu1 %2277  ;;  %v8618_v47 = vmul.f32 0.35355338, %v8242_v0  ;;  %v2954_v20 = vmul.f32 1.442695, %v2598_v37  ;;  %v2539_v32 = vsub.f32 %v12107_v60, %v8486_v55  ;;  %6243 = vpow2.f32 %v2830_v52 }
 0x3b6   : > { %12093 = vst [vmem:[#allocation225_spill] sm:$0xff] %v8586_v7  ;;  %v8592_v48 = vpop.f32.mrb[142].mxu0  ;;  %v8594_v12 = vpop.eup %6217  ;;  %12102 = vst [vmem:[#allocation228_spill] sm:$0xff] %v8615_v29  ;;  %v2956_v8 = vmul.f32 1.442695, %v2599_v16  ;;  %v12108_v0 = vld [vmem:[#allocation46_spill] sm:$0xff]  ;;  %2451 = vmax.xlane.f32.xlu1 %v2450_v42 }
 0x3b7   : > { %12095 = vst [vmem:[#allocation42_spill] sm:$0xff] %v8592_v48  ;;  %12096 = vst [vmem:[#allocation226_spill] sm:$0xff] %v8594_v12  ;;  %v8600_v33 = vpop.xlane.xlu0 %2184  ;;  %v8602_v40 = vpop.f32.mrb[143].mxu0  ;;  %v2832_v48 = vmul.f32 1.442695, %v2537_v63  ;;  %v3389_v63 = vadd.f32 %v8388_v59, %v8378_v39  ;;  %v2600_v27 = vsub.f32 %v12108_v0, %v8490_v25  ;;  %v12111_v37 = vld [vmem:[#allocation47_spill] sm:$0xff] }
 0x3b8   : > { %v8604_v34 = vpop.eup %6219  ;;  %v8608_v10 = vpop.f32.mrb[120].mxu1  ;;  %12103 = vst [vmem:[#allocation229_spill] sm:$0xff] %v8618_v47  ;;  %v2834_v61 = vmul.f32 1.442695, %v2538_v51  ;;  %v12112_v55 = vld [vmem:[#allocation52_spill] sm:$0xff] }
 0x3b9   : > { %12098 = vst [vmem:[#allocation43_spill] sm:$0xff] %v8604_v34  ;;  %12100 = vst [vmem:[#allocation48_spill] sm:$0xff] %v8608_v10  ;;  %v8610_v58 = vpop.eup %6221  ;;  %v8622_v56 = vpop.f32.mrb[121].mxu1  ;;  %3390 = vadd.xlane.f32.xlu0 %v3389_v63  ;;  %v2540_v60 = vsub.f32 %v12112_v55, %v8528_v49  ;;  %6245 = vpow2.f32 %v2832_v48  ;;  %v2453_v63 = vmax.f32 %v8615_v29, %v8618_v47  ;;  %v8653_v52 = vmul.f32 0.35355338, %v8248_v11  ;;  %v12119_v55 = vld [vmem:[#allocation53_spill] sm:$0xff] }
 0x3ba   : > { %12101 = vst [vmem:[#allocation227_spill] sm:$0xff] %v8610_v58  ;;  %12104 = vst [vmem:[#allocation230_spill] sm:$0xff] %v8622_v56  ;;  %v8624_v28 = vpop.f32.mrb[144].mxu0  ;;  %v8626_v1 = vpop.eup %6223  ;;  %v2601_v56 = vsub.f32 %v12111_v37, %v8490_v25  ;;  %v8656_v51 = vmul.f32 0.35355338, %v8262_v3  ;;  %6247 = vpow2.f32 %v2954_v20  ;;  %v12122_v11 = vld [vmem:[#allocation50_spill] sm:$0xff]  ;;  %v3296_v3 = vadd.f32 %v8370_v4, %v8360_v43 }
 0x3bb   : > { %12105 = vst [vmem:[#allocation231_spill] sm:$0xff] %v8624_v28  ;;  %12106 = vst [vmem:[#allocation232_spill] sm:$0xff] %v8626_v1  ;;  %v8630_v14 = vpop.xlane.xlu1 %2187  ;;  %v8634_v39 = vpop.xlane.xlu0 %2280  ;;  %v2836_v37 = vmul.f32 1.442695, %v2539_v32  ;;  %6249 = vpow2.f32 %v2956_v8  ;;  %v2958_v42 = vmul.f32 1.442695, %v2600_v27  ;;  %v2602_v47 = vsub.f32 %v12122_v11, %v8518_v30 }
 0x3bc   : > { %v8636_v59 = vpop.f32.mrb[122].mxu1  ;;  %v8638_v28 = vpop.eup %6225  ;;  %12116 = vst [vmem:[#allocation234_spill] sm:$0xff] %v8653_v52  ;;  %12117 = vst [vmem:[#allocation235_spill] sm:$0xff] %v8656_v51  ;;  %6251 = vpow2.f32 %v2834_v61  ;;  %v2838_v29 = vmul.f32 1.442695, %v2540_v60  ;;  %v2360_v11 = vmax.f32 %v8653_v52, %v8656_v51  ;;  %3297 = vadd.xlane.f32.xlu1 %v3296_v3  ;;  %v12133_v51 = vld [vmem:[#allocation56_spill] sm:$0xff] }
 0x3bd   : > { %12109 = vst [vmem:[#allocation49_spill] sm:$0xff] %v8636_v59  ;;  %12110 = vst [vmem:[#allocation46_spill] sm:$0xff] %v8638_v28  ;;  %v8644_v26 = vpop.f32.mrb[123].mxu1  ;;  %v8646_v16 = vpop.f32.mrb[145].mxu0  ;;  %2454 = vmax.xlane.f32.xlu0 %v2453_v63  ;;  %v8687_v63 = vmul.f32 0.35355338, %v8276_v13  ;;  %6253 = vpow2.f32 %v2836_v37  ;;  %v2542_v52 = vsub.f32 %v12133_v51, %v8558_v46 }
 0x3be   : > { %12113 = vst [vmem:[#allocation47_spill] sm:$0xff] %v8644_v26  ;;  %12114 = vst [vmem:[#allocation52_spill] sm:$0xff] %v8646_v16  ;;  %v8648_v0 = vpop.eup %6227  ;;  %v2541_v16 = vsub.f32 %v12119_v55, %v8528_v49  ;;  %v8664_v48 = vpop.f32.mrb[146].mxu0  ;;  %v2960_v55 = vmul.f32 1.442695, %v2601_v56  ;;  %v3299_v56 = vadd.f32 %v8410_v44, %v8394_v53  ;;  %6255 = vpow2.f32 %v2958_v42  ;;  %v12134_v3 = vld [vmem:[#allocation57_spill] sm:$0xff] }
 0x3bf   : > { %12115 = vst [vmem:[#allocation233_spill] sm:$0xff] %v8648_v0  ;;  %v8658_v25 = vpop.eup %6229  ;;  %v8662_v26 = vpop.xlane.xlu1 %2283  ;;  %12120 = vst [vmem:[#allocation53_spill] sm:$0xff] %v8664_v48  ;;  %v12125_v48 = vld [vmem:[#allocation51_spill] sm:$0xff]  ;;  %v8690_v43 = vmul.f32 0.35355338, %v8284_v19  ;;  %v2543_v4 = vsub.f32 %v12134_v3, %v8558_v46 }
 0x3c0   : > { %12118 = vst [vmem:[#allocation236_spill] sm:$0xff] %v8658_v25  ;;  %v8666_v59 = vpop.eup %6231  ;;  %v8672_v20 = vpop.xlane.xlu0 %2190  ;;  %v2603_v8 = vsub.f32 %v12125_v48, %v8518_v30  ;;  %12128 = vst [vmem:[#allocation240_spill] sm:$0xff] %v8687_v63  ;;  %v2840_v48 = vmul.f32 1.442695, %v2541_v16  ;;  %v2962_v19 = vmul.f32 1.442695, %v2602_v47  ;;  %6257 = vpow2.f32 %v2960_v55  ;;  %2361 = vmax.xlane.f32.xlu1 %v2360_v11 }
 0x3c1   : > { %12121 = vst [vmem:[#allocation237_spill] sm:$0xff] %v8666_v59  ;;  %v8674_v32 = vpop.f32.mrb[147].mxu0  ;;  %v8676_v49 = vpop.eup %6233  ;;  %12129 = vst [vmem:[#allocation241_spill] sm:$0xff] %v8690_v43  ;;  %3300 = vadd.xlane.f32.xlu0 %v3299_v56  ;;  %v12137_v16 = vld [vmem:[#allocation54_spill] sm:$0xff]  ;;  %v12138_v51 = vld [vmem:[#allocation55_spill] sm:$0xff]  ;;  %6259 = vpow2.f32 %v2838_v29  ;;  %v2363_v56 = vmax.f32 %v8687_v63, %v8690_v43 }
 0x3c2   : > { %12123 = vst [vmem:[#allocation50_spill] sm:$0xff] %v8674_v32  ;;  %12124 = vst [vmem:[#allocation238_spill] sm:$0xff] %v8676_v49  ;;  %v8680_v27 = vpop.f32.mrb[124].mxu1  ;;  %v8682_v10 = vpop.eup %6235  ;;  %v2964_v37 = vmul.f32 1.442695, %v2603_v8  ;;  %v12143_v8 = vld [vmem:[#allocation13_spill] sm:$0xff]  ;;  %6261 = vpow2.f32 %v2840_v48 }
 0x3c3   : > { %12126 = vst [vmem:[#allocation51_spill] sm:$0xff] %v8680_v27  ;;  %12127 = vst [vmem:[#allocation239_spill] sm:$0xff] %v8682_v10  ;;  %v8694_v61 = vpop.f32.mrb[125].mxu1  ;;  %v8696_v30 = vpop.f32.mrb[148].mxu0  ;;  %v2605_v27 = vsub.f32 %v12138_v51, %v8562_v5  ;;  %v8725_v55 = vmul.f32 0.35355338, %v8264_v22  ;;  %6263 = vpow2.f32 %v2962_v19 }
 0x3c4   : > { %12130 = vst [vmem:[#allocation242_spill] sm:$0xff] %v8694_v61  ;;  %12131 = vst [vmem:[#allocation243_spill] sm:$0xff] %v8696_v30  ;;  %v8698_v60 = vpop.eup %6237  ;;  %v8702_v13 = vpop.xlane.xlu1 %2193  ;;  %v2604_v61 = vsub.f32 %v12137_v16, %v8562_v5  ;;  %v8728_v3 = vmul.f32 0.35355338, %v12143_v8  ;;  %v2842_v5 = vmul.f32 1.442695, %v2542_v52  ;;  %v3392_v8 = vadd.f32 %v8432_v57, %v8422_v9 }
 0x3c5   : > { %12132 = vst [vmem:[#allocation244_spill] sm:$0xff] %v8698_v60  ;;  %v8706_v53 = vpop.xlane.xlu0 %2286  ;;  %v8708_v44 = vpop.f32.mrb[126].mxu1  ;;  %12142 = vst [vmem:[#allocation246_spill] sm:$0xff] %v8725_v55  ;;  %v12146_v51 = vld [vmem:[#allocation60_spill] sm:$0xff]  ;;  %v2844_v11 = vmul.f32 1.442695, %v2543_v4  ;;  %2364 = vmax.xlane.f32.xlu0 %v2363_v56  ;;  %6265 = vpow2.f32 %v2964_v37  ;;  %v3395_v37 = vadd.f32 %v8466_v2, %v8460_v36 }
 0x3c6   : > { %12135 = vst [vmem:[#allocation56_spill] sm:$0xff] %v8708_v44  ;;  %v8710_v30 = vpop.eup %6239  ;;  %v8716_v42 = vpop.f32.mrb[127].mxu1  ;;  %12144 = vst [vmem:[#allocation13_spill] sm:$0xff] %v8728_v3  ;;  %v12149_v22 = vld [vmem:[#allocation61_spill] sm:$0xff]  ;;  %v2966_v63 = vmul.f32 1.442695, %v2604_v61  ;;  %3393 = vadd.xlane.f32.xlu1 %v3392_v8  ;;  %6267 = vpow2.f32 %v2842_v5 }
 0x3c7   : > { %12136 = vst [vmem:[#allocation57_spill] sm:$0xff] %v8710_v30  ;;  %12139 = vst [vmem:[#allocation54_spill] sm:$0xff] %v8716_v42  ;;  %v8718_v47 = vpop.f32.mrb[149].mxu0  ;;  %v8720_v46 = vpop.eup %6241  ;;  %v2545_v43 = vsub.f32 %v12149_v22, %v8600_v33  ;;  %v12152_v32 = vld [vmem:[#allocation58_spill] sm:$0xff]  ;;  %v8760_v56 = vmul.f32 0.35355338, %v8314_v23  ;;  %6269 = vpow2.f32 %v2844_v11 }
 0x3c8   : > { %12140 = vst [vmem:[#allocation55_spill] sm:$0xff] %v8718_v47  ;;  %12141 = vst [vmem:[#allocation245_spill] sm:$0xff] %v8720_v46  ;;  %v8730_v16 = vpop.eup %6243  ;;  %v2544_v47 = vsub.f32 %v12146_v51, %v8600_v33  ;;  %v8734_v42 = vpop.xlane.xlu1 %2289  ;;  %v2606_v19 = vsub.f32 %v12152_v32, %v8590_v18  ;;  %v2456_v33 = vmax.f32 %v8725_v55, %v8728_v3  ;;  %v12154_v22 = vld [vmem:[#allocation14_spill] sm:$0xff]  ;;  %v12158_v32 = vld [vmem:[#allocation59_spill] sm:$0xff]  ;;  %6271 = vpow2.f32 %v2966_v63 }
 0x3c9   : > { %12145 = vst [vmem:[#allocation247_spill] sm:$0xff] %v8730_v16  ;;  %v8736_v29 = vpop.f32.mrb[150].mxu0  ;;  %v8738_v44 = vpop.eup %6245  ;;  %v8757_v9 = vmul.f32 0.35355338, %v12154_v22  ;;  %12156 = vst [vmem:[#allocation250_spill] sm:$0xff] %v8760_v56  ;;  %v2607_v57 = vsub.f32 %v12158_v32, %v8590_v18  ;;  %v12159_v22 = vld [vmem:[#allocation64_spill] sm:$0xff]  ;;  %3396 = vadd.xlane.f32.xlu0 %v3395_v37 }
 0x3ca   : > { %12147 = vst [vmem:[#allocation60_spill] sm:$0xff] %v8736_v29  ;;  %12148 = vst [vmem:[#allocation248_spill] sm:$0xff] %v8738_v44  ;;  %v8744_v48 = vpop.xlane.xlu0 %2196  ;;  %v8746_v52 = vpop.f32.mrb[151].mxu0  ;;  %v2968_v29 = vmul.f32 1.442695, %v2605_v27  ;;  %v2546_v8 = vsub.f32 %v12159_v22, %v8630_v14  ;;  %v12161_v5 = vld [vmem:[#allocation65_spill] sm:$0xff]  ;;  %2457 = vmax.xlane.f32.xlu1 %v2456_v33 }
 0x3cb   : > { %12150 = vst [vmem:[#allocation61_spill] sm:$0xff] %v8746_v52  ;;  %v8748_v51 = vpop.eup %6247  ;;  %12155 = vst [vmem:[#allocation14_spill] sm:$0xff] %v8757_v9  ;;  %v2846_v27 = vmul.f32 1.442695, %v2544_v47  ;;  %v2848_v3 = vmul.f32 1.442695, %v2545_v43  ;;  %v2547_v47 = vsub.f32 %v12161_v5, %v8630_v14  ;;  %v2459_v43 = vmax.f32 %v8757_v9, %v8760_v56 }
 0x3cc   : > { %12151 = vst [vmem:[#allocation249_spill] sm:$0xff] %v8748_v51  ;;  %v8752_v4 = vpop.eup %6249  ;;  %v8768_v52 = vpop.xlane.xlu1 %2199  ;;  %v2970_v36 = vmul.f32 1.442695, %v2606_v19  ;;  %v12162_v2 = vld [vmem:[#allocation62_spill] sm:$0xff]  ;;  %6273 = vpow2.f32 %v2968_v29  ;;  %v12164_v11 = vld [vmem:[#allocation20_spill] sm:$0xff]  ;;  %v12169_v19 = vld [vmem:[#allocation63_spill] sm:$0xff] }
 0x3cd   : > { %12153 = vst [vmem:[#allocation58_spill] sm:$0xff] %v8752_v4  ;;  %v8764_v61 = vpop.eup %6251  ;;  %v2608_v18 = vsub.f32 %v12162_v2, %v8634_v39  ;;  %v8785_v37 = vmul.f32 0.35355338, %v12164_v11  ;;  %v12166_v22 = vld [vmem:[#allocation184_spill] sm:$0xff]  ;;  %6275 = vpow2.f32 %v2846_v27  ;;  %v2972_v14 = vmul.f32 1.442695, %v2607_v57  ;;  %2460 = vmax.xlane.f32.xlu0 %v2459_v43 }
 0x3ce   : > { %12157 = vst [vmem:[#allocation251_spill] sm:$0xff] %v8764_v61  ;;  %v8772_v23 = vpop.xlane.xlu0 %2292  ;;  %v8774_v55 = vpop.eup %6253  ;;  %v2609_v2 = vsub.f32 %v12169_v19, %v8634_v39  ;;  %6277 = vpow2.f32 %v2848_v3  ;;  %v2850_v56 = vmul.f32 1.442695, %v2546_v8  ;;  %v12171_v33 = vld [vmem:[#allocation68_spill] sm:$0xff]  ;;  %v2852_v57 = vmul.f32 1.442695, %v2547_v47 }
 0x3cf   : > { %12160 = vst [vmem:[#allocation59_spill] sm:$0xff] %v8774_v55  ;;  %v8780_v32 = vpop.eup %6255  ;;  %12165 = vst [vmem:[#allocation65_spill] sm:$0xff] %v8785_v37  ;;  %v8788_v55 = vmul.f32 0.35355338, %v12166_v22  ;;  %v2548_v11 = vsub.f32 %v12171_v33, %v8672_v20  ;;  %v3302_v22 = vadd.f32 %v8450_v54, %v8442_v35  ;;  %6279 = vpow2.f32 %v2970_v36  ;;  %v12173_v19 = vld [vmem:[#allocation69_spill] sm:$0xff]  ;;  %v12177_v35 = vld [vmem:[#allocation19_spill] sm:$0xff] }
 0x3d0   : > { %12163 = vst [vmem:[#allocation64_spill] sm:$0xff] %v8780_v32  ;;  %v8790_v63 = vpop.eup %6257  ;;  %v8794_v5 = vpop.xlane.xlu1 %2295  ;;  %v2974_v39 = vmul.f32 1.442695, %v2608_v18  ;;  %v2549_v61 = vsub.f32 %v12173_v19, %v8672_v20  ;;  %v12175_v8 = vld [vmem:[#allocation21_spill] sm:$0xff]  ;;  %v8816_v43 = vmul.f32 0.35355338, %v12177_v35  ;;  %v3305_v36 = vadd.f32 %v8494_v31, %v8482_v50 }
 0x3d1   : > { %12167 = vst [vmem:[#allocation62_spill] sm:$0xff] %v8788_v55  ;;  %12168 = vst [vmem:[#allocation20_spill] sm:$0xff] %v8790_v63  ;;  %v8796_v29 = vpop.eup %6259  ;;  %v2366_v3 = vmax.f32 %v8785_v37, %v8788_v55  ;;  %v8813_v33 = vmul.f32 0.35355338, %v12175_v8  ;;  %3303 = vadd.xlane.f32.xlu1 %v3302_v22  ;;  %6281 = vpow2.f32 %v2972_v14  ;;  %v2976_v18 = vmul.f32 1.442695, %v2609_v2 }
 0x3d2   : > { %12170 = vst [vmem:[#allocation184_spill] sm:$0xff] %v8796_v29  ;;  %v8802_v9 = vpop.xlane.xlu0 %2202  ;;  %v8804_v27 = vpop.eup %6261  ;;  %12178 = vst [vmem:[#allocation21_spill] sm:$0xff] %v8816_v43  ;;  %v12180_v20 = vld [vmem:[#allocation66_spill] sm:$0xff]  ;;  %6283 = vpow2.f32 %v2850_v56  ;;  %v2854_v55 = vmul.f32 1.442695, %v2548_v11  ;;  %v12181_v8 = vld [vmem:[#allocation67_spill] sm:$0xff]  ;;  %3306 = vadd.xlane.f32.xlu0 %v3305_v36 }
 0x3d3   : > { %12172 = vst [vmem:[#allocation63_spill] sm:$0xff] %v8804_v27  ;;  %v8808_v29 = vpop.eup %6263  ;;  %12176 = vst [vmem:[#allocation69_spill] sm:$0xff] %v8813_v33  ;;  %v2610_v19 = vsub.f32 %v12180_v20, %v8662_v26  ;;  %v2611_v37 = vsub.f32 %v12181_v8, %v8662_v26  ;;  %6285 = vpow2.f32 %v2852_v57  ;;  %v2856_v50 = vmul.f32 1.442695, %v2549_v61  ;;  %v12183_v14 = vld [vmem:[#allocation72_spill] sm:$0xff]  ;;  %v12184_v31 = vld [vmem:[#allocation73_spill] sm:$0xff] }
 0x3d4   : > { %12174 = vst [vmem:[#allocation68_spill] sm:$0xff] %v8808_v29  ;;  %v8820_v47 = vpop.eup %6265  ;;  %v8824_v54 = vpop.xlane.xlu1 %2205  ;;  %v2550_v2 = vsub.f32 %v12183_v14, %v8702_v13  ;;  %v2551_v20 = vsub.f32 %v12184_v31, %v8702_v13  ;;  %6287 = vpow2.f32 %v2974_v39  ;;  %v2369_v56 = vmax.f32 %v8813_v33, %v8816_v43  ;;  %v12186_v26 = vld [vmem:[#allocation185_spill] sm:$0xff]  ;;  %v12188_v36 = vld [vmem:[#allocation24_spill] sm:$0xff]  ;;  %v12191_v14 = vld [vmem:[#allocation70_spill] sm:$0xff] }
 0x3d5   : > { %12179 = vst [vmem:[#allocation19_spill] sm:$0xff] %v8820_v47  ;;  %v8830_v22 = vpop.eup %6267  ;;  %2367 = vmax.xlane.f32.xlu1 %v2366_v3  ;;  %v8841_v11 = vmul.f32 0.35355338, %v12186_v26  ;;  %v8844_v8 = vmul.f32 0.35355338, %v12188_v36  ;;  %6289 = vpow2.f32 %v2976_v18  ;;  %v2612_v31 = vsub.f32 %v12191_v14, %v8706_v53  ;;  %v12193_v3 = vld [vmem:[#allocation71_spill] sm:$0xff] }
 0x3d6   : > { %v8828_v35 = vpop.xlane.xlu0 %2298  ;;  %12182 = vst [vmem:[#allocation66_spill] sm:$0xff] %v8830_v22  ;;  %v8836_v47 = vpop.eup %6269  ;;  %v2978_v57 = vmul.f32 1.442695, %v2610_v19  ;;  %6291 = vpow2.f32 %v2854_v55  ;;  %v2980_v43 = vmul.f32 1.442695, %v2611_v37  ;;  %v2613_v26 = vsub.f32 %v12193_v3, %v8706_v53  ;;  %2370 = vmax.xlane.f32.xlu0 %v2369_v56  ;;  %v12197_v53 = vld [vmem:[#allocation25_spill] sm:$0xff] }
 0x3d7   : > { %12185 = vst [vmem:[#allocation67_spill] sm:$0xff] %v8836_v47  ;;  %12187 = vst [vmem:[#allocation72_spill] sm:$0xff] %v8841_v11  ;;  %v8846_v61 = vpop.eup %6271  ;;  %v3398_v36 = vadd.f32 %v8514_v15, %v8504_v6  ;;  %6293 = vpow2.f32 %v2856_v50  ;;  %v2858_v19 = vmul.f32 1.442695, %v2550_v2  ;;  %v2860_v14 = vmul.f32 1.442695, %v2551_v20 }
 0x3d8   : > { %12189 = vst [vmem:[#allocation73_spill] sm:$0xff] %v8844_v8  ;;  %12190 = vst [vmem:[#allocation185_spill] sm:$0xff] %v8846_v61  ;;  %v8850_v13 = vpop.xlane.xlu1 %2301  ;;  %v8852_v39 = vpop.eup %6273  ;;  %v12195_v47 = vld [vmem:[#allocation76_spill] sm:$0xff]  ;;  %v2462_v55 = vmax.f32 %v8841_v11, %v8844_v8  ;;  %v8869_v37 = vmul.f32 0.35355338, %v12197_v53  ;;  %v12199_v56 = vld [vmem:[#allocation22_spill] sm:$0xff]  ;;  %v3401_v50 = vadd.f32 %v8554_v38, %v8538_v24  ;;  %6295 = vpow2.f32 %v2978_v57 }
 0x3d9   : > { %12192 = vst [vmem:[#allocation24_spill] sm:$0xff] %v8852_v39  ;;  %v8860_v18 = vpop.eup %6275  ;;  %v2552_v22 = vsub.f32 %v12195_v47, %v8744_v48  ;;  %3399 = vadd.xlane.f32.xlu1 %v3398_v36  ;;  %v8872_v3 = vmul.f32 0.35355338, %v12199_v56  ;;  %v2982_v20 = vmul.f32 1.442695, %v2612_v31  ;;  %v12202_v47 = vld [vmem:[#allocation77_spill] sm:$0xff]  ;;  %6297 = vpow2.f32 %v2980_v43 }
 0x3da   : > { %v8858_v33 = vpop.xlane.xlu0 %2208  ;;  %12194 = vst [vmem:[#allocation70_spill] sm:$0xff] %v8860_v18  ;;  %v8864_v39 = vpop.eup %6277  ;;  %12198 = vst [vmem:[#allocation76_spill] sm:$0xff] %v8869_v37  ;;  %v2553_v6 = vsub.f32 %v12202_v47, %v8744_v48  ;;  %v2984_v8 = vmul.f32 1.442695, %v2613_v26  ;;  %v12203_v53 = vld [vmem:[#allocation74_spill] sm:$0xff]  ;;  %3402 = vadd.xlane.f32.xlu0 %v3401_v50  ;;  %6299 = vpow2.f32 %v2858_v19  ;;  %v12205_v57 = vld [vmem:[#allocation75_spill] sm:$0xff] }
 0x3db   : > { %12196 = vst [vmem:[#allocation71_spill] sm:$0xff] %v8864_v39  ;;  %12200 = vst [vmem:[#allocation25_spill] sm:$0xff] %v8872_v3  ;;  %v8876_v2 = vpop.eup %6279  ;;  %v2614_v36 = vsub.f32 %v12203_v53, %v8734_v42  ;;  %v2862_v24 = vmul.f32 1.442695, %v2552_v22  ;;  %v2615_v31 = vsub.f32 %v12205_v57, %v8734_v42  ;;  %v12206_v38 = vld [vmem:[#allocation80_spill] sm:$0xff]  ;;  %6301 = vpow2.f32 %v2860_v14  ;;  %v12208_v26 = vld [vmem:[#allocation23_spill] sm:$0xff] }
 0x3dc   : > { %12201 = vst [vmem:[#allocation22_spill] sm:$0xff] %v8876_v2  ;;  %v8880_v15 = vpop.xlane.xlu1 %2307  ;;  %v8886_v11 = vpop.eup %6281  ;;  %v2554_v48 = vsub.f32 %v12206_v38, %v8768_v52  ;;  %v2465_v43 = vmax.f32 %v8869_v37, %v8872_v3  ;;  %v8897_v50 = vmul.f32 0.35355338, %v12208_v26  ;;  %v12210_v53 = vld [vmem:[#allocation196_spill] sm:$0xff]  ;;  %6303 = vpow2.f32 %v2982_v20  ;;  %v12213_v19 = vld [vmem:[#allocation81_spill] sm:$0xff] }
 0x3dd   : > { %12204 = vst [vmem:[#allocation77_spill] sm:$0xff] %v8886_v11  ;;  %v8892_v47 = vpop.eup %6283  ;;  %2463 = vmax.xlane.f32.xlu1 %v2462_v55  ;;  %v8900_v11 = vmul.f32 0.35355338, %v12210_v53  ;;  %v2864_v42 = vmul.f32 1.442695, %v2553_v6  ;;  %v2555_v38 = vsub.f32 %v12213_v19, %v8768_v52  ;;  %6305 = vpow2.f32 %v2984_v8  ;;  %v12215_v55 = vld [vmem:[#allocation78_spill] sm:$0xff] }
 0x3de   : > { %v8884_v56 = vpop.xlane.xlu0 %2304  ;;  %12207 = vst [vmem:[#allocation74_spill] sm:$0xff] %v8892_v47  ;;  %12209 = vst [vmem:[#allocation75_spill] sm:$0xff] %v8897_v50  ;;  %v8902_v22 = vpop.eup %6285  ;;  %v2986_v3 = vmul.f32 1.442695, %v2614_v36  ;;  %v2616_v26 = vsub.f32 %v12215_v55, %v8772_v23  ;;  %v3308_v53 = vadd.f32 %v8532_v21, %v8522_v41  ;;  %2466 = vmax.xlane.f32.xlu0 %v2465_v43  ;;  %6307 = vpow2.f32 %v2862_v24  ;;  %v12217_v19 = vld [vmem:[#allocation79_spill] sm:$0xff]  ;;  %v12219_v36 = vld [vmem:[#allocation28_spill] sm:$0xff] }
 0x3df   : > { %12211 = vst [vmem:[#allocation80_spill] sm:$0xff] %v8900_v11  ;;  %12212 = vst [vmem:[#allocation23_spill] sm:$0xff] %v8902_v22  ;;  %v8908_v14 = vpop.eup %6287  ;;  %v2988_v6 = vmul.f32 1.442695, %v2615_v31  ;;  %v2866_v52 = vmul.f32 1.442695, %v2554_v48  ;;  %v2617_v22 = vsub.f32 %v12217_v19, %v8772_v23  ;;  %v2372_v8 = vmax.f32 %v8897_v50, %v8900_v11 }
 0x3e0   : > { %v8906_v57 = vpop.xlane.xlu1 %2403  ;;  %12214 = vst [vmem:[#allocation196_spill] sm:$0xff] %v8908_v14  ;;  %v8916_v20 = vpop.eup %6289  ;;  %v8925_v55 = vmul.f32 0.35355338, %v12219_v36  ;;  %v12221_v41 = vld [vmem:[#allocation26_spill] sm:$0xff]  ;;  %v3311_v24 = vadd.f32 %v8576_v17, %v8566_v45  ;;  %6309 = vpow2.f32 %v2864_v42  ;;  %v2868_v48 = vmul.f32 1.442695, %v2555_v38 }
 0x3e1   : > { %12216 = vst [vmem:[#allocation81_spill] sm:$0xff] %v8916_v20  ;;  %v8920_v47 = vpop.eup %6291  ;;  %v8928_v43 = vmul.f32 0.35355338, %v12221_v41  ;;  %3309 = vadd.xlane.f32.xlu1 %v3308_v53  ;;  %v12224_v23 = vld [vmem:[#allocation84_spill] sm:$0xff]  ;;  %6311 = vpow2.f32 %v2986_v3  ;;  %v2990_v11 = vmul.f32 1.442695, %v2616_v26 }
 0x3e2   : > { %v8914_v37 = vpop.xlane.xlu0 %2310  ;;  %12218 = vst [vmem:[#allocation78_spill] sm:$0xff] %v8920_v47  ;;  %12220 = vst [vmem:[#allocation79_spill] sm:$0xff] %v8925_v55  ;;  %v8932_v31 = vpop.eup %6293  ;;  %v2556_v19 = vsub.f32 %v12224_v23, %v8802_v9  ;;  %v12225_v36 = vld [vmem:[#allocation85_spill] sm:$0xff]  ;;  %3312 = vadd.xlane.f32.xlu0 %v3311_v24  ;;  %6313 = vpow2.f32 %v2988_v6  ;;  %v2992_v45 = vmul.f32 1.442695, %v2617_v22  ;;  %v12227_v42 = vld [vmem:[#allocation82_spill] sm:$0xff] }
 0x3e3   : > { %12222 = vst [vmem:[#allocation28_spill] sm:$0xff] %v8928_v43  ;;  %12223 = vst [vmem:[#allocation26_spill] sm:$0xff] %v8932_v31  ;;  %v2557_v50 = vsub.f32 %v12225_v36, %v8802_v9  ;;  %v8942_v53 = vpop.eup %6295  ;;  %v2618_v38 = vsub.f32 %v12227_v42, %v8794_v5  ;;  %v12228_v17 = vld [vmem:[#allocation83_spill] sm:$0xff]  ;;  %6315 = vpow2.f32 %v2866_v52  ;;  %v2375_v3 = vmax.f32 %v8925_v55, %v8928_v43  ;;  %v12230_v9 = vld [vmem:[#allocation197_spill] sm:$0xff] }
 0x3e4   : > { %v8936_v21 = vpop.xlane.xlu1 %2313  ;;  %12226 = vst [vmem:[#allocation84_spill] sm:$0xff] %v8942_v53  ;;  %v2619_v23 = vsub.f32 %v12228_v17, %v8794_v5  ;;  %v8948_v31 = vpop.eup %6297  ;;  %v8953_v26 = vmul.f32 0.35355338, %v12230_v9  ;;  %v12232_v24 = vld [vmem:[#allocation27_spill] sm:$0xff]  ;;  %6317 = vpow2.f32 %v2868_v48  ;;  %v2870_v6 = vmul.f32 1.442695, %v2556_v19 }
 0x3e5   : > { %12229 = vst [vmem:[#allocation85_spill] sm:$0xff] %v8948_v31  ;;  %2373 = vmax.xlane.f32.xlu1 %v2372_v8  ;;  %v8956_v36 = vmul.f32 0.35355338, %v12232_v24  ;;  %v8958_v22 = vpop.eup %6299  ;;  %v12235_v42 = vld [vmem:[#allocation88_spill] sm:$0xff]  ;;  %6319 = vpow2.f32 %v2990_v11  ;;  %v2872_v43 = vmul.f32 1.442695, %v2557_v50  ;;  %v3404_v24 = vadd.f32 %v8594_v12, %v8586_v7 }
 0x3e6   : > { %v8940_v41 = vpop.xlane.xlu0 %2406  ;;  %12231 = vst [vmem:[#allocation82_spill] sm:$0xff] %v8953_v26  ;;  %12234 = vst [vmem:[#allocation197_spill] sm:$0xff] %v8958_v22  ;;  %v2558_v17 = vsub.f32 %v12235_v42, %v8824_v54  ;;  %v8964_v52 = vpop.eup %6301  ;;  %v12237_v8 = vld [vmem:[#allocation89_spill] sm:$0xff]  ;;  %2376 = vmax.xlane.f32.xlu0 %v2375_v3  ;;  %6321 = vpow2.f32 %v2992_v45  ;;  %v2994_v19 = vmul.f32 1.442695, %v2618_v38  ;;  %v12239_v22 = vld [vmem:[#allocation86_spill] sm:$0xff]  ;;  %v3407_v45 = vadd.f32 %v8638_v28, %v8626_v1 }
 0x3e7   : > { %12233 = vst [vmem:[#allocation83_spill] sm:$0xff] %v8956_v36  ;;  %12236 = vst [vmem:[#allocation27_spill] sm:$0xff] %v8964_v52  ;;  %v2559_v9 = vsub.f32 %v12237_v8, %v8824_v54  ;;  %v8972_v48 = vpop.eup %6303  ;;  %v2996_v42 = vmul.f32 1.442695, %v2619_v23  ;;  %v2620_v31 = vsub.f32 %v12239_v22, %v8828_v35  ;;  %v2468_v11 = vmax.f32 %v8953_v26, %v8956_v36  ;;  %v12241_v54 = vld [vmem:[#allocation32_spill] sm:$0xff]  ;;  %v12245_v22 = vld [vmem:[#allocation87_spill] sm:$0xff] }
 0x3e8   : > { %v8962_v5 = vpop.xlane.xlu1 %2409  ;;  %12238 = vst [vmem:[#allocation88_spill] sm:$0xff] %v8972_v48  ;;  %v8976_v52 = vpop.eup %6305  ;;  %v8981_v50 = vmul.f32 0.35355338, %v12241_v54  ;;  %v8984_v3 = vmul.f32 0.35355338, %v8458_v62  ;;  %6323 = vpow2.f32 %v2870_v6  ;;  %v2621_v8 = vsub.f32 %v12245_v22, %v8828_v35  ;;  %v12246_v54 = vld [vmem:[#allocation92_spill] sm:$0xff] }
 0x3e9   : > { %12240 = vst [vmem:[#allocation89_spill] sm:$0xff] %v8976_v52  ;;  %3405 = vadd.xlane.f32.xlu1 %v3404_v24  ;;  %v8988_v38 = vpop.eup %6307  ;;  %v2874_v23 = vmul.f32 1.442695, %v2558_v17  ;;  %6325 = vpow2.f32 %v2872_v43  ;;  %v2876_v12 = vmul.f32 1.442695, %v2559_v9  ;;  %v2560_v24 = vsub.f32 %v12246_v54, %v8858_v33  ;;  %v12248_v6 = vld [vmem:[#allocation93_spill] sm:$0xff] }
 0x3ea   : > { %v8970_v55 = vpop.xlane.xlu0 %2316  ;;  %12242 = vst [vmem:[#allocation86_spill] sm:$0xff] %v8981_v50  ;;  %12243 = vst [vmem:[#allocation32_spill] sm:$0xff] %v8984_v3  ;;  %3408 = vadd.xlane.f32.xlu0 %v3407_v45  ;;  %v8998_v36 = vpop.eup %6309  ;;  %6327 = vpow2.f32 %v2994_v19  ;;  %v2998_v1 = vmul.f32 1.442695, %v2620_v31  ;;  %v2561_v17 = vsub.f32 %v12248_v6, %v8858_v33  ;;  %v12249_v28 = vld [vmem:[#allocation90_spill] sm:$0xff]  ;;  %v2471_v43 = vmax.f32 %v8981_v50, %v8984_v3  ;;  %v12253_v54 = vld [vmem:[#allocation207_spill] sm:$0xff] }
 0x3eb   : > { %12244 = vst [vmem:[#allocation252_spill] sm:$0xff] %v8988_v38  ;;  %12247 = vst [vmem:[#allocation87_spill] sm:$0xff] %v8998_v36  ;;  %v2622_v35 = vsub.f32 %v12249_v28, %v8850_v13  ;;  %v9004_v22 = vpop.eup %6311  ;;  %6329 = vpow2.f32 %v2996_v42  ;;  %v12251_v9 = vld [vmem:[#allocation30_spill] sm:$0xff]  ;;  %v9012_v26 = vmul.f32 0.35355338, %v12253_v54  ;;  %v12256_v19 = vld [vmem:[#allocation91_spill] sm:$0xff]  ;;  %v3314_v54 = vadd.f32 %v8610_v58, %v8604_v34 }
 0x3ec   : > { %v8992_v7 = vpop.xlane.xlu1 %2319  ;;  %12250 = vst [vmem:[#allocation92_spill] sm:$0xff] %v9004_v22  ;;  %v9009_v45 = vmul.f32 0.35355338, %v12251_v9  ;;  %v9014_v31 = vpop.eup %6313  ;;  %6331 = vpow2.f32 %v2874_v23  ;;  %v3000_v33 = vmul.f32 1.442695, %v2621_v8  ;;  %v2623_v28 = vsub.f32 %v12256_v19, %v8850_v13  ;;  %v12260_v19 = vld [vmem:[#allocation97_spill] sm:$0xff] }
 0x3ed   : > { %2469 = vmax.xlane.f32.xlu1 %v2468_v11  ;;  %12254 = vst [vmem:[#allocation90_spill] sm:$0xff] %v9012_v26  ;;  %12255 = vst [vmem:[#allocation30_spill] sm:$0xff] %v9014_v31  ;;  %v9020_v42 = vpop.eup %6315  ;;  %6333 = vpow2.f32 %v2876_v12  ;;  %v2878_v3 = vmul.f32 1.442695, %v2560_v24  ;;  %v12258_v11 = vld [vmem:[#allocation96_spill] sm:$0xff]  ;;  %v2627_v31 = vsub.f32 %v12260_v19, %v8880_v15  ;;  %v12262_v24 = vld [vmem:[#allocation31_spill] sm:$0xff] }
 0x3ee   : > { %v8996_v62 = vpop.xlane.xlu0 %2412  ;;  %12252 = vst [vmem:[#allocation93_spill] sm:$0xff] %v9009_v45  ;;  %12257 = vst [vmem:[#allocation207_spill] sm:$0xff] %v9020_v42  ;;  %v2626_v9 = vsub.f32 %v12258_v11, %v8880_v15  ;;  %2472 = vmax.xlane.f32.xlu0 %v2471_v43  ;;  %v9028_v23 = vpop.eup %6317  ;;  %6335 = vpow2.f32 %v2998_v1  ;;  %v2880_v8 = vmul.f32 1.442695, %v2561_v17  ;;  %v3002_v13 = vmul.f32 1.442695, %v2622_v35 }
 0x3ef   : > { %12259 = vst [vmem:[#allocation91_spill] sm:$0xff] %v9028_v23  ;;  %v9032_v42 = vpop.eup %6319  ;;  %v2378_v12 = vmax.f32 %v9009_v45, %v9012_v26  ;;  %v9037_v11 = vmul.f32 0.35355338, %v12262_v24  ;;  %v12264_v34 = vld [vmem:[#allocation37_spill] sm:$0xff]  ;;  %v3317_v1 = vadd.f32 %v8658_v25, %v8648_v0  ;;  %6337 = vpow2.f32 %v3000_v33  ;;  %v12267_v15 = vld [vmem:[#allocation94_spill] sm:$0xff]  ;;  %v12268_v24 = vld [vmem:[#allocation95_spill] sm:$0xff] }
 0x3f0   : > { %v9018_v6 = vpop.xlane.xlu1 %2415  ;;  %12261 = vst [vmem:[#allocation96_spill] sm:$0xff] %v9032_v42  ;;  %v9040_v43 = vmul.f32 0.35355338, %v12264_v34  ;;  %v9044_v17 = vpop.eup %6321  ;;  %v3004_v35 = vmul.f32 1.442695, %v2623_v28  ;;  %v2624_v19 = vsub.f32 %v12267_v15, %v8884_v56  ;;  %6339 = vpow2.f32 %v2878_v3  ;;  %v12270_v33 = vld [vmem:[#allocation100_spill] sm:$0xff] }
 0x3f1   : > { %12263 = vst [vmem:[#allocation97_spill] sm:$0xff] %v9037_v11  ;;  %3315 = vadd.xlane.f32.xlu1 %v3314_v54  ;;  %12266 = vst [vmem:[#allocation37_spill] sm:$0xff] %v9044_v17  ;;  %v3010_v26 = vmul.f32 1.442695, %v2626_v9  ;;  %v2625_v45 = vsub.f32 %v12268_v24, %v8884_v56  ;;  %6341 = vpow2.f32 %v2880_v8  ;;  %v3012_v0 = vmul.f32 1.442695, %v2627_v31 }
 0x3f2   : > { %v9026_v50 = vpop.xlane.xlu0 %2322  ;;  %12265 = vst [vmem:[#allocation31_spill] sm:$0xff] %v9040_v43  ;;  %3318 = vadd.xlane.f32.xlu0 %v3317_v1  ;;  %v9054_v54 = vpop.eup %6323  ;;  %v2628_v28 = vsub.f32 %v12270_v33, %v8914_v37  ;;  %v12271_v25 = vld [vmem:[#allocation101_spill] sm:$0xff]  ;;  %6343 = vpow2.f32 %v3002_v13  ;;  %v2381_v3 = vmax.f32 %v9037_v11, %v9040_v43  ;;  %v12273_v56 = vld [vmem:[#allocation208_spill] sm:$0xff]  ;;  %v12275_v1 = vld [vmem:[#allocation34_spill] sm:$0xff]  ;;  %v3006_v8 = vmul.f32 1.442695, %v2624_v19 }
 0x3f3   : > { %12269 = vst [vmem:[#allocation94_spill] sm:$0xff] %v9054_v54  ;;  %v2629_v15 = vsub.f32 %v12271_v25, %v8914_v37  ;;  %v9060_v23 = vpop.eup %6325  ;;  %v9065_v9 = vmul.f32 0.35355338, %v12273_v56  ;;  %v9068_v24 = vmul.f32 0.35355338, %v12275_v1  ;;  %6345 = vpow2.f32 %v3004_v35  ;;  %v12278_v33 = vld [vmem:[#allocation98_spill] sm:$0xff] }
 0x3f4   : > { %v9048_v58 = vpop.xlane.xlu1 %2325  ;;  %12272 = vst [vmem:[#allocation95_spill] sm:$0xff] %v9060_v23  ;;  %v9070_v31 = vpop.eup %6327  ;;  %v2690_v25 = vsub.f32 %v12278_v33, %v8906_v57  ;;  %6347 = vpow2.f32 %v3010_v26  ;;  %v3008_v13 = vmul.f32 1.442695, %v2625_v45  ;;  %v12280_v43 = vld [vmem:[#allocation99_spill] sm:$0xff]  ;;  %v3410_v56 = vadd.f32 %v8676_v49, %v8666_v59  ;;  %v12282_v33 = vld [vmem:[#allocation104_spill] sm:$0xff] }
 0x3f5   : > { %2379 = vmax.xlane.f32.xlu1 %v2378_v12  ;;  %12274 = vst [vmem:[#allocation100_spill] sm:$0xff] %v9065_v9  ;;  %12276 = vst [vmem:[#allocation101_spill] sm:$0xff] %v9068_v24  ;;  %v9074_v37 = vpop.eup %6329  ;;  %v2691_v12 = vsub.f32 %v12280_v43, %v8906_v57  ;;  %6349 = vpow2.f32 %v3012_v0  ;;  %v3014_v35 = vmul.f32 1.442695, %v2628_v28  ;;  %v3016_v19 = vmul.f32 1.442695, %v2629_v15 }
 0x3f6   : > { %v9052_v34 = vpop.xlane.xlu0 %2418  ;;  %12277 = vst [vmem:[#allocation208_spill] sm:$0xff] %v9070_v31  ;;  %12279 = vst [vmem:[#allocation34_spill] sm:$0xff] %v9074_v37  ;;  %2382 = vmax.xlane.f32.xlu0 %v2381_v3  ;;  %v9082_v11 = vpop.eup %6331  ;;  %v2630_v31 = vsub.f32 %v12282_v33, %v8936_v21  ;;  %v2474_v57 = vmax.f32 %v9065_v9, %v9068_v24  ;;  %v12284_v45 = vld [vmem:[#allocation35_spill] sm:$0xff]  ;;  %v12286_v3 = vld [vmem:[#allocation40_spill] sm:$0xff]  ;;  %v3413_v0 = vadd.f32 %v8720_v46, %v8710_v30 }
 0x3f7   : > { %12281 = vst [vmem:[#allocation98_spill] sm:$0xff] %v9082_v11  ;;  %v9088_v26 = vpop.eup %6333  ;;  %v9093_v43 = vmul.f32 0.35355338, %v12284_v45  ;;  %v9096_v59 = vmul.f32 0.35355338, %v12286_v3  ;;  %6351 = vpow2.f32 %v3006_v8  ;;  %v12289_v33 = vld [vmem:[#allocation105_spill] sm:$0xff] }
 0x3f8   : > { %v9086_v37 = vpop.xlane.xlu1 %2421  ;;  %12283 = vst [vmem:[#allocation99_spill] sm:$0xff] %v9088_v26  ;;  %v9100_v28 = vpop.eup %6335  ;;  %v3138_v15 = vmul.f32 1.442695, %v2690_v25  ;;  %v2631_v49 = vsub.f32 %v12289_v33, %v8936_v21  ;;  %6353 = vpow2.f32 %v3008_v13  ;;  %v3140_v26 = vmul.f32 1.442695, %v2691_v12  ;;  %v12290_v24 = vld [vmem:[#allocation102_spill] sm:$0xff] }
 0x3f9   : > { %12285 = vst [vmem:[#allocation104_spill] sm:$0xff] %v9093_v43  ;;  %3411 = vadd.xlane.f32.xlu1 %v3410_v56  ;;  %12287 = vst [vmem:[#allocation35_spill] sm:$0xff] %v9096_v59  ;;  %v2692_v45 = vsub.f32 %v12290_v24, %v8940_v41  ;;  %v9108_v3 = vpop.eup %6337  ;;  %6355 = vpow2.f32 %v3014_v35  ;;  %v3018_v9 = vmul.f32 1.442695, %v2630_v31  ;;  %v12292_v30 = vld [vmem:[#allocation103_spill] sm:$0xff]  ;;  %v2477_v21 = vmax.f32 %v9093_v43, %v9096_v59  ;;  %v12294_v25 = vld [vmem:[#allocation41_spill] sm:$0xff] }
 0x3fa   : > { %v9080_v1 = vpop.xlane.xlu0 %2328  ;;  %12288 = vst [vmem:[#allocation40_spill] sm:$0xff] %v9100_v28  ;;  %3414 = vadd.xlane.f32.xlu0 %v3413_v0  ;;  %12291 = vst [vmem:[#allocation105_spill] sm:$0xff] %v9108_v3  ;;  %v2693_v46 = vsub.f32 %v12292_v30, %v8940_v41  ;;  %v9112_v8 = vpop.eup %6339  ;;  %6357 = vpow2.f32 %v3016_v19  ;;  %v9117_v13 = vmul.f32 0.35355338, %v12294_v25  ;;  %v12296_v24 = vld [vmem:[#allocation219_spill] sm:$0xff]  ;;  %v12299_v35 = vld [vmem:[#allocation108_spill] sm:$0xff]  ;;  %v3320_v25 = vadd.f32 %v8698_v60, %v8682_v10 }
 0x3fb   : > { %12293 = vst [vmem:[#allocation102_spill] sm:$0xff] %v9112_v8  ;;  %v9120_v12 = vmul.f32 0.35355338, %v12296_v24  ;;  %v9122_v0 = vpop.eup %6341  ;;  %6359 = vpow2.f32 %v3138_v15  ;;  %v3020_v31 = vmul.f32 1.442695, %v2631_v49  ;;  %v2632_v30 = vsub.f32 %v12299_v35, %v8970_v55  ;;  %v12303_v49 = vld [vmem:[#allocation106_spill] sm:$0xff] }
 0x3fc   : > { %12295 = vst [vmem:[#allocation103_spill] sm:$0xff] %v9117_v13  ;;  %12298 = vst [vmem:[#allocation219_spill] sm:$0xff] %v9122_v0  ;;  %v3268_v41 = vpop.xlane.xlu1 %3267  ;;  %v9126_v33 = vpop.eup %6343  ;;  %6361 = vpow2.f32 %v3140_v26  ;;  %v3142_v19 = vmul.f32 1.442695, %v2692_v45  ;;  %v3144_v15 = vmul.f32 1.442695, %v2693_v46  ;;  %v2694_v43 = vsub.f32 %v12303_v49, %v8962_v5 }
 0x3fd   : > { %2475 = vmax.xlane.f32.xlu1 %v2474_v57  ;;  %12297 = vst [vmem:[#allocation41_spill] sm:$0xff] %v9120_v12  ;;  %12300 = vst [vmem:[#allocation108_spill] sm:$0xff] %v9126_v33  ;;  %v12301_v57 = vld [vmem:[#allocation109_spill] sm:$0xff]  ;;  %v9132_v24 = vpop.eup %6345  ;;  %6363 = vpow2.f32 %v3018_v9  ;;  %v12304_v35 = vld [vmem:[#allocation38_spill] sm:$0xff]  ;;  %v3323_v46 = vadd.f32 %v8738_v44, %v8730_v16 }
 0x3fe   : > { %v9106_v56 = vpop.xlane.xlu0 %2424  ;;  %v2633_v59 = vsub.f32 %v12301_v57, %v8970_v55  ;;  %2478 = vmax.xlane.f32.xlu0 %v2477_v21  ;;  %12302 = vst [vmem:[#allocation109_spill] sm:$0xff] %v9132_v24  ;;  %v9137_v0 = vmul.f32 0.35355338, %v12304_v35  ;;  %v9139_v26 = vpop.eup %6347  ;;  %6365 = vrcp.f32 %v3268_v41  ;;  %v2384_v55 = vmax.f32 %v9117_v13, %v9120_v12  ;;  %v12307_v45 = vld [vmem:[#allocation44_spill] sm:$0xff]  ;;  %v12310_v10 = vld [vmem:[#allocation107_spill] sm:$0xff]  ;;  %v12315_v16 = vld [vmem:[#allocation45_spill] sm:$0xff] }
 0x3ff   : > { %12306 = vst [vmem:[#allocation38_spill] sm:$0xff] %v9139_v26  ;;  %v9144_v57 = vmul.f32 0.35355338, %v12307_v45  ;;  %v9148_v9 = vpop.eup %6349  ;;  %6367 = vpow2.f32 %v3020_v31  ;;  %v3022_v21 = vmul.f32 1.442695, %v2632_v30  ;;  %v2695_v41 = vsub.f32 %v12310_v10, %v8962_v5  ;;  %v12313_v30 = vld [vmem:[#allocation220_spill] sm:$0xff] }
 0x400   : > { %12305 = vst [vmem:[#allocation106_spill] sm:$0xff] %v9137_v0  ;;  %12309 = vst [vmem:[#allocation253_spill] sm:$0xff] %v9148_v9  ;;  %v9150_v49 = vpop.xlane.xlu1 %2331  ;;  %v3024_v35 = vmul.f32 1.442695, %v2633_v59  ;;  %v3146_v45 = vmul.f32 1.442695, %v2694_v43 }
 0x401   : > { %12308 = vst [vmem:[#allocation44_spill] sm:$0xff] %v9144_v57  ;;  %3321 = vadd.xlane.f32.xlu1 %v3320_v25  ;;  %v9154_v60 = vpop.eup %6351  ;;  %v2387_v31 = vmax.f32 %v9137_v0, %v9144_v57  ;;  %v9163_v59 = vmul.f32 0.35355338, %v12313_v30  ;;  %v9166_v10 = vmul.f32 0.35355338, %v12315_v16  ;;  %v12321_v16 = vld [vmem:[#allocation113_spill] sm:$0xff] }
 0x402   : > { %v3271_v33 = vpop.xlane.xlu0 %3270  ;;  %3324 = vadd.xlane.f32.xlu0 %v3323_v46  ;;  %12311 = vst [vmem:[#allocation107_spill] sm:$0xff] %v9154_v60  ;;  %v9158_v12 = vpop.eup %6353  ;;  %v2635_v44 = vsub.f32 %v12321_v16, %v8992_v7 }
 0x403   : > { %6369 = vrcp.f32 %v3271_v33  ;;  %12312 = vst [vmem:[#allocation254_spill] sm:$0xff] %v9158_v12  ;;  %12314 = vst [vmem:[#allocation220_spill] sm:$0xff] %v9163_v59  ;;  %v9168_v5 = vpop.eup %6355 }
 0x404   : > { %6371 = vpow2.f32 %v3142_v19  ;;  %12316 = vst [vmem:[#allocation45_spill] sm:$0xff] %v9166_v10  ;;  %12317 = vst [vmem:[#allocation255_spill] sm:$0xff] %v9168_v5  ;;  %v3364_v33 = vpop.xlane.xlu1 %3363  ;;  %v9170_v43 = vpop.eup %6357  ;;  %v3148_v19 = vmul.f32 1.442695, %v2695_v41  ;;  %v12324_v41 = vld [vmem:[#allocation42_spill] sm:$0xff] }
 0x405   : > { %6373 = vpow2.f32 %v3144_v15  ;;  %2385 = vmax.xlane.f32.xlu1 %v2384_v55  ;;  %12318 = vst [vmem:[#allocation256_spill] sm:$0xff] %v9170_v43  ;;  %v12319_v15 = vld [vmem:[#allocation112_spill] sm:$0xff]  ;;  %v3416_v55 = vadd.f32 %v8752_v4, %v8748_v51  ;;  %v9176_v30 = vpop.eup %6359  ;;  %v12328_v4 = vld [vmem:[#allocation111_spill] sm:$0xff] }
 0x406   : > { %v9156_v25 = vpop.xlane.xlu0 %2334  ;;  %6375 = vpow2.f32 %v3022_v21  ;;  %v2634_v46 = vsub.f32 %v12319_v15, %v8992_v7  ;;  %2388 = vmax.xlane.f32.xlu0 %v2387_v31  ;;  %12320 = vst [vmem:[#allocation112_spill] sm:$0xff] %v9176_v30  ;;  %v12322_v21 = vld [vmem:[#allocation110_spill] sm:$0xff]  ;;  %v9182_v13 = vpop.eup %6361  ;;  %v9187_v15 = vmul.f32 0.35355338, %v12324_v41  ;;  %v9190_v31 = vmul.f32 0.35355338, %v8602_v40 }
 0x407   : > { %6377 = vpow2.f32 %v3024_v35  ;;  %v2696_v57 = vsub.f32 %v12322_v21, %v8996_v62  ;;  %12323 = vst [vmem:[#allocation113_spill] sm:$0xff] %v9182_v13  ;;  %v2480_v35 = vmax.f32 %v9163_v59, %v9166_v10  ;;  %v9194_v7 = vpop.eup %6363  ;;  %v2697_v10 = vsub.f32 %v12328_v4, %v8996_v62  ;;  %v12333_v4 = vld [vmem:[#allocation230_spill] sm:$0xff]  ;;  %v12338_v30 = vld [vmem:[#allocation128_spill] sm:$0xff] }
 0x408   : > { %6379 = vpow2.f32 %v3146_v45  ;;  %12325 = vst [vmem:[#allocation110_spill] sm:$0xff] %v9187_v15  ;;  %12326 = vst [vmem:[#allocation42_spill] sm:$0xff] %v9190_v31  ;;  %v3419_v45 = vadd.f32 %v8790_v63, %v8780_v32  ;;  %v9196_v16 = vpop.xlane.xlu1 %2427  ;;  %v6366_v21 = vpop.eup %6365  ;;  %v3026_v51 = vmul.f32 1.442695, %v2634_v46  ;;  %v12330_v63 = vld [vmem:[#allocation115_spill] sm:$0xff] }
 0x409   : > { %3417 = vadd.xlane.f32.xlu1 %v3416_v55  ;;  %12327 = vst [vmem:[#allocation257_spill] sm:$0xff] %v9194_v7  ;;  %6381 = vrcp.f32 %v3364_v33  ;;  %v9200_v41 = vpop.eup %6367  ;;  %v3028_v55 = vmul.f32 1.442695, %v2635_v44  ;;  %v3150_v40 = vmul.f32 1.442695, %v2696_v57  ;;  %v2636_v33 = vsub.f32 %v12330_v63, %v9026_v50  ;;  %v12339_v63 = vld [vmem:[#allocation130_spill] sm:$0xff] }
 0x40a   : > { %v3367_v0 = vpop.xlane.xlu0 %3366  ;;  %6383 = vpow2.f32 %v3148_v19  ;;  %3420 = vadd.xlane.f32.xlu0 %v3419_v45  ;;  %12329 = vst [vmem:[#allocation111_spill] sm:$0xff] %v9200_v41  ;;  %v2483_v7 = vmax.f32 %v9187_v15, %v9190_v31  ;;  %v12331_v19 = vld [vmem:[#allocation48_spill] sm:$0xff]  ;;  %v9212_v62 = vmul.f32 0.35355338, %v12333_v4  ;;  %v12337_v41 = vld [vmem:[#allocation133_spill] sm:$0xff]  ;;  %v3778_v43 = vmul.f32 %v6366_v21, %v12338_v30  ;;  %v12342_v4 = vld [vmem:[#allocation251_spill] sm:$0xff] }
 0x40b   : > { %6385 = vrcp.f32 %v3367_v0  ;;  %v9209_v46 = vmul.f32 0.35355338, %v12331_v19  ;;  %v12336_v0 = vld [vmem:[#allocation129_spill] sm:$0xff]  ;;  %v12341_v19 = vld [vmem:[#allocation114_spill] sm:$0xff]  ;;  %v12343_v15 = vld [vmem:[#allocation59_spill] sm:$0xff] }
 0x40c   : > { %12334 = vst [vmem:[#allocation48_spill] sm:$0xff] %v9212_v62  ;;  %v3274_v44 = vpop.xlane.xlu1 %3273  ;;  %v3779_v57 = vmul.f32 %v6366_v21, %v12336_v0  ;;  %6387 = vpow2.f32 %v3026_v51  ;;  %v2698_v31 = vsub.f32 %v12341_v19, %v9018_v6  ;;  %v3326_v26 = vadd.f32 %v12343_v15, %v12342_v4 }
 0x40d   : > { %v6370_v32 = vpop.eup %6369  ;;  %2481 = vmax.xlane.f32.xlu1 %v2480_v35  ;;  %12332 = vst [vmem:[#allocation115_spill] sm:$0xff] %v9209_v46  ;;  %v3152_v35 = vmul.f32 1.442695, %v2697_v10  ;;  %6389 = vpow2.f32 %v3028_v55  ;;  %v2390_v51 = vmax.f32 %v9209_v46, %v9212_v62  ;;  %v12347_v10 = vld [vmem:[#allocation49_spill] sm:$0xff]  ;;  %v12367_v46 = vld [vmem:[#allocation136_spill] sm:$0xff] }
 0x40e   : > { %v9202_v59 = vpop.xlane.xlu0 %2430  ;;  %v9214_v45 = vpop.eup %6371  ;;  %v3781_v13 = vmul.f32 %v6370_v32, %v12337_v41  ;;  %v3780_v5 = vmul.f32 %v6370_v32, %v12339_v63  ;;  %2484 = vmax.xlane.f32.xlu0 %v2483_v7  ;;  %v12345_v41 = vld [vmem:[#allocation116_spill] sm:$0xff]  ;;  %v9235_v19 = vmul.f32 0.35355338, %v12347_v10  ;;  %6391 = vrcp.f32 %v3274_v44 }
 0x40f   : > { %12335 = vst [vmem:[#allocation230_spill] sm:$0xff] %v9214_v45  ;;  %v9220_v9 = vpop.eup %6373  ;;  %v2637_v0 = vsub.f32 %v12345_v41, %v9026_v50  ;;  %v12351_v7 = vld [vmem:[#allocation184_spill] sm:$0xff]  ;;  %v3030_v50 = vmul.f32 1.442695, %v2636_v33  ;;  %6393 = vpow2.f32 %v3150_v40  ;;  %v3154_v41 = vmul.f32 1.442695, %v2698_v31 }
 0x410   : > { %12340 = vst [vmem:[#allocation129_spill] sm:$0xff] %v9220_v9  ;;  %v9226_v45 = vpop.eup %6375  ;;  %v4035_v30 = vpack.c.bf16 %v3781_v13, %v3779_v57  ;;  %v4034_v32 = vpack.c.bf16 %v3780_v5, %v3778_v43  ;;  %12348 = vst [vmem:[#allocation130_spill] sm:$0xff] %v9235_v19  ;;  %v12349_v9 = vld [vmem:[#allocation47_spill] sm:$0xff]  ;;  %v3329_v55 = vadd.f32 %v8804_v27, %v12351_v7  ;;  %v12353_v13 = vld [vmem:[#allocation117_spill] sm:$0xff]  ;;  %v9246_v43 = vpop.xlane.xlu1 %2337 }
 0x411   : > { %12344 = vst [vmem:[#allocation133_spill] sm:$0xff] %v9226_v45  ;;  %v9230_v63 = vpop.eup %6377  ;;  %v9238_v4 = vmul.f32 0.35355338, %v12349_v9  ;;  %3327 = vadd.xlane.f32.xlu1 %v3326_v26  ;;  %v2699_v5 = vsub.f32 %v12353_v13, %v9018_v6  ;;  %v3032_v9 = vmul.f32 1.442695, %v2637_v0  ;;  %v12355_v6 = vld [vmem:[#allocation231_spill] sm:$0xff] }
 0x412   : > { %v3277_v21 = vpop.xlane.xlu0 %3276  ;;  %12346 = vst [vmem:[#allocation128_spill] sm:$0xff] %v9230_v63  ;;  %v9242_v15 = vpop.eup %6379  ;;  %4162 = vmatprep.subr.bf16.mxu1 %v4035_v30  ;;  %3330 = vadd.xlane.f32.xlu0 %v3329_v55  ;;  %v9255_v44 = vmul.f32 0.35355338, %v12355_v6  ;;  %v12357_v30 = vld [vmem:[#allocation52_spill] sm:$0xff]  ;;  %v12360_v55 = vld [vmem:[#allocation121_spill] sm:$0xff]  ;;  %v12361_v7 = vld [vmem:[#allocation118_spill] sm:$0xff] }
 0x413   : > { %12350 = vst [vmem:[#allocation114_spill] sm:$0xff] %v9238_v4  ;;  %12352 = vst [vmem:[#allocation116_spill] sm:$0xff] %v9242_v15  ;;  %4163 = vmatpush1.bf16.xpose.msra.mxu1 %v4034_v32  ;;  %v6382_v57 = vpop.eup %6381  ;;  %6395 = vrcp.f32 %v3277_v21  ;;  %v2393_v33 = vmax.f32 %v9235_v19, %v9238_v4  ;;  %v9258_v40 = vmul.f32 0.35355338, %v12357_v30  ;;  %v3156_v0 = vmul.f32 1.442695, %v2699_v5 }
 0x414   : > { %v9250_v10 = vpop.eup %6383  ;;  %6397 = vpow2.f32 %v3152_v35  ;;  %12356 = vst [vmem:[#allocation47_spill] sm:$0xff] %v9255_v44  ;;  %v12359_v31 = vld [vmem:[#allocation120_spill] sm:$0xff]  ;;  %v2639_v13 = vsub.f32 %v12360_v55, %v9048_v58  ;;  %v3370_v35 = vpop.xlane.xlu1 %3369  ;;  %v2700_v27 = vsub.f32 %v12361_v7, %v9052_v34  ;;  %v12363_v4 = vld [vmem:[#allocation137_spill] sm:$0xff] }
 0x415   : > { %12354 = vst [vmem:[#allocation49_spill] sm:$0xff] %v9250_v10  ;;  %2391 = vmax.xlane.f32.xlu1 %v2390_v51  ;;  %12358 = vst [vmem:[#allocation117_spill] sm:$0xff] %v9258_v40  ;;  %v6386_v32 = vpop.eup %6385  ;;  %6399 = vpow2.f32 %v3030_v50  ;;  %v2638_v21 = vsub.f32 %v12359_v31, %v9048_v58  ;;  %v12362_v51 = vld [vmem:[#allocation19_spill] sm:$0xff]  ;;  %v3843_v30 = vmul.f32 %v6382_v57, %v12363_v4  ;;  %v12364_v19 = vld [vmem:[#allocation141_spill] sm:$0xff] }
 0x416   : > { %v9248_v26 = vpop.xlane.xlu0 %2340  ;;  %v3422_v6 = vadd.f32 %v12362_v51, %v8808_v29  ;;  %2394 = vmax.xlane.f32.xlu0 %v2393_v33  ;;  %v3845_v62 = vmul.f32 %v6386_v32, %v12364_v19  ;;  %6401 = vpow2.f32 %v3032_v9  ;;  %v12365_v50 = vld [vmem:[#allocation53_spill] sm:$0xff]  ;;  %v3842_v10 = vmul.f32 %v6382_v57, %v12367_v46  ;;  %v12368_v58 = vld [vmem:[#allocation138_spill] sm:$0xff]  ;;  %v9275_v15 = vpop.eup %6387  ;;  %v12372_v19 = vld [vmem:[#allocation24_spill] sm:$0xff] }
 0x417   : > { %v9271_v5 = vmul.f32 0.35355338, %v12365_v50  ;;  %v3844_v55 = vmul.f32 %v6386_v32, %v12368_v58  ;;  %12369 = vst [vmem:[#allocation52_spill] sm:$0xff] %v9275_v15  ;;  %v2486_v7 = vmax.f32 %v9255_v44, %v9258_v40  ;;  %v12370_v33 = vld [vmem:[#allocation50_spill] sm:$0xff]  ;;  %v3425_v9 = vadd.f32 %v12372_v19, %v8846_v61  ;;  %v9284_v50 = vpop.eup %6389  ;;  %v12374_v46 = vld [vmem:[#allocation119_spill] sm:$0xff] }
 0x418   : > { %v9280_v29 = vmul.f32 0.35355338, %v12370_v33  ;;  %v4067_v4 = vpack.c.bf16 %v3845_v62, %v3843_v30  ;;  %12373 = vst [vmem:[#allocation121_spill] sm:$0xff] %v9284_v50  ;;  %v3034_v51 = vmul.f32 1.442695, %v2638_v21  ;;  %v2701_v57 = vsub.f32 %v12374_v46, %v9052_v34  ;;  %v9288_v32 = vpop.xlane.xlu1 %2433  ;;  %v12376_v21 = vld [vmem:[#allocation51_spill] sm:$0xff] }
 0x419   : > { %12366 = vst [vmem:[#allocation231_spill] sm:$0xff] %v9271_v5  ;;  %3423 = vadd.xlane.f32.xlu1 %v3422_v6  ;;  %6403 = vrcp.f32 %v3370_v35  ;;  %v4066_v58 = vpack.c.bf16 %v3844_v55, %v3842_v10  ;;  %v6392_v6 = vpop.eup %6391  ;;  %v3036_v33 = vmul.f32 1.442695, %v2639_v13  ;;  %v3158_v40 = vmul.f32 1.442695, %v2700_v27  ;;  %v12380_v13 = vld [vmem:[#allocation122_spill] sm:$0xff] }
 0x41a   : > { %v3373_v31 = vpop.xlane.xlu0 %3372  ;;  %12371 = vst [vmem:[#allocation120_spill] sm:$0xff] %v9280_v29  ;;  %6405 = vpow2.f32 %v3154_v41  ;;  %4203 = vmatprep.subr.bf16.mxu0 %v4067_v4  ;;  %3426 = vadd.xlane.f32.xlu0 %v3425_v9  ;;  %v9292_v30 = vpop.eup %6393  ;;  %v2489_v34 = vmax.f32 %v9271_v5, %v9280_v29  ;;  %v9297_v35 = vmul.f32 0.35355338, %v12376_v21  ;;  %v12378_v41 = vld [vmem:[#allocation242_spill] sm:$0xff]  ;;  %v3160_v27 = vmul.f32 1.442695, %v2701_v57 }
 0x41b   : > { %6407 = vrcp.f32 %v3373_v31  ;;  %4204 = vmatpush1.bf16.xpose.msra.mxu0 %v4066_v58  ;;  %12375 = vst [vmem:[#allocation118_spill] sm:$0xff] %v9292_v30  ;;  %v9300_v10 = vmul.f32 0.35355338, %v12378_v41  ;;  %v2640_v31 = vsub.f32 %v12380_v13, %v9080_v1  ;;  %v12381_v4 = vld [vmem:[#allocation123_spill] sm:$0xff]  ;;  %v12384_v21 = vld [vmem:[#allocation66_spill] sm:$0xff]  ;;  %v12386_v41 = vld [vmem:[#allocation145_spill] sm:$0xff] }
 0x41c   : > { %6409 = vpow2.f32 %v3156_v0  ;;  %12377 = vst [vmem:[#allocation137_spill] sm:$0xff] %v9297_v35  ;;  %v2641_v9 = vsub.f32 %v12381_v4, %v9080_v1  ;;  %v3280_v0 = vpop.xlane.xlu1 %3279  ;;  %v12385_v61 = vld [vmem:[#allocation67_spill] sm:$0xff]  ;;  %v3783_v29 = vmul.f32 %v6392_v6, %v12386_v41  ;;  %v12389_v13 = vld [vmem:[#allocation56_spill] sm:$0xff]  ;;  %v12392_v15 = vld [vmem:[#allocation146_spill] sm:$0xff] }
 0x41d   : > { %2487 = vmax.xlane.f32.xlu1 %v2486_v7  ;;  %12379 = vst [vmem:[#allocation141_spill] sm:$0xff] %v9300_v10  ;;  %v6396_v55 = vpop.eup %6395  ;;  %6411 = vpow2.f32 %v3034_v51  ;;  %v12383_v7 = vld [vmem:[#allocation124_spill] sm:$0xff]  ;;  %v3332_v19 = vadd.f32 %v12385_v61, %v12384_v21  ;;  %v12387_v51 = vld [vmem:[#allocation149_spill] sm:$0xff]  ;;  %v9317_v44 = vmul.f32 0.35355338, %v12389_v13  ;;  %v12393_v21 = vld [vmem:[#allocation54_spill] sm:$0xff] }
 0x41e   : > { %v9290_v62 = vpop.xlane.xlu0 %2436  ;;  %v9306_v46 = vpop.eup %6397  ;;  %v2702_v58 = vsub.f32 %v12383_v7, %v9086_v37  ;;  %2490 = vmax.xlane.f32.xlu0 %v2489_v34  ;;  %v3785_v57 = vmul.f32 %v6396_v55, %v12387_v51  ;;  %6413 = vpow2.f32 %v3036_v33  ;;  %v12391_v4 = vld [vmem:[#allocation144_spill] sm:$0xff]  ;;  %v2396_v7 = vmax.f32 %v9297_v35, %v9300_v10  ;;  %v12396_v61 = vld [vmem:[#allocation125_spill] sm:$0xff] }
 0x41f   : > { %12382 = vst [vmem:[#allocation53_spill] sm:$0xff] %v9306_v46  ;;  %v9314_v5 = vpop.eup %6399  ;;  %12390 = vst [vmem:[#allocation138_spill] sm:$0xff] %v9317_v44  ;;  %v3782_v50 = vmul.f32 %v6392_v6, %v12391_v4  ;;  %v3784_v46 = vmul.f32 %v6396_v55, %v12392_v15  ;;  %v9324_v34 = vmul.f32 0.35355338, %v12393_v21  ;;  %v3335_v51 = vadd.f32 %v8864_v39, %v8860_v18  ;;  %v12406_v18 = vld [vmem:[#allocation157_spill] sm:$0xff]  ;;  %v12411_v10 = vld [vmem:[#allocation156_spill] sm:$0xff] }
 0x420   : > { %12388 = vst [vmem:[#allocation136_spill] sm:$0xff] %v9314_v5  ;;  %v4037_v41 = vpack.c.bf16 %v3785_v57, %v3783_v29  ;;  %v9328_v33 = vpop.eup %6401  ;;  %v3038_v13 = vmul.f32 1.442695, %v2640_v31  ;;  %v2703_v5 = vsub.f32 %v12396_v61, %v9086_v37  ;;  %6415 = vrcp.f32 %v3280_v0  ;;  %v9332_v6 = vpop.xlane.xlu1 %2343  ;;  %v12398_v61 = vld [vmem:[#allocation243_spill] sm:$0xff]  ;;  %v12402_v57 = vld [vmem:[#allocation126_spill] sm:$0xff] }
 0x421   : > { %12394 = vst [vmem:[#allocation50_spill] sm:$0xff] %v9324_v34  ;;  %3333 = vadd.xlane.f32.xlu1 %v3332_v19  ;;  %12395 = vst [vmem:[#allocation119_spill] sm:$0xff] %v9328_v33  ;;  %v4036_v15 = vpack.c.bf16 %v3784_v46, %v3782_v50  ;;  %6417 = vpow2.f32 %v3158_v40  ;;  %v3040_v21 = vmul.f32 1.442695, %v2641_v9  ;;  %v2399_v31 = vmax.f32 %v9317_v44, %v9324_v34  ;;  %v12400_v50 = vld [vmem:[#allocation55_spill] sm:$0xff]  ;;  %v12410_v34 = vld [vmem:[#allocation150_spill] sm:$0xff] }
 0x422   : > { %v3283_v1 = vpop.xlane.xlu0 %3282  ;;  %4164 = vmatprep.subr.bf16.mxu1 %v4037_v41  ;;  %3336 = vadd.xlane.f32.xlu0 %v3335_v51  ;;  %v9341_v37 = vmul.f32 0.35355338, %v12398_v61  ;;  %v9344_v40 = vmul.f32 0.35355338, %v12400_v50  ;;  %v3162_v9 = vmul.f32 1.442695, %v2702_v58 }
 0x423   : > { %v6404_v55 = vpop.eup %6403  ;;  %6419 = vrcp.f32 %v3283_v1  ;;  %4165 = vmatpush1.bf16.xpose.msra.mxu1 %v4036_v15  ;;  %v3164_v46 = vmul.f32 1.442695, %v2703_v5  ;;  %v2704_v1 = vsub.f32 %v12402_v57, %v9106_v56  ;;  %v12405_v61 = vld [vmem:[#allocation151_spill] sm:$0xff]  ;;  %v12408_v5 = vld [vmem:[#allocation60_spill] sm:$0xff] }
 0x424   : > { %v9336_v19 = vpop.eup %6405  ;;  %6421 = vpow2.f32 %v3160_v27  ;;  %12399 = vst [vmem:[#allocation242_spill] sm:$0xff] %v9341_v37  ;;  %12401 = vst [vmem:[#allocation122_spill] sm:$0xff] %v9344_v40  ;;  %v3376_v4 = vpop.xlane.xlu1 %3375  ;;  %v12403_v27 = vld [vmem:[#allocation127_spill] sm:$0xff]  ;;  %v3847_v50 = vmul.f32 %v6404_v55, %v12405_v61  ;;  %v9359_v58 = vmul.f32 0.35355338, %v12408_v5  ;;  %v3846_v44 = vmul.f32 %v6404_v55, %v12410_v34 }
 0x425   : > { %12397 = vst [vmem:[#allocation51_spill] sm:$0xff] %v9336_v19  ;;  %2397 = vmax.xlane.f32.xlu1 %v2396_v7  ;;  %v6408_v0 = vpop.eup %6407  ;;  %6423 = vpow2.f32 %v3038_v13  ;;  %v2705_v51 = vsub.f32 %v12403_v27, %v9106_v56  ;;  %v12404_v7 = vld [vmem:[#allocation77_spill] sm:$0xff]  ;;  %v2492_v56 = vmax.f32 %v9341_v37, %v9344_v40  ;;  %v3166_v5 = vmul.f32 1.442695, %v2704_v1  ;;  %v12417_v1 = vld [vmem:[#allocation132_spill] sm:$0xff]  ;;  %v12428_v37 = vld [vmem:[#allocation139_spill] sm:$0xff] }
 0x426   : > { %v9334_v29 = vpop.xlane.xlu0 %2346  ;;  %v9348_v41 = vpop.eup %6409  ;;  %v3428_v15 = vadd.f32 %v12404_v7, %v8876_v2  ;;  %2400 = vmax.xlane.f32.xlu0 %v2399_v31  ;;  %v3849_v39 = vmul.f32 %v6408_v0, %v12406_v18  ;;  %6425 = vpow2.f32 %v3040_v21  ;;  %12409 = vst [vmem:[#allocation124_spill] sm:$0xff] %v9359_v58  ;;  %v3848_v35 = vmul.f32 %v6408_v0, %v12411_v10  ;;  %v12412_v31 = vld [vmem:[#allocation61_spill] sm:$0xff]  ;;  %v12415_v10 = vld [vmem:[#allocation131_spill] sm:$0xff] }
 0x427   : > { %v9356_v13 = vpop.eup %6411  ;;  %v9366_v27 = vmul.f32 0.35355338, %v12412_v31  ;;  %v3431_v18 = vadd.f32 %v8916_v20, %v8908_v14  ;;  %6427 = vrcp.f32 %v3376_v4  ;;  %v2642_v55 = vsub.f32 %v12415_v10, %v9150_v49 }
 0x428   : > { %12407 = vst [vmem:[#allocation123_spill] sm:$0xff] %v9356_v13  ;;  %v4069_v61 = vpack.c.bf16 %v3849_v39, %v3847_v50  ;;  %v9370_v21 = vpop.eup %6413  ;;  %v9372_v2 = vpop.xlane.xlu1 %2439  ;;  %v4068_v34 = vpack.c.bf16 %v3848_v35, %v3846_v44  ;;  %6429 = vpow2.f32 %v3162_v9  ;;  %v2643_v4 = vsub.f32 %v12417_v1, %v9150_v49  ;;  %v12418_v9 = vld [vmem:[#allocation134_spill] sm:$0xff]  ;;  %v12423_v49 = vld [vmem:[#allocation161_spill] sm:$0xff] }
 0x429   : > { %3429 = vadd.xlane.f32.xlu1 %v3428_v15  ;;  %12413 = vst [vmem:[#allocation145_spill] sm:$0xff] %v9366_v27  ;;  %12414 = vst [vmem:[#allocation149_spill] sm:$0xff] %v9370_v21  ;;  %v3168_v15 = vmul.f32 1.442695, %v2705_v51  ;;  %v2495_v44 = vmax.f32 %v9359_v58, %v9366_v27  ;;  %v2644_v31 = vsub.f32 %v12418_v9, %v9156_v25  ;;  %v12426_v9 = vld [vmem:[#allocation152_spill] sm:$0xff] }
 0x42a   : > { %v3379_v57 = vpop.xlane.xlu0 %3378  ;;  %4205 = vmatprep.subr.bf16.mxu0 %v4069_v61  ;;  %3432 = vadd.xlane.f32.xlu0 %v3431_v18  ;;  %v6416_v0 = vpop.eup %6415  ;;  %v3042_v61 = vmul.f32 1.442695, %v2642_v55  ;;  %v12420_v18 = vld [vmem:[#allocation74_spill] sm:$0xff]  ;;  %v12427_v58 = vld [vmem:[#allocation160_spill] sm:$0xff]  ;;  %v3044_v55 = vmul.f32 1.442695, %v2643_v4 }
 0x42b   : > { %6431 = vrcp.f32 %v3379_v57  ;;  %4206 = vmatpush1.bf16.xpose.msra.mxu0 %v4068_v34  ;;  %v9378_v50 = vpop.eup %6417  ;;  %v12421_v34 = vld [vmem:[#allocation23_spill] sm:$0xff]  ;;  %v3786_v27 = vmul.f32 %v6416_v0, %v12426_v9  ;;  %v12432_v4 = vld [vmem:[#allocation85_spill] sm:$0xff] }
 0x42c   : > { %12416 = vst [vmem:[#allocation56_spill] sm:$0xff] %v9378_v50  ;;  %6433 = vpow2.f32 %v3164_v46  ;;  %v3286_v51 = vpop.xlane.xlu1 %3285  ;;  %v3338_v10 = vadd.f32 %v12421_v34, %v12420_v18  ;;  %v12422_v46 = vld [vmem:[#allocation155_spill] sm:$0xff]  ;;  %v2706_v18 = vsub.f32 %v12428_v37, %v9196_v16  ;;  %v3434_v37 = vadd.f32 %v12432_v4, %v8942_v53 }
 0x42d   : > { %2493 = vmax.xlane.f32.xlu1 %v2492_v56  ;;  %v6420_v35 = vpop.eup %6419  ;;  %6435 = vpow2.f32 %v3166_v5  ;;  %v3787_v14 = vmul.f32 %v6416_v0, %v12422_v46  ;;  %v12425_v56 = vld [vmem:[#allocation135_spill] sm:$0xff]  ;;  %v12429_v46 = vld [vmem:[#allocation26_spill] sm:$0xff]  ;;  %v12431_v0 = vld [vmem:[#allocation140_spill] sm:$0xff] }
 0x42e   : > { %v9376_v39 = vpop.xlane.xlu0 %2442  ;;  %v9386_v57 = vpop.eup %6421  ;;  %2496 = vmax.xlane.f32.xlu0 %v2495_v44  ;;  %v3789_v1 = vmul.f32 %v6420_v35, %v12423_v49  ;;  %6437 = vpow2.f32 %v3168_v15  ;;  %v2645_v5 = vsub.f32 %v12425_v56, %v9156_v25  ;;  %v3788_v40 = vmul.f32 %v6420_v35, %v12427_v58 }
 0x42f   : > { %12419 = vst [vmem:[#allocation144_spill] sm:$0xff] %v9386_v57  ;;  %v9392_v20 = vpop.eup %6423  ;;  %v3341_v49 = vadd.f32 %v12429_v46, %v8920_v47  ;;  %v3046_v15 = vmul.f32 1.442695, %v2644_v31  ;;  %6439 = vrcp.f32 %v3286_v51  ;;  %v2707_v58 = vsub.f32 %v12431_v0, %v9196_v16  ;;  %v12438_v0 = vld [vmem:[#allocation171_spill] sm:$0xff] }
 0x430   : > { %12424 = vst [vmem:[#allocation146_spill] sm:$0xff] %v9392_v20  ;;  %v4039_v44 = vpack.c.bf16 %v3789_v1, %v3787_v14  ;;  %v9402_v34 = vpop.eup %6425  ;;  %v9404_v20 = vpop.xlane.xlu1 %2349  ;;  %v4038_v25 = vpack.c.bf16 %v3788_v40, %v3786_v27  ;;  %6441 = vpow2.f32 %v3042_v61  ;;  %v3048_v35 = vmul.f32 1.442695, %v2645_v5  ;;  %v12433_v40 = vld [vmem:[#allocation142_spill] sm:$0xff]  ;;  %v12434_v1 = vld [vmem:[#allocation143_spill] sm:$0xff] }
 0x431   : > { %3339 = vadd.xlane.f32.xlu1 %v3338_v10  ;;  %12430 = vst [vmem:[#allocation54_spill] sm:$0xff] %v9402_v34  ;;  %v6428_v14 = vpop.eup %6427  ;;  %v3170_v51 = vmul.f32 1.442695, %v2706_v18  ;;  %v2708_v27 = vsub.f32 %v12433_v40, %v9202_v59  ;;  %v3437_v16 = vadd.f32 %v8976_v52, %v8972_v48  ;;  %v2709_v56 = vsub.f32 %v12434_v1, %v9202_v59  ;;  %v12437_v18 = vld [vmem:[#allocation163_spill] sm:$0xff]  ;;  %v12440_v59 = vld [vmem:[#allocation162_spill] sm:$0xff]  ;;  %v12441_v52 = vld [vmem:[#allocation168_spill] sm:$0xff] }
 0x432   : > { %v3289_v7 = vpop.xlane.xlu0 %3288  ;;  %4166 = vmatprep.subr.bf16.mxu1 %v4039_v44  ;;  %3342 = vadd.xlane.f32.xlu0 %v3341_v49  ;;  %v9412_v31 = vpop.eup %6429  ;;  %v3172_v9 = vmul.f32 1.442695, %v2707_v58  ;;  %v12435_v44 = vld [vmem:[#allocation197_spill] sm:$0xff]  ;;  %v12436_v49 = vld [vmem:[#allocation27_spill] sm:$0xff]  ;;  %v3850_v1 = vmul.f32 %v6428_v14, %v12440_v59 }
 0x433   : > { %6443 = vrcp.f32 %v3289_v7  ;;  %4167 = vmatpush1.bf16.xpose.msra.mxu1 %v4038_v25  ;;  %v3851_v25 = vmul.f32 %v6428_v14, %v12437_v18  ;;  %v3174_v58 = vmul.f32 1.442695, %v2708_v27  ;;  %v12449_v59 = vld [vmem:[#allocation91_spill] sm:$0xff] }
 0x434   : > { %6445 = vpow2.f32 %v3044_v55  ;;  %v3382_v7 = vpop.xlane.xlu1 %3381  ;;  %v3344_v55 = vadd.f32 %v12436_v49, %v12435_v44 }
 0x435   : > { %3435 = vadd.xlane.f32.xlu1 %v3434_v37  ;;  %v6432_v61 = vpop.eup %6431  ;;  %6447 = vpow2.f32 %v3046_v15  ;;  %v12439_v15 = vld [vmem:[#allocation147_spill] sm:$0xff] }
 0x436   : > { %v9410_v10 = vpop.xlane.xlu0 %2352  ;;  %v9420_v5 = vpop.eup %6433  ;;  %3438 = vadd.xlane.f32.xlu0 %v3437_v16  ;;  %v3853_v37 = vmul.f32 %v6432_v61, %v12438_v0  ;;  %6449 = vpow2.f32 %v3048_v35  ;;  %v2646_v48 = vsub.f32 %v12439_v15, %v9246_v43  ;;  %v3852_v4 = vmul.f32 %v6432_v61, %v12441_v52  ;;  %v12442_v15 = vld [vmem:[#allocation148_spill] sm:$0xff]  ;;  %v12443_v52 = vld [vmem:[#allocation30_spill] sm:$0xff] }
 0x437   : > { %v9426_v40 = vpop.eup %6435  ;;  %6451 = vpow2.f32 %v3170_v51  ;;  %v3347_v16 = vadd.f32 %v8998_v36, %v8988_v38  ;;  %v3176_v0 = vmul.f32 1.442695, %v2709_v56  ;;  %v2647_v14 = vsub.f32 %v12442_v15, %v9246_v43  ;;  %v12451_v15 = vld [vmem:[#allocation173_spill] sm:$0xff]  ;;  %v12456_v38 = vld [vmem:[#allocation159_spill] sm:$0xff] }
 0x438   : > { %v4071_v44 = vpack.c.bf16 %v3853_v37, %v3851_v25  ;;  %v9434_v18 = vpop.eup %6437  ;;  %6453 = vrcp.f32 %v3382_v7  ;;  %v9436_v35 = vpop.xlane.xlu1 %2445  ;;  %v4070_v49 = vpack.c.bf16 %v3852_v4, %v3850_v1  ;;  %v3440_v51 = vadd.f32 %v12443_v52, %v9004_v22  ;;  %v12445_v4 = vld [vmem:[#allocation153_spill] sm:$0xff]  ;;  %v12448_v37 = vld [vmem:[#allocation207_spill] sm:$0xff] }
 0x439   : > { %3345 = vadd.xlane.f32.xlu1 %v3344_v55  ;;  %6455 = vpow2.f32 %v3172_v9  ;;  %v6440_v27 = vpop.eup %6439  ;;  %v3050_v61 = vmul.f32 1.442695, %v2646_v48  ;;  %v2648_v7 = vsub.f32 %v12445_v4, %v9248_v26  ;;  %v3443_v43 = vadd.f32 %v9044_v17, %v9032_v42  ;;  %v12455_v17 = vld [vmem:[#allocation172_spill] sm:$0xff] }
 0x43a   : > { %v3385_v53 = vpop.xlane.xlu0 %3384  ;;  %4207 = vmatprep.subr.bf16.mxu0 %v4071_v44  ;;  %3348 = vadd.xlane.f32.xlu0 %v3347_v16  ;;  %v9444_v56 = vpop.eup %6441  ;;  %v12446_v44 = vld [vmem:[#allocation154_spill] sm:$0xff]  ;;  %v3350_v1 = vadd.f32 %v12449_v59, %v12448_v37  ;;  %v2711_v37 = vsub.f32 %v12456_v38, %v9288_v32  ;;  %v12460_v38 = vld [vmem:[#allocation208_spill] sm:$0xff] }
 0x43b   : > { %6457 = vrcp.f32 %v3385_v53  ;;  %4208 = vmatpush1.bf16.xpose.msra.mxu0 %v4070_v49  ;;  %12444 = vst [vmem:[#allocation125_spill] sm:$0xff] %v9444_v56  ;;  %v2649_v25 = vsub.f32 %v12446_v44, %v9248_v26  ;;  %v3052_v49 = vmul.f32 1.442695, %v2647_v14  ;;  %v12454_v26 = vld [vmem:[#allocation166_spill] sm:$0xff]  ;;  %v3054_v14 = vmul.f32 1.442695, %v2648_v7 }
 0x43c   : > { %6459 = vpow2.f32 %v3174_v58  ;;  %v3292_v48 = vpop.xlane.xlu1 %3291  ;;  %v12450_v58 = vld [vmem:[#allocation167_spill] sm:$0xff]  ;;  %v3790_v44 = vmul.f32 %v6440_v27, %v12454_v26 }
 0x43d   : > { %3441 = vadd.xlane.f32.xlu1 %v3440_v51  ;;  %v6444_v9 = vpop.eup %6443  ;;  %6461 = vpow2.f32 %v3176_v0  ;;  %v3791_v16 = vmul.f32 %v6440_v27, %v12450_v58  ;;  %v12453_v0 = vld [vmem:[#allocation158_spill] sm:$0xff]  ;;  %v3353_v58 = vadd.f32 %v9060_v23, %v9054_v54 }
 0x43e   : > { %v9442_v55 = vpop.xlane.xlu0 %2448  ;;  %v9452_v53 = vpop.eup %6445  ;;  %3444 = vadd.xlane.f32.xlu0 %v3443_v43  ;;  %v3793_v51 = vmul.f32 %v6444_v9, %v12451_v15  ;;  %6463 = vpow2.f32 %v3050_v61  ;;  %v2710_v42 = vsub.f32 %v12453_v0, %v9288_v32  ;;  %v3792_v52 = vmul.f32 %v6444_v9, %v12455_v17  ;;  %v12459_v17 = vld [vmem:[#allocation164_spill] sm:$0xff]  ;;  %v12461_v32 = vld [vmem:[#allocation34_spill] sm:$0xff] }
 0x43f   : > { %12447 = vst [vmem:[#allocation243_spill] sm:$0xff] %v9452_v53  ;;  %v9458_v4 = vpop.eup %6447  ;;  %v3056_v61 = vmul.f32 1.442695, %v2649_v25  ;;  %6465 = vrcp.f32 %v3292_v48  ;;  %v2712_v27 = vsub.f32 %v12459_v17, %v9290_v62  ;;  %v3446_v7 = vadd.f32 %v12461_v32, %v12460_v38  ;;  %v12470_v32 = vld [vmem:[#allocation174_spill] sm:$0xff] }
 0x440   : > { %12452 = vst [vmem:[#allocation55_spill] sm:$0xff] %v9458_v4  ;;  %v4041_v43 = vpack.c.bf16 %v3793_v51, %v3791_v16  ;;  %v9468_v15 = vpop.eup %6449  ;;  %v9470_v59 = vpop.xlane.xlu1 %2355  ;;  %v4040_v0 = vpack.c.bf16 %v3792_v52, %v3790_v44  ;;  %6467 = vpow2.f32 %v3052_v49  ;;  %v3180_v52 = vmul.f32 1.442695, %v2711_v37  ;;  %v12462_v49 = vld [vmem:[#allocation165_spill] sm:$0xff] }
 0x441   : > { %3351 = vadd.xlane.f32.xlu1 %v3350_v1  ;;  %12457 = vst [vmem:[#allocation126_spill] sm:$0xff] %v9468_v15  ;;  %v9472_v36 = vpop.eup %6451  ;;  %v3178_v1 = vmul.f32 1.442695, %v2710_v42  ;;  %v2713_v16 = vsub.f32 %v12462_v49, %v9290_v62  ;;  %v3449_v51 = vadd.f32 %v9108_v3, %v9100_v28  ;;  %v12463_v44 = vld [vmem:[#allocation169_spill] sm:$0xff]  ;;  %v3182_v17 = vmul.f32 1.442695, %v2712_v27 }
 0x442   : > { %v3295_v22 = vpop.xlane.xlu0 %3294  ;;  %12458 = vst [vmem:[#allocation127_spill] sm:$0xff] %v9472_v36  ;;  %4168 = vmatprep.subr.bf16.mxu1 %v4041_v43  ;;  %3354 = vadd.xlane.f32.xlu0 %v3353_v58  ;;  %v6454_v9 = vpop.eup %6453  ;;  %v2650_v42 = vsub.f32 %v12463_v44, %v9332_v6  ;;  %v12464_v43 = vld [vmem:[#allocation99_spill] sm:$0xff]  ;;  %v12466_v62 = vld [vmem:[#allocation170_spill] sm:$0xff]  ;;  %v12467_v49 = vld [vmem:[#allocation177_spill] sm:$0xff] }
 0x443   : > { %6469 = vrcp.f32 %v3295_v22  ;;  %4169 = vmatpush1.bf16.xpose.msra.mxu1 %v4040_v0  ;;  %v9480_v48 = vpop.eup %6455  ;;  %v3356_v58 = vadd.f32 %v12464_v43, %v9082_v11  ;;  %v12465_v0 = vld [vmem:[#allocation219_spill] sm:$0xff]  ;;  %v3855_v38 = vmul.f32 %v6454_v9, %v12467_v49  ;;  %v3184_v27 = vmul.f32 1.442695, %v2713_v16 }
 0x444   : > { %6471 = vpow2.f32 %v3054_v14  ;;  %v3388_v22 = vpop.xlane.xlu1 %3387  ;;  %v3359_v14 = vadd.f32 %v12465_v0, %v9112_v8  ;;  %v12469_v44 = vld [vmem:[#allocation175_spill] sm:$0xff]  ;;  %v3854_v8 = vmul.f32 %v6454_v9, %v12470_v32  ;;  %v12474_v32 = vld [vmem:[#allocation17_spill] sm:$0xff] }
 0x445   : > { %3447 = vadd.xlane.f32.xlu1 %v3446_v7  ;;  %v6458_v26 = vpop.eup %6457  ;;  %6473 = vpow2.f32 %v3056_v61  ;;  %v2651_v7 = vsub.f32 %v12466_v62, %v9332_v6  ;;  %v12468_v61 = vld [vmem:[#allocation180_spill] sm:$0xff]  ;;  %v2652_v11 = vsub.f32 %v12469_v44, %v9334_v29  ;;  %v12471_v0 = vld [vmem:[#allocation179_spill] sm:$0xff]  ;;  %v2714_v9 = vsub.f32 %v12474_v32, %v9372_v2 }
 0x446   : > { %v9478_v25 = vpop.xlane.xlu0 %2358  ;;  %v9492_v37 = vpop.eup %6459  ;;  %3450 = vadd.xlane.f32.xlu0 %v3449_v51  ;;  %v3857_v28 = vmul.f32 %v6458_v26, %v12468_v61  ;;  %6475 = vpow2.f32 %v3178_v1  ;;  %v3856_v54 = vmul.f32 %v6458_v26, %v12471_v0  ;;  %v12472_v6 = vld [vmem:[#allocation176_spill] sm:$0xff]  ;;  %v3058_v61 = vmul.f32 1.442695, %v2650_v42  ;;  %v12478_v0 = vld [vmem:[#allocation182_spill] sm:$0xff] }
 0x447   : > { %v9498_v3 = vpop.eup %6461  ;;  %6477 = vpow2.f32 %v3180_v52  ;;  %v2653_v51 = vsub.f32 %v12472_v6, %v9334_v29  ;;  %v3060_v44 = vmul.f32 1.442695, %v2651_v7  ;;  %v12475_v52 = vld [vmem:[#allocation108_spill] sm:$0xff]  ;;  %v3062_v26 = vmul.f32 1.442695, %v2652_v11  ;;  %v12481_v7 = vld [vmem:[#allocation255_spill] sm:$0xff] }
 0x448   : > { %v4073_v62 = vpack.c.bf16 %v3857_v28, %v3855_v38  ;;  %v9506_v49 = vpop.eup %6463  ;;  %6479 = vrcp.f32 %v3388_v22  ;;  %v9508_v1 = vpop.xlane.xlu1 %2451  ;;  %v4072_v23 = vpack.c.bf16 %v3856_v54, %v3854_v8  ;;  %v3452_v16 = vadd.f32 %v9132_v24, %v12475_v52  ;;  %v12477_v8 = vld [vmem:[#allocation178_spill] sm:$0xff]  ;;  %v12482_v6 = vld [vmem:[#allocation256_spill] sm:$0xff] }
 0x449   : > { %3357 = vadd.xlane.f32.xlu1 %v3356_v58  ;;  %12473 = vst [vmem:[#allocation151_spill] sm:$0xff] %v9506_v49  ;;  %6481 = vpow2.f32 %v3182_v17  ;;  %v6466_v29 = vpop.eup %6465  ;;  %v3064_v54 = vmul.f32 1.442695, %v2653_v51  ;;  %v2715_v42 = vsub.f32 %v12477_v8, %v9372_v2  ;;  %v3455_v22 = vadd.f32 %v9158_v12, %v9154_v60  ;;  %v12489_v12 = vld [vmem:[#allocation15_spill] sm:$0xff] }
 0x44a   : > { %v3391_v43 = vpop.xlane.xlu0 %3390  ;;  %4209 = vmatprep.subr.bf16.mxu0 %v4073_v62  ;;  %3360 = vadd.xlane.f32.xlu0 %v3359_v14  ;;  %v9516_v38 = vpop.eup %6467  ;;  %v2716_v11 = vsub.f32 %v12478_v0, %v9376_v39  ;;  %v12480_v14 = vld [vmem:[#allocation253_spill] sm:$0xff]  ;;  %v3186_v2 = vmul.f32 1.442695, %v2714_v9  ;;  %v12484_v62 = vld [vmem:[#allocation16_spill] sm:$0xff]  ;;  %v12487_v0 = vld [vmem:[#allocation183_spill] sm:$0xff] }
 0x44b   : > { %6483 = vrcp.f32 %v3391_v43  ;;  %4210 = vmatpush1.bf16.xpose.msra.mxu0 %v4072_v23  ;;  %12476 = vst [vmem:[#allocation157_spill] sm:$0xff] %v9516_v38  ;;  %v12479_v23 = vld [vmem:[#allocation38_spill] sm:$0xff]  ;;  %v3795_v32 = vmul.f32 %v6466_v29, %v12484_v62  ;;  %v2717_v52 = vsub.f32 %v12487_v0, %v9376_v39 }
 0x44c   : > { %6485 = vpow2.f32 %v3184_v27  ;;  %v3298_v43 = vpop.xlane.xlu1 %3297  ;;  %v3458_v17 = vadd.f32 %v12480_v14, %v12479_v23  ;;  %v3461_v27 = vadd.f32 %v12482_v6, %v12481_v7  ;;  %v12488_v23 = vld [vmem:[#allocation12_spill] sm:$0xff]  ;;  %v3188_v6 = vmul.f32 1.442695, %v2715_v42  ;;  %v12494_v42 = vld [vmem:[#allocation113_spill] sm:$0xff] }
 0x44d   : > { %3453 = vadd.xlane.f32.xlu1 %v3452_v16  ;;  %v6470_v58 = vpop.eup %6469  ;;  %6487 = vpow2.f32 %v3058_v61  ;;  %v12485_v16 = vld [vmem:[#allocation181_spill] sm:$0xff]  ;;  %v3794_v14 = vmul.f32 %v6466_v29, %v12488_v23 }
 0x44e   : > { %v9514_v28 = vpop.xlane.xlu0 %2454  ;;  %v9528_v51 = vpop.eup %6471  ;;  %6489 = vpow2.f32 %v3060_v44  ;;  %3456 = vadd.xlane.f32.xlu0 %v3455_v22  ;;  %v3797_v8 = vmul.f32 %v6470_v58, %v12485_v16  ;;  %v3796_v7 = vmul.f32 %v6470_v58, %v12489_v12  ;;  %v12490_v44 = vld [vmem:[#allocation188_spill] sm:$0xff]  ;;  %v3190_v16 = vmul.f32 1.442695, %v2716_v11  ;;  %v12492_v29 = vld [vmem:[#allocation189_spill] sm:$0xff] }
 0x44f   : > { %12483 = vst [vmem:[#allocation60_spill] sm:$0xff] %v9528_v51  ;;  %v9532_v61 = vpop.eup %6473  ;;  %6491 = vpow2.f32 %v3062_v26  ;;  %v2654_v9 = vsub.f32 %v12490_v44, %v9404_v20  ;;  %v2655_v12 = vsub.f32 %v12492_v29, %v9404_v20  ;;  %v12496_v20 = vld [vmem:[#allocation230_spill] sm:$0xff]  ;;  %v12500_v44 = vld [vmem:[#allocation111_spill] sm:$0xff] }
 0x450   : > { %12486 = vst [vmem:[#allocation150_spill] sm:$0xff] %v9532_v61  ;;  %6493 = vpow2.f32 %v3064_v54  ;;  %v4043_v22 = vpack.c.bf16 %v3797_v8, %v3795_v32  ;;  %v9540_v62 = vpop.eup %6475  ;;  %v9542_v26 = vpop.xlane.xlu1 %2361  ;;  %v4042_v24 = vpack.c.bf16 %v3796_v7, %v3794_v14  ;;  %v12493_v54 = vld [vmem:[#allocation112_spill] sm:$0xff]  ;;  %v12495_v7 = vld [vmem:[#allocation194_spill] sm:$0xff]  ;;  %v12497_v32 = vld [vmem:[#allocation129_spill] sm:$0xff] }
 0x451   : > { %3459 = vadd.xlane.f32.xlu1 %v3458_v17  ;;  %12491 = vst [vmem:[#allocation156_spill] sm:$0xff] %v9540_v62  ;;  %6495 = vrcp.f32 %v3298_v43  ;;  %v9544_v39 = vpop.eup %6477  ;;  %v3554_v58 = vadd.f32 %v12494_v42, %v12493_v54  ;;  %v3192_v17 = vmul.f32 1.442695, %v2717_v52  ;;  %v3066_v14 = vmul.f32 1.442695, %v2654_v9  ;;  %v12502_v54 = vld [vmem:[#allocation18_spill] sm:$0xff] }
 0x452   : > { %v3301_v60 = vpop.xlane.xlu0 %3300  ;;  %6497 = vpow2.f32 %v3186_v2  ;;  %4170 = vmatprep.subr.bf16.mxu1 %v4043_v22  ;;  %3462 = vadd.xlane.f32.xlu0 %v3461_v27  ;;  %v6480_v23 = vpop.eup %6479  ;;  %v2656_v2 = vsub.f32 %v12495_v7, %v9410_v10  ;;  %v3557_v8 = vadd.f32 %v12497_v32, %v12496_v20  ;;  %v12498_v27 = vld [vmem:[#allocation195_spill] sm:$0xff]  ;;  %v3068_v29 = vmul.f32 1.442695, %v2655_v12 }
 0x453   : > { %6499 = vrcp.f32 %v3301_v60  ;;  %4171 = vmatpush1.bf16.xpose.msra.mxu1 %v4042_v24  ;;  %v9552_v43 = vpop.eup %6481  ;;  %v2657_v52 = vsub.f32 %v12498_v27, %v9410_v10  ;;  %v12499_v24 = vld [vmem:[#allocation257_spill] sm:$0xff]  ;;  %v3859_v20 = vmul.f32 %v6480_v23, %v12502_v54 }
 0x454   : > { %6501 = vpow2.f32 %v3188_v6  ;;  %v3394_v60 = vpop.xlane.xlu1 %3393  ;;  %v3464_v22 = vadd.f32 %v12500_v44, %v12499_v24  ;;  %v3467_v6 = vadd.f32 %v9230_v63, %v9226_v45  ;;  %v12505_v10 = vld [vmem:[#allocation201_spill] sm:$0xff]  ;;  %v12506_v44 = vld [vmem:[#allocation186_spill] sm:$0xff]  ;;  %v12507_v63 = vld [vmem:[#allocation191_spill] sm:$0xff] }
 0x455   : > { %3555 = vadd.xlane.f32.xlu1 %v3554_v58  ;;  %v6484_v0 = vpop.eup %6483  ;;  %6503 = vpow2.f32 %v3190_v16  ;;  %v12501_v58 = vld [vmem:[#allocation200_spill] sm:$0xff]  ;;  %v2719_v27 = vsub.f32 %v12505_v10, %v9436_v35  ;;  %v3858_v45 = vmul.f32 %v6480_v23, %v12506_v44  ;;  %v12512_v23 = vld [vmem:[#allocation206_spill] sm:$0xff] }
 0x456   : > { %v9550_v11 = vpop.xlane.xlu0 %2364  ;;  %v9564_v9 = vpop.eup %6485  ;;  %v2718_v7 = vsub.f32 %v12501_v58, %v9436_v35  ;;  %3558 = vadd.xlane.f32.xlu0 %v3557_v8  ;;  %v12503_v16 = vld [vmem:[#allocation192_spill] sm:$0xff]  ;;  %6505 = vpow2.f32 %v3192_v17  ;;  %v3860_v47 = vmul.f32 %v6484_v0, %v12507_v63  ;;  %v3070_v58 = vmul.f32 1.442695, %v2656_v2  ;;  %v12509_v8 = vld [vmem:[#allocation205_spill] sm:$0xff] }
 0x457   : > { %v3861_v32 = vmul.f32 %v6484_v0, %v12503_v16  ;;  %v9570_v42 = vpop.eup %6487  ;;  %6507 = vpow2.f32 %v3066_v14  ;;  %v2720_v54 = vsub.f32 %v12509_v8, %v9442_v55  ;;  %v3072_v17 = vmul.f32 1.442695, %v2657_v52  ;;  %v12513_v2 = vld [vmem:[#allocation116_spill] sm:$0xff]  ;;  %v12514_v0 = vld [vmem:[#allocation49_spill] sm:$0xff] }
 0x458   : > { %12504 = vst [vmem:[#allocation61_spill] sm:$0xff] %v9570_v42  ;;  %v9576_v12 = vpop.eup %6489  ;;  %6509 = vrcp.f32 %v3394_v60  ;;  %v9582_v42 = vpop.xlane.xlu1 %2457  ;;  %v4074_v35 = vpack.c.bf16 %v3860_v47, %v3858_v45  ;;  %v3194_v63 = vmul.f32 1.442695, %v2718_v7  ;;  %v2721_v14 = vsub.f32 %v12512_v23, %v9442_v55  ;;  %v12516_v45 = vld [vmem:[#allocation211_spill] sm:$0xff]  ;;  %v12517_v55 = vld [vmem:[#allocation53_spill] sm:$0xff]  ;;  %v12519_v8 = vld [vmem:[#allocation52_spill] sm:$0xff] }
 0x459   : > { %12508 = vst [vmem:[#allocation131_spill] sm:$0xff] %v9576_v12  ;;  %3465 = vadd.xlane.f32.xlu1 %v3464_v22  ;;  %v4075_v16 = vpack.c.bf16 %v3861_v32, %v3859_v20  ;;  %v9580_v46 = vpop.eup %6491  ;;  %6511 = vpow2.f32 %v3068_v29  ;;  %v3560_v44 = vadd.f32 %v12514_v0, %v12513_v2  ;;  %v3196_v32 = vmul.f32 1.442695, %v2719_v27  ;;  %v12521_v23 = vld [vmem:[#allocation136_spill] sm:$0xff] }
 0x45a   : > { %v3397_v24 = vpop.xlane.xlu0 %3396  ;;  %12510 = vst [vmem:[#allocation132_spill] sm:$0xff] %v9580_v46  ;;  %v9584_v10 = vpop.eup %6493  ;;  %3468 = vadd.xlane.f32.xlu0 %v3467_v6  ;;  %v3198_v47 = vmul.f32 1.442695, %v2720_v54  ;;  %v2658_v22 = vsub.f32 %v12516_v45, %v9470_v59  ;;  %v3563_v29 = vadd.f32 %v12517_v55, %v9292_v30  ;;  %v12518_v6 = vld [vmem:[#allocation212_spill] sm:$0xff]  ;;  %v3200_v45 = vmul.f32 1.442695, %v2721_v14 }
 0x45b   : > { %12511 = vst [vmem:[#allocation134_spill] sm:$0xff] %v9584_v10  ;;  %4211 = vmatprep.subr.bf16.mxu0 %v4075_v16  ;;  %v6496_v20 = vpop.eup %6495  ;;  %6513 = vrcp.f32 %v3397_v24  ;;  %v2659_v27 = vsub.f32 %v12518_v6, %v9470_v59  ;;  %v12520_v16 = vld [vmem:[#allocation121_spill] sm:$0xff]  ;;  %v12524_v30 = vld [vmem:[#allocation198_spill] sm:$0xff] }
 0x45c   : > { %4212 = vmatpush1.bf16.xpose.msra.mxu0 %v4074_v35  ;;  %v9592_v60 = vpop.eup %6497  ;;  %6515 = vpow2.f32 %v3070_v58  ;;  %v3470_v35 = vadd.f32 %v12520_v16, %v12519_v8  ;;  %v3473_v58 = vadd.f32 %v9328_v33, %v12521_v23  ;;  %v12526_v59 = vld [vmem:[#allocation217_spill] sm:$0xff]  ;;  %v12527_v8 = vld [vmem:[#allocation187_spill] sm:$0xff]  ;;  %v3074_v33 = vmul.f32 1.442695, %v2658_v22 }
 0x45d   : > { %12515 = vst [vmem:[#allocation155_spill] sm:$0xff] %v9592_v60  ;;  %3561 = vadd.xlane.f32.xlu1 %v3560_v44  ;;  %v6500_v7 = vpop.eup %6499  ;;  %6517 = vpow2.f32 %v3072_v17  ;;  %v12523_v44 = vld [vmem:[#allocation190_spill] sm:$0xff]  ;;  %v2660_v6 = vsub.f32 %v12526_v59, %v9478_v25  ;;  %v3798_v16 = vmul.f32 %v6496_v20, %v12527_v8  ;;  %v12528_v60 = vld [vmem:[#allocation193_spill] sm:$0xff]  ;;  %v3569_v8 = vadd.f32 %v9386_v57, %v9378_v50 }
 0x45e   : > { %v9590_v52 = vpop.xlane.xlu0 %2460  ;;  %v3304_v24 = vpop.xlane.xlu1 %3303  ;;  %6519 = vpow2.f32 %v3194_v63  ;;  %3564 = vadd.xlane.f32.xlu0 %v3563_v29  ;;  %v3799_v2 = vmul.f32 %v6496_v20, %v12523_v44  ;;  %v3801_v55 = vmul.f32 %v6500_v7, %v12524_v30  ;;  %v3800_v23 = vmul.f32 %v6500_v7, %v12528_v60  ;;  %v12529_v63 = vld [vmem:[#allocation218_spill] sm:$0xff]  ;;  %v12532_v20 = vld [vmem:[#allocation223_spill] sm:$0xff] }
 0x45f   : > { %v9604_v54 = vpop.eup %6501  ;;  %6521 = vpow2.f32 %v3196_v32  ;;  %v2661_v14 = vsub.f32 %v12529_v63, %v9478_v25  ;;  %v3076_v30 = vmul.f32 1.442695, %v2659_v27  ;;  %v2722_v60 = vsub.f32 %v12532_v20, %v9508_v1  ;;  %v12534_v27 = vld [vmem:[#allocation224_spill] sm:$0xff] }
 0x460   : > { %12522 = vst [vmem:[#allocation161_spill] sm:$0xff] %v9604_v54  ;;  %v9608_v17 = vpop.eup %6503  ;;  %6523 = vpow2.f32 %v3198_v47  ;;  %v4045_v29 = vpack.c.bf16 %v3801_v55, %v3799_v2  ;;  %v3566_v47 = vadd.f32 %v9348_v41, %v9336_v19  ;;  %v3078_v2 = vmul.f32 1.442695, %v2660_v6 }
 0x461   : > { %12525 = vst [vmem:[#allocation135_spill] sm:$0xff] %v9608_v17  ;;  %3471 = vadd.xlane.f32.xlu1 %v3470_v35  ;;  %v9616_v44 = vpop.eup %6505  ;;  %6525 = vrcp.f32 %v3304_v24  ;;  %v4044_v17 = vpack.c.bf16 %v3800_v23, %v3798_v16  ;;  %v3080_v7 = vmul.f32 1.442695, %v2661_v14  ;;  %v2723_v24 = vsub.f32 %v12534_v27, %v9508_v1  ;;  %v12535_v35 = vld [vmem:[#allocation228_spill] sm:$0xff]  ;;  %v12538_v1 = vld [vmem:[#allocation229_spill] sm:$0xff]  ;;  %v12539_v14 = vld [vmem:[#allocation199_spill] sm:$0xff] }
 0x462   : > { %v3307_v0 = vpop.xlane.xlu0 %3306  ;;  %12530 = vst [vmem:[#allocation152_spill] sm:$0xff] %v9616_v44  ;;  %v9618_v32 = vpop.xlane.xlu1 %2367  ;;  %6527 = vpow2.f32 %v3200_v45  ;;  %4172 = vmatprep.subr.bf16.mxu1 %v4045_v29  ;;  %3474 = vadd.xlane.f32.xlu0 %v3473_v58  ;;  %v2724_v23 = vsub.f32 %v12535_v35, %v9514_v28  ;;  %v3476_v58 = vadd.f32 %v9370_v21, %v9356_v13  ;;  %v12536_v45 = vld [vmem:[#allocation146_spill] sm:$0xff]  ;;  %v3202_v6 = vmul.f32 1.442695, %v2722_v60  ;;  %v12543_v21 = vld [vmem:[#allocation29_spill] sm:$0xff] }
 0x463   : > { %v9620_v59 = vpop.eup %6507  ;;  %6529 = vrcp.f32 %v3307_v0  ;;  %4173 = vmatpush1.bf16.xpose.msra.mxu1 %v4044_v17  ;;  %v2725_v63 = vsub.f32 %v12538_v1, %v9514_v28  ;;  %v12542_v27 = vld [vmem:[#allocation234_spill] sm:$0xff]  ;;  %v3204_v28 = vmul.f32 1.442695, %v2723_v24 }
 0x464   : > { %12531 = vst [vmem:[#allocation160_spill] sm:$0xff] %v9620_v59  ;;  %v6510_v25 = vpop.eup %6509  ;;  %6531 = vpow2.f32 %v3074_v33  ;;  %v3479_v33 = vadd.f32 %v9402_v34, %v12536_v45  ;;  %v2662_v35 = vsub.f32 %v12542_v27, %v9542_v26  ;;  %v12544_v34 = vld [vmem:[#allocation33_spill] sm:$0xff] }
 0x465   : > { %v9628_v55 = vpop.eup %6511  ;;  %3567 = vadd.xlane.f32.xlu1 %v3566_v47  ;;  %6533 = vpow2.f32 %v3076_v30  ;;  %v3863_v29 = vmul.f32 %v6510_v25, %v12539_v14  ;;  %v12540_v30 = vld [vmem:[#allocation204_spill] sm:$0xff]  ;;  %v3862_v45 = vmul.f32 %v6510_v25, %v12543_v21  ;;  %v3208_v21 = vmul.f32 1.442695, %v2725_v63 }
 0x466   : > { %v9626_v22 = vpop.xlane.xlu0 %2370  ;;  %12533 = vst [vmem:[#allocation139_spill] sm:$0xff] %v9628_v55  ;;  %v6514_v16 = vpop.eup %6513  ;;  %3570 = vadd.xlane.f32.xlu0 %v3569_v8  ;;  %6535 = vpow2.f32 %v3078_v2  ;;  %v12546_v8 = vld [vmem:[#allocation235_spill] sm:$0xff]  ;;  %v3206_v2 = vmul.f32 1.442695, %v2724_v23  ;;  %v3082_v24 = vmul.f32 1.442695, %v2662_v35 }
 0x467   : > { %v3400_v0 = vpop.xlane.xlu1 %3399  ;;  %v9640_v17 = vpop.eup %6515  ;;  %v3865_v20 = vmul.f32 %v6514_v16, %v12540_v30  ;;  %v3864_v19 = vmul.f32 %v6514_v16, %v12544_v34  ;;  %6537 = vpow2.f32 %v3080_v7  ;;  %v2663_v1 = vsub.f32 %v12546_v8, %v9542_v26  ;;  %v12547_v34 = vld [vmem:[#allocation240_spill] sm:$0xff] }
 0x468   : > { %12537 = vst [vmem:[#allocation140_spill] sm:$0xff] %v9640_v17  ;;  %v9646_v47 = vpop.eup %6517  ;;  %6539 = vrcp.f32 %v3400_v0  ;;  %v2664_v25 = vsub.f32 %v12547_v34, %v9550_v11  ;;  %v3572_v26 = vadd.f32 %v9420_v5, %v9412_v31  ;;  %v12548_v0 = vld [vmem:[#allocation241_spill] sm:$0xff] }
 0x469   : > { %12541 = vst [vmem:[#allocation142_spill] sm:$0xff] %v9646_v47  ;;  %v9652_v60 = vpop.eup %6519  ;;  %3477 = vadd.xlane.f32.xlu1 %v3476_v58  ;;  %v4077_v14 = vpack.c.bf16 %v3865_v20, %v3863_v29  ;;  %v4076_v27 = vpack.c.bf16 %v3864_v19, %v3862_v45  ;;  %6541 = vpow2.f32 %v3202_v6  ;;  %v3084_v19 = vmul.f32 1.442695, %v2663_v1  ;;  %v12552_v1 = vld [vmem:[#allocation36_spill] sm:$0xff] }
 0x46a   : > { %v3403_v13 = vpop.xlane.xlu0 %3402  ;;  %12545 = vst [vmem:[#allocation143_spill] sm:$0xff] %v9652_v60  ;;  %v9656_v30 = vpop.eup %6521  ;;  %3480 = vadd.xlane.f32.xlu0 %v3479_v33  ;;  %v2665_v58 = vsub.f32 %v12548_v0, %v9550_v11  ;;  %v3575_v45 = vadd.f32 %v9434_v18, %v9426_v40  ;;  %v12549_v33 = vld [vmem:[#allocation246_spill] sm:$0xff]  ;;  %v3482_v29 = vadd.f32 %v9452_v53, %v9444_v56  ;;  %v3086_v11 = vmul.f32 1.442695, %v2664_v25  ;;  %v12556_v56 = vld [vmem:[#allocation209_spill] sm:$0xff] }
 0x46b   : > { %v9658_v50 = vpop.xlane.xlu1 %2463  ;;  %v9660_v57 = vpop.eup %6523  ;;  %4213 = vmatprep.subr.bf16.mxu0 %v4077_v14  ;;  %6543 = vrcp.f32 %v3403_v13  ;;  %v2726_v63 = vsub.f32 %v12549_v33, %v9582_v42  ;;  %v3485_v20 = vadd.f32 %v9468_v15, %v9458_v4  ;;  %v12555_v0 = vld [vmem:[#allocation202_spill] sm:$0xff] }
 0x46c   : > { %v6526_v7 = vpop.eup %6525  ;;  %4214 = vmatpush1.bf16.xpose.msra.mxu0 %v4076_v27  ;;  %6545 = vpow2.f32 %v3204_v28  ;;  %v12551_v28 = vld [vmem:[#allocation203_spill] sm:$0xff]  ;;  %v12554_v27 = vld [vmem:[#allocation13_spill] sm:$0xff]  ;;  %v3088_v15 = vmul.f32 1.442695, %v2665_v58 }
 0x46d   : > { %v9668_v23 = vpop.eup %6527  ;;  %3573 = vadd.xlane.f32.xlu1 %v3572_v26  ;;  %6547 = vpow2.f32 %v3206_v2  ;;  %v3803_v8 = vmul.f32 %v6526_v7, %v12551_v28  ;;  %v2727_v34 = vsub.f32 %v12554_v27, %v9582_v42  ;;  %v3802_v33 = vmul.f32 %v6526_v7, %v12555_v0  ;;  %v12560_v7 = vld [vmem:[#allocation250_spill] sm:$0xff]  ;;  %v12564_v0 = vld [vmem:[#allocation69_spill] sm:$0xff] }
 0x46e   : > { %v9666_v16 = vpop.xlane.xlu0 %2466  ;;  %v6530_v6 = vpop.eup %6529  ;;  %6549 = vpow2.f32 %v3208_v21  ;;  %3576 = vadd.xlane.f32.xlu0 %v3575_v45  ;;  %v12557_v21 = vld [vmem:[#allocation14_spill] sm:$0xff] }
 0x46f   : > { %v3310_v13 = vpop.xlane.xlu1 %3309  ;;  %v9680_v35 = vpop.eup %6531  ;;  %v3805_v14 = vmul.f32 %v6530_v6, %v12552_v1  ;;  %6551 = vpow2.f32 %v3082_v24  ;;  %v3804_v4 = vmul.f32 %v6530_v6, %v12556_v56  ;;  %v2728_v25 = vsub.f32 %v12557_v21, %v9590_v52  ;;  %v12565_v21 = vld [vmem:[#allocation213_spill] sm:$0xff] }
 0x470   : > { %12550 = vst [vmem:[#allocation163_spill] sm:$0xff] %v9680_v35  ;;  %v9684_v2 = vpop.eup %6533  ;;  %6553 = vpow2.f32 %v3084_v19  ;;  %v3210_v1 = vmul.f32 1.442695, %v2726_v63  ;;  %v2729_v56 = vsub.f32 %v12560_v7, %v9590_v52  ;;  %v3578_v19 = vadd.f32 %v9480_v48, %v9472_v36 }
 0x471   : > { %12553 = vst [vmem:[#allocation171_spill] sm:$0xff] %v9684_v2  ;;  %3483 = vadd.xlane.f32.xlu1 %v3482_v29  ;;  %v4047_v45 = vpack.c.bf16 %v3805_v14, %v3803_v8  ;;  %v9692_v28 = vpop.eup %6535  ;;  %6555 = vrcp.f32 %v3310_v13  ;;  %v4046_v53 = vpack.c.bf16 %v3804_v4, %v3802_v33  ;;  %v3212_v6 = vmul.f32 1.442695, %v2727_v34  ;;  %v12562_v29 = vld [vmem:[#allocation65_spill] sm:$0xff] }
 0x472   : > { %v3313_v26 = vpop.xlane.xlu0 %3312  ;;  %12558 = vst [vmem:[#allocation147_spill] sm:$0xff] %v9692_v28  ;;  %v9696_v42 = vpop.eup %6537  ;;  %6557 = vpow2.f32 %v3086_v11  ;;  %3486 = vadd.xlane.f32.xlu0 %v3485_v20  ;;  %v3214_v4 = vmul.f32 1.442695, %v2728_v25  ;;  %v2666_v11 = vsub.f32 %v12562_v29, %v9618_v32  ;;  %v3581_v52 = vadd.f32 %v9498_v3, %v9492_v37  ;;  %v12563_v20 = vld [vmem:[#allocation62_spill] sm:$0xff] }
 0x473   : > { %v9694_v24 = vpop.xlane.xlu1 %2373  ;;  %12559 = vst [vmem:[#allocation162_spill] sm:$0xff] %v9696_v42  ;;  %4174 = vmatprep.subr.bf16.mxu1 %v4047_v45  ;;  %v6540_v58 = vpop.eup %6539  ;;  %6559 = vrcp.f32 %v3313_v26  ;;  %v2667_v14 = vsub.f32 %v12563_v20, %v9618_v32  ;;  %v3216_v26 = vmul.f32 1.442695, %v2729_v56  ;;  %v2668_v33 = vsub.f32 %v12564_v0, %v9626_v22  ;;  %v12566_v45 = vld [vmem:[#allocation221_spill] sm:$0xff]  ;;  %v12568_v20 = vld [vmem:[#allocation210_spill] sm:$0xff] }
 0x474   : > { %4175 = vmatpush1.bf16.xpose.msra.mxu1 %v4046_v53  ;;  %v9704_v13 = vpop.eup %6541  ;;  %6561 = vpow2.f32 %v3088_v15  ;;  %v3488_v53 = vadd.f32 %v9516_v38, %v9506_v49  ;;  %v3491_v15 = vadd.f32 %v9532_v61, %v9528_v51  ;;  %v3867_v25 = vmul.f32 %v6540_v58, %v12565_v21  ;;  %v12567_v32 = vld [vmem:[#allocation21_spill] sm:$0xff]  ;;  %v12569_v51 = vld [vmem:[#allocation216_spill] sm:$0xff] }
 0x475   : > { %12561 = vst [vmem:[#allocation168_spill] sm:$0xff] %v9704_v13  ;;  %3579 = vadd.xlane.f32.xlu1 %v3578_v19  ;;  %v6544_v8 = vpop.eup %6543  ;;  %6563 = vpow2.f32 %v3210_v1  ;;  %v2669_v19 = vsub.f32 %v12567_v32, %v9626_v22  ;;  %v3866_v49 = vmul.f32 %v6540_v58, %v12568_v20  ;;  %v3090_v0 = vmul.f32 1.442695, %v2666_v11  ;;  %v12573_v58 = vld [vmem:[#allocation73_spill] sm:$0xff] }
 0x476   : > { %v9702_v63 = vpop.xlane.xlu0 %2376  ;;  %v9716_v34 = vpop.eup %6545  ;;  %3582 = vadd.xlane.f32.xlu0 %v3581_v52  ;;  %v3869_v1 = vmul.f32 %v6544_v8, %v12566_v45  ;;  %6565 = vpow2.f32 %v3212_v6  ;;  %v3868_v61 = vmul.f32 %v6544_v8, %v12569_v51  ;;  %v12570_v52 = vld [vmem:[#allocation72_spill] sm:$0xff]  ;;  %v3092_v6 = vmul.f32 1.442695, %v2667_v14 }
 0x477   : > { %v3406_v27 = vpop.xlane.xlu1 %3405  ;;  %v9722_v7 = vpop.eup %6547  ;;  %6567 = vpow2.f32 %v3214_v4  ;;  %v2730_v21 = vsub.f32 %v12570_v52, %v9658_v50  ;;  %v3094_v51 = vmul.f32 1.442695, %v2668_v33  ;;  %v2731_v4 = vsub.f32 %v12573_v58, %v9658_v50 }
 0x478   : > { %v9728_v56 = vpop.eup %6549  ;;  %v4079_v45 = vpack.c.bf16 %v3869_v1, %v3867_v25  ;;  %6569 = vrcp.f32 %v3406_v27  ;;  %v4078_v22 = vpack.c.bf16 %v3868_v61, %v3866_v49  ;;  %v3584_v11 = vadd.f32 %v9544_v39, %v9540_v62  ;;  %v12575_v61 = vld [vmem:[#allocation76_spill] sm:$0xff] }
 0x479   : > { %3489 = vadd.xlane.f32.xlu1 %v3488_v53  ;;  %v9732_v38 = vpop.eup %6551  ;;  %6571 = vpow2.f32 %v3216_v26  ;;  %v3096_v53 = vmul.f32 1.442695, %v2669_v19  ;;  %v3218_v49 = vmul.f32 1.442695, %v2730_v21  ;;  %v2732_v26 = vsub.f32 %v12575_v61, %v9666_v16  ;;  %v12577_v19 = vld [vmem:[#allocation61_spill] sm:$0xff]  ;;  %v12579_v21 = vld [vmem:[#allocation215_spill] sm:$0xff] }
 0x47a   : > { %v3409_v29 = vpop.xlane.xlu0 %3408  ;;  %12571 = vst [vmem:[#allocation148_spill] sm:$0xff] %v9732_v38  ;;  %v9736_v32 = vpop.eup %6553  ;;  %4215 = vmatprep.subr.bf16.mxu0 %v4079_v45  ;;  %3492 = vadd.xlane.f32.xlu0 %v3491_v15  ;;  %v3587_v50 = vadd.f32 %v9564_v9, %v9552_v43  ;;  %v12576_v15 = vld [vmem:[#allocation25_spill] sm:$0xff]  ;;  %v3497_v20 = vadd.f32 %v9584_v10, %v9580_v46  ;;  %v3220_v52 = vmul.f32 1.442695, %v2731_v4 }
 0x47b   : > { %v9734_v36 = vpop.xlane.xlu1 %2469  ;;  %12572 = vst [vmem:[#allocation153_spill] sm:$0xff] %v9736_v32  ;;  %v6556_v8 = vpop.eup %6555  ;;  %6573 = vrcp.f32 %v3409_v29  ;;  %4216 = vmatpush1.bf16.xpose.msra.mxu0 %v4078_v22  ;;  %v2733_v25 = vsub.f32 %v12576_v15, %v9666_v16  ;;  %v3494_v29 = vadd.f32 %v9576_v12, %v12577_v19  ;;  %v12580_v22 = vld [vmem:[#allocation222_spill] sm:$0xff]  ;;  %v12582_v16 = vld [vmem:[#allocation75_spill] sm:$0xff]  ;;  %v3222_v10 = vmul.f32 1.442695, %v2732_v26 }
 0x47c   : > { %v9744_v27 = vpop.eup %6557  ;;  %6575 = vpow2.f32 %v3090_v0  ;;  %v3807_v45 = vmul.f32 %v6556_v8, %v12579_v21  ;;  %v12583_v15 = vld [vmem:[#allocation214_spill] sm:$0xff]  ;;  %v12584_v12 = vld [vmem:[#allocation39_spill] sm:$0xff] }
 0x47d   : > { %12574 = vst [vmem:[#allocation154_spill] sm:$0xff] %v9744_v27  ;;  %3585 = vadd.xlane.f32.xlu1 %v3584_v11  ;;  %v6560_v33 = vpop.eup %6559  ;;  %6577 = vpow2.f32 %v3092_v6  ;;  %v2670_v11 = vsub.f32 %v12582_v16, %v9694_v24  ;;  %v3806_v19 = vmul.f32 %v6556_v8, %v12583_v15  ;;  %v12586_v8 = vld [vmem:[#allocation79_spill] sm:$0xff] }
 0x47e   : > { %v9742_v14 = vpop.xlane.xlu0 %2472  ;;  %v9756_v0 = vpop.eup %6561  ;;  %6579 = vpow2.f32 %v3094_v51  ;;  %3588 = vadd.xlane.f32.xlu0 %v3587_v50  ;;  %v3809_v58 = vmul.f32 %v6560_v33, %v12580_v22  ;;  %v3808_v46 = vmul.f32 %v6560_v33, %v12584_v12  ;;  %v12585_v51 = vld [vmem:[#allocation80_spill] sm:$0xff]  ;;  %v3224_v22 = vmul.f32 1.442695, %v2733_v25 }
 0x47f   : > { %v3316_v1 = vpop.xlane.xlu1 %3315  ;;  %12578 = vst [vmem:[#allocation167_spill] sm:$0xff] %v9756_v0  ;;  %v9760_v6 = vpop.eup %6563  ;;  %6581 = vpow2.f32 %v3096_v53  ;;  %v2671_v4 = vsub.f32 %v12585_v51, %v9694_v24  ;;  %v2672_v12 = vsub.f32 %v12586_v8, %v9702_v63  ;;  %v3098_v33 = vmul.f32 1.442695, %v2670_v11 }
 0x480   : > { %12581 = vst [vmem:[#allocation173_spill] sm:$0xff] %v9760_v6  ;;  %6583 = vpow2.f32 %v3218_v49  ;;  %v4049_v50 = vpack.c.bf16 %v3809_v58, %v3807_v45  ;;  %v9768_v21 = vpop.eup %6565  ;;  %v4048_v62 = vpack.c.bf16 %v3808_v46, %v3806_v19  ;;  %v12587_v49 = vld [vmem:[#allocation155_spill] sm:$0xff]  ;;  %v12588_v19 = vld [vmem:[#allocation28_spill] sm:$0xff] }
 0x481   : > { %3495 = vadd.xlane.f32.xlu1 %v3494_v29  ;;  %6585 = vrcp.f32 %v3316_v1  ;;  %v9772_v16 = vpop.eup %6567  ;;  %v3590_v26 = vadd.f32 %v9604_v54, %v12587_v49  ;;  %v3100_v46 = vmul.f32 1.442695, %v2671_v4  ;;  %v2673_v29 = vsub.f32 %v12588_v19, %v9702_v63  ;;  %v12592_v63 = vld [vmem:[#allocation83_spill] sm:$0xff]  ;;  %v12597_v49 = vld [vmem:[#allocation225_spill] sm:$0xff] }
 0x482   : > { %v3319_v61 = vpop.xlane.xlu0 %3318  ;;  %6587 = vpow2.f32 %v3220_v52  ;;  %4176 = vmatprep.subr.bf16.mxu1 %v4049_v50  ;;  %3498 = vadd.xlane.f32.xlu0 %v3497_v20  ;;  %v6570_v24 = vpop.eup %6569  ;;  %v12589_v52 = vld [vmem:[#allocation135_spill] sm:$0xff]  ;;  %v12590_v20 = vld [vmem:[#allocation82_spill] sm:$0xff]  ;;  %v3102_v51 = vmul.f32 1.442695, %v2672_v12  ;;  %v2735_v4 = vsub.f32 %v12592_v63, %v9734_v36 }
 0x483   : > { %v9770_v53 = vpop.xlane.xlu1 %2379  ;;  %6589 = vrcp.f32 %v3319_v61  ;;  %4177 = vmatpush1.bf16.xpose.msra.mxu1 %v4048_v62  ;;  %v9780_v1 = vpop.eup %6571  ;;  %v3593_v45 = vadd.f32 %v9616_v44, %v12589_v52  ;;  %v2734_v11 = vsub.f32 %v12590_v20, %v9734_v36  ;;  %v3500_v62 = vadd.f32 %v9628_v55, %v9620_v59  ;;  %v12593_v50 = vld [vmem:[#allocation226_spill] sm:$0xff] }
 0x484   : > { %6591 = vpow2.f32 %v3222_v10  ;;  %v3503_v10 = vadd.f32 %v9646_v47, %v9640_v17  ;;  %v3871_v8 = vmul.f32 %v6570_v24, %v12593_v50  ;;  %v12596_v20 = vld [vmem:[#allocation86_spill] sm:$0xff]  ;;  %v3870_v17 = vmul.f32 %v6570_v24, %v12597_v49  ;;  %v12598_v47 = vld [vmem:[#allocation232_spill] sm:$0xff]  ;;  %v12601_v49 = vld [vmem:[#allocation93_spill] sm:$0xff] }
 0x485   : > { %3591 = vadd.xlane.f32.xlu1 %v3590_v26  ;;  %v6574_v58 = vpop.eup %6573  ;;  %6593 = vpow2.f32 %v3224_v22  ;;  %v12594_v22 = vld [vmem:[#allocation46_spill] sm:$0xff]  ;;  %v2736_v59 = vsub.f32 %v12596_v20, %v9742_v14  ;;  %v3104_v36 = vmul.f32 1.442695, %v2673_v29  ;;  %v2674_v24 = vsub.f32 %v12601_v49, %v9770_v53 }
 0x486   : > { %v9778_v25 = vpop.xlane.xlu0 %2382  ;;  %v9792_v15 = vpop.eup %6575  ;;  %3594 = vadd.xlane.f32.xlu0 %v3593_v45  ;;  %v3873_v26 = vmul.f32 %v6574_v58, %v12594_v22  ;;  %6595 = vpow2.f32 %v3098_v33  ;;  %v3872_v52 = vmul.f32 %v6574_v58, %v12598_v47  ;;  %v12599_v45 = vld [vmem:[#allocation32_spill] sm:$0xff]  ;;  %v3226_v33 = vmul.f32 1.442695, %v2734_v11 }
 0x487   : > { %v3412_v61 = vpop.xlane.xlu1 %3411  ;;  %12591 = vst [vmem:[#allocation158_spill] sm:$0xff] %v9792_v15  ;;  %v9798_v19 = vpop.eup %6577  ;;  %6597 = vpow2.f32 %v3100_v46  ;;  %v2737_v63 = vsub.f32 %v12599_v45, %v9742_v14  ;;  %v3228_v47 = vmul.f32 1.442695, %v2735_v4  ;;  %v3596_v14 = vadd.f32 %v9656_v30, %v9652_v60 }
 0x488   : > { %12595 = vst [vmem:[#allocation166_spill] sm:$0xff] %v9798_v19  ;;  %v9804_v12 = vpop.eup %6579  ;;  %v4081_v50 = vpack.c.bf16 %v3873_v26, %v3871_v8  ;;  %6599 = vrcp.f32 %v3412_v61  ;;  %v4080_v20 = vpack.c.bf16 %v3872_v52, %v3870_v17  ;;  %v3230_v29 = vmul.f32 1.442695, %v2736_v59  ;;  %v12602_v52 = vld [vmem:[#allocation90_spill] sm:$0xff] }
 0x489   : > { %3501 = vadd.xlane.f32.xlu1 %v3500_v62  ;;  %v9808_v22 = vpop.eup %6581  ;;  %6601 = vpow2.f32 %v3102_v51  ;;  %v3232_v17 = vmul.f32 1.442695, %v2737_v63  ;;  %v2675_v61 = vsub.f32 %v12602_v52, %v9770_v53  ;;  %v3599_v62 = vadd.f32 %v9668_v23, %v9660_v57  ;;  %v12606_v63 = vld [vmem:[#allocation236_spill] sm:$0xff]  ;;  %v12608_v52 = vld [vmem:[#allocation43_spill] sm:$0xff] }
 0x48a   : > { %v3415_v55 = vpop.xlane.xlu0 %3414  ;;  %v9812_v54 = vpop.eup %6583  ;;  %4217 = vmatprep.subr.bf16.mxu0 %v4081_v50  ;;  %3504 = vadd.xlane.f32.xlu0 %v3503_v10  ;;  %v12603_v10 = vld [vmem:[#allocation97_spill] sm:$0xff]  ;;  %v3506_v4 = vadd.f32 %v9684_v2, %v9680_v35  ;;  %v3509_v8 = vadd.f32 %v9696_v42, %v9692_v28  ;;  %v3106_v53 = vmul.f32 1.442695, %v2674_v24 }
 0x48b   : > { %v9810_v44 = vpop.xlane.xlu1 %2475  ;;  %12600 = vst [vmem:[#allocation172_spill] sm:$0xff] %v9812_v54  ;;  %v6586_v46 = vpop.eup %6585  ;;  %6603 = vrcp.f32 %v3415_v55  ;;  %4218 = vmatpush1.bf16.xpose.msra.mxu0 %v4080_v20  ;;  %v2676_v59 = vsub.f32 %v12603_v10, %v9778_v25  ;;  %v12607_v20 = vld [vmem:[#allocation31_spill] sm:$0xff]  ;;  %v12609_v35 = vld [vmem:[#allocation233_spill] sm:$0xff]  ;;  %v3108_v42 = vmul.f32 1.442695, %v2675_v61 }
 0x48c   : > { %v9820_v11 = vpop.eup %6587  ;;  %6605 = vpow2.f32 %v3104_v36  ;;  %v12605_v36 = vld [vmem:[#allocation227_spill] sm:$0xff]  ;;  %v2677_v49 = vsub.f32 %v12607_v20, %v9778_v25  ;;  %v3810_v10 = vmul.f32 %v6586_v46, %v12608_v52  ;;  %v12612_v25 = vld [vmem:[#allocation101_spill] sm:$0xff] }
 0x48d   : > { %3597 = vadd.xlane.f32.xlu1 %v3596_v14  ;;  %v6590_v51 = vpop.eup %6589  ;;  %6607 = vpow2.f32 %v3226_v33  ;;  %v3811_v45 = vmul.f32 %v6586_v46, %v12605_v36  ;;  %v2739_v46 = vsub.f32 %v12612_v25, %v9810_v44 }
 0x48e   : > { %v9818_v58 = vpop.xlane.xlu0 %2478  ;;  %v9832_v26 = vpop.eup %6591  ;;  %6609 = vpow2.f32 %v3228_v47  ;;  %3600 = vadd.xlane.f32.xlu0 %v3599_v62  ;;  %v3813_v50 = vmul.f32 %v6590_v51, %v12606_v63  ;;  %v3812_v28 = vmul.f32 %v6590_v51, %v12609_v35  ;;  %v12610_v47 = vld [vmem:[#allocation100_spill] sm:$0xff]  ;;  %v3110_v63 = vmul.f32 1.442695, %v2676_v59 }
 0x48f   : > { %v3322_v55 = vpop.xlane.xlu1 %3321  ;;  %12604 = vst [vmem:[#allocation159_spill] sm:$0xff] %v9832_v26  ;;  %v9836_v33 = vpop.eup %6593  ;;  %6611 = vpow2.f32 %v3230_v29  ;;  %v2738_v24 = vsub.f32 %v12610_v47, %v9810_v44  ;;  %v3602_v35 = vadd.f32 %v9716_v34, %v9704_v13  ;;  %v3112_v61 = vmul.f32 1.442695, %v2677_v49 }
 0x490   : > { %6613 = vpow2.f32 %v3232_v17  ;;  %v4051_v62 = vpack.c.bf16 %v3813_v50, %v3811_v45  ;;  %v9844_v36 = vpop.eup %6595  ;;  %v4050_v2 = vpack.c.bf16 %v3812_v28, %v3810_v10  ;;  %v3605_v44 = vadd.f32 %v9728_v56, %v9722_v7  ;;  %v12616_v10 = vld [vmem:[#allocation238_spill] sm:$0xff] }
 0x491   : > { %3507 = vadd.xlane.f32.xlu1 %v3506_v4  ;;  %12611 = vst [vmem:[#allocation164_spill] sm:$0xff] %v9844_v36  ;;  %6615 = vrcp.f32 %v3322_v55  ;;  %v9846_v60 = vpop.eup %6597  ;;  %v3234_v28 = vmul.f32 1.442695, %v2738_v24  ;;  %v12613_v55 = vld [vmem:[#allocation104_spill] sm:$0xff]  ;;  %v3236_v49 = vmul.f32 1.442695, %v2739_v46 }
 0x492   : > { %v3325_v14 = vpop.xlane.xlu0 %3324  ;;  %6617 = vpow2.f32 %v3106_v53  ;;  %4178 = vmatprep.subr.bf16.mxu1 %v4051_v62  ;;  %3510 = vadd.xlane.f32.xlu0 %v3509_v8  ;;  %v6600_v17 = vpop.eup %6599  ;;  %v2740_v4 = vsub.f32 %v12613_v55, %v9818_v58  ;;  %v12614_v8 = vld [vmem:[#allocation35_spill] sm:$0xff]  ;;  %v12617_v24 = vld [vmem:[#allocation245_spill] sm:$0xff] }
 0x493   : > { %v2386_v29 = vpop.xlane.xlu1 %2385  ;;  %6619 = vrcp.f32 %v3325_v14  ;;  %4179 = vmatpush1.bf16.xpose.msra.mxu1 %v4050_v2  ;;  %v9852_v59 = vpop.eup %6601  ;;  %v2741_v45 = vsub.f32 %v12614_v8, %v9818_v58  ;;  %v3512_v2 = vadd.f32 %v9736_v32, %v9732_v38  ;;  %v12615_v14 = vld [vmem:[#allocation103_spill] sm:$0xff]  ;;  %v3875_v47 = vmul.f32 %v6600_v17, %v12616_v10  ;;  %v12619_v58 = vld [vmem:[#allocation41_spill] sm:$0xff] }
 0x494   : > { %6621 = vpow2.f32 %v3108_v42  ;;  %v3515_v42 = vadd.f32 %v9756_v0, %v9744_v27  ;;  %v2678_v52 = vsub.f32 %v12615_v14, %v2386_v29  ;;  %v2679_v25 = vsub.f32 %v12619_v58, %v2386_v29  ;;  %v12620_v55 = vld [vmem:[#allocation237_spill] sm:$0xff]  ;;  %v12622_v14 = vld [vmem:[#allocation106_spill] sm:$0xff]  ;;  %v12624_v58 = vld [vmem:[#allocation44_spill] sm:$0xff] }
 0x495   : > { %3603 = vadd.xlane.f32.xlu1 %v3602_v35  ;;  %v6604_v53 = vpop.eup %6603  ;;  %6623 = vpow2.f32 %v3110_v63  ;;  %v3874_v8 = vmul.f32 %v6600_v17, %v12620_v55  ;;  %v12621_v38 = vld [vmem:[#allocation57_spill] sm:$0xff]  ;;  %v3238_v46 = vmul.f32 1.442695, %v2740_v4  ;;  %v12629_v55 = vld [vmem:[#allocation244_spill] sm:$0xff] }
 0x496   : > { %v2389_v51 = vpop.xlane.xlu0 %2388  ;;  %v9864_v20 = vpop.eup %6605  ;;  %3606 = vadd.xlane.f32.xlu0 %v3605_v44  ;;  %v3877_v62 = vmul.f32 %v6604_v53, %v12617_v24  ;;  %6625 = vpow2.f32 %v3112_v61  ;;  %v3876_v27 = vmul.f32 %v6604_v53, %v12621_v38  ;;  %v3240_v24 = vmul.f32 1.442695, %v2741_v45 }
 0x497   : > { %v3418_v50 = vpop.xlane.xlu1 %3417  ;;  %v9869_v63 = vpop.eup %6607  ;;  %6627 = vpow2.f32 %v3234_v28  ;;  %v2680_v44 = vsub.f32 %v12622_v14, %v2389_v51  ;;  %v3114_v17 = vmul.f32 1.442695, %v2678_v52  ;;  %v2681_v38 = vsub.f32 %v12624_v58, %v2389_v51  ;;  %v12627_v52 = vld [vmem:[#allocation45_spill] sm:$0xff] }
 0x498   : > { %12618 = vst [vmem:[#allocation165_spill] sm:$0xff] %v9869_v63  ;;  %v9874_v0 = vpop.eup %6609  ;;  %v4083_v10 = vpack.c.bf16 %v3877_v62, %v3875_v47  ;;  %6629 = vrcp.f32 %v3418_v50  ;;  %v4082_v13 = vpack.c.bf16 %v3876_v27, %v3874_v8  ;;  %v3608_v28 = vadd.f32 %v9768_v21, %v9760_v6  ;;  %v12626_v50 = vld [vmem:[#allocation220_spill] sm:$0xff] }
 0x499   : > { %3513 = vadd.xlane.f32.xlu1 %v3512_v2  ;;  %v9877_v32 = vpop.eup %6611  ;;  %6631 = vpow2.f32 %v3236_v49  ;;  %v3116_v53 = vmul.f32 1.442695, %v2679_v25  ;;  %v3118_v27 = vmul.f32 1.442695, %v2680_v44  ;;  %v3611_v51 = vadd.f32 %v9780_v1, %v9772_v16 }
 0x49a   : > { %v3421_v35 = vpop.xlane.xlu0 %3420  ;;  %12623 = vst [vmem:[#allocation169_spill] sm:$0xff] %v9877_v32  ;;  %v9879_v29 = vpop.eup %6613  ;;  %4219 = vmatprep.subr.bf16.mxu0 %v4083_v10  ;;  %3516 = vadd.xlane.f32.xlu0 %v3515_v42  ;;  %v3518_v25 = vadd.f32 %v9798_v19, %v9792_v15  ;;  %v12631_v10 = vld [vmem:[#allocation110_spill] sm:$0xff] }
 0x49b   : > { %v2482_v61 = vpop.xlane.xlu1 %2481  ;;  %v6616_v4 = vpop.eup %6615  ;;  %6633 = vrcp.f32 %v3421_v35  ;;  %4220 = vmatpush1.bf16.xpose.msra.mxu0 %v4082_v13  ;;  %v3120_v35 = vmul.f32 1.442695, %v2681_v38  ;;  %v3521_v38 = vadd.f32 %v9808_v22, %v9804_v12 }
 0x49c   : > { %v9884_v45 = vpop.eup %6617  ;;  %6635 = vpow2.f32 %v3238_v46  ;;  %v2742_v47 = vsub.f32 %v12626_v50, %v2482_v61  ;;  %v2743_v62 = vsub.f32 %v12627_v52, %v2482_v61  ;;  %v3815_v8 = vmul.f32 %v6616_v4, %v12629_v55  ;;  %v12630_v46 = vld [vmem:[#allocation248_spill] sm:$0xff]  ;;  %v12632_v61 = vld [vmem:[#allocation239_spill] sm:$0xff] }
 0x49d   : > { %12625 = vst [vmem:[#allocation170_spill] sm:$0xff] %v9884_v45  ;;  %3609 = vadd.xlane.f32.xlu1 %v3608_v28  ;;  %v6620_v49 = vpop.eup %6619  ;;  %6637 = vpow2.f32 %v3240_v24  ;;  %v3814_v28 = vmul.f32 %v6616_v4, %v12632_v61  ;;  %v12633_v50 = vld [vmem:[#allocation247_spill] sm:$0xff] }
 0x49e   : > { %v2485_v2 = vpop.xlane.xlu0 %2484  ;;  %v9892_v13 = vpop.eup %6621  ;;  %6639 = vpow2.f32 %v3114_v17  ;;  %3612 = vadd.xlane.f32.xlu0 %v3611_v51  ;;  %v3817_v14 = vmul.f32 %v6620_v49, %v12630_v46  ;;  %v3816_v52 = vmul.f32 %v6620_v49, %v12633_v50  ;;  %v3242_v15 = vmul.f32 1.442695, %v2742_v47  ;;  %v12634_v46 = vld [vmem:[#allocation42_spill] sm:$0xff]  ;;  %v12636_v4 = vld [vmem:[#allocation115_spill] sm:$0xff] }
 0x49f   : > { %v3328_v42 = vpop.xlane.xlu1 %3327  ;;  %12628 = vst [vmem:[#allocation177_spill] sm:$0xff] %v9892_v13  ;;  %v9896_v44 = vpop.eup %6623  ;;  %6641 = vpow2.f32 %v3116_v53  ;;  %v2744_v24 = vsub.f32 %v12631_v10, %v2485_v2  ;;  %v3244_v55 = vmul.f32 1.442695, %v2743_v62  ;;  %v2745_v53 = vsub.f32 %v12634_v46, %v2485_v2  ;;  %v12637_v2 = vld [vmem:[#allocation48_spill] sm:$0xff]  ;;  %v12638_v50 = vld [vmem:[#allocation130_spill] sm:$0xff] }
 0x4a0   : > { %6643 = vpow2.f32 %v3118_v27  ;;  %v4053_v17 = vpack.c.bf16 %v3817_v14, %v3815_v8  ;;  %v9903_v51 = vpop.eup %6625  ;;  %v4052_v10 = vpack.c.bf16 %v3816_v52, %v3814_v28  ;;  %v3614_v47 = vadd.f32 %v9820_v11, %v9812_v54 }
 0x4a1   : > { %3519 = vadd.xlane.f32.xlu1 %v3518_v25  ;;  %6645 = vrcp.f32 %v3328_v42  ;;  %v9906_v6 = vpop.eup %6627  ;;  %v3246_v25 = vmul.f32 1.442695, %v2744_v24  ;;  %v3248_v61 = vmul.f32 1.442695, %v2745_v53  ;;  %v3524_v24 = vadd.f32 %v9846_v60, %v9844_v36  ;;  %v12644_v53 = vld [vmem:[#allocation249_spill] sm:$0xff] }
 0x4a2   : > { %v3331_v58 = vpop.xlane.xlu0 %3330  ;;  %12635 = vst [vmem:[#allocation180_spill] sm:$0xff] %v9906_v6  ;;  %6647 = vpow2.f32 %v3120_v35  ;;  %4180 = vmatprep.subr.bf16.mxu1 %v4053_v17  ;;  %3522 = vadd.xlane.f32.xlu0 %v3521_v38  ;;  %v6630_v49 = vpop.eup %6629  ;;  %v3617_v35 = vadd.f32 %v9836_v33, %v9832_v26  ;;  %v12640_v38 = vld [vmem:[#allocation114_spill] sm:$0xff] }
 0x4a3   : > { %v2392_v19 = vpop.xlane.xlu1 %2391  ;;  %6649 = vrcp.f32 %v3331_v58  ;;  %4181 = vmatpush1.bf16.xpose.msra.mxu1 %v4052_v10  ;;  %v9911_v42 = vpop.eup %6631  ;;  %v12642_v10 = vld [vmem:[#allocation20_spill] sm:$0xff] }
 0x4a4   : > { %v2682_v27 = vsub.f32 %v12636_v4, %v2392_v19  ;;  %6651 = vpow2.f32 %v3242_v15  ;;  %v2683_v8 = vsub.f32 %v12637_v2, %v2392_v19  ;;  %v12641_v19 = vld [vmem:[#allocation58_spill] sm:$0xff]  ;;  %v3878_v2 = vmul.f32 %v6630_v49, %v12644_v53  ;;  %v12649_v53 = vld [vmem:[#allocation231_spill] sm:$0xff] }
 0x4a5   : > { %3615 = vadd.xlane.f32.xlu1 %v3614_v47  ;;  %v6634_v14 = vpop.eup %6633  ;;  %6653 = vpow2.f32 %v3244_v55  ;;  %v3879_v46 = vmul.f32 %v6630_v49, %v12641_v19  ;;  %v3620_v49 = vadd.f32 %v9874_v0, %v9869_v63 }
 0x4a6   : > { %v2395_v62 = vpop.xlane.xlu0 %2394  ;;  %v9919_v58 = vpop.eup %6635  ;;  %v3122_v17 = vmul.f32 1.442695, %v2682_v27  ;;  %3618 = vadd.xlane.f32.xlu0 %v3617_v35  ;;  %v3881_v4 = vmul.f32 %v6634_v14, %v12642_v10  ;;  %6655 = vpow2.f32 %v3246_v25  ;;  %v3124_v36 = vmul.f32 1.442695, %v2683_v8  ;;  %v12647_v8 = vld [vmem:[#allocation47_spill] sm:$0xff] }
 0x4a7   : > { %v3424_v28 = vpop.xlane.xlu1 %3423  ;;  %v2684_v52 = vsub.f32 %v12638_v50, %v2395_v62  ;;  %12639 = vst [vmem:[#allocation175_spill] sm:$0xff] %v9919_v58  ;;  %v2685_v15 = vsub.f32 %v12640_v38, %v2395_v62  ;;  %v9924_v47 = vpop.eup %6637  ;;  %v12645_v50 = vld [vmem:[#allocation64_spill] sm:$0xff]  ;;  %v3527_v62 = vadd.f32 %v9864_v20, %v9852_v59 }
 0x4a8   : > { %12643 = vst [vmem:[#allocation174_spill] sm:$0xff] %v9924_v47  ;;  %v3880_v54 = vmul.f32 %v6634_v14, %v12645_v50  ;;  %v9928_v26 = vpop.eup %6639  ;;  %6657 = vrcp.f32 %v3424_v28  ;;  %v4085_v27 = vpack.c.bf16 %v3881_v4, %v3879_v46 }
 0x4a9   : > { %12646 = vst [vmem:[#allocation179_spill] sm:$0xff] %v9928_v26  ;;  %3525 = vadd.xlane.f32.xlu1 %v3524_v24  ;;  %v9932_v35 = vpop.eup %6641  ;;  %6659 = vpow2.f32 %v3248_v61  ;;  %v3126_v38 = vmul.f32 1.442695, %v2684_v52  ;;  %v3128_v14 = vmul.f32 1.442695, %v2685_v15  ;;  %v12648_v24 = vld [vmem:[#allocation117_spill] sm:$0xff] }
 0x4aa   : > { %v3427_v55 = vpop.xlane.xlu0 %3426  ;;  %v4084_v25 = vpack.c.bf16 %v3880_v54, %v3878_v2  ;;  %v9936_v10 = vpop.eup %6643  ;;  %6661 = vpow2.f32 %v3122_v17  ;;  %4221 = vmatprep.subr.bf16.mxu0 %v4085_v27  ;;  %3528 = vadd.xlane.f32.xlu0 %v3527_v62  ;;  %v3623_v17 = vadd.f32 %v9879_v29, %v9877_v32  ;;  %v12656_v32 = vld [vmem:[#allocation184_spill] sm:$0xff] }
 0x4ab   : > { %v2488_v19 = vpop.xlane.xlu1 %2487  ;;  %v6646_v4 = vpop.eup %6645  ;;  %6663 = vrcp.f32 %v3427_v55  ;;  %v3530_v55 = vadd.f32 %v9892_v13, %v9884_v45 }
 0x4ac   : > { %v2746_v28 = vsub.f32 %v12647_v8, %v2488_v19  ;;  %v2747_v46 = vsub.f32 %v12648_v24, %v2488_v19  ;;  %4222 = vmatpush1.bf16.xpose.msra.mxu0 %v4084_v25  ;;  %v9940_v52 = vpop.eup %6647  ;;  %6665 = vpow2.f32 %v3124_v36  ;;  %v12650_v19 = vld [vmem:[#allocation120_spill] sm:$0xff] }
 0x4ad   : > { %3621 = vadd.xlane.f32.xlu1 %v3620_v49  ;;  %v6650_v15 = vpop.eup %6649  ;;  %6667 = vpow2.f32 %v3126_v38  ;;  %v12652_v49 = vld [vmem:[#allocation59_spill] sm:$0xff] }
 0x4ae   : > { %v2491_v61 = vpop.xlane.xlu0 %2490  ;;  %v3250_v54 = vmul.f32 1.442695, %v2746_v28  ;;  %v3252_v50 = vmul.f32 1.442695, %v2747_v46  ;;  %v9948_v25 = vpop.eup %6651  ;;  %6669 = vpow2.f32 %v3128_v14  ;;  %3624 = vadd.xlane.f32.xlu0 %v3623_v17  ;;  %v3819_v8 = vmul.f32 %v6646_v4, %v12652_v49  ;;  %v12653_v28 = vld [vmem:[#allocation63_spill] sm:$0xff] }
 0x4af   : > { %v2748_v2 = vsub.f32 %v12649_v53, %v2491_v61  ;;  %v3334_v27 = vpop.xlane.xlu1 %3333  ;;  %v2749_v62 = vsub.f32 %v12650_v19, %v2491_v61  ;;  %12651 = vst [vmem:[#allocation176_spill] sm:$0xff] %v9948_v25  ;;  %v3821_v24 = vmul.f32 %v6650_v15, %v12653_v28  ;;  %v9952_v53 = vpop.eup %6653  ;;  %v12655_v46 = vld [vmem:[#allocation251_spill] sm:$0xff]  ;;  %v3820_v61 = vmul.f32 %v6650_v15, %v12656_v32 }
 0x4b0   : > { %12654 = vst [vmem:[#allocation17_spill] sm:$0xff] %v9952_v53  ;;  %6671 = vpow2.f32 %v3250_v54  ;;  %v3818_v63 = vmul.f32 %v6646_v4, %v12655_v46  ;;  %v3533_v14 = vadd.f32 %v9903_v51, %v9896_v44  ;;  %v12658_v54 = vld [vmem:[#allocation137_spill] sm:$0xff]  ;;  %v3626_v32 = vadd.f32 %v9911_v42, %v9906_v6 }
 0x4b1   : > { %v3254_v36 = vmul.f32 1.442695, %v2748_v2  ;;  %6673 = vrcp.f32 %v3334_v27  ;;  %3531 = vadd.xlane.f32.xlu1 %v3530_v55  ;;  %v4055_v19 = vpack.c.bf16 %v3821_v24, %v3819_v8  ;;  %v9958_v2 = vpop.eup %6655  ;;  %v3256_v17 = vmul.f32 1.442695, %v2749_v62  ;;  %v12659_v4 = vld [vmem:[#allocation141_spill] sm:$0xff]  ;;  %v12663_v24 = vld [vmem:[#allocation50_spill] sm:$0xff] }
 0x4b2   : > { %v3337_v38 = vpop.xlane.xlu0 %3336  ;;  %12657 = vst [vmem:[#allocation178_spill] sm:$0xff] %v9958_v2  ;;  %6675 = vpow2.f32 %v3252_v50  ;;  %v4054_v28 = vpack.c.bf16 %v3820_v61, %v3818_v63  ;;  %v6658_v45 = vpop.eup %6657  ;;  %3534 = vadd.xlane.f32.xlu0 %v3533_v14  ;;  %v3629_v50 = vadd.f32 %v9924_v47, %v9919_v58 }
 0x4b3   : > { %v2398_v49 = vpop.xlane.xlu1 %2397  ;;  %6677 = vpow2.f32 %v3254_v36  ;;  %4182 = vmatprep.subr.bf16.mxu1 %v4055_v19  ;;  %v9964_v15 = vpop.eup %6659  ;;  %v12662_v36 = vld [vmem:[#allocation138_spill] sm:$0xff] }
 0x4b4   : > { %v2686_v13 = vsub.f32 %v12658_v54, %v2398_v49  ;;  %v2687_v46 = vsub.f32 %v12659_v4, %v2398_v49  ;;  %12660 = vst [vmem:[#allocation182_spill] sm:$0xff] %v9964_v15  ;;  %6679 = vrcp.f32 %v3337_v38  ;;  %4183 = vmatpush1.bf16.xpose.msra.mxu1 %v4054_v28  ;;  %v9968_v63 = vpop.eup %6661  ;;  %v3536_v38 = vadd.f32 %v9932_v35, %v9928_v26  ;;  %v12664_v49 = vld [vmem:[#allocation19_spill] sm:$0xff] }
 0x4b5   : > { %12661 = vst [vmem:[#allocation16_spill] sm:$0xff] %v9968_v63  ;;  %3627 = vadd.xlane.f32.xlu1 %v3626_v32  ;;  %v6664_v19 = vpop.eup %6663  ;;  %6681 = vpow2.f32 %v3256_v17  ;;  %v3883_v28 = vmul.f32 %v6658_v45, %v12664_v49 }
 0x4b6   : > { %v2401_v27 = vpop.xlane.xlu0 %2400  ;;  %v3130_v62 = vmul.f32 1.442695, %v2686_v13  ;;  %v3132_v55 = vmul.f32 1.442695, %v2687_v46  ;;  %v9975_v54 = vpop.eup %6665  ;;  %3630 = vadd.xlane.f32.xlu0 %v3629_v50  ;;  %v12665_v13 = vld [vmem:[#allocation24_spill] sm:$0xff] }
 0x4b7   : > { %v2688_v8 = vsub.f32 %v12662_v36, %v2401_v27  ;;  %v2689_v61 = vsub.f32 %v12663_v24, %v2401_v27  ;;  %v3430_v14 = vpop.xlane.xlu1 %3429  ;;  %v3885_v46 = vmul.f32 %v6664_v19, %v12665_v13  ;;  %v9978_v32 = vpop.eup %6667  ;;  %v12666_v36 = vld [vmem:[#allocation68_spill] sm:$0xff]  ;;  %v12667_v24 = vld [vmem:[#allocation185_spill] sm:$0xff] }
 0x4b8   : > { %6683 = vpow2.f32 %v3130_v62  ;;  %v3882_v17 = vmul.f32 %v6658_v45, %v12666_v36  ;;  %v3884_v58 = vmul.f32 %v6664_v19, %v12667_v24  ;;  %v9982_v47 = vpop.eup %6669  ;;  %v3539_v62 = vadd.f32 %v9940_v52, %v9936_v10  ;;  %v12670_v36 = vld [vmem:[#allocation122_spill] sm:$0xff] }
 0x4b9   : > { %v3134_v4 = vmul.f32 1.442695, %v2688_v8  ;;  %v3136_v6 = vmul.f32 1.442695, %v2689_v61  ;;  %6685 = vpow2.f32 %v3132_v55  ;;  %3537 = vadd.xlane.f32.xlu1 %v3536_v38  ;;  %v4087_v49 = vpack.c.bf16 %v3885_v46, %v3883_v28  ;;  %v12669_v55 = vld [vmem:[#allocation242_spill] sm:$0xff] }
 0x4ba   : > { %v3433_v27 = vpop.xlane.xlu0 %3432  ;;  %6687 = vrcp.f32 %v3430_v14  ;;  %v9986_v8 = vpop.eup %6671  ;;  %v4086_v61 = vpack.c.bf16 %v3884_v58, %v3882_v17  ;;  %v3632_v14 = vadd.f32 %v9952_v53, %v9948_v25  ;;  %3540 = vadd.xlane.f32.xlu0 %v3539_v62  ;;  %v12673_v17 = vld [vmem:[#allocation124_spill] sm:$0xff]  ;;  %v3542_v62 = vadd.f32 %v9975_v54, %v9968_v63 }
 0x4bb   : > { %12668 = vst [vmem:[#allocation181_spill] sm:$0xff] %v9986_v8  ;;  %6689 = vpow2.f32 %v3134_v4  ;;  %v2494_v50 = vpop.xlane.xlu1 %2493  ;;  %v6674_v13 = vpop.eup %6673  ;;  %4223 = vmatprep.subr.bf16.mxu0 %v4087_v49  ;;  %v3635_v4 = vadd.f32 %v9964_v15, %v9958_v2  ;;  %v12674_v49 = vld [vmem:[#allocation145_spill] sm:$0xff]  ;;  %v12676_v2 = vld [vmem:[#allocation71_spill] sm:$0xff] }
 0x4bc   : > { %6691 = vpow2.f32 %v3136_v6  ;;  %v2750_v45 = vsub.f32 %v12669_v55, %v2494_v50  ;;  %v2751_v19 = vsub.f32 %v12670_v36, %v2494_v50  ;;  %v9992_v38 = vpop.eup %6675  ;;  %4224 = vmatpush1.bf16.xpose.msra.mxu0 %v4086_v61 }
 0x4bd   : > { %12671 = vst [vmem:[#allocation183_spill] sm:$0xff] %v9992_v38  ;;  %6693 = vrcp.f32 %v3433_v27  ;;  %v9996_v58 = vpop.eup %6677  ;;  %3633 = vadd.xlane.f32.xlu1 %v3632_v14  ;;  %v12675_v27 = vld [vmem:[#allocation67_spill] sm:$0xff]  ;;  %v12678_v14 = vld [vmem:[#allocation66_spill] sm:$0xff] }
 0x4be   : > { %v2497_v28 = vpop.xlane.xlu0 %2496  ;;  %12672 = vst [vmem:[#allocation12_spill] sm:$0xff] %v9996_v58  ;;  %v3258_v6 = vmul.f32 1.442695, %v2750_v45  ;;  %v3260_v46 = vmul.f32 1.442695, %v2751_v19  ;;  %v6680_v55 = vpop.eup %6679  ;;  %v3823_v61 = vmul.f32 %v6674_v13, %v12675_v27  ;;  %3636 = vadd.xlane.f32.xlu0 %v3635_v4 }
 0x4bf   : > { %v2752_v24 = vsub.f32 %v12673_v17, %v2497_v28  ;;  %v2753_v50 = vsub.f32 %v12674_v49, %v2497_v28  ;;  %v3340_v36 = vpop.xlane.xlu1 %3339  ;;  %v3825_v15 = vmul.f32 %v6680_v55, %v12676_v2  ;;  %v10004_v45 = vpop.eup %6681  ;;  %v3822_v17 = vmul.f32 %v6674_v13, %v12678_v14  ;;  %v12679_v28 = vld [vmem:[#allocation70_spill] sm:$0xff] }
 0x4c0   : > { %6695 = vpow2.f32 %v3258_v6  ;;  %12677 = vst [vmem:[#allocation15_spill] sm:$0xff] %v10004_v45  ;;  %v3824_v49 = vmul.f32 %v6680_v55, %v12679_v28  ;;  %v3545_v6 = vadd.f32 %v9982_v47, %v9978_v32  ;;  %v3638_v13 = vadd.f32 %v9992_v38, %v9986_v8 }
 0x4c1   : > { %v3262_v25 = vmul.f32 1.442695, %v2752_v24  ;;  %v3264_v53 = vmul.f32 1.442695, %v2753_v50  ;;  %6697 = vpow2.f32 %v3260_v46  ;;  %3543 = vadd.xlane.f32.xlu1 %v3542_v62  ;;  %v4057_v63 = vpack.c.bf16 %v3825_v15, %v3823_v61  ;;  %v12685_v61 = vld [vmem:[#allocation81_spill] sm:$0xff] }
 0x4c2   : > { %v3343_v19 = vpop.xlane.xlu0 %3342  ;;  %v10008_v26 = vpop.eup %6683  ;;  %6699 = vrcp.f32 %v3340_v36  ;;  %v4056_v4 = vpack.c.bf16 %v3824_v49, %v3822_v17  ;;  %3546 = vadd.xlane.f32.xlu0 %v3545_v6  ;;  %v12686_v17 = vld [vmem:[#allocation22_spill] sm:$0xff]  ;;  %v12687_v49 = vld [vmem:[#allocation196_spill] sm:$0xff] }
 0x4c3   : > { %12680 = vst [vmem:[#allocation188_spill] sm:$0xff] %v10008_v26  ;;  %v10012_v24 = vpop.eup %6685  ;;  %6701 = vpow2.f32 %v3262_v25  ;;  %v3436_v2 = vpop.xlane.xlu1 %3435  ;;  %4184 = vmatprep.subr.bf16.mxu1 %v4057_v63  ;;  %v3641_v25 = vadd.f32 %v10004_v45, %v9996_v58  ;;  %v12684_v63 = vld [vmem:[#allocation77_spill] sm:$0xff] }
 0x4c4   : > { %12681 = vst [vmem:[#allocation189_spill] sm:$0xff] %v10012_v24  ;;  %v6688_v50 = vpop.eup %6687  ;;  %6703 = vpow2.f32 %v3264_v53  ;;  %4185 = vmatpush1.bf16.xpose.msra.mxu1 %v4056_v4  ;;  %v3548_v53 = vadd.f32 %v10012_v24, %v10008_v26 }
 0x4c5   : > { %v10016_v46 = vpop.eup %6689  ;;  %6705 = vrcp.f32 %v3436_v2  ;;  %3639 = vadd.xlane.f32.xlu1 %v3638_v13  ;;  %v3887_v27 = vmul.f32 %v6688_v50, %v12684_v63  ;;  %v3886_v28 = vmul.f32 %v6688_v50, %v12686_v17 }
 0x4c6   : > { %12682 = vst [vmem:[#allocation194_spill] sm:$0xff] %v10016_v46  ;;  %v3439_v15 = vpop.xlane.xlu0 %3438  ;;  %v10018_v55 = vpop.eup %6691  ;;  %6707 = vrcp.f32 %v3343_v19  ;;  %3642 = vadd.xlane.f32.xlu0 %v3641_v25 }
 0x4c7   : > { %12683 = vst [vmem:[#allocation195_spill] sm:$0xff] %v10018_v55  ;;  %v6694_v36 = vpop.eup %6693  ;;  %v3346_v62 = vpop.xlane.xlu1 %3345  ;;  %6709 = vrcp.f32 %v3439_v15  ;;  %v3551_v15 = vadd.f32 %v10018_v55, %v10016_v46  ;;  %v12697_v55 = vld [vmem:[#allocation89_spill] sm:$0xff] }
 0x4c8   : > { %6711 = vrcp.f32 %v3346_v62  ;;  %v3889_v14 = vmul.f32 %v6694_v36, %v12685_v61  ;;  %v3888_v19 = vmul.f32 %v6694_v36, %v12687_v49 }
 0x4c9   : > { %3549 = vadd.xlane.f32.xlu1 %v3548_v53 }
 0x4ca   : > { %v3349_v6 = vpop.xlane.xlu0 %3348  ;;  %v10028_v2 = vpop.eup %6695  ;;  %v4089_v4 = vpack.c.bf16 %v3889_v14, %v3887_v27  ;;  %v4088_v13 = vpack.c.bf16 %v3888_v19, %v3886_v28  ;;  %3552 = vadd.xlane.f32.xlu0 %v3551_v15  ;;  %v12692_v28 = vld [vmem:[#allocation23_spill] sm:$0xff] }
 0x4cb   : > { %12688 = vst [vmem:[#allocation200_spill] sm:$0xff] %v10028_v2  ;;  %6713 = vrcp.f32 %v3349_v6  ;;  %v10032_v26 = vpop.eup %6697  ;;  %v3442_v62 = vpop.xlane.xlu1 %3441  ;;  %v12693_v6 = vld [vmem:[#allocation26_spill] sm:$0xff] }
 0x4cc   : > { %12689 = vst [vmem:[#allocation18_spill] sm:$0xff] %v10032_v26  ;;  %v6700_v25 = vpop.eup %6699  ;;  %4225 = vmatprep.subr.bf16.mxu0 %v4089_v4  ;;  %6715 = vrcp.f32 %v3442_v62  ;;  %v3644_v50 = vadd.f32 %v10032_v26, %v10028_v2  ;;  %v12695_v2 = vld [vmem:[#allocation78_spill] sm:$0xff] }
 0x4cd   : > { %v10036_v36 = vpop.eup %6701  ;;  %4226 = vmatpush1.bf16.xpose.msra.mxu0 %v4088_v13  ;;  %v3827_v49 = vmul.f32 %v6700_v25, %v12692_v28  ;;  %v12694_v13 = vld [vmem:[#allocation74_spill] sm:$0xff] }
 0x4ce   : > { %12690 = vst [vmem:[#allocation192_spill] sm:$0xff] %v10036_v36  ;;  %v3445_v53 = vpop.xlane.xlu0 %3444  ;;  %v10038_v63 = vpop.eup %6703  ;;  %3645 = vadd.xlane.f32.xlu1 %v3644_v50  ;;  %v3826_v62 = vmul.f32 %v6700_v25, %v12694_v13  ;;  %v12696_v50 = vld [vmem:[#allocation85_spill] sm:$0xff]  ;;  %v12701_v13 = vld [vmem:[#allocation87_spill] sm:$0xff] }
 0x4cf   : > { %12691 = vst [vmem:[#allocation201_spill] sm:$0xff] %v10038_v63  ;;  %6717 = vrcp.f32 %v3445_v53  ;;  %v6706_v27 = vpop.eup %6705  ;;  %v3352_v61 = vpop.xlane.xlu1 %3351  ;;  %v3647_v14 = vadd.f32 %v10038_v63, %v10036_v36  ;;  %v12698_v36 = vld [vmem:[#allocation84_spill] sm:$0xff] }
 0x4d0   : > { %v6708_v17 = vpop.eup %6707  ;;  %6719 = vrcp.f32 %v3352_v61  ;;  %v3891_v53 = vmul.f32 %v6706_v27, %v12696_v50  ;;  %v3890_v63 = vmul.f32 %v6706_v27, %v12698_v36  ;;  %v12699_v61 = vld [vmem:[#allocation88_spill] sm:$0xff] }
 0x4d1   : > { %v6710_v19 = vpop.eup %6709  ;;  %3648 = vadd.xlane.f32.xlu0 %v3647_v14  ;;  %v3829_v4 = vmul.f32 %v6708_v17, %v12693_v6  ;;  %v3828_v26 = vmul.f32 %v6708_v17, %v12695_v2  ;;  %v12700_v2 = vld [vmem:[#allocation27_spill] sm:$0xff] }
 0x4d2   : > { %v3355_v15 = vpop.xlane.xlu0 %3354  ;;  %v6712_v46 = vpop.eup %6711  ;;  %v3893_v24 = vmul.f32 %v6710_v19, %v12697_v55  ;;  %v3892_v8 = vmul.f32 %v6710_v19, %v12699_v61  ;;  %v12702_v55 = vld [vmem:[#allocation252_spill] sm:$0xff]  ;;  %v12703_v19 = vld [vmem:[#allocation197_spill] sm:$0xff] }
 0x4d3   : > { %6721 = vrcp.f32 %v3355_v15  ;;  %v3448_v28 = vpop.xlane.xlu1 %3447  ;;  %v4059_v58 = vpack.c.bf16 %v3829_v4, %v3827_v49  ;;  %v4058_v14 = vpack.c.bf16 %v3828_v26, %v3826_v62  ;;  %v3831_v17 = vmul.f32 %v6712_v46, %v12700_v2  ;;  %v12705_v4 = vld [vmem:[#allocation37_spill] sm:$0xff] }
 0x4d4   : > { %6723 = vrcp.f32 %v3448_v28  ;;  %v4091_v6 = vpack.c.bf16 %v3893_v24, %v3891_v53  ;;  %v4090_v38 = vpack.c.bf16 %v3892_v8, %v3890_v63  ;;  %v3830_v24 = vmul.f32 %v6712_v46, %v12703_v19  ;;  %v12706_v53 = vld [vmem:[#allocation92_spill] sm:$0xff]  ;;  %v4334_v46 = vld [vmem:[%s11357_s5] sm:$0xff] }
 0x4d5   : > { %v6714_v45 = vpop.eup %6713  ;;  %4186 = vmatprep.subr.bf16.mxu1 %v4059_v58  ;;  %v12704_v58 = vld [vmem:[#allocation30_spill] sm:$0xff]  ;;  %v12707_v28 = vld [vmem:[#allocation96_spill] sm:$0xff] }
 0x4d6   : > { %v3451_v25 = vpop.xlane.xlu0 %3450  ;;  %v3833_v50 = vmul.f32 %v6714_v45, %v12701_v13  ;;  %v6716_v15 = vpop.eup %6715  ;;  %4187 = vmatpush1.bf16.xpose.msra.mxu1 %v4058_v14  ;;  %4227 = vmatprep.subr.bf16.mxu0 %v4091_v6  ;;  %v3832_v36 = vmul.f32 %v6714_v45, %v12702_v55 }
 0x4d7   : > { %6725 = vrcp.f32 %v3451_v25  ;;  %v3358_v27 = vpop.xlane.xlu1 %3357  ;;  %4228 = vmatpush1.bf16.xpose.msra.mxu0 %v4090_v38  ;;  %v3895_v63 = vmul.f32 %v6716_v15, %v12704_v58  ;;  %v3894_v61 = vmul.f32 %v6716_v15, %v12706_v53  ;;  %v4336_v58 = vld [vmem:[%s11357_s5 + $0x10] sm:$0xff]  ;;  %v12712_v53 = vld [vmem:[#allocation34_spill] sm:$0xff] }
 0x4d8   : > { %v4061_v49 = vpack.c.bf16 %v3833_v50, %v3831_v17  ;;  %6727 = vrcp.f32 %v3358_v27  ;;  %v4060_v45 = vpack.c.bf16 %v3832_v36, %v3830_v24  ;;  %v12708_v50 = vld [vmem:[#allocation91_spill] sm:$0xff] }
 0x4d9   : > { %v6718_v26 = vpop.eup %6717  ;;  %v12709_v27 = vld [vmem:[#allocation95_spill] sm:$0xff] }
 0x4da   : > { %4188 = vmatprep.subr.bf16.mxu1 %v4061_v49  ;;  %v3361_v8 = vpop.xlane.xlu0 %3360  ;;  %v3897_v62 = vmul.f32 %v6718_v26, %v12705_v4  ;;  %v3896_v14 = vmul.f32 %v6718_v26, %v12707_v28  ;;  %v6720_v6 = vpop.eup %6719  ;;  %v12710_v26 = vld [vmem:[#allocation94_spill] sm:$0xff]  ;;  %v12713_v28 = vld [vmem:[#allocation105_spill] sm:$0xff] }
 0x4db   : > { %6729 = vrcp.f32 %v3361_v8  ;;  %v3454_v25 = vpop.xlane.xlu1 %3453  ;;  %v3835_v55 = vmul.f32 %v6720_v6, %v12708_v50 }
 0x4dc   : > { %v4093_v38 = vpack.c.bf16 %v3897_v62, %v3895_v63  ;;  %v4092_v2 = vpack.c.bf16 %v3896_v14, %v3894_v61  ;;  %6731 = vrcp.f32 %v3454_v25  ;;  %v12711_v63 = vld [vmem:[#allocation207_spill] sm:$0xff] }
 0x4dd   : > { %v6722_v17 = vpop.eup %6721  ;;  %v3834_v4 = vmul.f32 %v6720_v6, %v12711_v63  ;;  %v4337_v6 = vld [vmem:[%s11357_s5 + $0x18] sm:$0xff] }
 0x4de   : > { %4229 = vmatprep.subr.bf16.mxu0 %v4093_v38  ;;  %v3457_v13 = vpop.xlane.xlu0 %3456  ;;  %v3837_v15 = vmul.f32 %v6722_v17, %v12709_v27  ;;  %v6724_v49 = vpop.eup %6723  ;;  %4189 = vmatpush1.bf16.xpose.msra.mxu1 %v4060_v45  ;;  %v3836_v36 = vmul.f32 %v6722_v17, %v12710_v26  ;;  %v12714_v45 = vld [vmem:[#allocation40_spill] sm:$0xff]  ;;  %v4335_v27 = vld [vmem:[%s11357_s5 + $0x8] sm:$0xff] }
 0x4df   : > { %6733 = vrcp.f32 %v3457_v13  ;;  %4340 = vperm.xlu1 %6072, %v4334_v46   ;;  %v3460_v19 = vpop.xlane.xlu1 %3459  ;;  %4230 = vmatpush1.bf16.xpose.msra.mxu0 %v4092_v2  ;;  %v3899_v61 = vmul.f32 %v6724_v49, %v12712_v53  ;;  %v12715_v17 = vld [vmem:[#allocation208_spill] sm:$0xff] }
 0x4e0   : > { %v4063_v24 = vpack.c.bf16 %v3837_v15, %v3835_v55  ;;  %6735 = vrcp.f32 %v3460_v19  ;;  %v4062_v2 = vpack.c.bf16 %v3836_v36, %v3834_v4  ;;  %v3898_v46 = vmul.f32 %v6724_v49, %v12715_v17  ;;  %v12716_v19 = vld [vmem:[#allocation99_spill] sm:$0xff] }
 0x4e1   : > { %v6726_v8 = vpop.eup %6725 }
 0x4e2   : > { %4190 = vmatprep.subr.bf16.mxu1 %v4063_v24  ;;  %v3463_v62 = vpop.xlane.xlu0 %3462  ;;  %v3901_v14 = vmul.f32 %v6726_v8, %v12713_v28  ;;  %v3900_v25 = vmul.f32 %v6726_v8, %v12714_v45  ;;  %v6728_v38 = vpop.eup %6727  ;;  %v12717_v24 = vld [vmem:[#allocation219_spill] sm:$0xff]  ;;  %v4435_v28 = vld [vmem:[%s11358_s6] sm:$0xff] }
 0x4e3   : > { %6737 = vrcp.f32 %v3463_v62  ;;  %4350 = vperm.xlu1 %6072, %v4336_v58   ;;  %v3556_v13 = vpop.xlane.xlu1 %3555  ;;  %v3839_v36 = vmul.f32 %v6728_v38, %v12716_v19  ;;  %v12718_v58 = vld [vmem:[#allocation102_spill] sm:$0xff] }
 0x4e4   : > { %v4095_v50 = vpack.c.bf16 %v3901_v14, %v3899_v61  ;;  %6739 = vrcp.f32 %v3556_v13  ;;  %v4094_v15 = vpack.c.bf16 %v3900_v25, %v3898_v46  ;;  %v4436_v61 = vld [vmem:[%s11358_s6 + $0x8] sm:$0xff]  ;;  %v12719_v14 = vld [vmem:[#allocation98_spill] sm:$0xff] }
 0x4e5   : > { %v6730_v55 = vpop.eup %6729  ;;  %v3838_v45 = vmul.f32 %v6728_v38, %v12719_v14  ;;  %v12721_v46 = vld [vmem:[#allocation254_spill] sm:$0xff]  ;;  %v4440_v38 = vld [vmem:[%s11359_s7 + $0x8] sm:$0xff] }
 0x4e6   : > { %4231 = vmatprep.subr.bf16.mxu0 %v4095_v50  ;;  %v3559_v26 = vpop.xlane.xlu0 %3558  ;;  %v3841_v49 = vmul.f32 %v6730_v55, %v12717_v24  ;;  %v6732_v8 = vpop.eup %6731  ;;  %4191 = vmatpush1.bf16.xpose.msra.mxu1 %v4062_v2  ;;  %v3840_v63 = vmul.f32 %v6730_v55, %v12718_v58  ;;  %v12720_v2 = vld [vmem:[#allocation109_spill] sm:$0xff]  ;;  %v12722_v50 = vld [vmem:[#allocation107_spill] sm:$0xff] }
 0x4e7   : > { %6741 = vrcp.f32 %v3559_v26  ;;  %4355 = vperm.xlu1 %6072, %v4337_v6   ;;  %v3466_v4 = vpop.xlane.xlu1 %3465  ;;  %4345 = vperm.xlu0 %6071, %v4335_v27   ;;  %v3903_v17 = vmul.f32 %v6732_v8, %v12720_v2 }
 0x4e8   : > { %v4065_v62 = vpack.c.bf16 %v3841_v49, %v3839_v36  ;;  %6743 = vrcp.f32 %v3466_v4  ;;  %4232 = vmatpush1.bf16.xpose.msra.mxu0 %v4094_v15  ;;  %v4064_v27 = vpack.c.bf16 %v3840_v63, %v3838_v45  ;;  %v12723_v15 = vld [vmem:[#allocation108_spill] sm:$0xff]  ;;  %v4439_v49 = vld [vmem:[%s11359_s7] sm:$0xff]  ;;  %v12724_v63 = vld [vmem:[#allocation253_spill] sm:$0xff] }
 0x4e9   : > { %v6734_v53 = vpop.eup %6733  ;;  %v3902_v26 = vmul.f32 %v6732_v8, %v12723_v15  ;;  %v12725_v8 = vld [vmem:[#allocation256_spill] sm:$0xff] }
 0x4ea   : > { %4192 = vmatprep.subr.bf16.mxu1 %v4065_v62  ;;  %v3469_v25 = vpop.xlane.xlu0 %3468  ;;  %v3905_v13 = vmul.f32 %v6734_v53, %v12721_v46  ;;  %v3904_v55 = vmul.f32 %v6734_v53, %v12722_v50  ;;  %v6736_v6 = vpop.eup %6735  ;;  %v4437_v46 = vld [vmem:[%s11358_s6 + $0x10] sm:$0xff] }
 0x4eb   : > { %6745 = vrcp.f32 %v3469_v25  ;;  %4522 = vperm.xlu1 %6072, %v4436_v61   ;;  %v3562_v19 = vpop.xlane.xlu1 %3561  ;;  %4517 = vperm.xlu0 %6071, %v4435_v28   ;;  %v3907_v62 = vmul.f32 %v6736_v6, %v12724_v63  ;;  %v12726_v28 = vld [vmem:[#allocation255_spill] sm:$0xff]  ;;  %v12732_v63 = vld [vmem:[#allocation6_spill] sm:$0xff] }
 0x4ec   : > { %v4097_v36 = vpack.c.bf16 %v3905_v13, %v3903_v17  ;;  %6747 = vrcp.f32 %v3562_v19  ;;  %v4096_v58 = vpack.c.bf16 %v3904_v55, %v3902_v26  ;;  %v4438_v17 = vld [vmem:[%s11358_s6 + $0x18] sm:$0xff]  ;;  %v12727_v13 = vld [vmem:[#allocation38_spill] sm:$0xff] }
 0x4ed   : > { %v6738_v24 = vpop.eup %6737  ;;  %v3906_v50 = vmul.f32 %v6736_v6, %v12727_v13  ;;  %v12729_v26 = vld [vmem:[#allocation129_spill] sm:$0xff] }
 0x4ee   : > { %4233 = vmatprep.subr.bf16.mxu0 %v4097_v36  ;;  %v3565_v4 = vpop.xlane.xlu0 %3564  ;;  %v3909_v53 = vmul.f32 %v6738_v24, %v12725_v8  ;;  %v6740_v61 = vpop.eup %6739  ;;  %4193 = vmatpush1.bf16.xpose.msra.mxu1 %v4064_v27  ;;  %v3908_v14 = vmul.f32 %v6738_v24, %v12726_v28  ;;  %v12728_v27 = vld [vmem:[#allocation113_spill] sm:$0xff]  ;;  %v12730_v36 = vld [vmem:[#allocation230_spill] sm:$0xff] }
 0x4ef   : > { %6749 = vrcp.f32 %v3565_v4  ;;  %4550 = vperm.xlu1 %6072, %v4440_v38   ;;  %v3472_v45 = vpop.xlane.xlu1 %3471  ;;  %4545 = vperm.xlu0 %6071, %v4439_v49   ;;  %v3971_v15 = vmul.f32 %v6740_v61, %v12728_v27  ;;  %v12733_v28 = vld [vmem:[#allocation9_spill] sm:$0xff] }
 0x4f0   : > { %v4099_v25 = vpack.c.bf16 %v3909_v53, %v3907_v62  ;;  %6751 = vrcp.f32 %v3472_v45  ;;  %4234 = vmatpush1.bf16.xpose.msra.mxu0 %v4096_v58  ;;  %v4098_v49 = vpack.c.bf16 %v3908_v14, %v3906_v50  ;;  %v12731_v58 = vld [vmem:[#allocation112_spill] sm:$0xff]  ;;  %v732_v62 = vpack.c.bf16 %v12732_v63, %v12732_v63  ;;  %v12734_v14 = vld [vmem:[#allocation7_spill] sm:$0xff] }
 0x4f1   : > { %v6742_v2 = vpop.eup %6741  ;;  %v3970_v4 = vmul.f32 %v6740_v61, %v12731_v58  ;;  %v737_v45 = vpack.c.bf16 %v12733_v28, %v12733_v28  ;;  %v734_v61 = vpack.c.bf16 %v12734_v14, %v12734_v14  ;;  %v12740_v28 = vld [vmem:[#allocation49_spill] sm:$0xff] }
 0x4f2   : > { %4244 = vmatprep.subr.bf16.mxu1 %v4099_v25  ;;  %v3475_v55 = vpop.xlane.xlu0 %3474  ;;  %v3973_v19 = vmul.f32 %v6742_v2, %v12729_v26  ;;  %v3972_v24 = vmul.f32 %v6742_v2, %v12730_v36  ;;  %v6744_v38 = vpop.eup %6743  ;;  %v4442_v25 = vld [vmem:[%s11359_s7 + $0x18] sm:$0xff]  ;;  %v12738_v36 = vld [vmem:[#allocation11_spill] sm:$0xff] }
 0x4f3   : > { %6753 = vrcp.f32 %v3475_v55  ;;  %4532 = vperm.xlu1 %6072, %v4438_v17   ;;  %v3568_v8 = vpop.xlane.xlu1 %3567  ;;  %4527 = vperm.xlu0 %6071, %v4437_v46   ;;  %v4441_v17 = vld [vmem:[%s11359_s7 + $0x10] sm:$0xff]  ;;  %v12735_v46 = vld [vmem:[#allocation111_spill] sm:$0xff]  ;;  %v12737_v26 = vld [vmem:[#allocation133_spill] sm:$0xff] }
 0x4f4   : > { %v4131_v6 = vpack.c.bf16 %v3973_v19, %v3971_v15  ;;  %6755 = vrcp.f32 %v3568_v8  ;;  %v4130_v2 = vpack.c.bf16 %v3972_v24, %v3970_v4  ;;  %v3911_v50 = vmul.f32 %v6744_v38, %v12735_v46  ;;  %v12736_v55 = vld [vmem:[#allocation128_spill] sm:$0xff] }
 0x4f5   : > { %v6746_v53 = vpop.eup %6745  ;;  %4195 = vmatmul.mubr.bf16.vlgmr.msra.gmra.mrb[128].mxu1 %v732_v62  ;;  %v739_v24 = vpack.c.bf16 %v12738_v36, %v12738_v36  ;;  %v4592_v62 = vld [vmem:[%s11361_s9 + $0x8] sm:$0xff]  ;;  %v12743_v46 = vld [vmem:[#allocation116_spill] sm:$0xff] }
 0x4f6   : > { %4285 = vmatprep.subr.bf16.mxu0 %v4131_v6  ;;  %v3571_v13 = vpop.xlane.xlu0 %3570  ;;  %v3913_v27 = vmul.f32 %v6746_v53, %v12736_v55  ;;  %v6748_v15 = vpop.eup %6747  ;;  %4245 = vmatpush1.bf16.xpose.msra.mxu1 %v4098_v49  ;;  %v3912_v19 = vmul.f32 %v6746_v53, %v12737_v26  ;;  %v12739_v49 = vld [vmem:[#allocation257_spill] sm:$0xff]  ;;  %v4591_v53 = vld [vmem:[%s11361_s9] sm:$0xff] }
 0x4f7   : > { %4276 = vmatprep.mubr.bf16.mxu1 %v737_v45  ;;  %6757 = vrcp.f32 %v3571_v13  ;;  %4560 = vperm.xlu1 %6072, %v4442_v25   ;;  %v3478_v58 = vpop.xlane.xlu1 %3477  ;;  %v3910_v8 = vmul.f32 %v6744_v38, %v12739_v49  ;;  %v3975_v45 = vmul.f32 %v6748_v15, %v12740_v28  ;;  %v12741_v25 = vld [vmem:[#allocation53_spill] sm:$0xff]  ;;  %v12746_v49 = vld [vmem:[#allocation136_spill] sm:$0xff] }
 0x4f8   : > { %4236 = vmatmul.mubr.bf16.vlgmr.msra.gmra.mrb[152].mxu0 %v734_v61  ;;  %v4101_v4 = vpack.c.bf16 %v3913_v27, %v3911_v50  ;;  %6759 = vrcp.f32 %v3478_v58  ;;  %4555 = vperm.xlu0 %6071, %v4441_v17   ;;  %v12742_v61 = vld [vmem:[#allocation118_spill] sm:$0xff]  ;;  %v3974_v50 = vmul.f32 %v6748_v15, %v12743_v46  ;;  %v4594_v26 = vld [vmem:[%s11361_s9 + $0x18] sm:$0xff]  ;;  %v4593_v58 = vld [vmem:[%s11361_s9 + $0x10] sm:$0xff] }
 0x4f9   : > { %v6750_v63 = vpop.eup %6749  ;;  %4286 = vmatpush1.bf16.xpose.msra.mxu0 %v4130_v2  ;;  %4317 = vmatprep.mubr.bf16.mxu0 %v739_v24  ;;  %v4100_v17 = vpack.c.bf16 %v3912_v19, %v3910_v8  ;;  %v12744_v19 = vld [vmem:[#allocation121_spill] sm:$0xff]  ;;  %v12745_v15 = vld [vmem:[#allocation119_spill] sm:$0xff]  ;;  %v12748_v46 = vld [vmem:[#allocation144_spill] sm:$0xff] }
 0x4fa   : > { %4246 = vmatprep.subr.bf16.mxu1 %v4101_v4  ;;  %v3481_v6 = vpop.xlane.xlu0 %3480  ;;  %v3977_v14 = vmul.f32 %v6750_v63, %v12741_v25  ;;  %v3976_v13 = vmul.f32 %v6750_v63, %v12742_v61  ;;  %v6752_v2 = vpop.eup %6751  ;;  %v12747_v25 = vld [vmem:[#allocation52_spill] sm:$0xff] }
 0x4fb   : > { %6761 = vrcp.f32 %v3481_v6  ;;  %4614 = vperm.xlu1 %6072, %v4592_v62   ;;  %v3574_v38 = vpop.xlane.xlu1 %3573  ;;  %v3915_v4 = vmul.f32 %v6752_v2, %v12744_v19 }
 0x4fc   : > { %v4133_v55 = vpack.c.bf16 %v3977_v14, %v3975_v45  ;;  %6763 = vrcp.f32 %v3574_v38  ;;  %4609 = vperm.xlu0 %6071, %v4591_v53   ;;  %v4132_v36 = vpack.c.bf16 %v3976_v13, %v3974_v50  ;;  %v4596_v45 = vld [vmem:[%s11361_s9 + $0x28] sm:$0xff]  ;;  %v3914_v14 = vmul.f32 %v6752_v2, %v12747_v25  ;;  %v4595_v13 = vld [vmem:[%s11361_s9 + $0x20] sm:$0xff]  ;;  %v12749_v38 = vld [vmem:[#allocation56_spill] sm:$0xff] }
 0x4fd   : > { %v6754_v27 = vpop.eup %6753 }
 0x4fe   : > { %4287 = vmatprep.subr.bf16.mxu0 %v4133_v55  ;;  %v3577_v24 = vpop.xlane.xlu0 %3576  ;;  %v3917_v63 = vmul.f32 %v6754_v27, %v12745_v15  ;;  %v6756_v62 = vpop.eup %6755  ;;  %4247 = vmatpush1.bf16.xpose.msra.mxu1 %v4100_v17  ;;  %v3916_v8 = vmul.f32 %v6754_v27, %v12746_v49  ;;  %v12751_v49 = vld [vmem:[#allocation149_spill] sm:$0xff] }
 0x4ff   : > { %6765 = vrcp.f32 %v3577_v24  ;;  %4624 = vperm.xlu1 %6072, %v4594_v26   ;;  %v3484_v6 = vpop.xlane.xlu1 %3483  ;;  %v3979_v17 = vmul.f32 %v6756_v62, %v9348_v41 }
 0x500   : > { %v4103_v53 = vpack.c.bf16 %v3917_v63, %v3915_v4  ;;  %6767 = vrcp.f32 %v3484_v6  ;;  %4619 = vperm.xlu0 %6071, %v4593_v58   ;;  %v4102_v26 = vpack.c.bf16 %v3916_v8, %v3914_v14  ;;  %v4598_v4 = vld [vmem:[%s11361_s9 + $0x38] sm:$0xff]  ;;  %v4597_v63 = vld [vmem:[%s11361_s9 + $0x30] sm:$0xff] }
 0x501   : > { %v6758_v28 = vpop.eup %6757  ;;  %4288 = vmatpush1.bf16.xpose.msra.mxu0 %v4132_v36  ;;  %v12750_v36 = vld [vmem:[#allocation51_spill] sm:$0xff] }
 0x502   : > { %4248 = vmatprep.subr.bf16.mxu1 %v4103_v53  ;;  %v3487_v61 = vpop.xlane.xlu0 %3486  ;;  %v3981_v50 = vmul.f32 %v6758_v28, %v12748_v46  ;;  %v3980_v55 = vmul.f32 %v6758_v28, %v12749_v38  ;;  %v6760_v27 = vpop.eup %6759  ;;  %v3978_v24 = vmul.f32 %v6756_v62, %v12750_v36  ;;  %v12752_v62 = vld [vmem:[#allocation54_spill] sm:$0xff] }
 0x503   : > { %6769 = vrcp.f32 %v3487_v61  ;;  %4634 = vperm.xlu1 %6072, %v4596_v45   ;;  %v3580_v58 = vpop.xlane.xlu1 %3579  ;;  %v3919_v8 = vmul.f32 %v6760_v27, %v12751_v49  ;;  %v12753_v28 = vld [vmem:[#allocation146_spill] sm:$0xff] }
 0x504   : > { %v4135_v2 = vpack.c.bf16 %v3981_v50, %v3979_v17  ;;  %6771 = vrcp.f32 %v3580_v58  ;;  %4629 = vperm.xlu0 %6071, %v4595_v13   ;;  %v4134_v41 = vpack.c.bf16 %v3980_v55, %v3978_v24  ;;  %v4600_v13 = vld [vmem:[%s11361_s9 + $0x48] sm:$0xff]  ;;  %v4599_v38 = vld [vmem:[%s11361_s9 + $0x40] sm:$0xff] }
 0x505   : > { %v6762_v19 = vpop.eup %6761  ;;  %v12754_v17 = vld [vmem:[#allocation123_spill] sm:$0xff] }
 0x506   : > { %4289 = vmatprep.subr.bf16.mxu0 %v4135_v2  ;;  %v3583_v15 = vpop.xlane.xlu0 %3582  ;;  %v3921_v6 = vmul.f32 %v6762_v19, %v12752_v62  ;;  %v6764_v53 = vpop.eup %6763  ;;  %4249 = vmatpush1.bf16.xpose.msra.mxu1 %v4102_v26  ;;  %v3920_v45 = vmul.f32 %v6762_v19, %v12753_v28  ;;  %v3918_v46 = vmul.f32 %v6760_v27, %v12754_v17  ;;  %v12757_v62 = vld [vmem:[#allocation55_spill] sm:$0xff]  ;;  %v4603_v17 = vld [vmem:[%s11361_s9 + $0x60] sm:$0xff] }
 0x507   : > { %6773 = vrcp.f32 %v3583_v15  ;;  %4644 = vperm.xlu1 %6072, %v4598_v4   ;;  %v3490_v25 = vpop.xlane.xlu1 %3489  ;;  %v3983_v55 = vmul.f32 %v6764_v53, %v9420_v5  ;;  %v3982_v2 = vmul.f32 %v6764_v53, %v9412_v31  ;;  %v12755_v15 = vld [vmem:[#allocation243_spill] sm:$0xff]  ;;  %v12756_v31 = vld [vmem:[#allocation126_spill] sm:$0xff] }
 0x508   : > { %v4105_v14 = vpack.c.bf16 %v3921_v6, %v3919_v8  ;;  %6775 = vrcp.f32 %v3490_v25  ;;  %4639 = vperm.xlu0 %6071, %v4597_v63   ;;  %v4104_v58 = vpack.c.bf16 %v3920_v45, %v3918_v46  ;;  %v4604_v25 = vld [vmem:[%s11361_s9 + $0x68] sm:$0xff] }
 0x509   : > { %v6766_v61 = vpop.eup %6765  ;;  %4290 = vmatpush1.bf16.xpose.msra.mxu0 %v4134_v41  ;;  %v4602_v41 = vld [vmem:[%s11361_s9 + $0x58] sm:$0xff] }
 0x50a   : > { %4250 = vmatprep.subr.bf16.mxu1 %v4105_v14  ;;  %v3493_v50 = vpop.xlane.xlu0 %3492  ;;  %v3985_v26 = vmul.f32 %v6766_v61, %v9434_v18  ;;  %v3984_v36 = vmul.f32 %v6766_v61, %v9426_v40  ;;  %v6768_v24 = vpop.eup %6767  ;;  %v4601_v40 = vld [vmem:[%s11361_s9 + $0x50] sm:$0xff]  ;;  %v12758_v14 = vld [vmem:[#allocation125_spill] sm:$0xff] }
 0x50b   : > { %6777 = vrcp.f32 %v3493_v50  ;;  %4654 = vperm.xlu1 %6072, %v4600_v13   ;;  %v3586_v19 = vpop.xlane.xlu1 %3585  ;;  %v3923_v63 = vmul.f32 %v6768_v24, %v12755_v15  ;;  %v3922_v61 = vmul.f32 %v6768_v24, %v12758_v14  ;;  %v12762_v15 = vld [vmem:[#allocation60_spill] sm:$0xff] }
 0x50c   : > { %v4137_v27 = vpack.c.bf16 %v3985_v26, %v3983_v55  ;;  %6779 = vrcp.f32 %v3586_v19  ;;  %4649 = vperm.xlu0 %6071, %v4599_v38   ;;  %v4136_v5 = vpack.c.bf16 %v3984_v36, %v3982_v2  ;;  %v12759_v36 = vld [vmem:[#allocation127_spill] sm:$0xff] }
 0x50d   : > { %v6770_v4 = vpop.eup %6769 }
 0x50e   : > { %4291 = vmatprep.subr.bf16.mxu0 %v4137_v27  ;;  %v3589_v18 = vpop.xlane.xlu0 %3588  ;;  %v3925_v49 = vmul.f32 %v6770_v4, %v12756_v31  ;;  %v6772_v8 = vpop.eup %6771  ;;  %4251 = vmatpush1.bf16.xpose.msra.mxu1 %v4104_v58  ;;  %v3924_v6 = vmul.f32 %v6770_v4, %v12757_v62  ;;  %v4606_v27 = vld [vmem:[%s11361_s9 + $0x78] sm:$0xff]  ;;  %v5717_v62 = vld [vmem:[%s11363_s11 + $0x8] sm:$0xff] }
 0x50f   : > { %6781 = vrcp.f32 %v3589_v18  ;;  %4664 = vperm.xlu1 %6072, %v4602_v41   ;;  %v3496_v53 = vpop.xlane.xlu1 %3495  ;;  %v3987_v46 = vmul.f32 %v6772_v8, %v9480_v48  ;;  %v3986_v58 = vmul.f32 %v6772_v8, %v12759_v36  ;;  %v12760_v4 = vld [vmem:[#allocation157_spill] sm:$0xff] }
 0x510   : > { %v4107_v28 = vpack.c.bf16 %v3925_v49, %v3923_v63  ;;  %6783 = vrcp.f32 %v3496_v53  ;;  %4659 = vperm.xlu0 %6071, %v4601_v40   ;;  %v4106_v26 = vpack.c.bf16 %v3924_v6, %v3922_v61  ;;  %v12763_v6 = vld [vmem:[#allocation151_spill] sm:$0xff]  ;;  %v5719_v36 = vld [vmem:[%s11363_s11 + $0x18] sm:$0xff] }
 0x511   : > { %v6774_v45 = vpop.eup %6773  ;;  %4292 = vmatpush1.bf16.xpose.msra.mxu0 %v4136_v5  ;;  %v12761_v5 = vld [vmem:[#allocation150_spill] sm:$0xff] }
 0x512   : > { %4252 = vmatprep.subr.bf16.mxu1 %v4107_v28  ;;  %v3499_v13 = vpop.xlane.xlu0 %3498  ;;  %v3989_v50 = vmul.f32 %v6774_v45, %v9498_v3  ;;  %v3988_v38 = vmul.f32 %v6774_v45, %v9492_v37  ;;  %v6776_v55 = vpop.eup %6775  ;;  %v4605_v37 = vld [vmem:[%s11361_s9 + $0x70] sm:$0xff]  ;;  %v5716_v45 = vld [vmem:[%s11363_s11] sm:$0xff] }
 0x513   : > { %6785 = vrcp.f32 %v3499_v13  ;;  %4674 = vperm.xlu1 %6072, %v4604_v25   ;;  %v3592_v2 = vpop.xlane.xlu1 %3591  ;;  %v3927_v41 = vmul.f32 %v6776_v55, %v12760_v4  ;;  %v3926_v53 = vmul.f32 %v6776_v55, %v12763_v6 }
 0x514   : > { %v4139_v24 = vpack.c.bf16 %v3989_v50, %v3987_v46  ;;  %6787 = vrcp.f32 %v3592_v2  ;;  %4669 = vperm.xlu0 %6071, %v4603_v17   ;;  %v4138_v48 = vpack.c.bf16 %v3988_v38, %v3986_v58  ;;  %v12764_v46 = vld [vmem:[#allocation156_spill] sm:$0xff]  ;;  %v12765_v58 = vld [vmem:[#allocation131_spill] sm:$0xff] }
 0x515   : > { %v6778_v19 = vpop.eup %6777 }
 0x516   : > { %4293 = vmatprep.subr.bf16.mxu0 %v4139_v24  ;;  %v3595_v3 = vpop.xlane.xlu0 %3594  ;;  %v3929_v18 = vmul.f32 %v6778_v19, %v12761_v5  ;;  %v6780_v40 = vpop.eup %6779  ;;  %4253 = vmatpush1.bf16.xpose.msra.mxu1 %v4106_v26  ;;  %v3928_v63 = vmul.f32 %v6778_v19, %v12762_v15  ;;  %v12766_v24 = vld [vmem:[#allocation134_spill] sm:$0xff]  ;;  %v12768_v5 = vld [vmem:[#allocation61_spill] sm:$0xff] }
 0x517   : > { %6789 = vrcp.f32 %v3595_v3  ;;  %4684 = vperm.xlu1 %6072, %v4606_v27   ;;  %v3502_v31 = vpop.xlane.xlu1 %3501  ;;  %v3991_v25 = vmul.f32 %v6780_v40, %v9544_v39  ;;  %v3990_v50 = vmul.f32 %v6780_v40, %v12764_v46  ;;  %v12769_v15 = vld [vmem:[#allocation161_spill] sm:$0xff]  ;;  %v12773_v46 = vld [vmem:[#allocation139_spill] sm:$0xff] }
 0x518   : > { %v4109_v49 = vpack.c.bf16 %v3929_v18, %v3927_v41  ;;  %6791 = vrcp.f32 %v3502_v31  ;;  %4679 = vperm.xlu0 %6071, %v4605_v37   ;;  %v4108_v17 = vpack.c.bf16 %v3928_v63, %v3926_v53  ;;  %v12770_v31 = vld [vmem:[#allocation152_spill] sm:$0xff] }
 0x519   : > { %v6782_v8 = vpop.eup %6781  ;;  %4294 = vmatpush1.bf16.xpose.msra.mxu0 %v4138_v48  ;;  %v12767_v48 = vld [vmem:[#allocation132_spill] sm:$0xff] }
 0x51a   : > { %4254 = vmatprep.subr.bf16.mxu1 %v4109_v49  ;;  %v3505_v28 = vpop.xlane.xlu0 %3504  ;;  %v3993_v14 = vmul.f32 %v6782_v8, %v9564_v9  ;;  %v3992_v61 = vmul.f32 %v6782_v8, %v9552_v43  ;;  %v6784_v13 = vpop.eup %6783  ;;  %v5718_v43 = vld [vmem:[%s11363_s11 + $0x10] sm:$0xff]  ;;  %v12771_v8 = vld [vmem:[#allocation135_spill] sm:$0xff] }
 0x51b   : > { %6793 = vrcp.f32 %v3505_v28  ;;  %5727 = vperm.xlu1 %6072, %v5717_v62   ;;  %v3598_v38 = vpop.xlane.xlu1 %3597  ;;  %v3931_v2 = vmul.f32 %v6784_v13, %v12765_v58  ;;  %v3930_v18 = vmul.f32 %v6784_v13, %v12768_v5  ;;  %v12772_v28 = vld [vmem:[#allocation155_spill] sm:$0xff] }
 0x51c   : > { %v4141_v55 = vpack.c.bf16 %v3993_v14, %v3991_v25  ;;  %6795 = vrcp.f32 %v3598_v38  ;;  %5722 = vperm.xlu0 %6071, %v5716_v45   ;;  %v4140_v39 = vpack.c.bf16 %v3992_v61, %v3990_v50  ;;  %v12774_v38 = vld [vmem:[#allocation142_spill] sm:$0xff] }
 0x51d   : > { %v6786_v26 = vpop.eup %6785 }
 0x51e   : > { %4295 = vmatprep.subr.bf16.mxu0 %v4141_v55  ;;  %v3601_v9 = vpop.xlane.xlu0 %3600  ;;  %v3933_v19 = vmul.f32 %v6786_v26, %v12766_v24  ;;  %v6788_v27 = vpop.eup %6787  ;;  %4255 = vmatpush1.bf16.xpose.msra.mxu1 %v4108_v17  ;;  %v3932_v3 = vmul.f32 %v6786_v26, %v12767_v48 }
 0x51f   : > { %6797 = vrcp.f32 %v3601_v9  ;;  %5737 = vperm.xlu1 %6072, %v5719_v36   ;;  %v3508_v37 = vpop.xlane.xlu1 %3507  ;;  %v3995_v63 = vmul.f32 %v6788_v27, %v12769_v15  ;;  %v3994_v45 = vmul.f32 %v6788_v27, %v12772_v28  ;;  %v12775_v36 = vld [vmem:[#allocation140_spill] sm:$0xff] }
 0x520   : > { %v4111_v4 = vpack.c.bf16 %v3933_v19, %v3931_v2  ;;  %6799 = vrcp.f32 %v3508_v37  ;;  %5732 = vperm.xlu0 %6071, %v5718_v43   ;;  %v4110_v53 = vpack.c.bf16 %v3932_v3, %v3930_v18  ;;  %v12776_v2 = vld [vmem:[#allocation160_spill] sm:$0xff] }
 0x521   : > { %v6790_v41 = vpop.eup %6789  ;;  %4296 = vmatpush1.bf16.xpose.msra.mxu0 %v4140_v39 }
 0x522   : > { %4256 = vmatprep.subr.bf16.mxu1 %v4111_v4  ;;  %v3511_v40 = vpop.xlane.xlu0 %3510  ;;  %v3997_v49 = vmul.f32 %v6790_v41, %v12770_v31  ;;  %v3996_v62 = vmul.f32 %v6790_v41, %v12771_v8  ;;  %v6792_v6 = vpop.eup %6791  ;;  %v12777_v41 = vld [vmem:[#allocation143_spill] sm:$0xff] }
 0x523   : > { %6801 = vrcp.f32 %v3511_v40  ;;  %v3604_v25 = vpop.xlane.xlu1 %3603  ;;  %v3935_v50 = vmul.f32 %v6792_v6, %v12773_v46  ;;  %v3934_v24 = vmul.f32 %v6792_v6, %v12776_v2  ;;  %v12783_v2 = vld [vmem:[#allocation153_spill] sm:$0xff] }
 0x524   : > { %v4143_v14 = vpack.c.bf16 %v3997_v49, %v3995_v63  ;;  %6803 = vrcp.f32 %v3604_v25  ;;  %v4142_v17 = vpack.c.bf16 %v3996_v62, %v3994_v45  ;;  %v12778_v49 = vld [vmem:[#allocation171_spill] sm:$0xff]  ;;  %v12779_v62 = vld [vmem:[#allocation162_spill] sm:$0xff] }
 0x525   : > { %v6794_v61 = vpop.eup %6793  ;;  %v12781_v25 = vld [vmem:[#allocation163_spill] sm:$0xff] }
 0x526   : > { %4297 = vmatprep.subr.bf16.mxu0 %v4143_v14  ;;  %v3607_v13 = vpop.xlane.xlu0 %3606  ;;  %v3937_v55 = vmul.f32 %v6794_v61, %v12774_v38  ;;  %v6796_v26 = vpop.eup %6795  ;;  %4257 = vmatpush1.bf16.xpose.msra.mxu1 %v4110_v53  ;;  %v3936_v39 = vmul.f32 %v6794_v61, %v12775_v36 }
 0x527   : > { %6805 = vrcp.f32 %v3607_v13  ;;  %v3514_v9 = vpop.xlane.xlu1 %3513  ;;  %v3999_v27 = vmul.f32 %v6796_v26, %v9656_v30  ;;  %v3998_v5 = vmul.f32 %v6796_v26, %v12777_v41 }
 0x528   : > { %v4113_v43 = vpack.c.bf16 %v3937_v55, %v3935_v50  ;;  %6807 = vrcp.f32 %v3514_v9  ;;  %v4112_v4 = vpack.c.bf16 %v3936_v39, %v3934_v24  ;;  %v12782_v55 = vld [vmem:[#allocation168_spill] sm:$0xff] }
 0x529   : > { %v6798_v58 = vpop.eup %6797  ;;  %4298 = vmatpush1.bf16.xpose.msra.mxu0 %v4142_v17 }
 0x52a   : > { %4258 = vmatprep.subr.bf16.mxu1 %v4113_v43  ;;  %v3517_v19 = vpop.xlane.xlu0 %3516  ;;  %v4001_v48 = vmul.f32 %v6798_v58, %v9668_v23  ;;  %v4000_v3 = vmul.f32 %v6798_v58, %v9660_v57  ;;  %v6800_v37 = vpop.eup %6799  ;;  %v12780_v57 = vld [vmem:[#allocation147_spill] sm:$0xff] }
 0x52b   : > { %6809 = vrcp.f32 %v3517_v19  ;;  %v3610_v18 = vpop.xlane.xlu1 %3609  ;;  %v3939_v8 = vmul.f32 %v6800_v37, %v12778_v49  ;;  %v3938_v14 = vmul.f32 %v6800_v37, %v12781_v25  ;;  %v12784_v19 = vld [vmem:[#allocation167_spill] sm:$0xff]  ;;  %v12787_v49 = vld [vmem:[#allocation173_spill] sm:$0xff] }
 0x52c   : > { %v4145_v40 = vpack.c.bf16 %v4001_v48, %v3999_v27  ;;  %6811 = vrcp.f32 %v3610_v18  ;;  %v4144_v63 = vpack.c.bf16 %v4000_v3, %v3998_v5 }
 0x52d   : > { %v6802_v15 = vpop.eup %6801 }
 0x52e   : > { %4299 = vmatprep.subr.bf16.mxu0 %v4145_v40  ;;  %v3613_v31 = vpop.xlane.xlu0 %3612  ;;  %v3941_v30 = vmul.f32 %v6802_v15, %v12779_v62  ;;  %v6804_v6 = vpop.eup %6803  ;;  %4259 = vmatpush1.bf16.xpose.msra.mxu1 %v4112_v4  ;;  %v3940_v23 = vmul.f32 %v6802_v15, %v12780_v57  ;;  %v12786_v4 = vld [vmem:[#allocation148_spill] sm:$0xff] }
 0x52f   : > { %6813 = vrcp.f32 %v3613_v31  ;;  %v3520_v53 = vpop.xlane.xlu1 %3519  ;;  %v4003_v17 = vmul.f32 %v6804_v6, %v9716_v34  ;;  %v4002_v26 = vmul.f32 %v6804_v6, %v12782_v55 }
 0x530   : > { %v4115_v28 = vpack.c.bf16 %v3941_v30, %v3939_v8  ;;  %6815 = vrcp.f32 %v3520_v53  ;;  %v4114_v38 = vpack.c.bf16 %v3940_v23, %v3938_v14  ;;  %v12788_v53 = vld [vmem:[#allocation166_spill] sm:$0xff] }
 0x531   : > { %v6806_v45 = vpop.eup %6805  ;;  %4300 = vmatpush1.bf16.xpose.msra.mxu0 %v4144_v63 }
 0x532   : > { %4260 = vmatprep.subr.bf16.mxu1 %v4115_v28  ;;  %v3523_v61 = vpop.xlane.xlu0 %3522  ;;  %v4005_v13 = vmul.f32 %v6806_v45, %v9728_v56  ;;  %v4004_v46 = vmul.f32 %v6806_v45, %v9722_v7  ;;  %v6808_v50 = vpop.eup %6807  ;;  %v12785_v7 = vld [vmem:[#allocation154_spill] sm:$0xff] }
 0x533   : > { %6817 = vrcp.f32 %v3523_v61  ;;  %v3616_v36 = vpop.xlane.xlu1 %3615  ;;  %v3943_v24 = vmul.f32 %v6808_v50, %v12783_v2  ;;  %v3942_v41 = vmul.f32 %v6808_v50, %v12786_v4  ;;  %v12789_v61 = vld [vmem:[#allocation158_spill] sm:$0xff]  ;;  %v12793_v4 = vld [vmem:[#allocation169_spill] sm:$0xff] }
 0x534   : > { %v4147_v39 = vpack.c.bf16 %v4005_v13, %v4003_v17  ;;  %6819 = vrcp.f32 %v3616_v36  ;;  %v4146_v43 = vpack.c.bf16 %v4004_v46, %v4002_v26  ;;  %v12791_v36 = vld [vmem:[#allocation172_spill] sm:$0xff] }
 0x535   : > { %v6810_v9 = vpop.eup %6809 }
 0x536   : > { %4301 = vmatprep.subr.bf16.mxu0 %v4147_v39  ;;  %v3619_v58 = vpop.xlane.xlu0 %3618  ;;  %v3945_v34 = vmul.f32 %v6810_v9, %v12784_v19  ;;  %v6812_v27 = vpop.eup %6811  ;;  %4261 = vmatpush1.bf16.xpose.msra.mxu1 %v4114_v38  ;;  %v3944_v56 = vmul.f32 %v6810_v9, %v12785_v7  ;;  %v12790_v38 = vld [vmem:[#allocation159_spill] sm:$0xff] }
 0x537   : > { %6821 = vrcp.f32 %v3619_v58  ;;  %v3526_v48 = vpop.xlane.xlu1 %3525  ;;  %v4007_v18 = vmul.f32 %v6812_v27, %v9768_v21  ;;  %v4006_v8 = vmul.f32 %v6812_v27, %v12787_v49 }
 0x538   : > { %v4117_v3 = vpack.c.bf16 %v3945_v34, %v3943_v24  ;;  %6823 = vrcp.f32 %v3526_v48  ;;  %v4116_v31 = vpack.c.bf16 %v3944_v56, %v3942_v41  ;;  %v12792_v56 = vld [vmem:[#allocation164_spill] sm:$0xff] }
 0x539   : > { %v6814_v37 = vpop.eup %6813  ;;  %4302 = vmatpush1.bf16.xpose.msra.mxu0 %v4146_v43 }
 0x53a   : > { %4262 = vmatprep.subr.bf16.mxu1 %v4117_v3  ;;  %v3529_v5 = vpop.xlane.xlu0 %3528  ;;  %v4009_v40 = vmul.f32 %v6814_v37, %v9780_v1  ;;  %v4008_v15 = vmul.f32 %v6814_v37, %v9772_v16  ;;  %v6816_v63 = vpop.eup %6815 }
 0x53b   : > { %6825 = vrcp.f32 %v3529_v5  ;;  %v3622_v62 = vpop.xlane.xlu1 %3621  ;;  %v3947_v28 = vmul.f32 %v6816_v63, %v12788_v53  ;;  %v3946_v17 = vmul.f32 %v6816_v63, %v12789_v61  ;;  %v12796_v53 = vld [vmem:[#allocation170_spill] sm:$0xff] }
 0x53c   : > { %v4149_v30 = vpack.c.bf16 %v4009_v40, %v4007_v18  ;;  %6827 = vrcp.f32 %v3622_v62  ;;  %v4148_v57 = vpack.c.bf16 %v4008_v15, %v4006_v8  ;;  %v12794_v18 = vld [vmem:[#allocation165_spill] sm:$0xff] }
 0x53d   : > { %v6818_v6 = vpop.eup %6817  ;;  %v12795_v8 = vld [vmem:[#allocation177_spill] sm:$0xff] }
 0x53e   : > { %4303 = vmatprep.subr.bf16.mxu0 %v4149_v30  ;;  %v3625_v23 = vpop.xlane.xlu0 %3624  ;;  %v3949_v21 = vmul.f32 %v6818_v6, %v9808_v22  ;;  %v6820_v45 = vpop.eup %6819  ;;  %4263 = vmatpush1.bf16.xpose.msra.mxu1 %v4116_v31  ;;  %v3948_v16 = vmul.f32 %v6818_v6, %v9804_v12 }
 0x53f   : > { %6829 = vrcp.f32 %v3625_v23  ;;  %v3532_v1 = vpop.xlane.xlu1 %3531  ;;  %v4011_v46 = vmul.f32 %v6820_v45, %v9820_v11  ;;  %v4010_v12 = vmul.f32 %v6820_v45, %v12791_v36 }
 0x540   : > { %v4119_v25 = vpack.c.bf16 %v3949_v21, %v3947_v28  ;;  %6831 = vrcp.f32 %v3532_v1  ;;  %v4118_v26 = vpack.c.bf16 %v3948_v16, %v3946_v17  ;;  %v12797_v16 = vld [vmem:[#allocation174_spill] sm:$0xff]  ;;  %v12799_v17 = vld [vmem:[#allocation180_spill] sm:$0xff] }
 0x541   : > { %v6822_v14 = vpop.eup %6821  ;;  %4304 = vmatpush1.bf16.xpose.msra.mxu0 %v4148_v57 }
 0x542   : > { %4264 = vmatprep.subr.bf16.mxu1 %v4119_v25  ;;  %v3535_v13 = vpop.xlane.xlu0 %3534  ;;  %v4013_v50 = vmul.f32 %v6822_v14, %v9836_v33  ;;  %v4012_v22 = vmul.f32 %v6822_v14, %v12790_v38  ;;  %v6824_v55 = vpop.eup %6823  ;;  %v12798_v25 = vld [vmem:[#allocation175_spill] sm:$0xff] }
 0x543   : > { %6833 = vrcp.f32 %v3535_v13  ;;  %v3628_v39 = vpop.xlane.xlu1 %3627  ;;  %v3951_v24 = vmul.f32 %v6824_v55, %v9846_v60  ;;  %v3950_v48 = vmul.f32 %v6824_v55, %v12792_v56 }
 0x544   : > { %v4151_v9 = vpack.c.bf16 %v4013_v50, %v4011_v46  ;;  %6835 = vrcp.f32 %v3628_v39  ;;  %v4150_v58 = vpack.c.bf16 %v4012_v22, %v4010_v12 }
 0x545   : > { %v6826_v43 = vpop.eup %6825 }
 0x546   : > { %4305 = vmatprep.subr.bf16.mxu0 %v4151_v9  ;;  %v3631_v2 = vpop.xlane.xlu0 %3630  ;;  %v3953_v11 = vmul.f32 %v6826_v43, %v9864_v20  ;;  %v6828_v19 = vpop.eup %6827  ;;  %4265 = vmatpush1.bf16.xpose.msra.mxu1 %v4118_v26  ;;  %v3952_v33 = vmul.f32 %v6826_v43, %v9852_v59  ;;  %v12800_v43 = vld [vmem:[#allocation179_spill] sm:$0xff] }
 0x547   : > { %6837 = vrcp.f32 %v3631_v2  ;;  %v3538_v34 = vpop.xlane.xlu1 %3537  ;;  %v4015_v37 = vmul.f32 %v6828_v19, %v9874_v0  ;;  %v4014_v59 = vmul.f32 %v6828_v19, %v12794_v18  ;;  %v12802_v19 = vld [vmem:[#allocation182_spill] sm:$0xff] }
 0x548   : > { %v4121_v27 = vpack.c.bf16 %v3953_v11, %v3951_v24  ;;  %6839 = vrcp.f32 %v3538_v34  ;;  %v4120_v5 = vpack.c.bf16 %v3952_v33, %v3950_v48  ;;  %v12801_v24 = vld [vmem:[#allocation17_spill] sm:$0xff]  ;;  %v12803_v33 = vld [vmem:[#allocation178_spill] sm:$0xff] }
 0x549   : > { %v6830_v7 = vpop.eup %6829  ;;  %4306 = vmatpush1.bf16.xpose.msra.mxu0 %v4150_v58 }
 0x54a   : > { %4266 = vmatprep.subr.bf16.mxu1 %v4121_v27  ;;  %v3541_v3 = vpop.xlane.xlu0 %3540  ;;  %v4017_v60 = vmul.f32 %v6830_v7, %v9879_v29  ;;  %v4016_v20 = vmul.f32 %v6830_v7, %v12793_v4  ;;  %v6832_v41 = vpop.eup %6831  ;;  %v12804_v7 = vld [vmem:[#allocation176_spill] sm:$0xff] }
 0x54b   : > { %6841 = vrcp.f32 %v3541_v3  ;;  %v3634_v40 = vpop.xlane.xlu1 %3633  ;;  %v3955_v62 = vmul.f32 %v6832_v41, %v12795_v8  ;;  %v3954_v28 = vmul.f32 %v6832_v41, %v12796_v53 }
 0x54c   : > { %v4153_v15 = vpack.c.bf16 %v4017_v60, %v4015_v37  ;;  %6843 = vrcp.f32 %v3634_v40  ;;  %v4152_v31 = vpack.c.bf16 %v4016_v20, %v4014_v59  ;;  %v12805_v40 = vld [vmem:[#allocation16_spill] sm:$0xff] }
 0x54d   : > { %v6834_v63 = vpop.eup %6833 }
 0x54e   : > { %4307 = vmatprep.subr.bf16.mxu0 %v4153_v15  ;;  %v3637_v49 = vpop.xlane.xlu0 %3636  ;;  %v3957_v0 = vmul.f32 %v6834_v63, %v9903_v51  ;;  %v6836_v30 = vpop.eup %6835  ;;  %4267 = vmatpush1.bf16.xpose.msra.mxu1 %v4120_v5  ;;  %v3956_v29 = vmul.f32 %v6834_v63, %v9896_v44  ;;  %v12806_v63 = vld [vmem:[#allocation183_spill] sm:$0xff] }
 0x54f   : > { %6845 = vrcp.f32 %v3637_v49  ;;  %v3544_v6 = vpop.xlane.xlu1 %3543  ;;  %v4019_v45 = vmul.f32 %v6836_v30, %v9911_v42  ;;  %v4018_v44 = vmul.f32 %v6836_v30, %v12799_v17  ;;  %v12807_v49 = vld [vmem:[#allocation15_spill] sm:$0xff]  ;;  %v12809_v30 = vld [vmem:[#allocation181_spill] sm:$0xff] }
 0x550   : > { %v4123_v57 = vpack.c.bf16 %v3957_v0, %v3955_v62  ;;  %6847 = vrcp.f32 %v3544_v6  ;;  %v4122_v61 = vpack.c.bf16 %v3956_v29, %v3954_v28  ;;  %v12808_v62 = vld [vmem:[#allocation12_spill] sm:$0xff]  ;;  %v12811_v28 = vld [vmem:[#allocation195_spill] sm:$0xff] }
 0x551   : > { %v6838_v23 = vpop.eup %6837  ;;  %4308 = vmatpush1.bf16.xpose.msra.mxu0 %v4152_v31 }
 0x552   : > { %4268 = vmatprep.subr.bf16.mxu1 %v4123_v57  ;;  %v3547_v21 = vpop.xlane.xlu0 %3546  ;;  %v4021_v1 = vmul.f32 %v6838_v23, %v12797_v16  ;;  %v4020_v51 = vmul.f32 %v6838_v23, %v12798_v25  ;;  %v6840_v14 = vpop.eup %6839  ;;  %v12810_v23 = vld [vmem:[#allocation189_spill] sm:$0xff] }
 0x553   : > { %6849 = vrcp.f32 %v3547_v21  ;;  %v3640_v13 = vpop.xlane.xlu1 %3639  ;;  %v3959_v55 = vmul.f32 %v6840_v14, %v9932_v35  ;;  %v3958_v58 = vmul.f32 %v6840_v14, %v12800_v43 }
 0x554   : > { %v4155_v46 = vpack.c.bf16 %v4021_v1, %v4019_v45  ;;  %6851 = vrcp.f32 %v3640_v13  ;;  %v4154_v38 = vpack.c.bf16 %v4020_v51, %v4018_v44  ;;  %v12812_v45 = vld [vmem:[#allocation194_spill] sm:$0xff]  ;;  %v12813_v51 = vld [vmem:[#allocation188_spill] sm:$0xff] }
 0x555   : > { %v6842_v50 = vpop.eup %6841  ;;  %v12814_v44 = vld [vmem:[#allocation18_spill] sm:$0xff] }
 0x556   : > { %4309 = vmatprep.subr.bf16.mxu0 %v4155_v46  ;;  %v3643_v22 = vpop.xlane.xlu0 %3642  ;;  %v3961_v42 = vmul.f32 %v6842_v50, %v9940_v52  ;;  %v6844_v26 = vpop.eup %6843  ;;  %4269 = vmatpush1.bf16.xpose.msra.mxu1 %v4122_v61  ;;  %v3960_v36 = vmul.f32 %v6842_v50, %v9936_v10  ;;  %v12815_v46 = vld [vmem:[#allocation201_spill] sm:$0xff] }
 0x557   : > { %6853 = vrcp.f32 %v3643_v22  ;;  %v3550_v12 = vpop.xlane.xlu1 %3549  ;;  %v4023_v11 = vmul.f32 %v6844_v26, %v12801_v24  ;;  %v4022_v10 = vmul.f32 %v6844_v26, %v12804_v7 }
 0x558   : > { %v4125_v39 = vpack.c.bf16 %v3961_v42, %v3959_v55  ;;  %6855 = vrcp.f32 %v3550_v12  ;;  %v4124_v27 = vpack.c.bf16 %v3960_v36, %v3958_v58  ;;  %v12817_v55 = vld [vmem:[#allocation192_spill] sm:$0xff]  ;;  %v12820_v58 = vmov 0  }
 0x559   : > { %v6846_v9 = vpop.eup %6845  ;;  %4310 = vmatpush1.bf16.xpose.msra.mxu0 %v4154_v38  ;;  %v12816_v38 = vld [vmem:[#allocation200_spill] sm:$0xff] }
 0x55a   : > { %4270 = vmatprep.subr.bf16.mxu1 %v4125_v39  ;;  %v3553_v2 = vpop.xlane.xlu0 %3552  ;;  %v4025_v35 = vmul.f32 %v6846_v9, %v12802_v19  ;;  %v4024_v52 = vmul.f32 %v6846_v9, %v12803_v33  ;;  %v6848_v34 = vpop.eup %6847  ;;  %v12818_v12 = vld [vmem:[#allocation8_spill] sm:$0xff]  ;;  %v12819_v9 = vld [vmem:[#allocation10_spill] sm:$0xff] }
 0x55b   : > { %6857 = vrcp.f32 %v3553_v2  ;;  %v3646_v56 = vpop.xlane.xlu1 %3645  ;;  %v3963_v60 = vmul.f32 %v6848_v34, %v9975_v54  ;;  %v3962_v15 = vmul.f32 %v6848_v34, %v12805_v40  ;;  %v736_v39 = vpack.c.bf16 %v12818_v12, %v12818_v12 }
 0x55c   : > { %v4157_v48 = vpack.c.bf16 %v4025_v35, %v4023_v11  ;;  %v4156_v37 = vpack.c.bf16 %v4024_v52, %v4022_v10  ;;  %6859 = vrcp.f32 %v3646_v56  ;;  %v738_v43 = vpack.c.bf16 %v12819_v9, %v12819_v9 }
 0x55d   : > { %v6850_v3 = vpop.eup %6849 }
 0x55e   : > { %4311 = vmatprep.subr.bf16.mxu0 %v4157_v48  ;;  %v3965_v4 = vmul.f32 %v6850_v3, %v9982_v47  ;;  %v6852_v20 = vpop.eup %6851  ;;  %4271 = vmatpush1.bf16.xpose.msra.mxu1 %v4124_v27  ;;  %v3649_v41 = vpop.xlane.xlu0 %3648  ;;  %v3964_v5 = vmul.f32 %v6850_v3, %v9978_v32 }
 0x55f   : > { %6861 = vrcp.f32 %v3649_v41  ;;  %v4027_v31 = vmul.f32 %v6852_v20, %v12806_v63  ;;  %v4026_v29 = vmul.f32 %v6852_v20, %v12809_v30  ;;  %v4341_v40 = vpop.permute.xlu1 %4340 }
 0x560   : > { %v4127_v18 = vpack.c.bf16 %v3965_v4, %v3963_v60  ;;  %v4126_v47 = vpack.c.bf16 %v3964_v5, %v3962_v15 }
 0x561   : > { %v6854_v59 = vpop.eup %6853  ;;  %4312 = vmatpush1.bf16.xpose.msra.mxu0 %v4156_v37 }
 0x562   : > { %4272 = vmatprep.subr.bf16.mxu1 %v4127_v18  ;;  %v4029_v8 = vmul.f32 %v6854_v59, %v12807_v49  ;;  %v4028_v54 = vmul.f32 %v6854_v59, %v12808_v62  ;;  %v6856_v0 = vpop.eup %6855  ;;  %v6079_v18 = vld [vmem:[%s11356_s4] sm:$0xff]   ;;  %v6080_v59 = vld [vmem:[%s11356_s4 + $0x8] sm:$0xff]  }
 0x563   : > { %v3967_v53 = vmul.f32 %v6856_v0, %v12810_v23  ;;  %v3966_v14 = vmul.f32 %v6856_v0, %v12813_v51  ;;  %v4351_v0 = vpop.permute.xlu1 %4350  ;;  %v6997_v23 = vld [vmem:[%s7217_s16] sm:$0xff] }
 0x564   : > { %v4159_v6 = vpack.c.bf16 %v4029_v8, %v4027_v31  ;;  %v4158_v32 = vpack.c.bf16 %v4028_v54, %v4026_v29  ;;  %v6995_v29 = vld [vmem:[%s7217_s16 + $0x10] sm:$0xff] }
 0x565   : > { %v6858_v57 = vpop.eup %6857 }
 0x566   : > { %4313 = vmatprep.subr.bf16.mxu0 %v4159_v6  ;;  %v3969_v21 = vmul.f32 %v6858_v57, %v12811_v28  ;;  %v3968_v16 = vmul.f32 %v6858_v57, %v12812_v45  ;;  %4273 = vmatpush1.bf16.xpose.msra.mxu1 %v4126_v47  ;;  %v6860_v1 = vpop.eup %6859  ;;  %v4346_v31 = vpop.permute.xlu0 %4345  ;;  %v6996_v57 = vld [vmem:[%s7217_s16 + $0x18] sm:$0xff]  ;;  %v6998_v28 = vld [vmem:[%s7217_s16 + $0x8] sm:$0xff] }
 0x567   : > { %v4031_v13 = vmul.f32 %v6860_v1, %v12814_v44  ;;  %v4030_v22 = vmul.f32 %v6860_v1, %v12816_v38  ;;  %v4356_v51 = vpop.permute.xlu1 %4355 }
 0x568   : > { %v4129_v25 = vpack.c.bf16 %v3969_v21, %v3967_v53  ;;  %v4128_v17 = vpack.c.bf16 %v3968_v16, %v3966_v14 }
 0x569   : > { %4314 = vmatpush1.bf16.xpose.msra.mxu0 %v4158_v32  ;;  %v6862_v61 = vpop.eup %6861 }
 0x56a   : > { %4274 = vmatprep.subr.bf16.mxu1 %v4129_v25  ;;  %v4033_v50 = vmul.f32 %v6862_v61, %v12815_v46  ;;  %v4032_v42 = vmul.f32 %v6862_v61, %v12817_v55  ;;  %v6999_v46 = vld [vmem:[%s7217_s16 + $0x20] sm:$0xff] }
 0x56c   : > { %v4161_v26 = vpack.c.bf16 %v4033_v50, %v4031_v13  ;;  %v4160_v36 = vpack.c.bf16 %v4032_v42, %v4030_v22 }
 0x56e   : > { %4275 = vmatpush1.bf16.xpose.msra.mxu1 %v4128_v17  ;;  %4315 = vmatprep.subr.bf16.mxu0 %v4161_v26  ;;  %v7000_v26 = vld [vmem:[%s7217_s16 + $0x28] sm:$0xff] }
 0x571   : > { %4316 = vmatpush1.bf16.xpose.msra.mxu0 %v4160_v36 }
 0x575   : > { %4277 = vmatmul.mubr.bf16.vlgmr.msra.gmra.mrb[132].mxu1 %v736_v39 }
 0x576   : > { %4406 = vmatprep.mubr.bf16.mxu1 %v12820_v58 }
 0x578   : > { %4318 = vmatmul.mubr.bf16.vlgmr.msra.gmra.mrb[156].mxu0 %v738_v43 }
 0x579   : > { %5784 = vmatprep.mubr.bf16.mxu0 %v12820_v58 }
 0x5c8   : > { %v4196_v2 = vpop.f32.mrb[128].mxu1 }
 0x5c9   : > { %v4198_v24 = vpop.f32.mrb[129].mxu1 }
 0x5ca   : > { %v4200_v11 = vpop.f32.mrb[130].mxu1 }
 0x5cb   : > { %v4237_v19 = vpop.f32.mrb[152].mxu0  ;;  %v4201_v35 = vpop.f32.mrb[131].mxu1 }
 0x5cc   : > { %v4326_v33 = vpack.c.bf16 %v4237_v19, %v4196_v2  ;;  %v4239_v52 = vpop.f32.mrb[153].mxu0  ;;  %v7001_v2 = vld [vmem:[%s7217_s16 + $0x30] sm:$0xff] }
 0x5cd   : > { %v4327_v34 = vpack.c.bf16 %v4239_v52, %v4198_v24  ;;  %v4241_v27 = vpop.f32.mrb[154].mxu0 }
 0x5ce   : > { %v4242_v7 = vpop.f32.mrb[155].mxu0 }
 0x5cf   : > { %4374 = vmatprep.subr.bf16.mxu1 %v4327_v34 }
 0x5d0   : > { %4375 = vmatpush1.bf16.msra.mxu1 %v4326_v33  ;;  %v7002_v33 = vld [vmem:[%s7217_s16 + $0x38] sm:$0xff]  ;;  %s404_s16 = sand.u32 1, %s7057_s22  }
 0x5d1   : > { %s5901_s15 = sshll.u32 %s404_s16, 6  ;;  %s11311_s26 = scalar_lea.sflag [#allocation3], %s404_s16 }
 0x5d2   : > { %s406_s17 = scalar_lea.vmem [#allocation2], %s5901_s15  ;;  %s7007_s15 = sshll.u32 %s7068_s29, 4  ;;  %s7008_s15 = int_to_ptr.vmem [resolvable:$false] %s7007_s15 }
 0x5d3   : > { %s5835_s18 = sshll.u32 %s406_s17, 4  ;;  %s7009_s30 = scalar_lea.vmem %s7008_s15, 2048  ;;  %s11305_s18 = int_to_ptr.vmem [resolvable:$true] %s5835_s18 }
 0x5d4   : > { %s7003_s28 = scalar_lea.vmem %s11305_s18, 1024  ;;  %p7010_p0 = scmp.lt.s32.totalorder %s11305_s18, %s7008_s15 }
 0x5d5   : > { %p7004_p11 = scmp.ne.s32.totalorder %s11305_s18, %s7003_s28  ;;  %p7011_p1 = scmp.lt.s32.totalorder %s7009_s30, %s7003_s28 }
 0x5d7   : > { %p7005_p12 = pnand %p7004_p11, %p7174_p5  ;;  %p7012_p2 = por %p7011_p1, %p7010_p0 }
 0x5d9   : > { %p7006_p13 = pneg %p7005_p12 }
 0x5db   : > { %p7013_p3 = pnand %p7012_p2, %p7006_p13 }
 0x648   : > { %v4278_v10 = vpop.f32.mrb[132].mxu1 }
 0x649   : > { %v4280_v56 = vpop.f32.mrb[133].mxu1 }
 0x64a   : > { %v4282_v48 = vpop.f32.mrb[134].mxu1 }
 0x64b   : > { %v4319_v3 = vpop.f32.mrb[156].mxu0  ;;  %v4283_v37 = vpop.f32.mrb[135].mxu1 }
 0x64c   : > { %v4328_v60 = vpack.c.bf16 %v4319_v3, %v4278_v10  ;;  %v4321_v4 = vpop.f32.mrb[157].mxu0 }
 0x64d   : > { %v4329_v20 = vpack.c.bf16 %v4321_v4, %v4280_v56  ;;  %v4323_v41 = vpop.f32.mrb[158].mxu0 }
 0x64e   : > { %v4324_v5 = vpop.f32.mrb[159].mxu0 }
 0x64f   : > { %4376 = vmatprep.subr.bf16.mxu1 %v4329_v20 }
 0x650   : > { %4377 = vmatpush1.bf16.msra.mxu1 %v4328_v60 }
 0x653   : > { %5986 = vmatmul.mubr.msk.bf16.vlgmr.msra.gmra.mrb[136].mxu1 %vm604_vm0, %v6079_v18 }
 0x654   : > { %4416 = vmatprep.mubr.bf16.mxu1 %v12820_v58 }
 0x65b   : > { %5987 = vmatmul.mubr.msk.bf16.gmra.mrb[140].mxu1 %vm604_vm0, %v6080_v59 }
 0x65c   : > { %4783 = vmatprep.mubr.bf16.mxu1 %v12820_v58 }
 0x726   : > { %v4408_v15 = vpop.f32.mrb[136].mxu1 }
 0x727   : > { %v4410_v63 = vpop.f32.mrb[137].mxu1  ;;  %v4409_v8 = vadd.f32 %v4408_v15, %v4341_v40 }
 0x728   : > { %v4412_v49 = vpop.f32.mrb[138].mxu1  ;;  %v4411_v47 = vadd.f32 %v4410_v63, %v4341_v40 }
 0x729   : > { %v4413_v62 = vadd.f32 %v4412_v49, %v4346_v31  ;;  %v4414_v54 = vpop.f32.mrb[139].mxu1  ;;  %v10329_v53 = vadd.f32 %v6997_v23, %v4409_v8 }
 0x72a   : > { %v4415_v30 = vadd.f32 %v4414_v54, %v4346_v31  ;;  %v10332_v21 = vadd.f32 %v6998_v28, %v4411_v47 }
 0x72b   : > { %v10323_v6 = vadd.f32 %v6995_v29, %v4413_v62  ;;  %12823 = vst [vmem:[#allocation205_spill] sm:$0xff] %v10329_v53  ;;  %v4463_v44 = vmul.f32 %v10329_v53, %v10329_v53 }
 0x72c   : > { %v10326_v32 = vadd.f32 %v6996_v57, %v4415_v30  ;;  %12824 = vst [vmem:[#allocation206_spill] sm:$0xff] %v10332_v21  ;;  %v4464_v55 = vmul.f32 %v10332_v21, %v10332_v21 }
 0x72d   : > { %12821 = vst [vmem:[#allocation186_spill] sm:$0xff] %v10323_v6  ;;  %v4465_v16 = vmul.f32 %v10323_v6, %v10323_v6  ;;  %v4443_v13 = vadd.f32 %v10323_v6, %v10329_v53 }
 0x72e   : > { %12822 = vst [vmem:[#allocation191_spill] sm:$0xff] %v10326_v32  ;;  %v4418_v45 = vpop.f32.mrb[140].mxu1  ;;  %v4466_v14 = vmul.f32 %v10326_v32, %v10326_v32  ;;  %v4452_v42 = vadd.f32 %v10326_v32, %v10332_v21 }
 0x72f   : > { %v4419_v1 = vadd.f32 %v4418_v45, %v4351_v0  ;;  %v4420_v25 = vpop.f32.mrb[141].mxu1  ;;  %v4471_v39 = vadd.f32 %v4465_v16, %v4463_v44 }
 0x730   : > { %v4421_v61 = vadd.f32 %v4420_v25, %v4351_v0  ;;  %v4422_v17 = vpop.f32.mrb[142].mxu1  ;;  %v4480_v11 = vadd.f32 %v4466_v14, %v4464_v55 }
 0x731   : > { %v10343_v50 = vadd.f32 %v6999_v46, %v4419_v1  ;;  %v4423_v38 = vadd.f32 %v4422_v17, %v4356_v51  ;;  %v4424_v22 = vpop.f32.mrb[143].mxu1  ;;  %v4518_v46 = vpop.permute.xlu0 %4517 }
 0x732   : > { %v10350_v36 = vadd.f32 %v7000_v26, %v4421_v61  ;;  %v4425_v12 = vadd.f32 %v4424_v22, %v4356_v51 }
 0x733   : > { %12825 = vst [vmem:[#allocation211_spill] sm:$0xff] %v10343_v50  ;;  %v4444_v9 = vadd.f32 %v4443_v13, %v10343_v50  ;;  %v4467_v43 = vmul.f32 %v10343_v50, %v10343_v50  ;;  %v10356_v24 = vadd.f32 %v7001_v2, %v4423_v38  ;;  %v4523_v13 = vpop.permute.xlu1 %4522 }
 0x734   : > { %12826 = vst [vmem:[#allocation212_spill] sm:$0xff] %v10350_v36  ;;  %v4453_v19 = vadd.f32 %v4452_v42, %v10350_v36  ;;  %v4468_v35 = vmul.f32 %v10350_v36, %v10350_v36  ;;  %v10362_v52 = vadd.f32 %v7002_v33, %v4425_v12 }
 0x735   : > { %12827 = vst [vmem:[#allocation190_spill] sm:$0xff] %v10356_v24  ;;  %v4472_v34 = vadd.f32 %v4471_v39, %v4467_v43  ;;  %v4445_v27 = vadd.f32 %v4444_v9, %v10356_v24  ;;  %v4469_v7 = vmul.f32 %v10356_v24, %v10356_v24  ;;  %v4546_v26 = vpop.permute.xlu0 %4545 }
 0x736   : > { %12828 = vst [vmem:[#allocation198_spill] sm:$0xff] %v10362_v52  ;;  %v4481_v10 = vadd.f32 %v4480_v11, %v4468_v35  ;;  %v4454_v56 = vadd.f32 %v4453_v19, %v10362_v52  ;;  %v4470_v48 = vmul.f32 %v10362_v52, %v10362_v52 }
 0x737   : > { %v4446_v3 = vrot.slane %v4445_v27, 4  ;;  %v4473_v37 = vadd.f32 %v4472_v34, %v4469_v7  ;;  %v4551_v42 = vpop.permute.xlu1 %4550 }
 0x738   : > { %v4455_v60 = vrot.slane %v4454_v56, 4  ;;  %v4482_v4 = vadd.f32 %v4481_v10, %v4470_v48 }
 0x739   : > { %v4447_v20 = vadd.f32 %v4446_v3, %v4445_v27  ;;  %v4474_v41 = vrot.slane %v4473_v37, 4  ;;  %v4528_v39 = vpop.permute.xlu0 %4527 }
 0x73a   : > { %v4456_v5 = vadd.f32 %v4455_v60, %v4454_v56  ;;  %v4483_v18 = vrot.slane %v4482_v4, 4 }
 0x73b   : > { %v4448_v59 = vrot.slane %v4447_v20, 2  ;;  %v4475_v40 = vadd.f32 %v4474_v41, %v4473_v37  ;;  %v4533_v12 = vpop.permute.xlu1 %4532 }
 0x73c   : > { %v4457_v15 = vrot.slane %v4456_v5, 2  ;;  %v4484_v63 = vadd.f32 %v4483_v18, %v4482_v4 }
 0x73d   : > { %v4449_v31 = vadd.f32 %v4448_v59, %v4447_v20  ;;  %v4476_v49 = vrot.slane %v4475_v40, 2 }
 0x73e   : > { %v4458_v8 = vadd.f32 %v4457_v15, %v4456_v5  ;;  %v4485_v62 = vrot.slane %v4484_v63, 2 }
 0x73f   : > { %v4450_v54 = vrot.slane %v4449_v31, 1  ;;  %v4477_v0 = vadd.f32 %v4476_v49, %v4475_v40 }
 0x740   : > { %v4459_v47 = vrot.slane %v4458_v8, 1  ;;  %v4486_v30 = vadd.f32 %v4485_v62, %v4484_v63  ;;  %v4561_v63 = vpop.permute.xlu1 %4560 }
 0x741   : > { %v4451_v29 = vadd.f32 %v4450_v54, %v4449_v31  ;;  %v4478_v57 = vrot.slane %v4477_v0, 1  ;;  %v4556_v31 = vpop.permute.xlu0 %4555 }
 0x742   : > { %v4460_v23 = vadd.f32 %v4459_v47, %v4458_v8  ;;  %v4487_v28 = vrot.slane %v4486_v30, 1 }
 0x743   : > { %v4461_v45 = vmul.f32 0.03125, %v4451_v29  ;;  %v4479_v16 = vadd.f32 %v4478_v57, %v4477_v0 }
 0x744   : > { %v4462_v1 = vmul.f32 0.03125, %v4460_v23  ;;  %v4488_v25 = vadd.f32 %v4487_v28, %v4486_v30 }
 0x745   : > { %v4489_v51 = vmul.f32 0.03125, %v4479_v16  ;;  %v4491_v14 = vmul.f32 %v4461_v45, %v4461_v45  ;;  %v4505_v9 = vsub.f32 %v10356_v24, %v4461_v45  ;;  %v4499_v43 = vsub.f32 %v10329_v53, %v4461_v45 }
 0x746   : > { %v4490_v61 = vmul.f32 0.03125, %v4488_v25  ;;  %v4492_v17 = vmul.f32 %v4462_v1, %v4462_v1  ;;  %v4501_v2 = vsub.f32 %v10323_v6, %v4461_v45  ;;  %v4503_v11 = vsub.f32 %v10343_v50, %v4461_v45  ;;  %v6081_v25 = vld [vmem:[%s11360_s8] sm:$0xff]  }
 0x747   : > { %v4493_v44 = vsub.f32 %v4489_v51, %v4491_v14  ;;  %v4506_v35 = vsub.f32 %v10362_v52, %v4462_v1  ;;  %v4500_v33 = vsub.f32 %v10332_v21, %v4462_v1  ;;  %v4502_v34 = vsub.f32 %v10326_v32, %v4462_v1  ;;  %v6082_v51 = vld [vmem:[%s11360_s8 + $0x8] sm:$0xff]   ;;  %v6083_v14 = vld [vmem:[%s11360_s8 + $0x10] sm:$0xff]  }
 0x748   : > { %v4494_v38 = vsub.f32 %v4490_v61, %v4492_v17  ;;  %v4504_v27 = vsub.f32 %v10350_v36, %v4462_v1  ;;  %v6084_v61 = vld [vmem:[%s11360_s8 + $0x18] sm:$0xff]   ;;  %v6085_v17 = vld [vmem:[%s11360_s8 + $0x20] sm:$0xff]  }
 0x749   : > { %v4495_v22 = vadd.f32 1e-05, %v4493_v44  ;;  %v6086_v44 = vld [vmem:[%s11360_s8 + $0x28] sm:$0xff]  }
 0x74a   : > { %v4496_v55 = vadd.f32 1e-05, %v4494_v38  ;;  %v4610_v38 = vpop.permute.xlu0 %4609 }
 0x74b   : > { %6863 = vrsqrt.f32 %v4495_v22 }
 0x74c   : > { %6865 = vrsqrt.f32 %v4496_v55 }
 0x755   : > { %v6864_v19 = vpop.eup %6863 }
 0x756   : > { %v6866_v7 = vpop.eup %6865  ;;  %v4513_v10 = vmul.f32 %v6864_v19, %v4505_v9  ;;  %v4507_v56 = vmul.f32 %v6864_v19, %v4499_v43  ;;  %v4509_v48 = vmul.f32 %v6864_v19, %v4501_v2  ;;  %v4511_v3 = vmul.f32 %v6864_v19, %v4503_v11 }
 0x757   : > { %v4508_v37 = vmul.f32 %v6866_v7, %v4500_v33  ;;  %v4510_v60 = vmul.f32 %v6866_v7, %v4502_v34  ;;  %v4512_v4 = vmul.f32 %v6866_v7, %v4504_v27  ;;  %v4514_v20 = vmul.f32 %v6866_v7, %v4506_v35 }
 0x758   : > { %v4535_v41 = vmul.f32 %v4518_v46, %v4507_v56  ;;  %v4537_v5 = vmul.f32 %v4523_v13, %v4509_v48  ;;  %v4539_v62 = vmul.f32 %v4528_v39, %v4511_v3  ;;  %v4541_v54 = vmul.f32 %v4533_v12, %v4513_v10 }
 0x759   : > { %v4536_v18 = vmul.f32 %v4518_v46, %v4508_v37  ;;  %v4538_v59 = vmul.f32 %v4523_v13, %v4510_v60  ;;  %v4540_v40 = vmul.f32 %v4528_v39, %v4512_v4  ;;  %v4542_v15 = vmul.f32 %v4533_v12, %v4514_v20  ;;  %v6087_v13 = vld [vmem:[%s11360_s8 + $0x30] sm:$0xff]   ;;  %v6088_v46 = vld [vmem:[%s11360_s8 + $0x38] sm:$0xff]  }
 0x75a   : > { %v4563_v49 = vadd.f32 %v4546_v26, %v4535_v41  ;;  %v4565_v8 = vadd.f32 %v4551_v42, %v4537_v5  ;;  %v4567_v28 = vadd.f32 %v4556_v31, %v4539_v62  ;;  %v4569_v45 = vadd.f32 %v4561_v63, %v4541_v54 }
 0x75b   : > { %v4564_v0 = vadd.f32 %v4546_v26, %v4536_v18  ;;  %v4566_v47 = vadd.f32 %v4551_v42, %v4538_v59  ;;  %v4568_v30 = vadd.f32 %v4556_v31, %v4540_v40  ;;  %v4570_v29 = vadd.f32 %v4561_v63, %v4542_v15  ;;  %v4615_v26 = vpop.permute.xlu1 %4614  ;;  %v4620_v18 = vpop.permute.xlu0 %4619 }
 0x75c   : > { %v4587_v23 = vpack.c.bf16 %v4565_v8, %v4563_v49  ;;  %v4589_v1 = vpack.c.bf16 %v4569_v45, %v4567_v28 }
 0x75d   : > { %v4588_v57 = vpack.c.bf16 %v4566_v47, %v4564_v0  ;;  %v4590_v16 = vpack.c.bf16 %v4570_v29, %v4568_v30 }
 0x75f   : > { %4751 = vmatprep.subr.bf16.mxu1 %v4588_v57  ;;  %v4625_v40 = vpop.permute.xlu1 %4624 }
 0x760   : > { %4752 = vmatpush1.bf16.msra.mxu1 %v4587_v23 }
 0x761   : > { %4753 = vmatprep.subr.bf16.mxu1 %v4590_v16 }
 0x764   : > { %4754 = vmatpush1.bf16.msra.mxu1 %v4589_v1 }
 0x767   : > { %5996 = vmatmul.mubr.msk.bf16.vlgmr.msra.gmra.mrb[144].mxu1 %vm604_vm0, %v6081_v25 }
 0x768   : > { %4793 = vmatprep.mubr.bf16.mxu1 %v12820_v58 }
 0x76f   : > { %5997 = vmatmul.mubr.msk.bf16.gmra.mrb[148].mxu1 %vm604_vm0, %v6082_v51 }
 0x770   : > { %4803 = vmatprep.mubr.bf16.mxu1 %v12820_v58 }
 0x777   : > { %5998 = vmatmul.mubr.msk.bf16.gmra.mrb[152].mxu1 %vm604_vm0, %v6083_v14 }
 0x778   : > { %4813 = vmatprep.mubr.bf16.mxu1 %v12820_v58 }
 0x77f   : > { %5999 = vmatmul.mubr.msk.bf16.gmra.mrb[156].mxu1 %vm604_vm0, %v6084_v61 }
 0x780   : > { %4823 = vmatprep.mubr.bf16.mxu1 %v12820_v58 }
 0x787   : > { %6000 = vmatmul.mubr.msk.bf16.gmra.mrb[160].mxu1 %vm604_vm0, %v6085_v17 }
 0x788   : > { %4833 = vmatprep.mubr.bf16.mxu1 %v12820_v58 }
 0x78f   : > { %6001 = vmatmul.mubr.msk.bf16.gmra.mrb[164].mxu1 %vm604_vm0, %v6086_v44 }
 0x790   : > { %4843 = vmatprep.mubr.bf16.mxu1 %v12820_v58 }
 0x797   : > { %6002 = vmatmul.mubr.msk.bf16.gmra.mrb[168].mxu1 %vm604_vm0, %v6087_v13 }
 0x798   : > { %4853 = vmatprep.mubr.bf16.mxu1 %v12820_v58 }
 0x79f   : > { %6003 = vmatmul.mubr.msk.bf16.gmra.mrb[172].mxu1 %vm604_vm0, %v6088_v46 }
 0x7a0   : > { %5794 = vmatprep.mubr.bf16.mxu1 %v12820_v58 }
 0x83a   : > { %v4785_v22 = vpop.f32.mrb[144].mxu1 }
 0x83b   : > { %v10418_v55 = vadd.f32 %v4785_v22, %v4610_v38  ;;  %v4787_v42 = vpop.f32.mrb[145].mxu1 }
 0x83c   : > { %v10420_v12 = vadd.f32 %v4787_v42, %v4610_v38  ;;  %v4789_v39 = vpop.f32.mrb[146].mxu1 }
 0x83d   : > { %v10423_v9 = vmul.f32 0.70710677, %v10418_v55  ;;  %v10425_v43 = vadd.f32 %v4789_v39, %v4615_v26  ;;  %v4791_v2 = vpop.f32.mrb[147].mxu1 }
 0x83e   : > { %v10428_v11 = vmul.f32 0.70710677, %v10420_v12  ;;  %v10430_v19 = vadd.f32 %v4791_v2, %v4615_v26 }
 0x83f   : > { %v4896_v58 = vand.u32 2147483647, %v10423_v9  ;;  %v10434_v35 = vmul.f32 0.70710677, %v10425_v43  ;;  %vm5504_vm3 = vcmp.ge.f32.partialorder %v10423_v9, 0.0 }
 0x840   : > { %v10437_v33 = vand.u32 2147483647, %v10428_v11  ;;  %v10440_v34 = vmul.f32 0.70710677, %v10430_v19  ;;  %vm5505_vm7 = vcmp.ge.f32.partialorder %v10428_v11, 0.0 }
 0x841   : > { %v4928_v27 = vmul.f32 0.3275911, %v4896_v58  ;;  %v4898_v7 = vand.u32 2147483647, %v10434_v35  ;;  %v5312_v30 = vsub.f32 0.0, %v4896_v58  ;;  %vm5506_vm4 = vcmp.ge.f32.partialorder %v10434_v35, 0.0 }
 0x842   : > { %v4929_v10 = vmul.f32 0.3275911, %v10437_v33  ;;  %v10445_v56 = vand.u32 2147483647, %v10440_v34  ;;  %v4795_v37 = vpop.f32.mrb[148].mxu1  ;;  %vm5507_vm8 = vcmp.ge.f32.partialorder %v10440_v34, 0.0 }
 0x843   : > { %v4960_v48 = vadd.f32 1.0, %v4928_v27  ;;  %v4930_v3 = vmul.f32 0.3275911, %v4898_v7  ;;  %v4797_v20 = vpop.f32.mrb[149].mxu1  ;;  %v10448_v63 = vadd.f32 %v4795_v37, %v4620_v18  ;;  %v5344_v61 = vmul.f32 %v5312_v30, %v4896_v58  ;;  %v10497_v37 = vpop.permute.xlu0 %4629 }
 0x844   : > { %v4961_v60 = vadd.f32 1.0, %v4929_v10  ;;  %v4931_v4 = vmul.f32 0.3275911, %v10445_v56  ;;  %v4799_v5 = vpop.f32.mrb[150].mxu1  ;;  %v10450_v31 = vadd.f32 %v4797_v20, %v4620_v18  ;;  %v5314_v17 = vsub.f32 0.0, %v4898_v7 }
 0x845   : > { %6867 = vrcp.f32 %v4960_v48  ;;  %v4962_v41 = vadd.f32 1.0, %v4930_v3  ;;  %v4801_v59 = vpop.f32.mrb[151].mxu1  ;;  %v10452_v49 = vadd.f32 %v4799_v5, %v4625_v40  ;;  %v10455_v8 = vmul.f32 0.70710677, %v10448_v63 }
 0x846   : > { %6869 = vrcp.f32 %v4961_v60  ;;  %v4963_v15 = vadd.f32 1.0, %v4931_v4  ;;  %v10458_v62 = vmul.f32 0.70710677, %v10450_v31  ;;  %v10463_v0 = vadd.f32 %v4801_v59, %v4625_v40 }
 0x847   : > { %6871 = vrcp.f32 %v4962_v41  ;;  %v10461_v54 = vmul.f32 0.70710677, %v10452_v49  ;;  %v4900_v29 = vand.u32 2147483647, %v10455_v8  ;;  %v5376_v10 = vmul.f32 1.442695, %v5344_v61 }
 0x848   : > { %6873 = vrcp.f32 %v4963_v15  ;;  %v10467_v57 = vand.u32 2147483647, %v10458_v62  ;;  %v10479_v51 = vmul.f32 0.70710677, %v10463_v0  ;;  %v5346_v48 = vmul.f32 %v5314_v17, %v4898_v7 }
 0x849   : > { %v10472_v28 = vand.u32 2147483647, %v10461_v54  ;;  %v4932_v16 = vmul.f32 0.3275911, %v4900_v29  ;;  %v10506_v18 = vmul.f32 0.5, %v10418_v55  ;;  %vm5508_vm5 = vcmp.ge.f32.partialorder %v10455_v8, 0.0 }
 0x84a   : > { %v4805_v47 = vpop.f32.mrb[152].mxu1  ;;  %v4933_v1 = vmul.f32 0.3275911, %v10467_v57  ;;  %v10489_v42 = vand.u32 2147483647, %v10479_v51  ;;  %vm5510_vm6 = vcmp.ge.f32.partialorder %v10461_v54, 0.0  ;;  %v4640_v54 = vpop.permute.xlu0 %4639 }
 0x84b   : > { %v10469_v23 = vpop.f32.mrb[153].mxu1  ;;  %v4934_v25 = vmul.f32 0.3275911, %v10472_v28  ;;  %v4964_v44 = vadd.f32 1.0, %v4932_v16  ;;  %v10509_v7 = vadd.f32 %v4805_v47, %v10497_v37  ;;  %vm5509_vm9 = vcmp.ge.f32.partialorder %v10458_v62, 0.0 }
 0x84c   : > { %v10474_v45 = vpop.f32.mrb[154].mxu1  ;;  %v4965_v13 = vadd.f32 1.0, %v4933_v1  ;;  %v4935_v58 = vmul.f32 0.3275911, %v10489_v42  ;;  %v5380_v1 = vmul.f32 1.442695, %v5346_v48 }
 0x84d   : > { %v10483_v46 = vpop.f32.mrb[155].mxu1  ;;  %6875 = vrcp.f32 %v4964_v44  ;;  %v4966_v39 = vadd.f32 1.0, %v4934_v25  ;;  %v5316_v25 = vsub.f32 0.0, %v4900_v29  ;;  %v10515_v61 = vmul.f32 0.70710677, %v10509_v7 }
 0x84e   : > { %6877 = vrcp.f32 %v4965_v13  ;;  %v4967_v59 = vadd.f32 1.0, %v4935_v58  ;;  %v10520_v44 = vmul.f32 0.5, %v10420_v12  ;;  %v5313_v58 = vsub.f32 0.0, %v10437_v33 }
 0x84f   : > { %v10481_v14 = vpop.eup %6867  ;;  %6879 = vrcp.f32 %v4966_v39  ;;  %v10529_v39 = vand.u32 2147483647, %v10515_v61  ;;  %vm5512_vm10 = vcmp.ge.f32.partialorder %v10515_v61, 0.0  ;;  %vm5511_vm11 = vcmp.ge.f32.partialorder %v10479_v51, 0.0 }
 0x850   : > { %v10485_v38 = vpop.eup %6869  ;;  %v5024_v22 = vmul.f32 1.0614054, %v10481_v14  ;;  %6881 = vpow2.f32 %v5376_v10 }
 0x851   : > { %v5025_v26 = vmul.f32 1.0614054, %v10485_v38  ;;  %v10493_v27 = vpop.eup %6871  ;;  %6883 = vrcp.f32 %v4967_v59 }
 0x852   : > { %v5056_v2 = vadd.f32 -1.4531521, %v5024_v22  ;;  %v10495_v3 = vpop.f32.mrb[156].mxu1  ;;  %v5026_v20 = vmul.f32 1.0614054, %v10493_v27  ;;  %v10503_v5 = vpop.eup %6873  ;;  %v10526_v22 = vmul.f32 0.5, %v10425_v43  ;;  %6885 = vpow2.f32 %v5380_v1 }
 0x853   : > { %v5057_v4 = vadd.f32 -1.4531521, %v5025_v26  ;;  %v10501_v41 = vpop.f32.mrb[157].mxu1  ;;  %v5027_v16 = vmul.f32 1.0614054, %v10503_v5 }
 0x854   : > { %v5088_v60 = vmul.f32 %v10481_v14, %v5056_v2  ;;  %v10511_v40 = vpop.f32.mrb[158].mxu1  ;;  %v5058_v30 = vadd.f32 -1.4531521, %v5026_v20  ;;  %v4936_v43 = vmul.f32 0.3275911, %v10529_v39 }
 0x855   : > { %v5089_v17 = vmul.f32 %v10485_v38, %v5057_v4  ;;  %v10523_v13 = vpop.f32.mrb[159].mxu1  ;;  %v5059_v26 = vadd.f32 -1.4531521, %v5027_v16  ;;  %v5318_v4 = vsub.f32 0.0, %v10472_v28 }
 0x856   : > { %v5120_v15 = vadd.f32 1.4214138, %v5088_v60  ;;  %v5090_v47 = vmul.f32 %v10493_v27, %v5058_v30  ;;  %v5348_v60 = vmul.f32 %v5316_v25, %v4900_v29  ;;  %v5315_v29 = vsub.f32 0.0, %v10445_v56 }
 0x857   : > { %v10534_v12 = vpop.eup %6875  ;;  %v5121_v30 = vadd.f32 1.4214138, %v5089_v17  ;;  %v5091_v1 = vmul.f32 %v10503_v5, %v5059_v26  ;;  %v4968_v52 = vadd.f32 1.0, %v4936_v43  ;;  %v5345_v17 = vmul.f32 %v5313_v58, %v10437_v33 }
 0x858   : > { %v5152_v55 = vmul.f32 %v10481_v14, %v5120_v15  ;;  %v5122_v10 = vadd.f32 1.4214138, %v5090_v47  ;;  %v10540_v59 = vpop.eup %6877  ;;  %v5350_v26 = vmul.f32 %v5318_v4, %v10472_v28 }
 0x859   : > { %v5029_v25 = vmul.f32 1.0614054, %v10540_v59  ;;  %v5153_v53 = vmul.f32 %v10485_v38, %v5121_v30  ;;  %6887 = vrcp.f32 %v4968_v52 }
 0x85a   : > { %v5184_v2 = vadd.f32 -0.28449672, %v5152_v55  ;;  %v10532_v48 = vpop.f32.mrb[160].mxu1  ;;  %v5154_v16 = vmul.f32 %v10493_v27, %v5122_v10  ;;  %v5028_v55 = vmul.f32 1.0614054, %v10534_v12 }
 0x85b   : > { %v10538_v20 = vpop.f32.mrb[161].mxu1  ;;  %v5384_v10 = vmul.f32 1.442695, %v5348_v60  ;;  %v5061_v21 = vadd.f32 -1.4531521, %v5029_v25  ;;  %v5347_v60 = vmul.f32 %v5315_v29, %v10445_v56 }
 0x85c   : > { %v5216_v15 = vmul.f32 %v10481_v14, %v5184_v2  ;;  %v10545_v47 = vpop.f32.mrb[162].mxu1  ;;  %v5186_v6 = vadd.f32 -0.28449672, %v5154_v16  ;;  %v5060_v36 = vadd.f32 -1.4531521, %v5028_v55  ;;  %v10552_v2 = vpop.eup %6879 }
 0x85d   : > { %12829 = vst [vmem:[#allocation217_spill] sm:$0xff] %v10545_v47  ;;  %v10550_v32 = vpop.f32.mrb[163].mxu1  ;;  %v6882_v16 = vpop.eup %6881  ;;  %v5123_v55 = vadd.f32 1.4214138, %v5091_v1  ;;  %v5030_v47 = vmul.f32 1.0614054, %v10552_v2  ;;  %6889 = vpow2.f32 %v5384_v10 }
 0x85e   : > { %12830 = vst [vmem:[#allocation187_spill] sm:$0xff] %v10550_v32  ;;  %v5248_v24 = vadd.f32 0.2548296, %v5216_v15  ;;  %v5218_v43 = vmul.f32 %v10493_v27, %v5186_v6  ;;  %v5092_v15 = vmul.f32 %v10534_v12, %v5060_v36  ;;  %v5093_v32 = vmul.f32 %v10540_v59, %v5061_v21 }
 0x85f   : > { %v5317_v6 = vsub.f32 0.0, %v10467_v57  ;;  %v5062_v36 = vadd.f32 -1.4531521, %v5030_v47  ;;  %v5185_v1 = vadd.f32 -0.28449672, %v5153_v53  ;;  %v5155_v29 = vmul.f32 %v10503_v5, %v5123_v55 }
 0x860   : > { %v5280_v50 = vmul.f32 %v10481_v14, %v5248_v24  ;;  %v5250_v58 = vadd.f32 0.2548296, %v5218_v43  ;;  %v5124_v28 = vadd.f32 1.4214138, %v5092_v15  ;;  %v10566_v24 = vpop.eup %6883  ;;  %v5388_v14 = vmul.f32 1.442695, %v5350_v26 }
 0x861   : > { %v6886_v25 = vpop.eup %6885  ;;  %v5378_v56 = vmul.f32 1.442695, %v5345_v17  ;;  %v5125_v43 = vadd.f32 1.4214138, %v5093_v32  ;;  %v5094_v15 = vmul.f32 %v10552_v2, %v5062_v36  ;;  %v5031_v53 = vmul.f32 1.0614054, %v10566_v24 }
 0x862   : > { %v5440_v33 = vmul.f32 %v6882_v16, %v5280_v50  ;;  %v10564_v4 = vpop.f32.mrb[164].mxu1  ;;  %v5282_v21 = vmul.f32 %v10493_v27, %v5250_v58  ;;  %v5156_v52 = vmul.f32 %v10534_v12, %v5124_v28  ;;  %v5382_v27 = vmul.f32 1.442695, %v5347_v60 }
 0x863   : > { %v10571_v50 = vpop.f32.mrb[165].mxu1  ;;  %v5349_v58 = vmul.f32 %v5317_v6, %v10467_v57  ;;  %v5126_v28 = vadd.f32 1.4214138, %v5094_v15  ;;  %6891 = vpow2.f32 %v5388_v14  ;;  %v5217_v32 = vmul.f32 %v10485_v38, %v5185_v1  ;;  %v10593_v6 = vpop.eup %6887 }
 0x864   : > { %v5472_v30 = vsub.f32 1.0, %v5440_v33  ;;  %v10575_v10 = vpop.f32.mrb[166].mxu1  ;;  %v5442_v47 = vmul.f32 %v6886_v25, %v5282_v21  ;;  %v5188_v26 = vadd.f32 -0.28449672, %v5156_v52  ;;  %6893 = vpow2.f32 %v5378_v56 }
 0x865   : > { %12831 = vst [vmem:[#allocation193_spill] sm:$0xff] %v10575_v10  ;;  %v10578_v33 = vpop.f32.mrb[167].mxu1  ;;  %v5187_v21 = vadd.f32 -0.28449672, %v5155_v29  ;;  %v5157_v52 = vmul.f32 %v10540_v59, %v5125_v43  ;;  %v5158_v25 = vmul.f32 %v10552_v2, %v5126_v28  ;;  %v5063_v10 = vadd.f32 -1.4531521, %v5031_v53  ;;  %v10603_v28 = vpop.permute.xlu1 %4634 }
 0x866   : > { %v5536_v16 = vsub.f32 0.0, %v5472_v30  ;;  %12832 = vst [vmem:[#allocation218_spill] sm:$0xff] %v10578_v33  ;;  %v5474_v55 = vsub.f32 1.0, %v5442_v47  ;;  %v5220_v36 = vmul.f32 %v10534_v12, %v5188_v26  ;;  %v10589_v57 = vadd.f32 %v10469_v23, %v10497_v37 }
 0x867   : > { %6895 = vpow2.f32 %v5382_v27  ;;  %v5249_v1 = vadd.f32 0.2548296, %v5217_v32  ;;  %v5386_v43 = vmul.f32 1.442695, %v5349_v58  ;;  %v5219_v23 = vmul.f32 %v10503_v5, %v5187_v21 }
 0x868   : > { %v5568_v17 = vsel %vm5504_vm3, %v5472_v30, %v5536_v16  ;;  %v5538_v33 = vsub.f32 0.0, %v5474_v55  ;;  %v5252_v60 = vadd.f32 0.2548296, %v5220_v36  ;;  %v5190_v30 = vadd.f32 -0.28449672, %v5158_v25  ;;  %v6890_v16 = vpop.eup %6889 }
 0x869   : > { %v5632_v14 = vadd.f32 1.0, %v5568_v17  ;;  %v5189_v37 = vadd.f32 -0.28449672, %v5157_v52  ;;  %v5095_v27 = vmul.f32 %v10566_v24, %v5063_v10  ;;  %v10616_v36 = vadd.f32 %v10474_v45, %v10603_v28 }
 0x86a   : > { %v10591_v9 = vpop.f32.mrb[168].mxu1  ;;  %v5570_v56 = vsel %vm5506_vm4, %v5474_v55, %v5538_v33  ;;  %v5284_v29 = vmul.f32 %v10534_v12, %v5252_v60  ;;  %v5222_v26 = vmul.f32 %v10552_v2, %v5190_v30  ;;  %v5032_v33 = vmul.f32 1.0614054, %v10593_v6 }
 0x86b   : > { %v10597_v15 = vpop.f32.mrb[169].mxu1  ;;  %v5634_v47 = vadd.f32 1.0, %v5570_v56  ;;  %v10608_v12 = vmul.f32 0.70710677, %v10589_v57  ;;  %v5664_v17 = vmul.f32 %v5632_v14, %v10506_v18  ;;  %v5281_v21 = vmul.f32 %v10485_v38, %v5249_v1 }
 0x86c   : > { %v10601_v53 = vpop.f32.mrb[170].mxu1  ;;  %v5444_v35 = vmul.f32 %v6890_v16, %v5284_v29  ;;  %v5254_v55 = vadd.f32 0.2548296, %v5222_v26  ;;  %v5319_v10 = vsub.f32 0.0, %v10489_v42  ;;  %v5064_v25 = vadd.f32 -1.4531521, %v5032_v33 }
 0x86d   : > { %v10610_v58 = vpop.f32.mrb[171].mxu1  ;;  %v5666_v32 = vmul.f32 %v5634_v47, %v10526_v22  ;;  %v6892_v60 = vpop.eup %6891  ;;  %v5251_v56 = vadd.f32 0.2548296, %v5219_v23  ;;  %v5221_v29 = vmul.f32 %v10540_v59, %v5189_v37  ;;  %v5127_v14 = vadd.f32 1.4214138, %v5095_v27 }
 0x86e   : > { %v5476_v52 = vsub.f32 1.0, %v5444_v35  ;;  %v5286_v18 = vmul.f32 %v10552_v2, %v5254_v55  ;;  %v5096_v16 = vmul.f32 %v10593_v6, %v5064_v25  ;;  %v10626_v45 = vand.u32 2147483647, %v10608_v12  ;;  %v6894_v1 = vpop.eup %6893 }
 0x86f   : > { %v10620_v30 = vpack.c.bf16 %v5666_v32, %v5664_v17  ;;  %6897 = vpow2.f32 %v5386_v43  ;;  %v5320_v26 = vsub.f32 0.0, %v10529_v39  ;;  %v10632_v23 = vmul.f32 0.70710677, %v10616_v36 }
 0x870   : > { %v5540_v22 = vsub.f32 0.0, %v5476_v52  ;;  %v5446_v47 = vmul.f32 %v6892_v60, %v5286_v18  ;;  %v5441_v2 = vmul.f32 %v6894_v1, %v5281_v21  ;;  %v5128_v35 = vadd.f32 1.4214138, %v5096_v16 }
 0x871   : > { %12833 = vst [vmem:[#allocation223_spill] sm:$0xff] %v10620_v30  ;;  %v4937_v27 = vmul.f32 0.3275911, %v10626_v45  ;;  %v6896_v33 = vpop.eup %6895  ;;  %v5283_v17 = vmul.f32 %v10503_v5, %v5251_v56  ;;  %v5604_v43 = vmul.f32 0.5, %v10448_v63  ;;  %v5253_v60 = vadd.f32 0.2548296, %v5221_v29 }
 0x872   : > { %v10628_v38 = vpop.f32.mrb[172].mxu1  ;;  %v5572_v32 = vsel %vm5508_vm5, %v5476_v52, %v5540_v22  ;;  %v5478_v55 = vsub.f32 1.0, %v5446_v47  ;;  %v5159_v18 = vmul.f32 %v10566_v24, %v5127_v14  ;;  %v5351_v30 = vmul.f32 %v5319_v10, %v10489_v42 }
 0x873   : > { %v10634_v37 = vpop.f32.mrb[173].mxu1  ;;  %v4969_v21 = vadd.f32 1.0, %v4937_v27  ;;  %v5160_v8 = vmul.f32 %v10593_v6, %v5128_v35  ;;  %v5352_v16 = vmul.f32 %v5320_v26, %v10529_v39  ;;  %v5473_v5 = vsub.f32 1.0, %v5441_v2 }
 0x874   : > { %12834 = vst [vmem:[#allocation224_spill] sm:$0xff] %v10634_v37  ;;  %v10640_v25 = vpop.f32.mrb[174].mxu1  ;;  %v5542_v1 = vsub.f32 0.0, %v5478_v55  ;;  %v10647_v37 = vand.u32 2147483647, %v10632_v23  ;;  %v5636_v52 = vadd.f32 1.0, %v5572_v32  ;;  %v5443_v63 = vmul.f32 %v6896_v33, %v5283_v17 }
 0x875   : > { %12835 = vst [vmem:[#allocation228_spill] sm:$0xff] %v10640_v25  ;;  %6899 = vrcp.f32 %v4969_v21  ;;  %v5606_v29 = vmul.f32 0.5, %v10452_v49  ;;  %v10652_v10 = vpop.f32.mrb[175].mxu1  ;;  %v5285_v22 = vmul.f32 %v10540_v59, %v5253_v60  ;;  %v5191_v39 = vadd.f32 -0.28449672, %v5159_v18 }
 0x876   : > { %v5574_v56 = vsel %vm5510_vm6, %v5478_v55, %v5542_v1  ;;  %v4938_v42 = vmul.f32 0.3275911, %v10647_v37  ;;  %12836 = vst [vmem:[#allocation229_spill] sm:$0xff] %v10652_v10  ;;  %v5390_v47 = vmul.f32 1.442695, %v5351_v30  ;;  %v5537_v27 = vsub.f32 0.0, %v5473_v5 }
 0x877   : > { %v5638_v14 = vadd.f32 1.0, %v5574_v56  ;;  %v5192_v26 = vadd.f32 -0.28449672, %v5160_v8  ;;  %v5392_v2 = vmul.f32 1.442695, %v5352_v16  ;;  %v5668_v33 = vmul.f32 %v5636_v52, %v5604_v43 }
 0x878   : > { %v4970_v35 = vadd.f32 1.0, %v4938_v42  ;;  %v10658_v49 = vadd.f32 %v10483_v46, %v10603_v28  ;;  %v5475_v55 = vsub.f32 1.0, %v5443_v63  ;;  %v10661_v59 = vadd.f32 %v10495_v3, %v4640_v54 }
 0x879   : > { %v5670_v17 = vmul.f32 %v5638_v14, %v5606_v29  ;;  %v6898_v32 = vpop.eup %6897  ;;  %v10664_v30 = vadd.f32 %v10501_v41, %v4640_v54  ;;  %v5223_v21 = vmul.f32 %v10566_v24, %v5191_v39  ;;  %v10673_v46 = vmul.f32 0.5, %v10430_v19 }
 0x87a   : > { %6901 = vrcp.f32 %v4970_v35  ;;  %v5445_v60 = vmul.f32 %v6898_v32, %v5285_v22  ;;  %v10670_v43 = vmul.f32 0.70710677, %v10658_v49  ;;  %v5224_v28 = vmul.f32 %v10593_v6, %v5192_v26 }
 0x87b   : > { %v10666_v18 = vpack.c.bf16 %v5670_v17, %v5668_v33  ;;  %6903 = vpow2.f32 %v5390_v47  ;;  %v10677_v3 = vmul.f32 0.70710677, %v10661_v59  ;;  %v10681_v41 = vmul.f32 0.5, %v10450_v31 }
 0x87c   : > { %6905 = vpow2.f32 %v5392_v2  ;;  %v10684_v1 = vand.u32 2147483647, %v10670_v43  ;;  %v5569_v8 = vsel %vm5505_vm7, %v5473_v5, %v5537_v27  ;;  %v5539_v19 = vsub.f32 0.0, %v5475_v55  ;;  %v4645_v5 = vpop.permute.xlu1 %4644 }
 0x87d   : > { %12837 = vst [vmem:[#allocation199_spill] sm:$0xff] %v10666_v18  ;;  %v10689_v16 = vand.u32 2147483647, %v10677_v3  ;;  %v10692_v52 = vmul.f32 0.70710677, %v10664_v30  ;;  %v5477_v56 = vsub.f32 1.0, %v5445_v60  ;;  %v10707_v27 = vadd.f32 %v10511_v40, %v4645_v5 }
 0x87e   : > { %v5255_v29 = vadd.f32 0.2548296, %v5223_v21  ;;  %v5322_v31 = vsub.f32 0.0, %v10647_v37  ;;  %v4939_v42 = vmul.f32 0.3275911, %v10684_v1  ;;  %v5633_v39 = vadd.f32 1.0, %v5569_v8 }
 0x87f   : > { %v10694_v63 = vpop.eup %6899  ;;  %v5256_v22 = vadd.f32 0.2548296, %v5224_v28  ;;  %v4940_v11 = vmul.f32 0.3275911, %v10689_v16  ;;  %v10702_v26 = vand.u32 2147483647, %v10692_v52  ;;  %v5571_v2 = vsel %vm5507_vm8, %v5475_v55, %v5539_v19 }
 0x880   : > { %v5033_v14 = vmul.f32 1.0614054, %v10694_v63  ;;  %v4971_v47 = vadd.f32 1.0, %v4939_v42  ;;  %v5541_v33 = vsub.f32 0.0, %v5477_v56  ;;  %v5287_v17 = vmul.f32 %v10566_v24, %v5255_v29 }
 0x881   : > { %v4972_v54 = vadd.f32 1.0, %v4940_v11  ;;  %v4941_v32 = vmul.f32 0.3275911, %v10702_v26  ;;  %v10714_v21 = vmul.f32 0.5, %v10463_v0  ;;  %v5288_v28 = vmul.f32 %v10593_v6, %v5256_v22 }
 0x882   : > { %v5065_v35 = vadd.f32 -1.4531521, %v5033_v14  ;;  %6907 = vrcp.f32 %v4971_v47  ;;  %v5354_v34 = vmul.f32 %v5322_v31, %v10647_v37  ;;  %v10719_v55 = vmul.f32 0.5, %v10509_v7  ;;  %v10734_v14 = vpop.permute.xlu0 %4649 }
 0x883   : > { %6909 = vrcp.f32 %v4972_v54  ;;  %v5321_v40 = vsub.f32 0.0, %v10626_v45  ;;  %v4973_v8 = vadd.f32 1.0, %v4941_v32  ;;  %v10724_v29 = vmul.f32 %v5633_v39, %v10520_v44 }
 0x884   : > { %v10711_v60 = vpop.eup %6901  ;;  %v5635_v42 = vadd.f32 1.0, %v5571_v2  ;;  %v5097_v0 = vmul.f32 %v10694_v63, %v5065_v35  ;;  %v10728_v6 = vmul.f32 0.70710677, %v10707_v27  ;;  %v5573_v7 = vsel %vm5509_vm9, %v5477_v56, %v5541_v33 }
 0x885   : > { %v5034_v24 = vmul.f32 1.0614054, %v10711_v60  ;;  %v6904_v19 = vpop.eup %6903  ;;  %6911 = vrcp.f32 %v4973_v8  ;;  %v5396_v47 = vmul.f32 1.442695, %v5354_v34  ;;  %v10740_v39 = vadd.f32 %v10523_v13, %v4645_v5 }
 0x886   : > { %v6906_v37 = vpop.eup %6905  ;;  %v10732_v31 = vmul.f32 %v6904_v19, %v5287_v17  ;;  %v10737_v44 = vand.u32 2147483647, %v10728_v6  ;;  %v5353_v2 = vmul.f32 %v5321_v40, %v10626_v45  ;;  %v10744_v35 = vmul.f32 0.5, %v10589_v57 }
 0x887   : > { %v5066_v22 = vadd.f32 -1.4531521, %v5034_v24  ;;  %v5448_v11 = vmul.f32 %v6906_v37, %v5288_v28  ;;  %v10749_v56 = vadd.f32 %v10532_v48, %v10734_v14  ;;  %v5637_v54 = vadd.f32 1.0, %v5573_v7 }
 0x888   : > { %v5129_v33 = vadd.f32 1.4214138, %v5097_v0  ;;  %v5324_v17 = vsub.f32 0.0, %v10689_v16  ;;  %v4942_v32 = vmul.f32 0.3275911, %v10737_v44  ;;  %v10754_v13 = vmul.f32 %v5635_v42, %v10673_v46 }
 0x889   : > { %v5098_v62 = vmul.f32 %v10711_v60, %v5066_v22  ;;  %v10757_v45 = vmul.f32 0.70710677, %v10740_v39  ;;  %v10760_v57 = vmul.f32 0.70710677, %v10749_v56  ;;  %v5479_v28 = vsub.f32 1.0, %v10732_v31 }
 0x88a   : > { %12838 = vst [vmem:[#allocation204_spill] sm:$0xff] %v10754_v13  ;;  %v5480_v48 = vsub.f32 1.0, %v5448_v11  ;;  %6913 = vpow2.f32 %v5396_v47  ;;  %v4974_v34 = vadd.f32 1.0, %v4942_v32  ;;  %v5394_v24 = vmul.f32 1.442695, %v5353_v2 }
 0x88b   : > { %v5130_v5 = vadd.f32 1.4214138, %v5098_v62  ;;  %v10768_v8 = vand.u32 2147483647, %v10757_v45  ;;  %v10771_v19 = vand.u32 2147483647, %v10760_v57  ;;  %v5161_v0 = vmul.f32 %v10694_v63, %v5129_v33 }
 0x88c   : > { %v10764_v40 = vpop.eup %6907  ;;  %v5356_v7 = vmul.f32 %v5324_v17, %v10689_v16  ;;  %6915 = vrcp.f32 %v4974_v34  ;;  %v10780_v31 = vmul.f32 %v5637_v54, %v10681_v41  ;;  %v5543_v2 = vsub.f32 0.0, %v5479_v28 }
 0x88d   : > { %v5162_v46 = vmul.f32 %v10711_v60, %v5130_v5  ;;  %v10773_v42 = vpop.eup %6909  ;;  %v5035_v37 = vmul.f32 1.0614054, %v10764_v40  ;;  %v4943_v47 = vmul.f32 0.3275911, %v10768_v8  ;;  %v5544_v62 = vsub.f32 0.0, %v5480_v48 }
 0x88e   : > { %12839 = vst [vmem:[#allocation234_spill] sm:$0xff] %v10780_v31  ;;  %v5036_v11 = vmul.f32 1.0614054, %v10773_v42  ;;  %v5323_v5 = vsub.f32 0.0, %v10684_v1  ;;  %v4944_v17 = vmul.f32 0.3275911, %v10771_v19 }
 0x88f   : > { %v5194_v22 = vadd.f32 -0.28449672, %v5162_v46  ;;  %v5067_v32 = vadd.f32 -1.4531521, %v5035_v37  ;;  %v10785_v18 = vpop.eup %6911  ;;  %v4975_v16 = vadd.f32 1.0, %v4943_v47  ;;  %vm5514_vm12 = vcmp.ge.f32.partialorder %v10632_v23, 0.0 }
 0x890   : > { %v5068_v10 = vadd.f32 -1.4531521, %v5036_v11  ;;  %v5193_v41 = vadd.f32 -0.28449672, %v5161_v0  ;;  %v5400_v34 = vmul.f32 1.442695, %v5356_v7  ;;  %v5576_v0 = vsel %vm5512_vm10, %v5480_v48, %v5544_v62 }
 0x891   : > { %v5226_v33 = vmul.f32 %v10711_v60, %v5194_v22  ;;  %v5099_v54 = vmul.f32 %v10764_v40, %v5067_v32  ;;  %v5037_v46 = vmul.f32 1.0614054, %v10785_v18  ;;  %6917 = vrcp.f32 %v4975_v16 }
 0x892   : > { %v5100_v25 = vmul.f32 %v10773_v42, %v5068_v10  ;;  %v4976_v37 = vadd.f32 1.0, %v4944_v17  ;;  %6919 = vpow2.f32 %v5394_v24  ;;  %v5355_v22 = vmul.f32 %v5323_v5, %v10684_v1 }
 0x893   : > { %v5258_v31 = vadd.f32 0.2548296, %v5226_v33  ;;  %v5069_v11 = vadd.f32 -1.4531521, %v5037_v46  ;;  %v5326_v47 = vsub.f32 0.0, %v10737_v44  ;;  %v10801_v24 = vadd.f32 %v10538_v20, %v10734_v14 }
 0x894   : > { %v5132_v32 = vadd.f32 1.4214138, %v5100_v25  ;;  %6921 = vrcp.f32 %v4976_v37  ;;  %v6914_v33 = vpop.eup %6913  ;;  %v5131_v13 = vadd.f32 1.4214138, %v5099_v54  ;;  %v5575_v1 = vsel %vm5511_vm11, %v5479_v28, %v5543_v2 }
 0x895   : > { %v5290_v7 = vmul.f32 %v10711_v60, %v5258_v31  ;;  %6923 = vpow2.f32 %v5400_v34  ;;  %v5101_v10 = vmul.f32 %v10785_v18, %v5069_v11  ;;  %v5225_v5 = vmul.f32 %v10694_v63, %v5193_v41 }
 0x896   : > { %v5164_v48 = vmul.f32 %v10773_v42, %v5132_v32  ;;  %v10807_v60 = vpop.eup %6915  ;;  %v5640_v25 = vadd.f32 1.0, %v5576_v0  ;;  %v5610_v31 = vmul.f32 0.5, %v10616_v36  ;;  %v5398_v62 = vmul.f32 1.442695, %v5355_v22 }
 0x897   : > { %v5450_v61 = vmul.f32 %v6914_v33, %v5290_v7  ;;  %v5358_v16 = vmul.f32 %v5326_v47, %v10737_v44  ;;  %v5325_v20 = vsub.f32 0.0, %v10702_v26  ;;  %v5038_v51 = vmul.f32 1.0614054, %v10807_v60 }
 0x898   : > { %v5196_v54 = vadd.f32 -0.28449672, %v5164_v48  ;;  %v10813_v14 = vadd.f32 1.0, %v5575_v1  ;;  %v5163_v28 = vmul.f32 %v10764_v40, %v5131_v13  ;;  %v5133_v2 = vadd.f32 1.4214138, %v5101_v10 }
 0x899   : > { %v5482_v17 = vsub.f32 1.0, %v5450_v61  ;;  %v10817_v41 = vmul.f32 0.70710677, %v10801_v24  ;;  %v5257_v34 = vadd.f32 0.2548296, %v5225_v5  ;;  %v5672_v44 = vmul.f32 %v5640_v25, %v10719_v55 }
 0x89a   : > { %v5228_v36 = vmul.f32 %v10773_v42, %v5196_v54  ;;  %v5070_v37 = vadd.f32 -1.4531521, %v5038_v51  ;;  %6925 = vpow2.f32 %v5398_v62  ;;  %v5404_v22 = vmul.f32 1.442695, %v5358_v16 }
 0x89b   : > { %v5546_v46 = vsub.f32 0.0, %v5482_v17  ;;  %v10822_v11 = vand.u32 2147483647, %v10817_v41  ;;  %v10824_v47 = vpop.eup %6917  ;;  %v5357_v7 = vmul.f32 %v5325_v20, %v10702_v26  ;;  %v5195_v1 = vadd.f32 -0.28449672, %v5163_v28 }
 0x89c   : > { %v5260_v0 = vadd.f32 0.2548296, %v5228_v36  ;;  %v5102_v32 = vmul.f32 %v10807_v60, %v5070_v37  ;;  %v6920_v33 = vpop.eup %6919  ;;  %v5165_v55 = vmul.f32 %v10785_v18, %v5133_v2  ;;  %v5039_v5 = vmul.f32 1.0614054, %v10824_v47 }
 0x89d   : > { %v5578_v13 = vsel %vm5514_vm12, %v5482_v17, %v5546_v46  ;;  %v5289_v48 = vmul.f32 %v10694_v63, %v5257_v34  ;;  %v4945_v62 = vmul.f32 0.3275911, %v10822_v11  ;;  %6927 = vpow2.f32 %v5404_v22 }
 0x89e   : > { %v5642_v10 = vadd.f32 1.0, %v5578_v13  ;;  %v10832_v61 = vpop.eup %6921  ;;  %v5292_v25 = vmul.f32 %v10773_v42, %v5260_v0  ;;  %v5134_v23 = vadd.f32 1.4214138, %v5102_v32  ;;  %v5071_v17 = vadd.f32 -1.4531521, %v5039_v5  ;;  %v4655_v13 = vpop.permute.xlu1 %4654 }
 0x89f   : > { %v6924_v16 = vpop.eup %6923  ;;  %v5327_v54 = vsub.f32 0.0, %v10768_v8  ;;  %v5040_v28 = vmul.f32 1.0614054, %v10832_v61  ;;  %v4977_v2 = vadd.f32 1.0, %v4945_v62  ;;  %v5227_v63 = vmul.f32 %v10764_v40, %v5195_v1 }
 0x8a0   : > { %v5674_v26 = vmul.f32 %v5642_v10, %v5610_v31  ;;  %v5452_v20 = vmul.f32 %v6924_v16, %v5292_v25  ;;  %v5166_v51 = vmul.f32 %v10807_v60, %v5134_v23  ;;  %v5197_v42 = vadd.f32 -0.28449672, %v5165_v55  ;;  %v12840_v55 = vld [vmem:[#allocation217_spill] sm:$0xff] }
 0x8a1   : > { %v5103_v34 = vmul.f32 %v10824_v47, %v5071_v17  ;;  %v10844_v36 = vmul.f32 %v6920_v33, %v5289_v48  ;;  %v5402_v31 = vmul.f32 1.442695, %v5357_v7  ;;  %v5072_v22 = vadd.f32 -1.4531521, %v5040_v28 }
 0x8a2   : > { %v10840_v46 = vpack.c.bf16 %v5674_v26, %v5672_v44  ;;  %v5198_v37 = vadd.f32 -0.28449672, %v5166_v51  ;;  %v5359_v32 = vmul.f32 %v5327_v54, %v10768_v8  ;;  %v5328_v10 = vsub.f32 0.0, %v10771_v19  ;;  %v12841_v51 = vld [vmem:[#allocation187_spill] sm:$0xff] }
 0x8a3   : > { %v5135_v0 = vadd.f32 1.4214138, %v5103_v34  ;;  %6929 = vrcp.f32 %v4977_v2  ;;  %v5484_v5 = vsub.f32 1.0, %v5452_v20  ;;  %v5104_v1 = vmul.f32 %v10832_v61, %v5072_v22 }
 0x8a4   : > { %v5230_v44 = vmul.f32 %v10807_v60, %v5198_v37  ;;  %v10851_v25 = vadd.f32 %v12840_v55, %v4655_v13  ;;  %v6926_v33 = vpop.eup %6925  ;;  %v5259_v48 = vadd.f32 0.2548296, %v5227_v63  ;;  %v10854_v7 = vmul.f32 0.5, %v10658_v49 }
 0x8a5   : > { %v5229_v23 = vmul.f32 %v10785_v18, %v5197_v42  ;;  %v5167_v8 = vmul.f32 %v10824_v47, %v5135_v0  ;;  %v5481_v62 = vsub.f32 1.0, %v10844_v36  ;;  %6931 = vpow2.f32 %v5402_v31 }
 0x8a6   : > { %v5262_v16 = vadd.f32 0.2548296, %v5230_v44  ;;  %v5136_v26 = vadd.f32 1.4214138, %v5104_v1  ;;  %vm5513_vm13 = vcmp.ge.f32.partialorder %v10608_v12, 0.0  ;;  %v5360_v20 = vmul.f32 %v5328_v10, %v10771_v19 }
 0x8a7   : > { %v5199_v17 = vadd.f32 -0.28449672, %v5167_v8  ;;  %v5406_v54 = vmul.f32 1.442695, %v5359_v32  ;;  %v10862_v28 = vadd.f32 %v12841_v51, %v4655_v13  ;;  %v5548_v49 = vsub.f32 0.0, %v5484_v5  ;;  %v6928_v34 = vpop.eup %6927 }
 0x8a8   : > { %v5294_v2 = vmul.f32 %v10807_v60, %v5262_v16  ;;  %v5168_v63 = vmul.f32 %v10832_v61, %v5136_v26  ;;  %v10867_v42 = vmul.f32 0.70710677, %v10851_v25  ;;  %v10871_v36 = vmul.f32 %v10813_v14, %v10714_v21 }
 0x8a9   : > { %v5291_v31 = vmul.f32 %v10764_v40, %v5259_v48  ;;  %v5612_v19 = vmul.f32 0.5, %v10661_v59  ;;  %v5261_v37 = vadd.f32 0.2548296, %v5229_v23  ;;  %vm5516_vm14 = vcmp.ge.f32.partialorder %v10677_v3, 0.0 }
 0x8aa   : > { %v5454_v22 = vmul.f32 %v6928_v34, %v5294_v2  ;;  %v5231_v60 = vmul.f32 %v10824_v47, %v5199_v17  ;;  %v4914_v13 = vand.u32 2147483647, %v10867_v42  ;;  %6933 = vpow2.f32 %v5406_v54 }
 0x8ab   : > { %v5200_v0 = vadd.f32 -0.28449672, %v5168_v63  ;;  %v5408_v32 = vmul.f32 1.442695, %v5360_v20  ;;  %v10879_v10 = vmul.f32 0.70710677, %v10862_v28  ;;  %v5580_v14 = vsel %vm5516_vm14, %v5484_v5, %v5548_v49 }
 0x8ac   : > { %v5545_v21 = vsub.f32 0.0, %v5481_v62  ;;  %v5486_v44 = vsub.f32 1.0, %v5454_v22  ;;  %v4946_v40 = vmul.f32 0.3275911, %v4914_v13  ;;  %v5451_v59 = vmul.f32 %v6926_v33, %v5291_v31 }
 0x8ad   : > { %v10881_v1 = vpop.eup %6929  ;;  %v5293_v3 = vmul.f32 %v10785_v18, %v5261_v37  ;;  %v5614_v55 = vmul.f32 0.5, %v10707_v27  ;;  %v10886_v48 = vand.u32 2147483647, %v10879_v10  ;;  %vm5518_vm15 = vcmp.ge.f32.partialorder %v10728_v6, 0.0  ;;  %v4660_v6 = vpop.permute.xlu0 %4659 }
 0x8ae   : > { %v5550_v23 = vsub.f32 0.0, %v5486_v44  ;;  %v5263_v8 = vadd.f32 0.2548296, %v5231_v60  ;;  %v4978_v16 = vadd.f32 1.0, %v4946_v40  ;;  %v5644_v26 = vadd.f32 1.0, %v5580_v14 }
 0x8af   : > { %v5232_v5 = vmul.f32 %v10832_v61, %v5200_v0  ;;  %6935 = vpow2.f32 %v5408_v32  ;;  %v4947_v17 = vmul.f32 0.3275911, %v10886_v48  ;;  %v6932_v54 = vpop.eup %6931  ;;  %v5577_v18 = vsel %vm5513_vm13, %v5481_v62, %v5545_v21 }
 0x8b0   : > { %vm5515_vm0 = vcmp.ge.f32.partialorder %v10670_v43, 0.0  ;;  %v5582_v27 = vsel %vm5518_vm15, %v5486_v44, %v5550_v23  ;;  %v5041_v33 = vmul.f32 1.0614054, %v10881_v1  ;;  %6937 = vrcp.f32 %v4978_v16  ;;  %v12842_v16 = vld [vmem:[#allocation193_spill] sm:$0xff] }
 0x8b1   : > { %v5483_v20 = vsub.f32 1.0, %v5451_v59  ;;  %v5453_v51 = vmul.f32 %v6932_v54, %v5293_v3  ;;  %v5646_v49 = vadd.f32 1.0, %v5582_v27  ;;  %v5329_v2 = vsub.f32 0.0, %v10822_v11  ;;  %v4665_v59 = vpop.permute.xlu1 %4664 }
 0x8b2   : > { %v5295_v63 = vmul.f32 %v10824_v47, %v5263_v8  ;;  %v5330_v34 = vsub.f32 0.0, %v4914_v13  ;;  %v4979_v31 = vadd.f32 1.0, %v4947_v17  ;;  %v10898_v37 = vadd.f32 %v10564_v4, %v4660_v6 }
 0x8b3   : > { %v5676_v12 = vmul.f32 %v5644_v26, %v5612_v19  ;;  %v10901_v62 = vmul.f32 0.5, %v10664_v30  ;;  %v5678_v22 = vmul.f32 %v5646_v49, %v5614_v55  ;;  %v5264_v60 = vadd.f32 0.2548296, %v5232_v5 }
 0x8b4   : > { %v5641_v0 = vadd.f32 1.0, %v5577_v18  ;;  %v5073_v32 = vadd.f32 -1.4531521, %v5041_v33  ;;  %6939 = vrcp.f32 %v4979_v31  ;;  %v10904_v21 = vmul.f32 0.70710677, %v10898_v37  ;;  %v6934_v14 = vpop.eup %6933 }
 0x8b5   : > { %v5547_v44 = vsub.f32 0.0, %v5483_v20  ;;  %v5485_v47 = vsub.f32 1.0, %v5453_v51  ;;  %v10906_v40 = vpack.c.bf16 %v5678_v22, %v5676_v12  ;;  %v5361_v4 = vmul.f32 %v5329_v2, %v10822_v11 }
 0x8b6   : > { %vm5517_vm1 = vcmp.ge.f32.partialorder %v10692_v52, 0.0  ;;  %v5455_v30 = vmul.f32 %v6934_v14, %v5295_v63  ;;  %v5362_v19 = vmul.f32 %v5330_v34, %v4914_v13  ;;  %v4916_v3 = vand.u32 2147483647, %v10904_v21 }
 0x8b7   : > { %v10912_v55 = vmul.f32 0.5, %v10740_v39  ;;  %v5296_v23 = vmul.f32 %v10832_v61, %v5264_v60  ;;  %v10916_v8 = vadd.f32 %v10571_v50, %v4660_v6  ;;  %v10919_v26 = vadd.f32 %v12842_v16, %v4665_v59 }
 0x8b8   : > { %v10922_v11 = vmul.f32 %v5641_v0, %v10744_v35  ;;  %v10925_v5 = vmul.f32 0.5, %v10749_v56  ;;  %v5105_v13 = vmul.f32 %v10881_v1, %v5073_v32  ;;  %v4948_v17 = vmul.f32 0.3275911, %v4916_v3 }
 0x8b9   : > { %v6936_v54 = vpop.eup %6935  ;;  %v5579_v39 = vsel %vm5515_vm0, %v5483_v20, %v5547_v44  ;;  %v5549_v61 = vsub.f32 0.0, %v5485_v47  ;;  %v5410_v18 = vmul.f32 1.442695, %v5361_v4  ;;  %v10931_v50 = vmul.f32 0.70710677, %v10916_v8 }
 0x8ba   : > { %v10933_v27 = vpop.eup %6937  ;;  %v5487_v33 = vsub.f32 1.0, %v5455_v30  ;;  %vm5519_vm2 = vcmp.ge.f32.partialorder %v10757_v45, 0.0  ;;  %v5412_v35 = vmul.f32 1.442695, %v5362_v19  ;;  %v4980_v56 = vadd.f32 1.0, %v4948_v17 }
 0x8bb   : > { %v10937_v6 = vmul.f32 0.70710677, %v10919_v26  ;;  %v5456_v51 = vmul.f32 %v6936_v54, %v5296_v23  ;;  %v10940_v49 = vmul.f32 0.5, %v10801_v24  ;;  %v5042_v43 = vmul.f32 1.0614054, %v10933_v27 }
 0x8bc   : > { %v10944_v20 = vand.u32 2147483647, %v10931_v50  ;;  %v5643_v2 = vadd.f32 1.0, %v5579_v39  ;;  %v5137_v63 = vadd.f32 1.4214138, %v5105_v13  ;;  %6941 = vrcp.f32 %v4980_v56  ;;  %v12843_v13 = vld [vmem:[#allocation218_spill] sm:$0xff] }
 0x8bd   : > { %v10947_v34 = vand.u32 2147483647, %v10937_v6  ;;  %6943 = vpow2.f32 %v5410_v18  ;;  %v5074_v31 = vadd.f32 -1.4531521, %v5042_v43  ;;  %v5331_v12 = vsub.f32 0.0, %v10886_v48 }
 0x8be   : > { %v4949_v22 = vmul.f32 0.3275911, %v10944_v20  ;;  %v10951_v60 = vpop.eup %6939  ;;  %v5581_v24 = vsel %vm5517_vm1, %v5485_v47, %v5549_v61  ;;  %v5551_v0 = vsub.f32 0.0, %v5487_v33  ;;  %vm5520_vm3 = vcmp.ge.f32.partialorder %v10760_v57, 0.0 }
 0x8bf   : > { %6945 = vpow2.f32 %v5412_v35  ;;  %v4950_v32 = vmul.f32 0.3275911, %v10947_v34  ;;  %v5488_v14 = vsub.f32 1.0, %v5456_v51  ;;  %v5106_v44 = vmul.f32 %v10933_v27, %v5074_v31  ;;  %v4670_v35 = vpop.permute.xlu0 %4669 }
 0x8c0   : > { %v5043_v4 = vmul.f32 1.0614054, %v10951_v60  ;;  %v4981_v30 = vadd.f32 1.0, %v4949_v22  ;;  %v5169_v19 = vmul.f32 %v10881_v1, %v5137_v63  ;;  %v5332_v23 = vsub.f32 0.0, %v4916_v3 }
 0x8c1   : > { %v4982_v16 = vadd.f32 1.0, %v4950_v32  ;;  %v10961_v17 = vadd.f32 %v12843_v13, %v4665_v59  ;;  %v10964_v52 = vmul.f32 %v5643_v2, %v10854_v7  ;;  %v5138_v47 = vadd.f32 1.4214138, %v5106_v44 }
 0x8c2   : > { %v5363_v54 = vmul.f32 %v5331_v12, %v10886_v48  ;;  %6947 = vrcp.f32 %v4981_v30  ;;  %v10968_v39 = vmul.f32 0.5, %v10851_v25  ;;  %v5075_v61 = vadd.f32 -1.4531521, %v5043_v4 }
 0x8c3   : > { %6949 = vrcp.f32 %v4982_v16  ;;  %v10971_v18 = vmul.f32 0.70710677, %v10961_v17  ;;  %v10973_v56 = vadd.f32 1.0, %v5581_v24  ;;  %v5583_v59 = vsel %vm5519_vm2, %v5487_v33, %v5551_v0 }
 0x8c4   : > { %v5552_v7 = vsub.f32 0.0, %v5488_v14  ;;  %v5170_v51 = vmul.f32 %v10933_v27, %v5138_v47  ;;  %v5201_v43 = vadd.f32 -0.28449672, %v5169_v19  ;;  %v5364_v48 = vmul.f32 %v5332_v23, %v4916_v3 }
 0x8c5   : > { %v10979_v2 = vand.u32 2147483647, %v10971_v18  ;;  %v10982_v25 = vadd.f32 %v10591_v9, %v4670_v35  ;;  %v5414_v31 = vmul.f32 1.442695, %v5363_v54  ;;  %v10985_v12 = vmul.f32 0.5, %v10862_v28 }
 0x8c6   : > { %v5202_v63 = vadd.f32 -0.28449672, %v5170_v51  ;;  %v10988_v22 = vmul.f32 0.5, %v10898_v37  ;;  %v10990_v45 = vpop.eup %6941  ;;  %v10992_v33 = vadd.f32 1.0, %v5583_v59  ;;  %v5107_v3 = vmul.f32 %v10951_v60, %v5075_v61 }
 0x8c7   : > { %v4951_v24 = vmul.f32 0.3275911, %v10979_v2  ;;  %v10997_v0 = vmul.f32 0.70710677, %v10982_v25  ;;  %v10999_v9 = vpop.eup %6943  ;;  %v5584_v28 = vsel %vm5520_vm3, %v5488_v14, %v5552_v7  ;;  %v5044_v37 = vmul.f32 1.0614054, %v10990_v45 }
 0x8c8   : > { %v5234_v32 = vmul.f32 %v10933_v27, %v5202_v63  ;;  %v5334_v44 = vsub.f32 0.0, %v10947_v34  ;;  %v5233_v30 = vmul.f32 %v10881_v1, %v5201_v43  ;;  %v5416_v19 = vmul.f32 1.442695, %v5364_v48 }
 0x8c9   : > { %v6946_v4 = vpop.eup %6945  ;;  %v4983_v23 = vadd.f32 1.0, %v4951_v24  ;;  %v11008_v16 = vand.u32 2147483647, %v10997_v0  ;;  %6951 = vpow2.f32 %v5414_v31  ;;  %v5076_v47 = vadd.f32 -1.4531521, %v5044_v37 }
 0x8ca   : > { %v5266_v13 = vadd.f32 0.2548296, %v5234_v32  ;;  %v5333_v57 = vsub.f32 0.0, %v10944_v20  ;;  %vm5522_vm4 = vcmp.ge.f32.partialorder %v10867_v42, 0.0  ;;  %v5139_v14 = vadd.f32 1.4214138, %v5107_v3 }
 0x8cb   : > { %6953 = vrcp.f32 %v4983_v23  ;;  %v4952_v54 = vmul.f32 0.3275911, %v11008_v16  ;;  %v11014_v61 = vadd.f32 %v10597_v15, %v4670_v35  ;;  %v5648_v7 = vadd.f32 1.0, %v5584_v28 }
 0x8cc   : > { %v11016_v59 = vpop.eup %6947  ;;  %v5298_v51 = vmul.f32 %v10933_v27, %v5266_v13  ;;  %v5108_v43 = vmul.f32 %v10990_v45, %v5076_v47  ;;  %v5366_v48 = vmul.f32 %v5334_v44, %v10947_v34  ;;  %v5265_v31 = vadd.f32 0.2548296, %v5233_v30 }
 0x8cd   : > { %v11021_v63 = vpop.eup %6949  ;;  %6955 = vpow2.f32 %v5416_v19  ;;  %v5045_v3 = vmul.f32 1.0614054, %v11016_v59  ;;  %v4984_v24 = vadd.f32 1.0, %v4952_v54  ;;  %v5365_v15 = vmul.f32 %v5333_v57, %v10944_v20 }
 0x8ce   : > { %v5458_v32 = vmul.f32 %v6946_v4, %v5298_v51  ;;  %v5140_v37 = vadd.f32 1.4214138, %v5108_v43  ;;  %v5046_v35 = vmul.f32 1.0614054, %v11021_v63  ;;  %v5171_v28 = vmul.f32 %v10951_v60, %v5139_v14 }
 0x8cf   : > { %v5077_v27 = vadd.f32 -1.4531521, %v5045_v3  ;;  %6957 = vrcp.f32 %v4984_v24  ;;  %v11028_v23 = vmul.f32 0.70710677, %v11014_v61  ;;  %v5420_v19 = vmul.f32 1.442695, %v5366_v48 }
 0x8d0   : > { %v5490_v34 = vsub.f32 1.0, %v5458_v32  ;;  %v5172_v44 = vmul.f32 %v10990_v45, %v5140_v37  ;;  %v5078_v30 = vadd.f32 -1.4531521, %v5046_v35  ;;  %v11033_v4 = vmul.f32 0.5, %v10919_v26 }
 0x8d1   : > { %v5109_v13 = vmul.f32 %v11016_v59, %v5077_v27  ;;  %v5335_v20 = vsub.f32 0.0, %v10979_v2  ;;  %v11037_v47 = vand.u32 2147483647, %v11028_v23  ;;  %v5418_v54 = vmul.f32 1.442695, %v5365_v15 }
 0x8d2   : > { %v5554_v57 = vsub.f32 0.0, %v5490_v34  ;;  %v5204_v14 = vadd.f32 -0.28449672, %v5172_v44  ;;  %v5110_v51 = vmul.f32 %v11021_v63, %v5078_v30  ;;  %v5297_v43 = vmul.f32 %v10881_v1, %v5265_v31 }
 0x8d3   : > { %v5203_v3 = vadd.f32 -0.28449672, %v5171_v28  ;;  %v5141_v24 = vadd.f32 1.4214138, %v5109_v13  ;;  %v4953_v48 = vmul.f32 0.3275911, %v11037_v47  ;;  %v11042_v32 = vpop.eup %6951  ;;  %6959 = vpow2.f32 %v5420_v19 }
 0x8d4   : > { %v5586_v26 = vsel %vm5522_vm4, %v5490_v34, %v5554_v57  ;;  %v5236_v37 = vmul.f32 %v10990_v45, %v5204_v14  ;;  %v5142_v35 = vadd.f32 1.4214138, %v5110_v51  ;;  %v5367_v1 = vmul.f32 %v5335_v20, %v10979_v2 }
 0x8d5   : > { %v11047_v27 = vpop.eup %6953  ;;  %v5650_v15 = vadd.f32 1.0, %v5586_v26  ;;  %v5173_v44 = vmul.f32 %v11016_v59, %v5141_v24  ;;  %v4985_v31 = vadd.f32 1.0, %v4953_v48  ;;  %v5680_v28 = vmul.f32 %v5648_v7, %v10925_v5 }
 0x8d6   : > { %v5268_v30 = vadd.f32 0.2548296, %v5236_v37  ;;  %v5174_v13 = vmul.f32 %v11021_v63, %v5142_v35  ;;  %v5047_v42 = vmul.f32 1.0614054, %v11047_v27  ;;  %v5235_v19 = vmul.f32 %v10951_v60, %v5203_v3  ;;  %v4675_v3 = vpop.permute.xlu1 %4674 }
 0x8d7   : > { %v6956_v34 = vpop.eup %6955  ;;  %v5682_v57 = vmul.f32 %v5650_v15, %v10968_v39  ;;  %v5336_v14 = vsub.f32 0.0, %v11008_v16  ;;  %6961 = vrcp.f32 %v4985_v31  ;;  %v5205_v24 = vadd.f32 -0.28449672, %v5173_v44 }
 0x8d8   : > { %v5300_v51 = vmul.f32 %v10990_v45, %v5268_v30  ;;  %v5206_v2 = vadd.f32 -0.28449672, %v5174_v13  ;;  %v5079_v20 = vadd.f32 -1.4531521, %v5047_v42  ;;  %v11061_v5 = vmul.f32 %v10999_v9, %v5297_v43 }
 0x8d9   : > { %v11058_v48 = vpop.eup %6957  ;;  %v11063_v7 = vpack.c.bf16 %v5682_v57, %v5680_v28  ;;  %vm5524_vm5 = vcmp.ge.f32.partialorder %v10904_v21, 0.0  ;;  %6963 = vpow2.f32 %v5418_v54  ;;  %v5422_v39 = vmul.f32 1.442695, %v5367_v1 }
 0x8da   : > { %v5460_v26 = vmul.f32 %v6956_v34, %v5300_v51  ;;  %v5238_v37 = vmul.f32 %v11021_v63, %v5206_v2  ;;  %v5111_v45 = vmul.f32 %v11047_v27, %v5079_v20  ;;  %v5048_v35 = vmul.f32 1.0614054, %v11058_v48 }
 0x8db   : > { %v5267_v15 = vadd.f32 0.2548296, %v5235_v19  ;;  %v5368_v44 = vmul.f32 %v5336_v14, %v11008_v16  ;;  %v11071_v9 = vadd.f32 %v10601_v53, %v4675_v3  ;;  %v11074_v43 = vadd.f32 %v10610_v58, %v4675_v3 }
 0x8dc   : > { %v5492_v31 = vsub.f32 1.0, %v5460_v26  ;;  %v5237_v54 = vmul.f32 %v11016_v59, %v5205_v24  ;;  %v5270_v1 = vadd.f32 0.2548296, %v5238_v37  ;;  %v5143_v28 = vadd.f32 1.4214138, %v5111_v45 }
 0x8dd   : > { %vm5526_vm6 = vcmp.ge.f32.partialorder %v10937_v6, 0.0  ;;  %6965 = vpow2.f32 %v5422_v39  ;;  %v5080_v30 = vadd.f32 -1.4531521, %v5048_v35  ;;  %v11079_v13 = vmul.f32 0.70710677, %v11071_v9  ;;  %v6960_v42 = vpop.eup %6959 }
 0x8de   : > { %v5556_v16 = vsub.f32 0.0, %v5492_v31  ;;  %v5302_v53 = vmul.f32 %v11021_v63, %v5270_v1  ;;  %v5175_v34 = vmul.f32 %v11047_v27, %v5143_v28  ;;  %v11084_v58 = vmul.f32 0.70710677, %v11074_v43 }
 0x8df   : > { %v5489_v57 = vsub.f32 1.0, %v11061_v5  ;;  %v5299_v19 = vmul.f32 %v10951_v60, %v5267_v15  ;;  %v5112_v14 = vmul.f32 %v11058_v48, %v5080_v30  ;;  %v11090_v51 = vand.u32 2147483647, %v11079_v13 }
 0x8e0   : > { %v5269_v24 = vadd.f32 0.2548296, %v5237_v54  ;;  %v5462_v2 = vmul.f32 %v6960_v42, %v5302_v53  ;;  %v5207_v20 = vadd.f32 -0.28449672, %v5175_v34  ;;  %v5424_v39 = vmul.f32 1.442695, %v5368_v44  ;;  %v4680_v34 = vpop.permute.xlu0 %4679 }
 0x8e1   : > { %v11092_v3 = vpop.eup %6961  ;;  %v11096_v63 = vmul.f32 %v10973_v56, %v10901_v62  ;;  %v5144_v26 = vadd.f32 1.4214138, %v5112_v14  ;;  %v4954_v5 = vmul.f32 0.3275911, %v11090_v51  ;;  %v11100_v60 = vand.u32 2147483647, %v11084_v58 }
 0x8e2   : > { %vm5521_vm7 = vcmp.ge.f32.partialorder %v10817_v41, 0.0  ;;  %v5588_v37 = vsel %vm5524_vm5, %v5492_v31, %v5556_v16  ;;  %v5494_v45 = vsub.f32 1.0, %v5462_v2  ;;  %v5239_v35 = vmul.f32 %v11047_v27, %v5207_v20 }
 0x8e3   : > { %v5049_v15 = vmul.f32 1.0614054, %v11092_v3  ;;  %v6964_v44 = vpop.eup %6963  ;;  %v5459_v62 = vmul.f32 %v11042_v32, %v5299_v19  ;;  %v5176_v56 = vmul.f32 %v11058_v48, %v5144_v26  ;;  %v5337_v54 = vsub.f32 0.0, %v11037_v47 }
 0x8e4   : > { %v4986_v1 = vadd.f32 1.0, %v4954_v5  ;;  %v5301_v28 = vmul.f32 %v11016_v59, %v5269_v24  ;;  %v5558_v30 = vsub.f32 0.0, %v5494_v45  ;;  %v5271_v42 = vadd.f32 0.2548296, %v5239_v35 }
 0x8e5   : > { %v5081_v53 = vadd.f32 -1.4531521, %v5049_v15  ;;  %v5652_v21 = vadd.f32 1.0, %v5588_v37  ;;  %v5208_v31 = vadd.f32 -0.28449672, %v5176_v56  ;;  %v5553_v14 = vsub.f32 0.0, %v5489_v57 }
 0x8e6   : > { %6967 = vrcp.f32 %v4986_v1  ;;  %v4955_v16 = vmul.f32 0.3275911, %v11100_v60  ;;  %vm5523_vm8 = vcmp.ge.f32.partialorder %v10879_v10, 0.0  ;;  %v5590_v32 = vsel %vm5526_vm6, %v5494_v45, %v5558_v30 }
 0x8e7   : > { %v5303_v19 = vmul.f32 %v11047_v27, %v5271_v42  ;;  %v5113_v2 = vmul.f32 %v11092_v3, %v5081_v53  ;;  %v6966_v59 = vpop.eup %6965  ;;  %v5491_v24 = vsub.f32 1.0, %v5459_v62  ;;  %v5654_v20 = vadd.f32 1.0, %v5590_v32 }
 0x8e8   : > { %v4987_v26 = vadd.f32 1.0, %v4955_v16  ;;  %v11118_v5 = vadd.f32 %v10628_v38, %v4680_v34  ;;  %v11120_v37 = vmul.f32 %v6964_v44, %v5301_v28  ;;  %6969 = vpow2.f32 %v5424_v39  ;;  %v12845_v16 = vld [vmem:[#allocation224_spill] sm:$0xff] }
 0x8e9   : > { %v5145_v35 = vadd.f32 1.4214138, %v5113_v2  ;;  %v5369_v15 = vmul.f32 %v5337_v54, %v11037_v47  ;;  %v5684_v6 = vmul.f32 %v5652_v21, %v10988_v22  ;;  %v5686_v45 = vmul.f32 %v5654_v20, %v11033_v4 }
 0x8ea   : > { %v5463_v27 = vmul.f32 %v6966_v59, %v5303_v19  ;;  %v5240_v56 = vmul.f32 %v11058_v48, %v5208_v31  ;;  %v11127_v62 = vmul.f32 0.5, %v10916_v8  ;;  %v5338_v38 = vsub.f32 0.0, %v11090_v51 }
 0x8eb   : > { %v5177_v1 = vmul.f32 %v11092_v3, %v5145_v35  ;;  %6971 = vrcp.f32 %v4987_v26  ;;  %v5585_v39 = vsel %vm5521_vm7, %v5489_v57, %v5553_v14  ;;  %v5555_v44 = vsub.f32 0.0, %v5491_v24  ;;  %v12844_v57 = vld [vmem:[#allocation204_spill] sm:$0xff]  ;;  %v12846_v26 = vld [vmem:[#allocation223_spill] sm:$0xff] }
 0x8ec   : > { %v11133_v47 = vpack.c.bf16 %v5686_v45, %v5684_v6  ;;  %v11136_v22 = vmul.f32 0.70710677, %v11118_v5  ;;  %v5493_v4 = vsub.f32 1.0, %v11120_v37  ;;  %v11140_v54 = vmul.f32 0.5, %v10961_v17  ;;  %v12847_v35 = vld [vmem:[#allocation228_spill] sm:$0xff] }
 0x8ed   : > { %v5209_v8 = vadd.f32 -0.28449672, %v5177_v1  ;;  %v5426_v28 = vmul.f32 1.442695, %v5369_v15  ;;  %vm5525_vm9 = vcmp.ge.f32.partialorder %v10931_v50, 0.0  ;;  %v5495_v30 = vsub.f32 1.0, %v5463_v27 }
 0x8ee   : > { %v5272_v42 = vadd.f32 0.2548296, %v5240_v56  ;;  %v11144_v41 = vand.u32 2147483647, %v11136_v22  ;;  %v5701_v53 = vpack.c.bf16 %v12844_v57, %v10724_v29  ;;  %v5649_v21 = vadd.f32 1.0, %v5585_v39  ;;  %v4685_v29 = vpop.permute.xlu1 %4684 }
 0x8ef   : > { %vm5527_vm10 = vcmp.ge.f32.partialorder %v10971_v18, 0.0  ;;  %v5370_v31 = vmul.f32 %v5338_v38, %v11090_v51  ;;  %v11151_v17 = vadd.f32 %v12845_v16, %v4680_v34  ;;  %v5587_v32 = vsel %vm5523_vm8, %v5491_v24, %v5555_v44 }
 0x8f0   : > { %v11153_v14 = vpop.eup %6967  ;;  %v5241_v19 = vmul.f32 %v11092_v3, %v5209_v8  ;;  %v5339_v2 = vsub.f32 0.0, %v11100_v60  ;;  %v4956_v59 = vmul.f32 0.3275911, %v11144_v41  ;;  %5752 = vmatprep.subr.bf16.mxu0 %v5701_v53  ;;  %6013 = vmatprep.subr.bf16.mxu1 %v5701_v53  ;;  %v5557_v20 = vsub.f32 0.0, %v5493_v4 }
 0x8f1   : > { %6973 = vpow2.f32 %v5426_v28  ;;  %v5050_v51 = vmul.f32 1.0614054, %v11153_v14  ;;  %v11162_v34 = vmul.f32 0.70710677, %v11151_v17  ;;  %5753 = vmatpush1.bf16.msra.mxu0 %v12846_v26  ;;  %6021 = vmatpush1.bf16.msra.mxu1 %v12846_v26  ;;  %v5559_v10 = vsub.f32 0.0, %v5495_v30 }
 0x8f2   : > { %v5304_v24 = vmul.f32 %v11058_v48, %v5272_v42  ;;  %v4988_v37 = vadd.f32 1.0, %v4956_v59  ;;  %v11168_v15 = vadd.f32 %v12847_v35, %v4685_v29  ;;  %v6970_v6 = vpop.eup %6969  ;;  %v5679_v45 = vmul.f32 %v10992_v33, %v10912_v55 }
 0x8f3   : > { %v5082_v27 = vadd.f32 -1.4531521, %v5050_v51  ;;  %v5428_v56 = vmul.f32 1.442695, %v5370_v31  ;;  %v11173_v1 = vand.u32 2147483647, %v11162_v34  ;;  %v5371_v44 = vmul.f32 %v5339_v2, %v11100_v60 }
 0x8f4   : > { %v11176_v38 = vmul.f32 0.5, %v10982_v25  ;;  %v5273_v39 = vadd.f32 0.2548296, %v5241_v19  ;;  %6975 = vrcp.f32 %v4988_v37  ;;  %v5681_v8 = vmul.f32 %v5649_v21, %v10940_v49  ;;  %v12849_v37 = vld [vmem:[#allocation234_spill] sm:$0xff] }
 0x8f5   : > { %v11179_v48 = vpop.eup %6971  ;;  %v5651_v28 = vadd.f32 1.0, %v5587_v32  ;;  %v5114_v42 = vmul.f32 %v11153_v14, %v5082_v27  ;;  %v4957_v55 = vmul.f32 0.3275911, %v11173_v1  ;;  %v5591_v33 = vsel %vm5527_vm10, %v5495_v30, %v5559_v10  ;;  %v12848_v10 = vld [vmem:[#allocation229_spill] sm:$0xff] }
 0x8f6   : > { %v5464_v57 = vmul.f32 %v6970_v6, %v5304_v24  ;;  %v5051_v25 = vmul.f32 1.0614054, %v11179_v48  ;;  %v11188_v53 = vmul.f32 0.70710677, %v11168_v15  ;;  %v5589_v60 = vsel %vm5525_vm9, %v5493_v4, %v5557_v20 }
 0x8f7   : > { %v5146_v31 = vadd.f32 1.4214138, %v5114_v42  ;;  %6977 = vpow2.f32 %v5428_v56  ;;  %v4989_v49 = vadd.f32 1.0, %v4957_v55  ;;  %v5305_v21 = vmul.f32 %v11092_v3, %v5273_v39  ;;  %v12850_v55 = vld [vmem:[#allocation199_spill] sm:$0xff] }
 0x8f8   : > { %v5083_v16 = vadd.f32 -1.4531521, %v5051_v25  ;;  %v5430_v32 = vmul.f32 1.442695, %v5371_v44  ;;  %v11194_v19 = vand.u32 2147483647, %v11188_v53  ;;  %v5683_v50 = vmul.f32 %v5651_v28, %v10985_v12 }
 0x8f9   : > { %v5655_v18 = vadd.f32 1.0, %v5591_v33  ;;  %vm5528_vm11 = vcmp.ge.f32.partialorder %v10997_v0, 0.0  ;;  %v5178_v30 = vmul.f32 %v11153_v14, %v5146_v31  ;;  %v5340_v2 = vsub.f32 0.0, %v11144_v41 }
 0x8fa   : > { %6979 = vrcp.f32 %v4989_v49  ;;  %v5496_v4 = vsub.f32 1.0, %v5464_v57  ;;  %v5115_v59 = vmul.f32 %v11179_v48, %v5083_v16  ;;  %v4958_v3 = vmul.f32 0.3275911, %v11194_v19 }
 0x8fb   : > { %v6974_v20 = vpop.eup %6973  ;;  %v5653_v51 = vadd.f32 1.0, %v5589_v60  ;;  %v5210_v26 = vadd.f32 -0.28449672, %v5178_v30  ;;  %v11203_v24 = vadd.f32 %v12848_v10, %v4685_v29  ;;  %v5703_v35 = vpack.c.bf16 %v10871_v36, %v12849_v37 }
 0x8fc   : > { %v11207_v6 = vmul.f32 %v6974_v20, %v5305_v21  ;;  %v5147_v27 = vadd.f32 1.4214138, %v5115_v59  ;;  %6981 = vpow2.f32 %v5430_v32  ;;  %v4990_v56 = vadd.f32 1.0, %v4958_v3 }
 0x8fd   : > { %v5687_v12 = vmul.f32 %v5655_v18, %v11140_v54  ;;  %v5242_v39 = vmul.f32 %v11153_v14, %v5210_v26  ;;  %v5372_v44 = vmul.f32 %v5340_v2, %v11144_v41  ;;  %v11213_v28 = vmul.f32 0.70710677, %v11203_v24  ;;  %5754 = vmatprep.subr.bf16.mxu0 %v5703_v35  ;;  %6014 = vmatprep.subr.bf16.mxu1 %v5703_v35 }
 0x8fe   : > { %v11215_v29 = vpop.eup %6975  ;;  %v5560_v42 = vsub.f32 0.0, %v5496_v4  ;;  %v5179_v36 = vmul.f32 %v11179_v48, %v5147_v27  ;;  %6983 = vrcp.f32 %v4990_v56  ;;  %5755 = vmatpush1.bf16.msra.mxu0 %v12850_v55  ;;  %6022 = vmatpush1.bf16.msra.mxu1 %v12850_v55  ;;  %v5705_v54 = vpack.c.bf16 %v10964_v52, %v10922_v11 }
 0x8ff   : > { %v5685_v41 = vmul.f32 %v5653_v51, %v11127_v62  ;;  %v5274_v33 = vadd.f32 0.2548296, %v5242_v39  ;;  %v5052_v57 = vmul.f32 1.0614054, %v11215_v29  ;;  %v5707_v25 = vpack.c.bf16 %v5679_v45, %v11096_v63 }
 0x900   : > { %v5497_v60 = vsub.f32 1.0, %v11207_v6  ;;  %v5211_v31 = vadd.f32 -0.28449672, %v5179_v36  ;;  %v11227_v49 = vand.u32 2147483647, %v11213_v28  ;;  %5756 = vmatprep.subr.bf16.mxu0 %v5705_v54  ;;  %6015 = vmatprep.subr.bf16.mxu1 %v5705_v54  ;;  %v5709_v21 = vpack.c.bf16 %v5683_v50, %v5681_v8 }
 0x901   : > { %v6978_v16 = vpop.eup %6977  ;;  %v5306_v32 = vmul.f32 %v11153_v14, %v5274_v33  ;;  %v5084_v11 = vadd.f32 -1.4531521, %v5052_v57  ;;  %v5432_v52 = vmul.f32 1.442695, %v5372_v44  ;;  %v5711_v62 = vpack.c.bf16 %v5687_v12, %v5685_v41 }
 0x902   : > { %v5592_v18 = vsel %vm5528_vm11, %v5496_v4, %v5560_v42  ;;  %v5243_v63 = vmul.f32 %v11179_v48, %v5211_v31  ;;  %v5341_v45 = vsub.f32 0.0, %v11173_v1  ;;  %v4959_v30 = vmul.f32 0.3275911, %v11227_v49  ;;  %5757 = vmatpush1.bf16.msra.mxu0 %v10840_v46  ;;  %6023 = vmatpush1.bf16.msra.mxu1 %v10840_v46 }
 0x903   : > { %vm5529_vm12 = vcmp.ge.f32.partialorder %v11028_v23, 0.0  ;;  %v5466_v14 = vmul.f32 %v6978_v16, %v5306_v32  ;;  %v5116_v2 = vmul.f32 %v11215_v29, %v5084_v11  ;;  %v5342_v0 = vsub.f32 0.0, %v11194_v19  ;;  %5758 = vmatprep.subr.bf16.mxu0 %v5707_v25  ;;  %6016 = vmatprep.subr.bf16.mxu1 %v5707_v25 }
 0x904   : > { %v11237_v8 = vpop.eup %6979  ;;  %v5561_v50 = vsub.f32 0.0, %v5497_v60  ;;  %v5275_v4 = vadd.f32 0.2548296, %v5243_v63  ;;  %v4991_v3 = vadd.f32 1.0, %v4959_v30  ;;  %v5656_v20 = vadd.f32 1.0, %v5592_v18 }
 0x905   : > { %v5053_v59 = vmul.f32 1.0614054, %v11237_v8  ;;  %v5498_v51 = vsub.f32 1.0, %v5466_v14  ;;  %v5148_v26 = vadd.f32 1.4214138, %v5116_v2  ;;  %6985 = vpow2.f32 %v5432_v52 }
 0x906   : > { %v6982_v46 = vpop.eup %6981  ;;  %v5307_v10 = vmul.f32 %v11179_v48, %v5275_v4  ;;  %v5373_v35 = vmul.f32 %v5341_v45, %v11173_v1  ;;  %6987 = vrcp.f32 %v4991_v3  ;;  %5759 = vmatpush1.bf16.msra.mxu0 %v10906_v40  ;;  %6024 = vmatpush1.bf16.msra.mxu1 %v10906_v40  ;;  %v5626_v27 = vmul.f32 0.5, %v11071_v9 }
 0x907   : > { %v5085_v37 = vadd.f32 -1.4531521, %v5053_v59  ;;  %v5562_v6 = vsub.f32 0.0, %v5498_v51  ;;  %v5180_v56 = vmul.f32 %v11215_v29, %v5148_v26  ;;  %v5374_v12 = vmul.f32 %v5342_v0, %v11194_v19  ;;  %5760 = vmatprep.subr.bf16.mxu0 %v5709_v21  ;;  %6017 = vmatprep.subr.bf16.mxu1 %v5709_v21 }
 0x908   : > { %v11250_v39 = vpop.eup %6983  ;;  %v5593_v48 = vsel %vm5529_vm12, %v5497_v60, %v5561_v50  ;;  %vm5530_vm13 = vcmp.ge.f32.partialorder %v11079_v13, 0.0  ;;  %v5467_v1 = vmul.f32 %v6982_v46, %v5307_v10  ;;  %v5688_v40 = vmul.f32 %v5656_v20, %v11176_v38 }
 0x909   : > { %v5117_v44 = vmul.f32 %v11237_v8, %v5085_v37  ;;  %v5594_v42 = vsel %vm5530_vm13, %v5498_v51, %v5562_v6  ;;  %v5212_v9 = vadd.f32 -0.28449672, %v5180_v56  ;;  %v5054_v36 = vmul.f32 1.0614054, %v11250_v39 }
 0x90a   : > { %v5658_v55 = vadd.f32 1.0, %v5594_v42  ;;  %v5499_v19 = vsub.f32 1.0, %v5467_v1  ;;  %v5434_v41 = vmul.f32 1.442695, %v5373_v35  ;;  %5761 = vmatpush1.bf16.msra.mxu0 %v11063_v7  ;;  %6025 = vmatpush1.bf16.msra.mxu1 %v11063_v7  ;;  %v5657_v23 = vadd.f32 1.0, %v5593_v48 }
 0x90b   : > { %v5149_v54 = vadd.f32 1.4214138, %v5117_v44  ;;  %v5244_v13 = vmul.f32 %v11215_v29, %v5212_v9  ;;  %v5086_v33 = vadd.f32 -1.4531521, %v5054_v36  ;;  %v5436_v57 = vmul.f32 1.442695, %v5374_v12  ;;  %5762 = vmatprep.subr.bf16.mxu0 %v5711_v62  ;;  %6018 = vmatprep.subr.bf16.mxu1 %v5711_v62 }
 0x90c   : > { %v5690_v38 = vmul.f32 %v5658_v55, %v5626_v27  ;;  %v5563_v25 = vsub.f32 0.0, %v5499_v19  ;;  %v5343_v31 = vsub.f32 0.0, %v11227_v49  ;;  %v5625_v21 = vmul.f32 0.5, %v11014_v61 }
 0x90d   : > { %v5181_v60 = vmul.f32 %v11237_v8, %v5149_v54  ;;  %vm5531_vm14 = vcmp.ge.f32.partialorder %v11084_v58, 0.0  ;;  %v5276_v16 = vadd.f32 0.2548296, %v5244_v13  ;;  %v5118_v7 = vmul.f32 %v11250_v39, %v5086_v33 }
 0x90e   : > { %v5712_v32 = vpack.c.bf16 %v5690_v38, %v5688_v40  ;;  %v5595_v11 = vsel %vm5531_vm14, %v5499_v19, %v5563_v25  ;;  %6989 = vpow2.f32 %v5434_v41  ;;  %5763 = vmatpush1.bf16.msra.mxu0 %v11133_v47  ;;  %6026 = vmatpush1.bf16.msra.mxu1 %v11133_v47  ;;  %v5627_v18 = vmul.f32 0.5, %v11074_v43 }
 0x90f   : > { %v5213_v52 = vadd.f32 -0.28449672, %v5181_v60  ;;  %v6986_v62 = vpop.eup %6985  ;;  %v5659_v63 = vadd.f32 1.0, %v5595_v11  ;;  %v5308_v45 = vmul.f32 %v11215_v29, %v5276_v16  ;;  %v5150_v61 = vadd.f32 1.4214138, %v5118_v7 }
 0x910   : > { %v6988_v30 = vpop.eup %6987  ;;  %v5689_v58 = vmul.f32 %v5657_v23, %v5625_v21  ;;  %6991 = vpow2.f32 %v5436_v57  ;;  %v5375_v2 = vmul.f32 %v5343_v31, %v11227_v49  ;;  %vm5532_vm15 = vcmp.ge.f32.partialorder %v11136_v22, 0.0 }
 0x911   : > { %v5245_v14 = vmul.f32 %v11237_v8, %v5213_v52  ;;  %v5691_v0 = vmul.f32 %v5659_v63, %v5627_v18  ;;  %v5468_v50 = vmul.f32 %v6986_v62, %v5308_v45  ;;  %v5182_v4 = vmul.f32 %v11250_v39, %v5150_v61 }
 0x912   : > { %v5055_v59 = vmul.f32 1.0614054, %v6988_v30  ;;  %v5438_v51 = vmul.f32 1.442695, %v5375_v2  ;;  %vm5534_vm0 = vcmp.ge.f32.partialorder %v11188_v53, 0.0  ;;  %v5630_v33 = vmul.f32 0.5, %v11168_v15 }
 0x913   : > { %v5277_v47 = vadd.f32 0.2548296, %v5245_v14  ;;  %v5214_v3 = vadd.f32 -0.28449672, %v5182_v4  ;;  %v5713_v43 = vpack.c.bf16 %v5691_v0, %v5689_v58  ;;  %v5500_v26 = vsub.f32 1.0, %v5468_v50 }
 0x914   : > { %v5087_v20 = vadd.f32 -1.4531521, %v5055_v59  ;;  %6993 = vpow2.f32 %v5438_v51  ;;  %vm5533_vm1 = vcmp.ge.f32.partialorder %v11162_v34, 0.0  ;;  %vm5535_vm2 = vcmp.ge.f32.partialorder %v11213_v28, 0.0  ;;  %v6089_v34 = vld [vmem:[%s11362_s10] sm:$0xff]   ;;  %v6090_v28 = vld [vmem:[%s11362_s10 + $0x8] sm:$0xff]  }
 0x915   : > { %v5309_v29 = vmul.f32 %v11237_v8, %v5277_v47  ;;  %v5246_v46 = vmul.f32 %v11250_v39, %v5214_v3  ;;  %5764 = vmatprep.subr.bf16.mxu0 %v5713_v43  ;;  %6019 = vmatprep.subr.bf16.mxu1 %v5713_v43  ;;  %v5564_v6 = vsub.f32 0.0, %v5500_v26  ;;  %v12851_v47 = vld [vmem:[#allocation205_spill] sm:$0xff] }
 0x916   : > { %v5119_v10 = vmul.f32 %v6988_v30, %v5087_v20  ;;  %5765 = vmatpush1.bf16.msra.mxu0 %v5712_v32  ;;  %6027 = vmatpush1.bf16.msra.mxu1 %v5712_v32  ;;  %v5629_v32 = vmul.f32 0.5, %v11151_v17  ;;  %v5728_v17 = vpop.permute.xlu1 %5727  ;;  %v12852_v20 = vld [vmem:[#allocation211_spill] sm:$0xff] }
 0x917   : > { %v5278_v49 = vadd.f32 0.2548296, %v5246_v46  ;;  %v5596_v8 = vsel %vm5532_vm15, %v5500_v26, %v5564_v6 }
 0x918   : > { %v5151_v37 = vadd.f32 1.4214138, %v5119_v10  ;;  %v6990_v35 = vpop.eup %6989  ;;  %v5660_v19 = vadd.f32 1.0, %v5596_v8  ;;  %v12853_v10 = vld [vmem:[#allocation206_spill] sm:$0xff] }
 0x919   : > { %v5469_v27 = vmul.f32 %v6990_v35, %v5309_v29  ;;  %v5310_v56 = vmul.f32 %v11250_v39, %v5278_v49  ;;  %v5628_v39 = vmul.f32 0.5, %v11118_v5  ;;  %v5631_v5 = vmul.f32 0.5, %v11203_v24  ;;  %v5723_v24 = vpop.permute.xlu0 %5722 }
 0x91a   : > { %v5183_v12 = vmul.f32 %v6988_v30, %v5151_v37  ;;  %v6992_v48 = vpop.eup %6991  ;;  %v5738_v18 = vpop.permute.xlu1 %5737  ;;  %v12854_v37 = vld [vmem:[#allocation212_spill] sm:$0xff] }
 0x91b   : > { %v5470_v1 = vmul.f32 %v6992_v48, %v5310_v56  ;;  %v5501_v40 = vsub.f32 1.0, %v5469_v27  ;;  %v5692_v22 = vmul.f32 %v5660_v19, %v5628_v39  ;;  %v12855_v56 = vld [vmem:[#allocation186_spill] sm:$0xff] }
 0x91c   : > { %v5215_v44 = vadd.f32 -0.28449672, %v5183_v12  ;;  %v12856_v48 = vld [vmem:[#allocation190_spill] sm:$0xff] }
 0x91d   : > { %v5502_v42 = vsub.f32 1.0, %v5470_v1  ;;  %v5565_v54 = vsub.f32 0.0, %v5501_v40  ;;  %v5733_v63 = vpop.permute.xlu0 %5732 }
 0x91e   : > { %v5247_v9 = vmul.f32 %v6988_v30, %v5215_v44  ;;  %v6994_v13 = vpop.eup %6993  ;;  %v12857_v44 = vld [vmem:[#allocation191_spill] sm:$0xff] }
 0x91f   : > { %v5566_v36 = vsub.f32 0.0, %v5502_v42  ;;  %v5597_v60 = vsel %vm5533_vm1, %v5501_v40, %v5565_v54  ;;  %v12858_v40 = vld [vmem:[#allocation198_spill] sm:$0xff] }
 0x920   : > { %v5279_v55 = vadd.f32 0.2548296, %v5247_v9  ;;  %v5661_v7 = vadd.f32 1.0, %v5597_v60 }
 0x921   : > { %v5598_v41 = vsel %vm5534_vm0, %v5502_v42, %v5566_v36 }
 0x922   : > { %v5311_v23 = vmul.f32 %v6988_v30, %v5279_v55  ;;  %v5662_v57 = vadd.f32 1.0, %v5598_v41  ;;  %v5693_v11 = vmul.f32 %v5661_v7, %v5629_v32 }
 0x924   : > { %v5471_v38 = vmul.f32 %v6994_v13, %v5311_v23  ;;  %v5694_v25 = vmul.f32 %v5662_v57, %v5630_v33 }
 0x926   : > { %v5503_v31 = vsub.f32 1.0, %v5471_v38  ;;  %v5714_v21 = vpack.c.bf16 %v5694_v25, %v5692_v22 }
 0x928   : > { %v5567_v16 = vsub.f32 0.0, %v5503_v31 }
 0x92a   : > { %v5599_v53 = vsel %vm5535_vm2, %v5503_v31, %v5567_v16 }
 0x92b   : > { %v5663_v15 = vadd.f32 1.0, %v5599_v53 }
 0x92d   : > { %v5695_v52 = vmul.f32 %v5663_v15, %v5631_v5 }
 0x92f   : > { %v5715_v62 = vpack.c.bf16 %v5695_v52, %v5693_v11 }
 0x931   : > { %5766 = vmatprep.subr.bf16.mxu0 %v5715_v62  ;;  %6020 = vmatprep.subr.bf16.mxu1 %v5715_v62 }
 0x932   : > { %5767 = vmatpush1.bf16.msra.mxu0 %v5714_v21  ;;  %6028 = vmatpush1.bf16.msra.mxu1 %v5714_v21 }
 0x935   : > { %5785 = vmatmul.mubr.bf16.vlgmr.msra.gmra.mrb[160].mxu0 %v6089_v34  ;;  %5795 = vmatmul.mubr.bf16.vlgmr.msra.gmra.mrb[176].mxu1 %v6090_v28 }
 0xa08   : > { %v5786_v45 = vpop.f32.mrb[160].mxu0  ;;  %v5796_v61 = vpop.f32.mrb[176].mxu1 }
 0xa09   : > { %v5787_v30 = vadd.f32 %v5786_v45, %v5723_v24  ;;  %v5797_v58 = vadd.f32 %v5796_v61, %v5733_v63  ;;  %v5788_v14 = vpop.f32.mrb[161].mxu0  ;;  %v5798_v2 = vpop.f32.mrb[177].mxu1 }
 0xa0a   : > { %v5789_v0 = vadd.f32 %v5788_v14, %v5723_v24  ;;  %v5799_v50 = vadd.f32 %v5798_v2, %v5733_v63  ;;  %v5790_v4 = vpop.f32.mrb[162].mxu0  ;;  %v5800_v59 = vpop.f32.mrb[178].mxu1 }
 0xa0b   : > { %v5805_v3 = vadd.f32 %v5787_v30, %v12851_v47  ;;  %v5809_v43 = vadd.f32 %v5797_v58, %v12852_v20  ;;  %v5791_v51 = vadd.f32 %v5790_v4, %v5728_v17  ;;  %v5801_v26 = vadd.f32 %v5800_v59, %v5738_v18  ;;  %v5792_v29 = vpop.f32.mrb[163].mxu0  ;;  %v5802_v46 = vpop.f32.mrb[179].mxu1 }
 0xa0c   : > { %v5806_v49 = vadd.f32 %v5789_v0, %v12853_v10  ;;  %v5810_v35 = vadd.f32 %v5799_v50, %v12854_v37  ;;  %v5793_v6 = vadd.f32 %v5792_v29, %v5728_v17  ;;  %v5803_v27 = vadd.f32 %v5802_v46, %v5738_v18 }
 0xa0d   : > { %5813 = vst [vmem:[%s406_s17] sm:$0xff] %v5805_v3  ;;  %5817 = vst [vmem:[%s406_s17 + $0x20] sm:$0xff] %v5809_v43  ;;  %v5807_v12 = vadd.f32 %v5791_v51, %v12855_v56  ;;  %v5811_v1 = vadd.f32 %v5801_v26, %v12856_v48 }
 0xa0e   : > { %5814 = vst [vmem:[%s406_s17 + $0x8] sm:$0xff] %v5806_v49  ;;  %5818 = vst [vmem:[%s406_s17 + $0x28] sm:$0xff] %v5810_v35  ;;  %v5808_v8 = vadd.f32 %v5793_v6, %v12857_v44  ;;  %v5812_v42 = vadd.f32 %v5803_v27, %v12858_v40 }
 0xa0f   : > { %5815 = vst [vmem:[%s406_s17 + $0x10] sm:$0xff] %v5807_v12  ;;  %5819 = vst [vmem:[%s406_s17 + $0x30] sm:$0xff] %v5811_v1 }
 0xa10   : > { %5816 = vst [vmem:[%s406_s17 + $0x18] sm:$0xff] %v5808_v8  ;;  %5820 = vst [vmem:[%s406_s17 + $0x38] sm:$0xff] %v5812_v42 }
 0xa11   : > { %7016 = shalt.err (!%p7013_p3)
}
 0xa12   : > { %s7017_s16 = scalar_lea.hbm %s11303_s20, 1024  ;;  %s7021_s19 = scalar_lea.hbm %s11364_s12, 4096 }
 0xa13   : > { %p7018_p4 = scmp.ne.s32.totalorder %s11303_s20, %s7017_s16  ;;  %p7022_p9 = scmp.lt.u32.totalorder %s11303_s20, %s11364_s12 }
 0xa14   : > { %p7023_p10 = scmp.lt.u32.totalorder %s7021_s19, %s7017_s16  ;;  %p7025_p12 = scmp.lt.u32.totalorder %s7017_s16, %s11303_s20 }
 0xa15   : > { %p7019_p7 = pnand %p7018_p4, %p7174_p5 }
 0xa16   : > { %p7024_p11 = por %p7023_p10, %p7022_p9 }
 0xa17   : > { %p7020_p8 = pneg %p7019_p7 }
 0xa18   : > { %p7026_p13 = por %p7025_p12, %p7024_p11 }
 0xa1a   : > { %p7027_p0 = pnand %p7026_p13, %p7020_p8 }
 0xa1c   : > { %7030 = shalt.err (!%p7027_p0)
}
 0xa1d   : > { %s7069_s28 = smov 256   ;;  %s7070_s30 = smov 16  }
 0xa1e   : > { %6029 = dma.vmem_to_hbm [thread:$0]  (%p7174_p5), %s11305_s18, 1024, %s11303_s20, %s11311_s26, %s7069_s28, %s7069_s28, %s7070_s30  }
 0xa1f PF: > { %p6035_p1 = scmp.ge.s32.totalorder %s7065_s24, 2  ;;  %s5850_s17 = sand.u32 1, %s7053_s21  }
 0xa20   : > { %s5851_s16 = scalar_lea.sflag [#allocation3], %s5850_s17 }
 0xa21   : > { %p6032_p2 = pnand %p6035_p1, %p7178_p6 }
 0xa23   : > { %7048 = dma.done.wait (!%p6032_p2), %s5851_s16, 1024  }
 0xa24   : > { %7050 = vsyncadd (!%p6032_p2), %s5851_s16, 4294966272  ;;  %s12859_s25 = sld [smem:[#allocation5_spill]]  ;;  %p22_p3 = scmp.ge.s32.totalorder %s7161_s27, 6  }
 0xa25   : > { %s12860_s21 = smov %s7057_s22  ;;  %s12861_s22 = smov %s7061_s23 }
 0xa26   : > { %s12863_s24 = smov %s7161_s27  ;;  %24 = sbr.rel (!%p22_p3) target bundleno = 3 (0x3), region = 103 }
 0xa2a   : > { %s12862_s23 = smov %s12859_s25 }
 0xa2d   :  { %5856 = vsyncpa [#allocation3], 1 }
 0xa2e   :  { %5858 = vsyncpa [#allocation3 + $0x1], 1 }

</bundles_post_ra>
